<compile_context>
chip_gen: v7x
topology: tpu7x:2x2x1
jax: 0.10.0
libtpu: 0.0.40
codegen_flags: <defaults>
</compile_context>

<pallas_src>
import functools
import math

import jax
import jax.numpy as jnp
from jax.experimental import pallas as pl
from jax.experimental.pallas import tpu as pltpu

EMBED_DIM = 32
NUM_HEADS = 4
HEAD_DIM = EMBED_DIM // NUM_HEADS
NUM_TRANSFORMER_LAYERS = 2
NUM_BLOCKS = 9
FEAT_CH = 16            # channels of the stand-in conv backbone
HEAD_HIDDEN = 256
OUT_PAD = 128           # lane-dense padded logits width (true logits = first 9)
KDIM_PAD = 32           # im2col K (3*3*3 = 27) padded to a sublane-aligned 32
PER_LAYER_REFS = 12
LN_EPS = 1e-5
NEG_INF = -1e30


def _full_spec(shape):
    nd = len(shape)
    return pl.BlockSpec(shape, lambda i, _nd=nd: (0,) * _nd)


def _layer_norm(v, gamma, beta):
    mu = jnp.mean(v, axis=-1, keepdims=True)
    var = jnp.mean(jnp.square(v - mu), axis=-1, keepdims=True)
    return (v - mu) * jax.lax.rsqrt(var + LN_EPS) * gamma + beta


def _mm(a, w_bf16):
    """bf16 MXU inputs, f32 accumulate; elementwise math stays f32."""
    return jnp.dot(a.astype(jnp.bfloat16), w_bf16,
                   preferred_element_type=jnp.float32)


# ----------------------------- fused kernel -----------------------------

def _puzzlenet_kernel(patches_ref, pos_col_ref, pos_row_ref, cw_ref, cb_ref,
                      pw_ref, pb_ref, pos_ref, *args,
                      batch, num_layers, num_heads):
    out_ref = args[-1]
    layer_refs = args[:PER_LAYER_REFS * num_layers]
    hdw1, hdb1, hdw2, hdb2 = args[PER_LAYER_REFS * num_layers:
                                  PER_LAYER_REFS * num_layers + 4]

    rows = batch * NUM_BLOCKS
    hw = patches_ref.shape[2]
    kdim = patches_ref.shape[3]

    # ---- stand-in backbone tail: conv3x3 (im2col GEMM) + ReLU + GAP + proj
    p = patches_ref[...].reshape(rows, hw, kdim)          # leading-dim merge only
    y = jax.lax.dot_general(p, cw_ref[...], (((2,), (0,)), ((), ())),
                            preferred_element_type=jnp.float32)
    y = jnp.maximum(y + cb_ref[...], 0.0)
    g = jnp.mean(y, axis=1)                               # (rows, FEAT_CH) f32
    x2 = _mm(g, pw_ref[...]) + pb_ref[...]                # (rows, E)
    x2 = x2 + pos_ref[...]                                # pos pre-tiled per row

    # additive same-position mask built in-kernel from O(rows) id vectors:
    # token (b, j) only attends tokens (b', j)  (batch_first=False semantics).
    same = pos_col_ref[...] == pos_row_ref[...]           # (rows, rows)
    attn_bias = jnp.where(same, 0.0, NEG_INF).astype(jnp.float32)
    scale = 1.0 / math.sqrt(HEAD_DIM)

    # ---- transformer encoder layers (post-LN, ReLU FFN, dropout = identity)
    for l in range(num_layers):
        (w_in, b_in, w_out, b_out, g1, b1,
         wf1, bf1, wf2, bf2, g2, b2) = layer_refs[PER_LAYER_REFS * l:
                                                  PER_LAYER_REFS * (l + 1)]
        qkv = _mm(x2, w_in[...]) + b_in[...]              # (rows, 3E), one matmul
        q = qkv[:, :EMBED_DIM] * scale
        k = qkv[:, EMBED_DIM:2 * EMBED_DIM]
        v = qkv[:, 2 * EMBED_DIM:]
        heads = []
        for h in range(num_heads):
            lo, hi = h * HEAD_DIM, (h + 1) * HEAD_DIM
            s = jax.lax.dot_general(q[:, lo:hi], k[:, lo:hi],
                                    (((1,), (1,)), ((), ())),
                                    preferred_element_type=jnp.float32)
            s = s + attn_bias
            m = jnp.max(s, axis=-1, keepdims=True)
            e = jnp.exp(s - m)
            inv = pl.reciprocal(jnp.sum(e, axis=-1, keepdims=True), approx=True)
            heads.append(jnp.dot(e * inv, v[:, lo:hi],
                                 preferred_element_type=jnp.float32))
        attn = _mm(jnp.concatenate(heads, axis=1), w_out[...]) + b_out[...]
        x2 = _layer_norm(x2 + attn, g1[...], b1[...])
        ff = jnp.maximum(_mm(x2, wf1[...]) + bf1[...], 0.0)
        ff = _mm(ff, wf2[...]) + bf2[...]
        x2 = _layer_norm(x2 + ff, g2[...], b2[...])

    # ---- prediction head: Linear(E,256) + ReLU + (Dropout=id) + Linear(256,128pad)
    hmid = jnp.maximum(_mm(x2, hdw1[...]) + hdb1[...], 0.0)
    out_ref[...] = _mm(hmid, hdw2[...]) + hdb2[...]       # (rows, 128) full vst


# ----------------------------- params -----------------------------

def init_params(key):
    keys = iter(jax.random.split(key, 32))

    def w(shape, scale=0.02):
        return scale * jax.random.normal(next(keys), shape, dtype=jnp.float32)

    p = {}
    # stand-in backbone: conv3x3(3 -> FEAT_CH) + ReLU + GAP + linear(FEAT_CH -> EMBED_DIM)
    p['conv_w'] = w((FEAT_CH, 3, 3, 3))            # (Cout, Cin, kh, kw)
    p['conv_b'] = jnp.zeros((FEAT_CH,), jnp.float32)
    p['proj_w'] = w((FEAT_CH, EMBED_DIM))
    p['proj_b'] = jnp.zeros((EMBED_DIM,), jnp.float32)
    p['pos_embedding'] = w((NUM_BLOCKS, EMBED_DIM), scale=1.0)

    layers = []
    for _ in range(NUM_TRANSFORMER_LAYERS):
        layers.append(dict(
            w_in=w((EMBED_DIM, 3 * EMBED_DIM)),    # fused QKV in_proj (in, 3E)
            b_in=jnp.zeros((3 * EMBED_DIM,), jnp.float32),
            w_out=w((EMBED_DIM, EMBED_DIM)),
            b_out=jnp.zeros((EMBED_DIM,), jnp.float32),
            ln1_g=jnp.ones((EMBED_DIM,), jnp.float32),
            ln1_b=jnp.zeros((EMBED_DIM,), jnp.float32),
            w_ff1=w((EMBED_DIM, 4 * EMBED_DIM)),
            b_ff1=jnp.zeros((4 * EMBED_DIM,), jnp.float32),
            w_ff2=w((4 * EMBED_DIM, EMBED_DIM)),
            b_ff2=jnp.zeros((EMBED_DIM,), jnp.float32),
            ln2_g=jnp.ones((EMBED_DIM,), jnp.float32),
            ln2_b=jnp.zeros((EMBED_DIM,), jnp.float32),
        ))
    p['layers'] = layers

    p['head_w1'] = w((EMBED_DIM, HEAD_HIDDEN))
    p['head_b1'] = jnp.zeros((HEAD_HIDDEN,), jnp.float32)
    p['head_w2'] = w((HEAD_HIDDEN, NUM_BLOCKS))
    p['head_b2'] = jnp.zeros((NUM_BLOCKS,), jnp.float32)
    return p


# ----------------------------- wrapper-side prep -----------------------------

def _im2col(x):
    """Layout prep only: (B, 9, C, H, W) -> (B, 9, H*W, C*9), k = c*9 + dy*3 + dx."""
    B, NB, C, H, W = x.shape
    xb = x.reshape(B * NB, C, H, W)
    xp = jnp.pad(xb, ((0, 0), (0, 0), (1, 1), (1, 1)))
    cols = [xp[:, :, dy:dy + H, dx:dx + W] for dy in range(3) for dx in range(3)]
    pat = jnp.stack(cols, axis=2)                   # (B*NB, C, 9, H, W)
    pat = pat.transpose(0, 3, 4, 1, 2)              # (B*NB, H, W, C, 9)
    return pat.reshape(B, NB, H * W, C * 9)


@jax.jit
def puzzle_net_forward(params, x):
    B, NB, C, H, W = x.shape
    rows = B * NB                                    # row = b*9 + j (batch-major)
    kdim = C * 9

    # im2col, K padded to 32, bf16 to halve the only sizable HBM transfer.
    patches = _im2col(x)
    patches = jnp.pad(patches, ((0, 0), (0, 0), (0, 0), (0, KDIM_PAD - kdim)))
    patches = patches.astype(jnp.bfloat16)
    conv_w2d = params['conv_w'].reshape(FEAT_CH, kdim).T          # (27, 16)
    conv_w2d = jnp.pad(conv_w2d, ((0, KDIM_PAD - kdim), (0, 0))).astype(jnp.bfloat16)

    # per-row position embedding (row = b*9 + j -> pos[j]); pure layout prep.
    pos_tiled = jnp.tile(params['pos_embedding'], (B, 1))         # (rows, E)
    # O(rows) position-id vectors for the in-kernel same-position mask.
    pid = (jnp.arange(rows, dtype=jnp.int32) % NB).astype(jnp.float32)
    pos_col = pid.reshape(rows, 1)
    pos_row = pid.reshape(1, rows)

    bf = lambda a: a.astype(jnp.bfloat16)
    inputs = [patches, pos_col, pos_row, conv_w2d,
              params['conv_b'].reshape(1, FEAT_CH),
              bf(params['proj_w']), params['proj_b'].reshape(1, EMBED_DIM),
              pos_tiled]
    for lp in params['layers']:
        inputs += [bf(lp['w_in']), lp['b_in'].reshape(1, -1),
                   bf(lp['w_out']), lp['b_out'].reshape(1, -1),
                   lp['ln1_g'].reshape(1, -1), lp['ln1_b'].reshape(1, -1),
                   bf(lp['w_ff1']), lp['b_ff1'].reshape(1, -1),
                   bf(lp['w_ff2']), lp['b_ff2'].reshape(1, -1),
                   lp['ln2_g'].reshape(1, -1), lp['ln2_b'].reshape(1, -1)]
    # lane-dense head: pad the 9 logit columns to 128 (zeros); slice outside.
    head_w2 = jnp.pad(params['head_w2'], ((0, 0), (0, OUT_PAD - NUM_BLOCKS)))
    head_b2 = jnp.pad(params['head_b2'], ((0, OUT_PAD - NUM_BLOCKS),))
    inputs += [bf(params['head_w1']), params['head_b1'].reshape(1, -1),
               bf(head_w2), head_b2.reshape(1, -1)]

    in_specs = [_full_spec(tuple(a.shape)) for a in inputs]

    out = pl.pallas_call(
        functools.partial(_puzzlenet_kernel, batch=B,
                          num_layers=NUM_TRANSFORMER_LAYERS,
                          num_heads=NUM_HEADS),
        grid=(1,),                                   # single step: no grid overhead
        in_specs=in_specs,
        out_specs=_full_spec((rows, OUT_PAD)),
        out_shape=jax.ShapeDtypeStruct((rows, OUT_PAD), jnp.float32),
        compiler_params=pltpu.CompilerParams(
            dimension_semantics=("arbitrary",)),
    )(*inputs)

    # rows are batch-major (b*9 + j): free reshape, no transpose, then slice pad.
    return out.reshape(B, NB, OUT_PAD)[..., :NUM_BLOCKS]


if __name__ == "__main__":
    key = jax.random.PRNGKey(0)
    kx, kp = jax.random.split(key)
    params = init_params(kp)
    x = jax.random.normal(kx, (2, NUM_BLOCKS, 3, 16, 16), dtype=jnp.float32)
    out = puzzle_net_forward(params, x)
    jax.block_until_ready(out)
    assert out.shape == (2, NUM_BLOCKS, NUM_BLOCKS), out.shape
    assert bool(jnp.all(jnp.isfinite(out)))
    print("KERNEL_OK")
</pallas_src>

<mosaic_0001>
module attributes {stable_mosaic.version = 11 : i64} {
  func.func @_puzzlenet_kernel(%arg0: i32, %arg1: memref<2x9x256x32xbf16, #tpu.memory_space<vmem>>, %arg2: memref<18x1xf32, #tpu.memory_space<vmem>>, %arg3: memref<1x18xf32, #tpu.memory_space<vmem>>, %arg4: memref<32x16xbf16, #tpu.memory_space<vmem>>, %arg5: memref<1x16xf32, #tpu.memory_space<vmem>>, %arg6: memref<16x32xbf16, #tpu.memory_space<vmem>>, %arg7: memref<1x32xf32, #tpu.memory_space<vmem>>, %arg8: memref<18x32xf32, #tpu.memory_space<vmem>>, %arg9: memref<32x96xbf16, #tpu.memory_space<vmem>>, %arg10: memref<1x96xf32, #tpu.memory_space<vmem>>, %arg11: memref<32x32xbf16, #tpu.memory_space<vmem>>, %arg12: memref<1x32xf32, #tpu.memory_space<vmem>>, %arg13: memref<1x32xf32, #tpu.memory_space<vmem>>, %arg14: memref<1x32xf32, #tpu.memory_space<vmem>>, %arg15: memref<32x128xbf16, #tpu.memory_space<vmem>>, %arg16: memref<1x128xf32, #tpu.memory_space<vmem>>, %arg17: memref<128x32xbf16, #tpu.memory_space<vmem>>, %arg18: memref<1x32xf32, #tpu.memory_space<vmem>>, %arg19: memref<1x32xf32, #tpu.memory_space<vmem>>, %arg20: memref<1x32xf32, #tpu.memory_space<vmem>>, %arg21: memref<32x96xbf16, #tpu.memory_space<vmem>>, %arg22: memref<1x96xf32, #tpu.memory_space<vmem>>, %arg23: memref<32x32xbf16, #tpu.memory_space<vmem>>, %arg24: memref<1x32xf32, #tpu.memory_space<vmem>>, %arg25: memref<1x32xf32, #tpu.memory_space<vmem>>, %arg26: memref<1x32xf32, #tpu.memory_space<vmem>>, %arg27: memref<32x128xbf16, #tpu.memory_space<vmem>>, %arg28: memref<1x128xf32, #tpu.memory_space<vmem>>, %arg29: memref<128x32xbf16, #tpu.memory_space<vmem>>, %arg30: memref<1x32xf32, #tpu.memory_space<vmem>>, %arg31: memref<1x32xf32, #tpu.memory_space<vmem>>, %arg32: memref<1x32xf32, #tpu.memory_space<vmem>>, %arg33: memref<32x256xbf16, #tpu.memory_space<vmem>>, %arg34: memref<1x256xf32, #tpu.memory_space<vmem>>, %arg35: memref<256x128xbf16, #tpu.memory_space<vmem>>, %arg36: memref<1x128xf32, #tpu.memory_space<vmem>>, %arg37: memref<18x128xf32, #tpu.memory_space<vmem>>) attributes {dimension_semantics = [#tpu.dimension_semantics<arbitrary>], iteration_bounds = array<i64: 1>, scalar_prefetch = 0 : i64, scratch_operands = 0 : i64, tpu.core_type = #tpu.core_type<tc>, window_params = [{pipeline_mode = #tpu.pipeline_mode<synchronous>, transform_indices = @transform_0, window_bounds = array<i64: 2, 9, 256, 32>}, {pipeline_mode = #tpu.pipeline_mode<synchronous>, transform_indices = @transform_1, window_bounds = array<i64: 18, 1>}, {pipeline_mode = #tpu.pipeline_mode<synchronous>, transform_indices = @transform_2, window_bounds = array<i64: 1, 18>}, {pipeline_mode = #tpu.pipeline_mode<synchronous>, transform_indices = @transform_3, window_bounds = array<i64: 32, 16>}, {pipeline_mode = #tpu.pipeline_mode<synchronous>, transform_indices = @transform_4, window_bounds = array<i64: 1, 16>}, {pipeline_mode = #tpu.pipeline_mode<synchronous>, transform_indices = @transform_5, window_bounds = array<i64: 16, 32>}, {pipeline_mode = #tpu.pipeline_mode<synchronous>, transform_indices = @transform_6, window_bounds = array<i64: 1, 32>}, {pipeline_mode = #tpu.pipeline_mode<synchronous>, transform_indices = @transform_7, window_bounds = array<i64: 18, 32>}, {pipeline_mode = #tpu.pipeline_mode<synchronous>, transform_indices = @transform_8, window_bounds = array<i64: 32, 96>}, {pipeline_mode = #tpu.pipeline_mode<synchronous>, transform_indices = @transform_9, window_bounds = array<i64: 1, 96>}, {pipeline_mode = #tpu.pipeline_mode<synchronous>, transform_indices = @transform_10, window_bounds = array<i64: 32, 32>}, {pipeline_mode = #tpu.pipeline_mode<synchronous>, transform_indices = @transform_11, window_bounds = array<i64: 1, 32>}, {pipeline_mode = #tpu.pipeline_mode<synchronous>, transform_indices = @transform_12, window_bounds = array<i64: 1, 32>}, {pipeline_mode = #tpu.pipeline_mode<synchronous>, transform_indices = @transform_13, window_bounds = array<i64: 1, 32>}, {pipeline_mode = #tpu.pipeline_mode<synchronous>, transform_indices = @transform_14, window_bounds = array<i64: 32, 128>}, {pipeline_mode = #tpu.pipeline_mode<synchronous>, transform_indices = @transform_15, window_bounds = array<i64: 1, 128>}, {pipeline_mode = #tpu.pipeline_mode<synchronous>, transform_indices = @transform_16, window_bounds = array<i64: 128, 32>}, {pipeline_mode = #tpu.pipeline_mode<synchronous>, transform_indices = @transform_17, window_bounds = array<i64: 1, 32>}, {pipeline_mode = #tpu.pipeline_mode<synchronous>, transform_indices = @transform_18, window_bounds = array<i64: 1, 32>}, {pipeline_mode = #tpu.pipeline_mode<synchronous>, transform_indices = @transform_19, window_bounds = array<i64: 1, 32>}, {pipeline_mode = #tpu.pipeline_mode<synchronous>, transform_indices = @transform_20, window_bounds = array<i64: 32, 96>}, {pipeline_mode = #tpu.pipeline_mode<synchronous>, transform_indices = @transform_21, window_bounds = array<i64: 1, 96>}, {pipeline_mode = #tpu.pipeline_mode<synchronous>, transform_indices = @transform_22, window_bounds = array<i64: 32, 32>}, {pipeline_mode = #tpu.pipeline_mode<synchronous>, transform_indices = @transform_23, window_bounds = array<i64: 1, 32>}, {pipeline_mode = #tpu.pipeline_mode<synchronous>, transform_indices = @transform_24, window_bounds = array<i64: 1, 32>}, {pipeline_mode = #tpu.pipeline_mode<synchronous>, transform_indices = @transform_25, window_bounds = array<i64: 1, 32>}, {pipeline_mode = #tpu.pipeline_mode<synchronous>, transform_indices = @transform_26, window_bounds = array<i64: 32, 128>}, {pipeline_mode = #tpu.pipeline_mode<synchronous>, transform_indices = @transform_27, window_bounds = array<i64: 1, 128>}, {pipeline_mode = #tpu.pipeline_mode<synchronous>, transform_indices = @transform_28, window_bounds = array<i64: 128, 32>}, {pipeline_mode = #tpu.pipeline_mode<synchronous>, transform_indices = @transform_29, window_bounds = array<i64: 1, 32>}, {pipeline_mode = #tpu.pipeline_mode<synchronous>, transform_indices = @transform_30, window_bounds = array<i64: 1, 32>}, {pipeline_mode = #tpu.pipeline_mode<synchronous>, transform_indices = @transform_31, window_bounds = array<i64: 1, 32>}, {pipeline_mode = #tpu.pipeline_mode<synchronous>, transform_indices = @transform_32, window_bounds = array<i64: 32, 256>}, {pipeline_mode = #tpu.pipeline_mode<synchronous>, transform_indices = @transform_33, window_bounds = array<i64: 1, 256>}, {pipeline_mode = #tpu.pipeline_mode<synchronous>, transform_indices = @transform_34, window_bounds = array<i64: 256, 128>}, {pipeline_mode = #tpu.pipeline_mode<synchronous>, transform_indices = @transform_35, window_bounds = array<i64: 1, 128>}, {pipeline_mode = #tpu.pipeline_mode<synchronous>, transform_indices = @transform_36, window_bounds = array<i64: 18, 128>}]} {
    %c0 = arith.constant 0 : index
    %c0_0 = arith.constant 0 : index
    %c0_1 = arith.constant 0 : index
    %c0_2 = arith.constant 0 : index
    %0 = vector.load %arg1[%c0, %c0_0, %c0_1, %c0_2] : memref<2x9x256x32xbf16, #tpu.memory_space<vmem>>, vector<2x9x256x32xbf16>
    %1 = vector.shape_cast %0 : vector<2x9x256x32xbf16> to vector<18x256x32xbf16>
    %c0_3 = arith.constant 0 : index
    %c0_4 = arith.constant 0 : index
    %2 = vector.load %arg4[%c0_3, %c0_4] : memref<32x16xbf16, #tpu.memory_space<vmem>>, vector<32x16xbf16>
    %cst = arith.constant dense<0.000000e+00> : vector<18x256x16xf32>
    %3 = tpu.matmul %1, %2, %cst {dimension_numbers = #tpu.dot_dimension_numbers<[2], [0], [0, 1], [1], [0, 0, 0, 1, 1, 1], [], []>} : vector<18x256x32xbf16>, vector<32x16xbf16>, vector<18x256x16xf32> -> vector<18x256x16xf32>
    %c0_5 = arith.constant 0 : index
    %c0_6 = arith.constant 0 : index
    %4 = vector.load %arg5[%c0_5, %c0_6] : memref<1x16xf32, #tpu.memory_space<vmem>>, vector<1x16xf32>
    %5 = vector.shape_cast %4 : vector<1x16xf32> to vector<1x1x16xf32>
    %6 = vector.broadcast %5 : vector<1x1x16xf32> to vector<18x256x16xf32>
    %7 = arith.addf %3, %6 : vector<18x256x16xf32>
    %cst_7 = arith.constant 0.000000e+00 : f32
    %8 = vector.broadcast %cst_7 : f32 to vector<18x256x16xf32>
    %9 = arith.maximumf %7, %8 : vector<18x256x16xf32>
    %cst_8 = arith.constant dense<0.000000e+00> : vector<18x16xf32>
    %10 = vector.multi_reduction <add>, %9, %cst_8 [1] : vector<18x256x16xf32> to vector<18x16xf32>
    %cst_9 = arith.constant 2.560000e+02 : f32
    %11 = vector.broadcast %cst_9 : f32 to vector<18x16xf32>
    %12 = arith.divf %10, %11 : vector<18x16xf32>
    %c0_10 = arith.constant 0 : index
    %c0_11 = arith.constant 0 : index
    %13 = vector.load %arg6[%c0_10, %c0_11] : memref<16x32xbf16, #tpu.memory_space<vmem>>, vector<16x32xbf16>
    %14 = arith.truncf %12 : vector<18x16xf32> to vector<18x16xbf16>
    %cst_12 = arith.constant dense<0.000000e+00> : vector<18x32xf32>
    %15 = tpu.matmul %14, %13, %cst_12 {dimension_numbers = #tpu.dot_dimension_numbers<[1], [0], [0], [1], [0, 0, 1, 1], [], []>} : vector<18x16xbf16>, vector<16x32xbf16>, vector<18x32xf32> -> vector<18x32xf32>
    %c0_13 = arith.constant 0 : index
    %c0_14 = arith.constant 0 : index
    %16 = vector.load %arg7[%c0_13, %c0_14] : memref<1x32xf32, #tpu.memory_space<vmem>>, vector<1x32xf32>
    %17 = vector.broadcast %16 : vector<1x32xf32> to vector<18x32xf32>
    %18 = arith.addf %15, %17 : vector<18x32xf32>
    %c0_15 = arith.constant 0 : index
    %c0_16 = arith.constant 0 : index
    %19 = vector.load %arg8[%c0_15, %c0_16] : memref<18x32xf32, #tpu.memory_space<vmem>>, vector<18x32xf32>
    %20 = arith.addf %18, %19 : vector<18x32xf32>
    %c0_17 = arith.constant 0 : index
    %c0_18 = arith.constant 0 : index
    %21 = vector.load %arg2[%c0_17, %c0_18] : memref<18x1xf32, #tpu.memory_space<vmem>>, vector<18x1xf32>
    %c0_19 = arith.constant 0 : index
    %c0_20 = arith.constant 0 : index
    %22 = vector.load %arg3[%c0_19, %c0_20] : memref<1x18xf32, #tpu.memory_space<vmem>>, vector<1x18xf32>
    %23 = vector.broadcast %21 : vector<18x1xf32> to vector<18x18xf32>
    %24 = vector.broadcast %22 : vector<1x18xf32> to vector<18x18xf32>
    %25 = arith.cmpf oeq, %23, %24 : vector<18x18xf32>
    %cst_21 = arith.constant 0.000000e+00 : f32
    %cst_22 = arith.constant -1.000000e+30 : f32
    %26 = vector.broadcast %cst_21 : f32 to vector<18x18xf32>
    %27 = vector.broadcast %cst_22 : f32 to vector<18x18xf32>
    %28 = arith.select %25, %26, %27 : vector<18x18xi1>, vector<18x18xf32>
    %c0_23 = arith.constant 0 : index
    %c0_24 = arith.constant 0 : index
    %29 = vector.load %arg9[%c0_23, %c0_24] : memref<32x96xbf16, #tpu.memory_space<vmem>>, vector<32x96xbf16>
    %30 = arith.truncf %20 : vector<18x32xf32> to vector<18x32xbf16>
    %cst_25 = arith.constant dense<0.000000e+00> : vector<18x96xf32>
    %31 = tpu.matmul %30, %29, %cst_25 {dimension_numbers = #tpu.dot_dimension_numbers<[1], [0], [0], [1], [0, 0, 1, 1], [], []>} : vector<18x32xbf16>, vector<32x96xbf16>, vector<18x96xf32> -> vector<18x96xf32>
    %c0_26 = arith.constant 0 : index
    %c0_27 = arith.constant 0 : index
    %32 = vector.load %arg10[%c0_26, %c0_27] : memref<1x96xf32, #tpu.memory_space<vmem>>, vector<1x96xf32>
    %33 = vector.broadcast %32 : vector<1x96xf32> to vector<18x96xf32>
    %34 = arith.addf %31, %33 : vector<18x96xf32>
    %35 = vector.extract_strided_slice %34 {offsets = [0, 0], sizes = [18, 32], strides = [1, 1]} : vector<18x96xf32> to vector<18x32xf32>
    %cst_28 = arith.constant 0.353553385 : f32
    %36 = vector.broadcast %cst_28 : f32 to vector<18x32xf32>
    %37 = arith.mulf %35, %36 : vector<18x32xf32>
    %38 = vector.extract_strided_slice %34 {offsets = [0, 32], sizes = [18, 32], strides = [1, 1]} : vector<18x96xf32> to vector<18x32xf32>
    %39 = vector.extract_strided_slice %34 {offsets = [0, 64], sizes = [18, 32], strides = [1, 1]} : vector<18x96xf32> to vector<18x32xf32>
    %40 = vector.extract_strided_slice %37 {offsets = [0, 0], sizes = [18, 8], strides = [1, 1]} : vector<18x32xf32> to vector<18x8xf32>
    %41 = vector.extract_strided_slice %38 {offsets = [0, 0], sizes = [18, 8], strides = [1, 1]} : vector<18x32xf32> to vector<18x8xf32>
    %cst_29 = arith.constant dense<0.000000e+00> : vector<18x18xf32>
    %42 = tpu.matmul %40, %41, %cst_29 {dimension_numbers = #tpu.dot_dimension_numbers<[1], [1], [0], [0], [0, 0, 1, 0], [], []>} : vector<18x8xf32>, vector<18x8xf32>, vector<18x18xf32> -> vector<18x18xf32>
    %43 = arith.addf %42, %28 : vector<18x18xf32>
    %cst_30 = arith.constant dense<0xFF800000> : vector<18xf32>
    %44 = vector.multi_reduction <maximumf>, %43, %cst_30 [1] : vector<18x18xf32> to vector<18xf32>
    %45 = vector.shape_cast %44 : vector<18xf32> to vector<18x1xf32>
    %46 = vector.broadcast %45 : vector<18x1xf32> to vector<18x18xf32>
    %47 = arith.subf %43, %46 : vector<18x18xf32>
    %48 = math.exp %47 : vector<18x18xf32>
    %cst_31 = arith.constant dense<0.000000e+00> : vector<18xf32>
    %49 = vector.multi_reduction <add>, %48, %cst_31 [1] : vector<18x18xf32> to vector<18xf32>
    %50 = vector.shape_cast %49 : vector<18xf32> to vector<18x1xf32>
    %51 = tpu.reciprocal %50 {approx = true} : vector<18x1xf32> -> vector<18x1xf32>
    %52 = vector.broadcast %51 : vector<18x1xf32> to vector<18x18xf32>
    %53 = arith.mulf %48, %52 : vector<18x18xf32>
    %54 = vector.extract_strided_slice %39 {offsets = [0, 0], sizes = [18, 8], strides = [1, 1]} : vector<18x32xf32> to vector<18x8xf32>
    %cst_32 = arith.constant dense<0.000000e+00> : vector<18x8xf32>
    %55 = tpu.matmul %53, %54, %cst_32 {dimension_numbers = #tpu.dot_dimension_numbers<[1], [0], [0], [1], [0, 0, 1, 1], [], []>} : vector<18x18xf32>, vector<18x8xf32>, vector<18x8xf32> -> vector<18x8xf32>
    %56 = vector.extract_strided_slice %37 {offsets = [0, 8], sizes = [18, 8], strides = [1, 1]} : vector<18x32xf32> to vector<18x8xf32>
    %57 = vector.extract_strided_slice %38 {offsets = [0, 8], sizes = [18, 8], strides = [1, 1]} : vector<18x32xf32> to vector<18x8xf32>
    %cst_33 = arith.constant dense<0.000000e+00> : vector<18x18xf32>
    %58 = tpu.matmul %56, %57, %cst_33 {dimension_numbers = #tpu.dot_dimension_numbers<[1], [1], [0], [0], [0, 0, 1, 0], [], []>} : vector<18x8xf32>, vector<18x8xf32>, vector<18x18xf32> -> vector<18x18xf32>
    %59 = arith.addf %58, %28 : vector<18x18xf32>
    %cst_34 = arith.constant dense<0xFF800000> : vector<18xf32>
    %60 = vector.multi_reduction <maximumf>, %59, %cst_34 [1] : vector<18x18xf32> to vector<18xf32>
    %61 = vector.shape_cast %60 : vector<18xf32> to vector<18x1xf32>
    %62 = vector.broadcast %61 : vector<18x1xf32> to vector<18x18xf32>
    %63 = arith.subf %59, %62 : vector<18x18xf32>
    %64 = math.exp %63 : vector<18x18xf32>
    %cst_35 = arith.constant dense<0.000000e+00> : vector<18xf32>
    %65 = vector.multi_reduction <add>, %64, %cst_35 [1] : vector<18x18xf32> to vector<18xf32>
    %66 = vector.shape_cast %65 : vector<18xf32> to vector<18x1xf32>
    %67 = tpu.reciprocal %66 {approx = true} : vector<18x1xf32> -> vector<18x1xf32>
    %68 = vector.broadcast %67 : vector<18x1xf32> to vector<18x18xf32>
    %69 = arith.mulf %64, %68 : vector<18x18xf32>
    %70 = vector.extract_strided_slice %39 {offsets = [0, 8], sizes = [18, 8], strides = [1, 1]} : vector<18x32xf32> to vector<18x8xf32>
    %cst_36 = arith.constant dense<0.000000e+00> : vector<18x8xf32>
    %71 = tpu.matmul %69, %70, %cst_36 {dimension_numbers = #tpu.dot_dimension_numbers<[1], [0], [0], [1], [0, 0, 1, 1], [], []>} : vector<18x18xf32>, vector<18x8xf32>, vector<18x8xf32> -> vector<18x8xf32>
    %72 = vector.extract_strided_slice %37 {offsets = [0, 16], sizes = [18, 8], strides = [1, 1]} : vector<18x32xf32> to vector<18x8xf32>
    %73 = vector.extract_strided_slice %38 {offsets = [0, 16], sizes = [18, 8], strides = [1, 1]} : vector<18x32xf32> to vector<18x8xf32>
    %cst_37 = arith.constant dense<0.000000e+00> : vector<18x18xf32>
    %74 = tpu.matmul %72, %73, %cst_37 {dimension_numbers = #tpu.dot_dimension_numbers<[1], [1], [0], [0], [0, 0, 1, 0], [], []>} : vector<18x8xf32>, vector<18x8xf32>, vector<18x18xf32> -> vector<18x18xf32>
    %75 = arith.addf %74, %28 : vector<18x18xf32>
    %cst_38 = arith.constant dense<0xFF800000> : vector<18xf32>
    %76 = vector.multi_reduction <maximumf>, %75, %cst_38 [1] : vector<18x18xf32> to vector<18xf32>
    %77 = vector.shape_cast %76 : vector<18xf32> to vector<18x1xf32>
    %78 = vector.broadcast %77 : vector<18x1xf32> to vector<18x18xf32>
    %79 = arith.subf %75, %78 : vector<18x18xf32>
    %80 = math.exp %79 : vector<18x18xf32>
    %cst_39 = arith.constant dense<0.000000e+00> : vector<18xf32>
    %81 = vector.multi_reduction <add>, %80, %cst_39 [1] : vector<18x18xf32> to vector<18xf32>
    %82 = vector.shape_cast %81 : vector<18xf32> to vector<18x1xf32>
    %83 = tpu.reciprocal %82 {approx = true} : vector<18x1xf32> -> vector<18x1xf32>
    %84 = vector.broadcast %83 : vector<18x1xf32> to vector<18x18xf32>
    %85 = arith.mulf %80, %84 : vector<18x18xf32>
    %86 = vector.extract_strided_slice %39 {offsets = [0, 16], sizes = [18, 8], strides = [1, 1]} : vector<18x32xf32> to vector<18x8xf32>
    %cst_40 = arith.constant dense<0.000000e+00> : vector<18x8xf32>
    %87 = tpu.matmul %85, %86, %cst_40 {dimension_numbers = #tpu.dot_dimension_numbers<[1], [0], [0], [1], [0, 0, 1, 1], [], []>} : vector<18x18xf32>, vector<18x8xf32>, vector<18x8xf32> -> vector<18x8xf32>
    %88 = vector.extract_strided_slice %37 {offsets = [0, 24], sizes = [18, 8], strides = [1, 1]} : vector<18x32xf32> to vector<18x8xf32>
    %89 = vector.extract_strided_slice %38 {offsets = [0, 24], sizes = [18, 8], strides = [1, 1]} : vector<18x32xf32> to vector<18x8xf32>
    %cst_41 = arith.constant dense<0.000000e+00> : vector<18x18xf32>
    %90 = tpu.matmul %88, %89, %cst_41 {dimension_numbers = #tpu.dot_dimension_numbers<[1], [1], [0], [0], [0, 0, 1, 0], [], []>} : vector<18x8xf32>, vector<18x8xf32>, vector<18x18xf32> -> vector<18x18xf32>
    %91 = arith.addf %90, %28 : vector<18x18xf32>
    %cst_42 = arith.constant dense<0xFF800000> : vector<18xf32>
    %92 = vector.multi_reduction <maximumf>, %91, %cst_42 [1] : vector<18x18xf32> to vector<18xf32>
    %93 = vector.shape_cast %92 : vector<18xf32> to vector<18x1xf32>
    %94 = vector.broadcast %93 : vector<18x1xf32> to vector<18x18xf32>
    %95 = arith.subf %91, %94 : vector<18x18xf32>
    %96 = math.exp %95 : vector<18x18xf32>
    %cst_43 = arith.constant dense<0.000000e+00> : vector<18xf32>
    %97 = vector.multi_reduction <add>, %96, %cst_43 [1] : vector<18x18xf32> to vector<18xf32>
    %98 = vector.shape_cast %97 : vector<18xf32> to vector<18x1xf32>
    %99 = tpu.reciprocal %98 {approx = true} : vector<18x1xf32> -> vector<18x1xf32>
    %100 = vector.broadcast %99 : vector<18x1xf32> to vector<18x18xf32>
    %101 = arith.mulf %96, %100 : vector<18x18xf32>
    %102 = vector.extract_strided_slice %39 {offsets = [0, 24], sizes = [18, 8], strides = [1, 1]} : vector<18x32xf32> to vector<18x8xf32>
    %cst_44 = arith.constant dense<0.000000e+00> : vector<18x8xf32>
    %103 = tpu.matmul %101, %102, %cst_44 {dimension_numbers = #tpu.dot_dimension_numbers<[1], [0], [0], [1], [0, 0, 1, 1], [], []>} : vector<18x18xf32>, vector<18x8xf32>, vector<18x8xf32> -> vector<18x8xf32>
    %104 = tpu.concatenate %55, %71, %87, %103 in 1 : vector<18x8xf32>, vector<18x8xf32>, vector<18x8xf32>, vector<18x8xf32> -> vector<18x32xf32>
    %c0_45 = arith.constant 0 : index
    %c0_46 = arith.constant 0 : index
    %105 = vector.load %arg11[%c0_45, %c0_46] : memref<32x32xbf16, #tpu.memory_space<vmem>>, vector<32x32xbf16>
    %106 = arith.truncf %104 : vector<18x32xf32> to vector<18x32xbf16>
    %cst_47 = arith.constant dense<0.000000e+00> : vector<18x32xf32>
    %107 = tpu.matmul %106, %105, %cst_47 {dimension_numbers = #tpu.dot_dimension_numbers<[1], [0], [0], [1], [0, 0, 1, 1], [], []>} : vector<18x32xbf16>, vector<32x32xbf16>, vector<18x32xf32> -> vector<18x32xf32>
    %c0_48 = arith.constant 0 : index
    %c0_49 = arith.constant 0 : index
    %108 = vector.load %arg12[%c0_48, %c0_49] : memref<1x32xf32, #tpu.memory_space<vmem>>, vector<1x32xf32>
    %109 = vector.broadcast %108 : vector<1x32xf32> to vector<18x32xf32>
    %110 = arith.addf %107, %109 : vector<18x32xf32>
    %111 = arith.addf %20, %110 : vector<18x32xf32>
    %c0_50 = arith.constant 0 : index
    %c0_51 = arith.constant 0 : index
    %112 = vector.load %arg13[%c0_50, %c0_51] : memref<1x32xf32, #tpu.memory_space<vmem>>, vector<1x32xf32>
    %c0_52 = arith.constant 0 : index
    %c0_53 = arith.constant 0 : index
    %113 = vector.load %arg14[%c0_52, %c0_53] : memref<1x32xf32, #tpu.memory_space<vmem>>, vector<1x32xf32>
    %cst_54 = arith.constant dense<0.000000e+00> : vector<18xf32>
    %114 = vector.multi_reduction <add>, %111, %cst_54 [1] : vector<18x32xf32> to vector<18xf32>
    %115 = vector.shape_cast %114 : vector<18xf32> to vector<18x1xf32>
    %cst_55 = arith.constant 3.200000e+01 : f32
    %116 = vector.broadcast %cst_55 : f32 to vector<18x1xf32>
    %117 = arith.divf %115, %116 : vector<18x1xf32>
    %118 = vector.broadcast %117 : vector<18x1xf32> to vector<18x32xf32>
    %119 = arith.subf %111, %118 : vector<18x32xf32>
    %120 = arith.mulf %119, %119 : vector<18x32xf32>
    %cst_56 = arith.constant dense<0.000000e+00> : vector<18xf32>
    %121 = vector.multi_reduction <add>, %120, %cst_56 [1] : vector<18x32xf32> to vector<18xf32>
    %122 = vector.shape_cast %121 : vector<18xf32> to vector<18x1xf32>
    %cst_57 = arith.constant 3.200000e+01 : f32
    %123 = vector.broadcast %cst_57 : f32 to vector<18x1xf32>
    %124 = arith.divf %122, %123 : vector<18x1xf32>
    %125 = vector.broadcast %117 : vector<18x1xf32> to vector<18x32xf32>
    %126 = arith.subf %111, %125 : vector<18x32xf32>
    %cst_58 = arith.constant 9.99999974E-6 : f32
    %127 = vector.broadcast %cst_58 : f32 to vector<18x1xf32>
    %128 = arith.addf %124, %127 : vector<18x1xf32>
    %129 = math.rsqrt %128 : vector<18x1xf32>
    %130 = vector.broadcast %129 : vector<18x1xf32> to vector<18x32xf32>
    %131 = arith.mulf %126, %130 : vector<18x32xf32>
    %132 = vector.broadcast %112 : vector<1x32xf32> to vector<18x32xf32>
    %133 = arith.mulf %131, %132 : vector<18x32xf32>
    %134 = vector.broadcast %113 : vector<1x32xf32> to vector<18x32xf32>
    %135 = arith.addf %133, %134 : vector<18x32xf32>
    %c0_59 = arith.constant 0 : index
    %c0_60 = arith.constant 0 : index
    %136 = vector.load %arg15[%c0_59, %c0_60] : memref<32x128xbf16, #tpu.memory_space<vmem>>, vector<32x128xbf16>
    %137 = arith.truncf %135 : vector<18x32xf32> to vector<18x32xbf16>
    %cst_61 = arith.constant dense<0.000000e+00> : vector<18x128xf32>
    %138 = tpu.matmul %137, %136, %cst_61 {dimension_numbers = #tpu.dot_dimension_numbers<[1], [0], [0], [1], [0, 0, 1, 1], [], []>} : vector<18x32xbf16>, vector<32x128xbf16>, vector<18x128xf32> -> vector<18x128xf32>
    %c0_62 = arith.constant 0 : index
    %c0_63 = arith.constant 0 : index
    %139 = vector.load %arg16[%c0_62, %c0_63] : memref<1x128xf32, #tpu.memory_space<vmem>>, vector<1x128xf32>
    %140 = vector.broadcast %139 : vector<1x128xf32> to vector<18x128xf32>
    %141 = arith.addf %138, %140 : vector<18x128xf32>
    %cst_64 = arith.constant 0.000000e+00 : f32
    %142 = vector.broadcast %cst_64 : f32 to vector<18x128xf32>
    %143 = arith.maximumf %141, %142 : vector<18x128xf32>
    %c0_65 = arith.constant 0 : index
    %c0_66 = arith.constant 0 : index
    %144 = vector.load %arg17[%c0_65, %c0_66] : memref<128x32xbf16, #tpu.memory_space<vmem>>, vector<128x32xbf16>
    %145 = arith.truncf %143 : vector<18x128xf32> to vector<18x128xbf16>
    %cst_67 = arith.constant dense<0.000000e+00> : vector<18x32xf32>
    %146 = tpu.matmul %145, %144, %cst_67 {dimension_numbers = #tpu.dot_dimension_numbers<[1], [0], [0], [1], [0, 0, 1, 1], [], []>} : vector<18x128xbf16>, vector<128x32xbf16>, vector<18x32xf32> -> vector<18x32xf32>
    %c0_68 = arith.constant 0 : index
    %c0_69 = arith.constant 0 : index
    %147 = vector.load %arg18[%c0_68, %c0_69] : memref<1x32xf32, #tpu.memory_space<vmem>>, vector<1x32xf32>
    %148 = vector.broadcast %147 : vector<1x32xf32> to vector<18x32xf32>
    %149 = arith.addf %146, %148 : vector<18x32xf32>
    %150 = arith.addf %135, %149 : vector<18x32xf32>
    %c0_70 = arith.constant 0 : index
    %c0_71 = arith.constant 0 : index
    %151 = vector.load %arg19[%c0_70, %c0_71] : memref<1x32xf32, #tpu.memory_space<vmem>>, vector<1x32xf32>
    %c0_72 = arith.constant 0 : index
    %c0_73 = arith.constant 0 : index
    %152 = vector.load %arg20[%c0_72, %c0_73] : memref<1x32xf32, #tpu.memory_space<vmem>>, vector<1x32xf32>
    %cst_74 = arith.constant dense<0.000000e+00> : vector<18xf32>
    %153 = vector.multi_reduction <add>, %150, %cst_74 [1] : vector<18x32xf32> to vector<18xf32>
    %154 = vector.shape_cast %153 : vector<18xf32> to vector<18x1xf32>
    %cst_75 = arith.constant 3.200000e+01 : f32
    %155 = vector.broadcast %cst_75 : f32 to vector<18x1xf32>
    %156 = arith.divf %154, %155 : vector<18x1xf32>
    %157 = vector.broadcast %156 : vector<18x1xf32> to vector<18x32xf32>
    %158 = arith.subf %150, %157 : vector<18x32xf32>
    %159 = arith.mulf %158, %158 : vector<18x32xf32>
    %cst_76 = arith.constant dense<0.000000e+00> : vector<18xf32>
    %160 = vector.multi_reduction <add>, %159, %cst_76 [1] : vector<18x32xf32> to vector<18xf32>
    %161 = vector.shape_cast %160 : vector<18xf32> to vector<18x1xf32>
    %cst_77 = arith.constant 3.200000e+01 : f32
    %162 = vector.broadcast %cst_77 : f32 to vector<18x1xf32>
    %163 = arith.divf %161, %162 : vector<18x1xf32>
    %164 = vector.broadcast %156 : vector<18x1xf32> to vector<18x32xf32>
    %165 = arith.subf %150, %164 : vector<18x32xf32>
    %cst_78 = arith.constant 9.99999974E-6 : f32
    %166 = vector.broadcast %cst_78 : f32 to vector<18x1xf32>
    %167 = arith.addf %163, %166 : vector<18x1xf32>
    %168 = math.rsqrt %167 : vector<18x1xf32>
    %169 = vector.broadcast %168 : vector<18x1xf32> to vector<18x32xf32>
    %170 = arith.mulf %165, %169 : vector<18x32xf32>
    %171 = vector.broadcast %151 : vector<1x32xf32> to vector<18x32xf32>
    %172 = arith.mulf %170, %171 : vector<18x32xf32>
    %173 = vector.broadcast %152 : vector<1x32xf32> to vector<18x32xf32>
    %174 = arith.addf %172, %173 : vector<18x32xf32>
    %c0_79 = arith.constant 0 : index
    %c0_80 = arith.constant 0 : index
    %175 = vector.load %arg21[%c0_79, %c0_80] : memref<32x96xbf16, #tpu.memory_space<vmem>>, vector<32x96xbf16>
    %176 = arith.truncf %174 : vector<18x32xf32> to vector<18x32xbf16>
    %cst_81 = arith.constant dense<0.000000e+00> : vector<18x96xf32>
    %177 = tpu.matmul %176, %175, %cst_81 {dimension_numbers = #tpu.dot_dimension_numbers<[1], [0], [0], [1], [0, 0, 1, 1], [], []>} : vector<18x32xbf16>, vector<32x96xbf16>, vector<18x96xf32> -> vector<18x96xf32>
    %c0_82 = arith.constant 0 : index
    %c0_83 = arith.constant 0 : index
    %178 = vector.load %arg22[%c0_82, %c0_83] : memref<1x96xf32, #tpu.memory_space<vmem>>, vector<1x96xf32>
    %179 = vector.broadcast %178 : vector<1x96xf32> to vector<18x96xf32>
    %180 = arith.addf %177, %179 : vector<18x96xf32>
    %181 = vector.extract_strided_slice %180 {offsets = [0, 0], sizes = [18, 32], strides = [1, 1]} : vector<18x96xf32> to vector<18x32xf32>
    %cst_84 = arith.constant 0.353553385 : f32
    %182 = vector.broadcast %cst_84 : f32 to vector<18x32xf32>
    %183 = arith.mulf %181, %182 : vector<18x32xf32>
    %184 = vector.extract_strided_slice %180 {offsets = [0, 32], sizes = [18, 32], strides = [1, 1]} : vector<18x96xf32> to vector<18x32xf32>
    %185 = vector.extract_strided_slice %180 {offsets = [0, 64], sizes = [18, 32], strides = [1, 1]} : vector<18x96xf32> to vector<18x32xf32>
    %186 = vector.extract_strided_slice %183 {offsets = [0, 0], sizes = [18, 8], strides = [1, 1]} : vector<18x32xf32> to vector<18x8xf32>
    %187 = vector.extract_strided_slice %184 {offsets = [0, 0], sizes = [18, 8], strides = [1, 1]} : vector<18x32xf32> to vector<18x8xf32>
    %cst_85 = arith.constant dense<0.000000e+00> : vector<18x18xf32>
    %188 = tpu.matmul %186, %187, %cst_85 {dimension_numbers = #tpu.dot_dimension_numbers<[1], [1], [0], [0], [0, 0, 1, 0], [], []>} : vector<18x8xf32>, vector<18x8xf32>, vector<18x18xf32> -> vector<18x18xf32>
    %189 = arith.addf %188, %28 : vector<18x18xf32>
    %cst_86 = arith.constant dense<0xFF800000> : vector<18xf32>
    %190 = vector.multi_reduction <maximumf>, %189, %cst_86 [1] : vector<18x18xf32> to vector<18xf32>
    %191 = vector.shape_cast %190 : vector<18xf32> to vector<18x1xf32>
    %192 = vector.broadcast %191 : vector<18x1xf32> to vector<18x18xf32>
    %193 = arith.subf %189, %192 : vector<18x18xf32>
    %194 = math.exp %193 : vector<18x18xf32>
    %cst_87 = arith.constant dense<0.000000e+00> : vector<18xf32>
    %195 = vector.multi_reduction <add>, %194, %cst_87 [1] : vector<18x18xf32> to vector<18xf32>
    %196 = vector.shape_cast %195 : vector<18xf32> to vector<18x1xf32>
    %197 = tpu.reciprocal %196 {approx = true} : vector<18x1xf32> -> vector<18x1xf32>
    %198 = vector.broadcast %197 : vector<18x1xf32> to vector<18x18xf32>
    %199 = arith.mulf %194, %198 : vector<18x18xf32>
    %200 = vector.extract_strided_slice %185 {offsets = [0, 0], sizes = [18, 8], strides = [1, 1]} : vector<18x32xf32> to vector<18x8xf32>
    %cst_88 = arith.constant dense<0.000000e+00> : vector<18x8xf32>
    %201 = tpu.matmul %199, %200, %cst_88 {dimension_numbers = #tpu.dot_dimension_numbers<[1], [0], [0], [1], [0, 0, 1, 1], [], []>} : vector<18x18xf32>, vector<18x8xf32>, vector<18x8xf32> -> vector<18x8xf32>
    %202 = vector.extract_strided_slice %183 {offsets = [0, 8], sizes = [18, 8], strides = [1, 1]} : vector<18x32xf32> to vector<18x8xf32>
    %203 = vector.extract_strided_slice %184 {offsets = [0, 8], sizes = [18, 8], strides = [1, 1]} : vector<18x32xf32> to vector<18x8xf32>
    %cst_89 = arith.constant dense<0.000000e+00> : vector<18x18xf32>
    %204 = tpu.matmul %202, %203, %cst_89 {dimension_numbers = #tpu.dot_dimension_numbers<[1], [1], [0], [0], [0, 0, 1, 0], [], []>} : vector<18x8xf32>, vector<18x8xf32>, vector<18x18xf32> -> vector<18x18xf32>
    %205 = arith.addf %204, %28 : vector<18x18xf32>
    %cst_90 = arith.constant dense<0xFF800000> : vector<18xf32>
    %206 = vector.multi_reduction <maximumf>, %205, %cst_90 [1] : vector<18x18xf32> to vector<18xf32>
    %207 = vector.shape_cast %206 : vector<18xf32> to vector<18x1xf32>
    %208 = vector.broadcast %207 : vector<18x1xf32> to vector<18x18xf32>
    %209 = arith.subf %205, %208 : vector<18x18xf32>
    %210 = math.exp %209 : vector<18x18xf32>
    %cst_91 = arith.constant dense<0.000000e+00> : vector<18xf32>
    %211 = vector.multi_reduction <add>, %210, %cst_91 [1] : vector<18x18xf32> to vector<18xf32>
    %212 = vector.shape_cast %211 : vector<18xf32> to vector<18x1xf32>
    %213 = tpu.reciprocal %212 {approx = true} : vector<18x1xf32> -> vector<18x1xf32>
    %214 = vector.broadcast %213 : vector<18x1xf32> to vector<18x18xf32>
    %215 = arith.mulf %210, %214 : vector<18x18xf32>
    %216 = vector.extract_strided_slice %185 {offsets = [0, 8], sizes = [18, 8], strides = [1, 1]} : vector<18x32xf32> to vector<18x8xf32>
    %cst_92 = arith.constant dense<0.000000e+00> : vector<18x8xf32>
    %217 = tpu.matmul %215, %216, %cst_92 {dimension_numbers = #tpu.dot_dimension_numbers<[1], [0], [0], [1], [0, 0, 1, 1], [], []>} : vector<18x18xf32>, vector<18x8xf32>, vector<18x8xf32> -> vector<18x8xf32>
    %218 = vector.extract_strided_slice %183 {offsets = [0, 16], sizes = [18, 8], strides = [1, 1]} : vector<18x32xf32> to vector<18x8xf32>
    %219 = vector.extract_strided_slice %184 {offsets = [0, 16], sizes = [18, 8], strides = [1, 1]} : vector<18x32xf32> to vector<18x8xf32>
    %cst_93 = arith.constant dense<0.000000e+00> : vector<18x18xf32>
    %220 = tpu.matmul %218, %219, %cst_93 {dimension_numbers = #tpu.dot_dimension_numbers<[1], [1], [0], [0], [0, 0, 1, 0], [], []>} : vector<18x8xf32>, vector<18x8xf32>, vector<18x18xf32> -> vector<18x18xf32>
    %221 = arith.addf %220, %28 : vector<18x18xf32>
    %cst_94 = arith.constant dense<0xFF800000> : vector<18xf32>
    %222 = vector.multi_reduction <maximumf>, %221, %cst_94 [1] : vector<18x18xf32> to vector<18xf32>
    %223 = vector.shape_cast %222 : vector<18xf32> to vector<18x1xf32>
    %224 = vector.broadcast %223 : vector<18x1xf32> to vector<18x18xf32>
    %225 = arith.subf %221, %224 : vector<18x18xf32>
    %226 = math.exp %225 : vector<18x18xf32>
    %cst_95 = arith.constant dense<0.000000e+00> : vector<18xf32>
    %227 = vector.multi_reduction <add>, %226, %cst_95 [1] : vector<18x18xf32> to vector<18xf32>
    %228 = vector.shape_cast %227 : vector<18xf32> to vector<18x1xf32>
    %229 = tpu.reciprocal %228 {approx = true} : vector<18x1xf32> -> vector<18x1xf32>
    %230 = vector.broadcast %229 : vector<18x1xf32> to vector<18x18xf32>
    %231 = arith.mulf %226, %230 : vector<18x18xf32>
    %232 = vector.extract_strided_slice %185 {offsets = [0, 16], sizes = [18, 8], strides = [1, 1]} : vector<18x32xf32> to vector<18x8xf32>
    %cst_96 = arith.constant dense<0.000000e+00> : vector<18x8xf32>
    %233 = tpu.matmul %231, %232, %cst_96 {dimension_numbers = #tpu.dot_dimension_numbers<[1], [0], [0], [1], [0, 0, 1, 1], [], []>} : vector<18x18xf32>, vector<18x8xf32>, vector<18x8xf32> -> vector<18x8xf32>
    %234 = vector.extract_strided_slice %183 {offsets = [0, 24], sizes = [18, 8], strides = [1, 1]} : vector<18x32xf32> to vector<18x8xf32>
    %235 = vector.extract_strided_slice %184 {offsets = [0, 24], sizes = [18, 8], strides = [1, 1]} : vector<18x32xf32> to vector<18x8xf32>
    %cst_97 = arith.constant dense<0.000000e+00> : vector<18x18xf32>
    %236 = tpu.matmul %234, %235, %cst_97 {dimension_numbers = #tpu.dot_dimension_numbers<[1], [1], [0], [0], [0, 0, 1, 0], [], []>} : vector<18x8xf32>, vector<18x8xf32>, vector<18x18xf32> -> vector<18x18xf32>
    %237 = arith.addf %236, %28 : vector<18x18xf32>
    %cst_98 = arith.constant dense<0xFF800000> : vector<18xf32>
    %238 = vector.multi_reduction <maximumf>, %237, %cst_98 [1] : vector<18x18xf32> to vector<18xf32>
    %239 = vector.shape_cast %238 : vector<18xf32> to vector<18x1xf32>
    %240 = vector.broadcast %239 : vector<18x1xf32> to vector<18x18xf32>
    %241 = arith.subf %237, %240 : vector<18x18xf32>
    %242 = math.exp %241 : vector<18x18xf32>
    %cst_99 = arith.constant dense<0.000000e+00> : vector<18xf32>
    %243 = vector.multi_reduction <add>, %242, %cst_99 [1] : vector<18x18xf32> to vector<18xf32>
    %244 = vector.shape_cast %243 : vector<18xf32> to vector<18x1xf32>
    %245 = tpu.reciprocal %244 {approx = true} : vector<18x1xf32> -> vector<18x1xf32>
    %246 = vector.broadcast %245 : vector<18x1xf32> to vector<18x18xf32>
    %247 = arith.mulf %242, %246 : vector<18x18xf32>
    %248 = vector.extract_strided_slice %185 {offsets = [0, 24], sizes = [18, 8], strides = [1, 1]} : vector<18x32xf32> to vector<18x8xf32>
    %cst_100 = arith.constant dense<0.000000e+00> : vector<18x8xf32>
    %249 = tpu.matmul %247, %248, %cst_100 {dimension_numbers = #tpu.dot_dimension_numbers<[1], [0], [0], [1], [0, 0, 1, 1], [], []>} : vector<18x18xf32>, vector<18x8xf32>, vector<18x8xf32> -> vector<18x8xf32>
    %250 = tpu.concatenate %201, %217, %233, %249 in 1 : vector<18x8xf32>, vector<18x8xf32>, vector<18x8xf32>, vector<18x8xf32> -> vector<18x32xf32>
    %c0_101 = arith.constant 0 : index
    %c0_102 = arith.constant 0 : index
    %251 = vector.load %arg23[%c0_101, %c0_102] : memref<32x32xbf16, #tpu.memory_space<vmem>>, vector<32x32xbf16>
    %252 = arith.truncf %250 : vector<18x32xf32> to vector<18x32xbf16>
    %cst_103 = arith.constant dense<0.000000e+00> : vector<18x32xf32>
    %253 = tpu.matmul %252, %251, %cst_103 {dimension_numbers = #tpu.dot_dimension_numbers<[1], [0], [0], [1], [0, 0, 1, 1], [], []>} : vector<18x32xbf16>, vector<32x32xbf16>, vector<18x32xf32> -> vector<18x32xf32>
    %c0_104 = arith.constant 0 : index
    %c0_105 = arith.constant 0 : index
    %254 = vector.load %arg24[%c0_104, %c0_105] : memref<1x32xf32, #tpu.memory_space<vmem>>, vector<1x32xf32>
    %255 = vector.broadcast %254 : vector<1x32xf32> to vector<18x32xf32>
    %256 = arith.addf %253, %255 : vector<18x32xf32>
    %257 = arith.addf %174, %256 : vector<18x32xf32>
    %c0_106 = arith.constant 0 : index
    %c0_107 = arith.constant 0 : index
    %258 = vector.load %arg25[%c0_106, %c0_107] : memref<1x32xf32, #tpu.memory_space<vmem>>, vector<1x32xf32>
    %c0_108 = arith.constant 0 : index
    %c0_109 = arith.constant 0 : index
    %259 = vector.load %arg26[%c0_108, %c0_109] : memref<1x32xf32, #tpu.memory_space<vmem>>, vector<1x32xf32>
    %cst_110 = arith.constant dense<0.000000e+00> : vector<18xf32>
    %260 = vector.multi_reduction <add>, %257, %cst_110 [1] : vector<18x32xf32> to vector<18xf32>
    %261 = vector.shape_cast %260 : vector<18xf32> to vector<18x1xf32>
    %cst_111 = arith.constant 3.200000e+01 : f32
    %262 = vector.broadcast %cst_111 : f32 to vector<18x1xf32>
    %263 = arith.divf %261, %262 : vector<18x1xf32>
    %264 = vector.broadcast %263 : vector<18x1xf32> to vector<18x32xf32>
    %265 = arith.subf %257, %264 : vector<18x32xf32>
    %266 = arith.mulf %265, %265 : vector<18x32xf32>
    %cst_112 = arith.constant dense<0.000000e+00> : vector<18xf32>
    %267 = vector.multi_reduction <add>, %266, %cst_112 [1] : vector<18x32xf32> to vector<18xf32>
    %268 = vector.shape_cast %267 : vector<18xf32> to vector<18x1xf32>
    %cst_113 = arith.constant 3.200000e+01 : f32
    %269 = vector.broadcast %cst_113 : f32 to vector<18x1xf32>
    %270 = arith.divf %268, %269 : vector<18x1xf32>
    %271 = vector.broadcast %263 : vector<18x1xf32> to vector<18x32xf32>
    %272 = arith.subf %257, %271 : vector<18x32xf32>
    %cst_114 = arith.constant 9.99999974E-6 : f32
    %273 = vector.broadcast %cst_114 : f32 to vector<18x1xf32>
    %274 = arith.addf %270, %273 : vector<18x1xf32>
    %275 = math.rsqrt %274 : vector<18x1xf32>
    %276 = vector.broadcast %275 : vector<18x1xf32> to vector<18x32xf32>
    %277 = arith.mulf %272, %276 : vector<18x32xf32>
    %278 = vector.broadcast %258 : vector<1x32xf32> to vector<18x32xf32>
    %279 = arith.mulf %277, %278 : vector<18x32xf32>
    %280 = vector.broadcast %259 : vector<1x32xf32> to vector<18x32xf32>
    %281 = arith.addf %279, %280 : vector<18x32xf32>
    %c0_115 = arith.constant 0 : index
    %c0_116 = arith.constant 0 : index
    %282 = vector.load %arg27[%c0_115, %c0_116] : memref<32x128xbf16, #tpu.memory_space<vmem>>, vector<32x128xbf16>
    %283 = arith.truncf %281 : vector<18x32xf32> to vector<18x32xbf16>
    %cst_117 = arith.constant dense<0.000000e+00> : vector<18x128xf32>
    %284 = tpu.matmul %283, %282, %cst_117 {dimension_numbers = #tpu.dot_dimension_numbers<[1], [0], [0], [1], [0, 0, 1, 1], [], []>} : vector<18x32xbf16>, vector<32x128xbf16>, vector<18x128xf32> -> vector<18x128xf32>
    %c0_118 = arith.constant 0 : index
    %c0_119 = arith.constant 0 : index
    %285 = vector.load %arg28[%c0_118, %c0_119] : memref<1x128xf32, #tpu.memory_space<vmem>>, vector<1x128xf32>
    %286 = vector.broadcast %285 : vector<1x128xf32> to vector<18x128xf32>
    %287 = arith.addf %284, %286 : vector<18x128xf32>
    %cst_120 = arith.constant 0.000000e+00 : f32
    %288 = vector.broadcast %cst_120 : f32 to vector<18x128xf32>
    %289 = arith.maximumf %287, %288 : vector<18x128xf32>
    %c0_121 = arith.constant 0 : index
    %c0_122 = arith.constant 0 : index
    %290 = vector.load %arg29[%c0_121, %c0_122] : memref<128x32xbf16, #tpu.memory_space<vmem>>, vector<128x32xbf16>
    %291 = arith.truncf %289 : vector<18x128xf32> to vector<18x128xbf16>
    %cst_123 = arith.constant dense<0.000000e+00> : vector<18x32xf32>
    %292 = tpu.matmul %291, %290, %cst_123 {dimension_numbers = #tpu.dot_dimension_numbers<[1], [0], [0], [1], [0, 0, 1, 1], [], []>} : vector<18x128xbf16>, vector<128x32xbf16>, vector<18x32xf32> -> vector<18x32xf32>
    %c0_124 = arith.constant 0 : index
    %c0_125 = arith.constant 0 : index
    %293 = vector.load %arg30[%c0_124, %c0_125] : memref<1x32xf32, #tpu.memory_space<vmem>>, vector<1x32xf32>
    %294 = vector.broadcast %293 : vector<1x32xf32> to vector<18x32xf32>
    %295 = arith.addf %292, %294 : vector<18x32xf32>
    %296 = arith.addf %281, %295 : vector<18x32xf32>
    %c0_126 = arith.constant 0 : index
    %c0_127 = arith.constant 0 : index
    %297 = vector.load %arg31[%c0_126, %c0_127] : memref<1x32xf32, #tpu.memory_space<vmem>>, vector<1x32xf32>
    %c0_128 = arith.constant 0 : index
    %c0_129 = arith.constant 0 : index
    %298 = vector.load %arg32[%c0_128, %c0_129] : memref<1x32xf32, #tpu.memory_space<vmem>>, vector<1x32xf32>
    %cst_130 = arith.constant dense<0.000000e+00> : vector<18xf32>
    %299 = vector.multi_reduction <add>, %296, %cst_130 [1] : vector<18x32xf32> to vector<18xf32>
    %300 = vector.shape_cast %299 : vector<18xf32> to vector<18x1xf32>
    %cst_131 = arith.constant 3.200000e+01 : f32
    %301 = vector.broadcast %cst_131 : f32 to vector<18x1xf32>
    %302 = arith.divf %300, %301 : vector<18x1xf32>
    %303 = vector.broadcast %302 : vector<18x1xf32> to vector<18x32xf32>
    %304 = arith.subf %296, %303 : vector<18x32xf32>
    %305 = arith.mulf %304, %304 : vector<18x32xf32>
    %cst_132 = arith.constant dense<0.000000e+00> : vector<18xf32>
    %306 = vector.multi_reduction <add>, %305, %cst_132 [1] : vector<18x32xf32> to vector<18xf32>
    %307 = vector.shape_cast %306 : vector<18xf32> to vector<18x1xf32>
    %cst_133 = arith.constant 3.200000e+01 : f32
    %308 = vector.broadcast %cst_133 : f32 to vector<18x1xf32>
    %309 = arith.divf %307, %308 : vector<18x1xf32>
    %310 = vector.broadcast %302 : vector<18x1xf32> to vector<18x32xf32>
    %311 = arith.subf %296, %310 : vector<18x32xf32>
    %cst_134 = arith.constant 9.99999974E-6 : f32
    %312 = vector.broadcast %cst_134 : f32 to vector<18x1xf32>
    %313 = arith.addf %309, %312 : vector<18x1xf32>
    %314 = math.rsqrt %313 : vector<18x1xf32>
    %315 = vector.broadcast %314 : vector<18x1xf32> to vector<18x32xf32>
    %316 = arith.mulf %311, %315 : vector<18x32xf32>
    %317 = vector.broadcast %297 : vector<1x32xf32> to vector<18x32xf32>
    %318 = arith.mulf %316, %317 : vector<18x32xf32>
    %319 = vector.broadcast %298 : vector<1x32xf32> to vector<18x32xf32>
    %320 = arith.addf %318, %319 : vector<18x32xf32>
    %c0_135 = arith.constant 0 : index
    %c0_136 = arith.constant 0 : index
    %321 = vector.load %arg33[%c0_135, %c0_136] : memref<32x256xbf16, #tpu.memory_space<vmem>>, vector<32x256xbf16>
    %322 = arith.truncf %320 : vector<18x32xf32> to vector<18x32xbf16>
    %cst_137 = arith.constant dense<0.000000e+00> : vector<18x256xf32>
    %323 = tpu.matmul %322, %321, %cst_137 {dimension_numbers = #tpu.dot_dimension_numbers<[1], [0], [0], [1], [0, 0, 1, 1], [], []>} : vector<18x32xbf16>, vector<32x256xbf16>, vector<18x256xf32> -> vector<18x256xf32>
    %c0_138 = arith.constant 0 : index
    %c0_139 = arith.constant 0 : index
    %324 = vector.load %arg34[%c0_138, %c0_139] : memref<1x256xf32, #tpu.memory_space<vmem>>, vector<1x256xf32>
    %325 = vector.broadcast %324 : vector<1x256xf32> to vector<18x256xf32>
    %326 = arith.addf %323, %325 : vector<18x256xf32>
    %cst_140 = arith.constant 0.000000e+00 : f32
    %327 = vector.broadcast %cst_140 : f32 to vector<18x256xf32>
    %328 = arith.maximumf %326, %327 : vector<18x256xf32>
    %c0_141 = arith.constant 0 : index
    %c0_142 = arith.constant 0 : index
    %329 = vector.load %arg35[%c0_141, %c0_142] : memref<256x128xbf16, #tpu.memory_space<vmem>>, vector<256x128xbf16>
    %330 = arith.truncf %328 : vector<18x256xf32> to vector<18x256xbf16>
    %cst_143 = arith.constant dense<0.000000e+00> : vector<18x128xf32>
    %331 = tpu.matmul %330, %329, %cst_143 {dimension_numbers = #tpu.dot_dimension_numbers<[1], [0], [0], [1], [0, 0, 1, 1], [], []>} : vector<18x256xbf16>, vector<256x128xbf16>, vector<18x128xf32> -> vector<18x128xf32>
    %c0_144 = arith.constant 0 : index
    %c0_145 = arith.constant 0 : index
    %332 = vector.load %arg36[%c0_144, %c0_145] : memref<1x128xf32, #tpu.memory_space<vmem>>, vector<1x128xf32>
    %333 = vector.broadcast %332 : vector<1x128xf32> to vector<18x128xf32>
    %334 = arith.addf %331, %333 : vector<18x128xf32>
    %c0_146 = arith.constant 0 : index
    %c0_147 = arith.constant 0 : index
    %335 = vector.load %arg37[%c0_146, %c0_147] : memref<18x128xf32, #tpu.memory_space<vmem>>, vector<18x128xf32>
    tpu.vector_store %arg37[%c0_146, %c0_147], %334 {strides = array<i32>} : memref<18x128xf32, #tpu.memory_space<vmem>>, vector<18x128xf32>,
    return
  }
  func.func @transform_0(%arg0: i32) -> (i32, i32, i32, i32) {
    %c0_i32 = arith.constant 0 : i32
    %c0_i32_0 = arith.constant 0 : i32
    %c0_i32_1 = arith.constant 0 : i32
    %c0_i32_2 = arith.constant 0 : i32
    %c0_i32_3 = arith.constant 0 : i32
    return %c0_i32, %c0_i32_0, %c0_i32_1, %c0_i32_2 : i32, i32, i32, i32
  }
  func.func @transform_1(%arg0: i32) -> (i32, i32) {
    %c0_i32 = arith.constant 0 : i32
    %c0_i32_0 = arith.constant 0 : i32
    %c0_i32_1 = arith.constant 0 : i32
    return %c0_i32, %c0_i32_0 : i32, i32
  }
  func.func @transform_2(%arg0: i32) -> (i32, i32) {
    %c0_i32 = arith.constant 0 : i32
    %c0_i32_0 = arith.constant 0 : i32
    %c0_i32_1 = arith.constant 0 : i32
    return %c0_i32, %c0_i32_0 : i32, i32
  }
  func.func @transform_3(%arg0: i32) -> (i32, i32) {
    %c0_i32 = arith.constant 0 : i32
    %c0_i32_0 = arith.constant 0 : i32
    %c0_i32_1 = arith.constant 0 : i32
    return %c0_i32, %c0_i32_0 : i32, i32
  }
  func.func @transform_4(%arg0: i32) -> (i32, i32) {
    %c0_i32 = arith.constant 0 : i32
    %c0_i32_0 = arith.constant 0 : i32
    %c0_i32_1 = arith.constant 0 : i32
    return %c0_i32, %c0_i32_0 : i32, i32
  }
  func.func @transform_5(%arg0: i32) -> (i32, i32) {
    %c0_i32 = arith.constant 0 : i32
    %c0_i32_0 = arith.constant 0 : i32
    %c0_i32_1 = arith.constant 0 : i32
    return %c0_i32, %c0_i32_0 : i32, i32
  }
  func.func @transform_6(%arg0: i32) -> (i32, i32) {
    %c0_i32 = arith.constant 0 : i32
    %c0_i32_0 = arith.constant 0 : i32
    %c0_i32_1 = arith.constant 0 : i32
    return %c0_i32, %c0_i32_0 : i32, i32
  }
  func.func @transform_7(%arg0: i32) -> (i32, i32) {
    %c0_i32 = arith.constant 0 : i32
    %c0_i32_0 = arith.constant 0 : i32
    %c0_i32_1 = arith.constant 0 : i32
    return %c0_i32, %c0_i32_0 : i32, i32
  }
  func.func @transform_8(%arg0: i32) -> (i32, i32) {
    %c0_i32 = arith.constant 0 : i32
    %c0_i32_0 = arith.constant 0 : i32
    %c0_i32_1 = arith.constant 0 : i32
    return %c0_i32, %c0_i32_0 : i32, i32
  }
  func.func @transform_9(%arg0: i32) -> (i32, i32) {
    %c0_i32 = arith.constant 0 : i32
    %c0_i32_0 = arith.constant 0 : i32
    %c0_i32_1 = arith.constant 0 : i32
    return %c0_i32, %c0_i32_0 : i32, i32
  }
  func.func @transform_10(%arg0: i32) -> (i32, i32) {
    %c0_i32 = arith.constant 0 : i32
    %c0_i32_0 = arith.constant 0 : i32
    %c0_i32_1 = arith.constant 0 : i32
    return %c0_i32, %c0_i32_0 : i32, i32
  }
  func.func @transform_11(%arg0: i32) -> (i32, i32) {
    %c0_i32 = arith.constant 0 : i32
    %c0_i32_0 = arith.constant 0 : i32
    %c0_i32_1 = arith.constant 0 : i32
    return %c0_i32, %c0_i32_0 : i32, i32
  }
  func.func @transform_12(%arg0: i32) -> (i32, i32) {
    %c0_i32 = arith.constant 0 : i32
    %c0_i32_0 = arith.constant 0 : i32
    %c0_i32_1 = arith.constant 0 : i32
    return %c0_i32, %c0_i32_0 : i32, i32
  }
  func.func @transform_13(%arg0: i32) -> (i32, i32) {
    %c0_i32 = arith.constant 0 : i32
    %c0_i32_0 = arith.constant 0 : i32
    %c0_i32_1 = arith.constant 0 : i32
    return %c0_i32, %c0_i32_0 : i32, i32
  }
  func.func @transform_14(%arg0: i32) -> (i32, i32) {
    %c0_i32 = arith.constant 0 : i32
    %c0_i32_0 = arith.constant 0 : i32
    %c0_i32_1 = arith.constant 0 : i32
    return %c0_i32, %c0_i32_0 : i32, i32
  }
  func.func @transform_15(%arg0: i32) -> (i32, i32) {
    %c0_i32 = arith.constant 0 : i32
    %c0_i32_0 = arith.constant 0 : i32
    %c0_i32_1 = arith.constant 0 : i32
    return %c0_i32, %c0_i32_0 : i32, i32
  }
  func.func @transform_16(%arg0: i32) -> (i32, i32) {
    %c0_i32 = arith.constant 0 : i32
    %c0_i32_0 = arith.constant 0 : i32
    %c0_i32_1 = arith.constant 0 : i32
    return %c0_i32, %c0_i32_0 : i32, i32
  }
  func.func @transform_17(%arg0: i32) -> (i32, i32) {
    %c0_i32 = arith.constant 0 : i32
    %c0_i32_0 = arith.constant 0 : i32
    %c0_i32_1 = arith.constant 0 : i32
    return %c0_i32, %c0_i32_0 : i32, i32
  }
  func.func @transform_18(%arg0: i32) -> (i32, i32) {
    %c0_i32 = arith.constant 0 : i32
    %c0_i32_0 = arith.constant 0 : i32
    %c0_i32_1 = arith.constant 0 : i32
    return %c0_i32, %c0_i32_0 : i32, i32
  }
  func.func @transform_19(%arg0: i32) -> (i32, i32) {
    %c0_i32 = arith.constant 0 : i32
    %c0_i32_0 = arith.constant 0 : i32
    %c0_i32_1 = arith.constant 0 : i32
    return %c0_i32, %c0_i32_0 : i32, i32
  }
  func.func @transform_20(%arg0: i32) -> (i32, i32) {
    %c0_i32 = arith.constant 0 : i32
    %c0_i32_0 = arith.constant 0 : i32
    %c0_i32_1 = arith.constant 0 : i32
    return %c0_i32, %c0_i32_0 : i32, i32
  }
  func.func @transform_21(%arg0: i32) -> (i32, i32) {
    %c0_i32 = arith.constant 0 : i32
    %c0_i32_0 = arith.constant 0 : i32
    %c0_i32_1 = arith.constant 0 : i32
    return %c0_i32, %c0_i32_0 : i32, i32
  }
  func.func @transform_22(%arg0: i32) -> (i32, i32) {
    %c0_i32 = arith.constant 0 : i32
    %c0_i32_0 = arith.constant 0 : i32
    %c0_i32_1 = arith.constant 0 : i32
    return %c0_i32, %c0_i32_0 : i32, i32
  }
  func.func @transform_23(%arg0: i32) -> (i32, i32) {
    %c0_i32 = arith.constant 0 : i32
    %c0_i32_0 = arith.constant 0 : i32
    %c0_i32_1 = arith.constant 0 : i32
    return %c0_i32, %c0_i32_0 : i32, i32
  }
  func.func @transform_24(%arg0: i32) -> (i32, i32) {
    %c0_i32 = arith.constant 0 : i32
    %c0_i32_0 = arith.constant 0 : i32
    %c0_i32_1 = arith.constant 0 : i32
    return %c0_i32, %c0_i32_0 : i32, i32
  }
  func.func @transform_25(%arg0: i32) -> (i32, i32) {
    %c0_i32 = arith.constant 0 : i32
    %c0_i32_0 = arith.constant 0 : i32
    %c0_i32_1 = arith.constant 0 : i32
    return %c0_i32, %c0_i32_0 : i32, i32
  }
  func.func @transform_26(%arg0: i32) -> (i32, i32) {
    %c0_i32 = arith.constant 0 : i32
    %c0_i32_0 = arith.constant 0 : i32
    %c0_i32_1 = arith.constant 0 : i32
    return %c0_i32, %c0_i32_0 : i32, i32
  }
  func.func @transform_27(%arg0: i32) -> (i32, i32) {
    %c0_i32 = arith.constant 0 : i32
    %c0_i32_0 = arith.constant 0 : i32
    %c0_i32_1 = arith.constant 0 : i32
    return %c0_i32, %c0_i32_0 : i32, i32
  }
  func.func @transform_28(%arg0: i32) -> (i32, i32) {
    %c0_i32 = arith.constant 0 : i32
    %c0_i32_0 = arith.constant 0 : i32
    %c0_i32_1 = arith.constant 0 : i32
    return %c0_i32, %c0_i32_0 : i32, i32
  }
  func.func @transform_29(%arg0: i32) -> (i32, i32) {
    %c0_i32 = arith.constant 0 : i32
    %c0_i32_0 = arith.constant 0 : i32
    %c0_i32_1 = arith.constant 0 : i32
    return %c0_i32, %c0_i32_0 : i32, i32
  }
  func.func @transform_30(%arg0: i32) -> (i32, i32) {
    %c0_i32 = arith.constant 0 : i32
    %c0_i32_0 = arith.constant 0 : i32
    %c0_i32_1 = arith.constant 0 : i32
    return %c0_i32, %c0_i32_0 : i32, i32
  }
  func.func @transform_31(%arg0: i32) -> (i32, i32) {
    %c0_i32 = arith.constant 0 : i32
    %c0_i32_0 = arith.constant 0 : i32
    %c0_i32_1 = arith.constant 0 : i32
    return %c0_i32, %c0_i32_0 : i32, i32
  }
  func.func @transform_32(%arg0: i32) -> (i32, i32) {
    %c0_i32 = arith.constant 0 : i32
    %c0_i32_0 = arith.constant 0 : i32
    %c0_i32_1 = arith.constant 0 : i32
    return %c0_i32, %c0_i32_0 : i32, i32
  }
  func.func @transform_33(%arg0: i32) -> (i32, i32) {
    %c0_i32 = arith.constant 0 : i32
    %c0_i32_0 = arith.constant 0 : i32
    %c0_i32_1 = arith.constant 0 : i32
    return %c0_i32, %c0_i32_0 : i32, i32
  }
  func.func @transform_34(%arg0: i32) -> (i32, i32) {
    %c0_i32 = arith.constant 0 : i32
    %c0_i32_0 = arith.constant 0 : i32
    %c0_i32_1 = arith.constant 0 : i32
    return %c0_i32, %c0_i32_0 : i32, i32
  }
  func.func @transform_35(%arg0: i32) -> (i32, i32) {
    %c0_i32 = arith.constant 0 : i32
    %c0_i32_0 = arith.constant 0 : i32
    %c0_i32_1 = arith.constant 0 : i32
    return %c0_i32, %c0_i32_0 : i32, i32
  }
  func.func @transform_36(%arg0: i32) -> (i32, i32) {
    %c0_i32 = arith.constant 0 : i32
    %c0_i32_0 = arith.constant 0 : i32
    %c0_i32_1 = arith.constant 0 : i32
    return %c0_i32, %c0_i32_0 : i32, i32
  }
}

</mosaic_0001>

<bundles_post_ra>
// kernel: tile.9
= control target key start
LH: loop header
LB: loop body
LE: loop exit
PB: predicated region body
PF: predicated region fallthrough
CT: control target
= control target key end

     0   :  { %vm3_vm0 = vcmask 261120   ;;  %s6_s6 = smov 3  ;;  %s48_s0 = inlined_call_operand.vmem [shape: f32[2,9,32], index: 0, kind: input, shape index: {}]   ;;  %s49_s1 = inlined_call_operand.vmem [shape: f32[18,32], index: 1, kind: output, shape index: {}]  }
   0x1   :  { %v2_v0 = vld [vmem:[%s48_s0] sm:$0xff]   ;;  %v18_v2 = vld [vmem:[%s48_s0 + $0x11] sm:$0xff]  }
   0x2   :  { %v16_v1 = vld [vmem:[%s48_s0 + $0x8] ss:$8 sm:%s6_s6]   ;;  %4 = vst.msk [vmem:[%s49_s1] sm:$0xff] %vm3_vm0, %v2_v0   ;;  %19 = vst.msk [vmem:[%s49_s1 + $0xa] sm:$0xff] %vm3_vm0, %v18_v2  }
   0x3   :  { %17 = vst.msk [vmem:[%s49_s1 + $0x8] sm:$0x3] %vm3_vm0, %v16_v1  }

// kernel: puzzle_net_forward.1
= control target key start
LH: loop header
LB: loop body
LE: loop exit
PB: predicated region body
PF: predicated region fallthrough
CT: control target
= control target key end

     0   :  { %s13515_s3 = smov 3   ;;  %vm2190_vm0 = vcmask 261120   ;;  %s13516_s10 = smov 4   ;;  %vm5968_vm1 = vcmask 130048   ;;  %vm7293_vm2 = vcmask 1041409   ;;  %vm7295_vm3 = vcmask 1042434   ;;  %s16791_s0 = inlined_call_operand.smem [shape: u32[37], index: -1, kind: input, shape index: {}] }
   0x1   :  { %s10672_s6 = sld [smem:[%s16791_s0 + %s13515_s3]]   ;;  %s13517_s14 = smov 5   ;;  %vm7297_vm4 = vcmask 1043459   ;;  %vm7299_vm5 = vcmask 1044484   ;;  %vm7301_vm6 = vcmask 1045509   ;;  %vm7303_vm7 = vcmask 1046534  }
   0x2   :  { %s13578_s9 = sld [smem:[%s16791_s0]]   ;;  %vm7305_vm8 = vcmask 1047559   ;;  %s13518_s18 = smov 8   ;;  %vm13524_vm9 = vmmov 0   ;;  %vm7505_vm10 = vcmask 64512   ;;  %vm7601_vm13 = vcmask 146432  }
   0x3   :  { %s13703_s13 = sld [smem:[%s16791_s0 + %s13516_s10]]   ;;  %s13519_s22 = smov 6   ;;  %vm16134_vm11 = vmpackc.low %vm7505_vm10, %vm7505_vm10 }
   0x4   :  { %s14401_s17 = sld [smem:[%s16791_s0 + %s13517_s14]]   ;;  %s13520_s26 = smov 7  }
   0x5   :  { %s10677_s21 = sld [smem:[%s16791_s0 + %s13518_s18]]   ;;  %s13521_s30 = smov 9  }
   0x6   :  { %s10675_s25 = sld [smem:[%s16791_s0 + %s13519_s22]]   ;;  %s13523_s4 = smov 96  }
   0x7   :  { %v13048_v0 = vld [vmem:[%s10672_s6] sm:$0xff]   ;;  %v13049_v1 = vld [vmem:[%s10672_s6 + $0x8] sm:$0xff]   ;;  %s10676_s29 = sld [smem:[%s16791_s0 + %s13520_s26]]   ;;  %s13527_s5 = smov 1  }
   0x8   :  { %11910 = vmatprep.subr.bf16.mxu0 %v13048_v0  ;;  %v13050_v2 = vld [vmem:[%s13578_s9] sm:$0xff]   ;;  %12880 = vmatprep.subr.bf16.mxu1 %v13048_v0  ;;  %v13051_v3 = vld [vmem:[%s13578_s9 + $0x8] sm:$0xff]   ;;  %v13052_v4 = vld [vmem:[%s13578_s9 + $0x10] sm:$0xff]   ;;  %s10678_s3 = sld [smem:[%s16791_s0 + %s13521_s30]]   ;;  %s13531_s14 = smov 88  }
   0x9   :  { %11911 = vmatpush3.bf16.msra.mxu0 %v13048_v0  ;;  %12882 = vmatpush3.bf16.msra.mxu1 %v13048_v0  ;;  %v13053_v5 = vld [vmem:[%s13578_s9 + $0x18] sm:$0xff]   ;;  %v13054_v6 = vld [vmem:[%s13578_s9 + $0x20] sm:$0xff]   ;;  %v13055_v7 = vld [vmem:[%s13578_s9 + $0x28] sm:$0xff]   ;;  %s10670_s8 = sld [smem:[%s16791_s0 + %s13527_s5]]   ;;  %s13532_s15 = smov 120  }
   0xa   :  { %11912 = vmatprep.subr.bf16.mxu0 %v13049_v1  ;;  %11914 = vmatprep.mubr.msk.bf16.mxu0 %vm2190_vm0, %v13050_v2  ;;  %v13056_v8 = vld [vmem:[%s13578_s9 + $0x30] sm:$0xff]   ;;  %v13057_v9 = vld [vmem:[%s13578_s9 + $0x38] sm:$0xff]   ;;  %v13058_v10 = vld [vmem:[%s13578_s9 + $0x40] sm:$0xff]   ;;  %s13533_s16 = smov 56   ;;  %s13535_s19 = smov 112  }
   0xb   :  { %12881 = vmatprep.subr.bf16.mxu1 %v13049_v1  ;;  %v13059_v11 = vld [vmem:[%s13578_s9 + $0x48] sm:$0xff]   ;;  %v13060_v12 = vld [vmem:[%s13578_s9 + $0x50] sm:$0xff]   ;;  %v13061_v13 = vld [vmem:[%s13578_s9 + $0x58] sm:$0xff]   ;;  %s13536_s20 = smov 48   ;;  %s13538_s22 = smov 104  }
   0xc   :  { %v13062_v14 = vld [vmem:[%s13578_s9 + $0x60] sm:$0xff]   ;;  %v13063_v15 = vld [vmem:[%s13578_s9 + $0x68] sm:$0xff]   ;;  %v13064_v16 = vld [vmem:[%s13578_s9 + $0x70] sm:$0xff]   ;;  %s13539_s23 = smov 16   ;;  %s13540_s27 = smov 40  }
   0xd   :  { %11913 = vmatpush3.bf16.msra.mxu0 %v13049_v1  ;;  %12883 = vmatpush3.bf16.msra.mxu1 %v13049_v1  ;;  %v13065_v17 = vld [vmem:[%s13578_s9 + $0x78] sm:$0xff]   ;;  %v13066_v18 = vld [vmem:[%s13578_s9 + $0x80] sm:$0xff]   ;;  %v13067_v19 = vld [vmem:[%s13578_s9 + $0x88] sm:$0xff]   ;;  %s16342_s26 = sld [smem:[%s16791_s0 + %s13539_s23]]   ;;  %s13541_s28 = smov 10  }
   0xe   :  { %v13068_v20 = vld [vmem:[%s13578_s9 + $0x90] sm:$0xff]   ;;  %v13069_v21 = vld [vmem:[%s13578_s9 + $0x98] sm:$0xff]   ;;  %v13070_v22 = vld [vmem:[%s13578_s9 + $0xa0] sm:$0xff]   ;;  %s10679_s1 = sld [smem:[%s16791_s0 + %s13541_s28]]   ;;  %s13542_s2 = smov 24  }
   0xf   :  { %v13071_v23 = vld [vmem:[%s13578_s9 + $0xa8] sm:$0xff]   ;;  %v13072_v24 = vld [vmem:[%s13578_s9 + $0xb0] sm:$0xff]   ;;  %v13073_v25 = vld [vmem:[%s13578_s9 + $0xb8] sm:$0xff]   ;;  %s13547_s5 = smov 15   ;;  %s10693_s30 = sld [smem:[%s16791_s0 + %s13542_s2]]  }
  0x10   :  { %11915 = vmatmul.mubr.msk.bf16.vlgmr.msra.gmra.mrb[0].mxu0 %vm2190_vm0, %v13051_v3  ;;  %v13074_v26 = vld [vmem:[%s13578_s9 + $0xc0] sm:$0xff]   ;;  %v13075_v27 = vld [vmem:[%s13578_s9 + $0xc8] sm:$0xff]   ;;  %v13076_v28 = vld [vmem:[%s13578_s9 + $0xd0] sm:$0xff]  }
  0x11   :  { %11918 = vmatprep.mubr.msk.bf16.mxu0 %vm2190_vm0, %v13052_v4  ;;  %v13077_v29 = vld [vmem:[%s13578_s9 + $0xd8] sm:$0xff]   ;;  %v13078_v30 = vld [vmem:[%s13578_s9 + $0xe0] sm:$0xff]   ;;  %v13079_v31 = vld [vmem:[%s13578_s9 + $0xe8] sm:$0xff]  }
  0x12   :  { %v13080_v32 = vld [vmem:[%s13578_s9 + $0xf0] sm:$0xff]   ;;  %v13081_v33 = vld [vmem:[%s13578_s9 + $0xf8] sm:$0xff]   ;;  %v13082_v34 = vld [vmem:[%s13578_s9 + $0x100] sm:$0xff]  }
  0x13   :  { %v13083_v35 = vld [vmem:[%s13578_s9 + $0x108] sm:$0xff]   ;;  %v13084_v36 = vld [vmem:[%s13578_s9 + $0x110] sm:$0xff]   ;;  %v13085_v37 = vld [vmem:[%s13578_s9 + $0x118] sm:$0xff]  }
  0x14   :  { %v13086_v38 = vld [vmem:[%s13578_s9 + $0x120] sm:$0xff]   ;;  %v13087_v39 = vld [vmem:[%s13578_s9 + $0x128] sm:$0xff]   ;;  %v13088_v40 = vld [vmem:[%s13578_s9 + $0x130] sm:$0xff]  }
  0x15   :  { %v13089_v41 = vld [vmem:[%s13578_s9 + $0x138] sm:$0xff]   ;;  %v13090_v42 = vld [vmem:[%s13578_s9 + $0x140] sm:$0xff]   ;;  %v13091_v43 = vld [vmem:[%s13578_s9 + $0x148] sm:$0xff]  }
  0x16   :  { %v13092_v44 = vld [vmem:[%s13578_s9 + $0x150] sm:$0xff]   ;;  %v13093_v45 = vld [vmem:[%s13578_s9 + $0x158] sm:$0xff]   ;;  %v13094_v46 = vld [vmem:[%s13578_s9 + $0x160] sm:$0xff]  }
  0x17   :  { %v13095_v47 = vld [vmem:[%s13578_s9 + $0x168] sm:$0xff]   ;;  %v13096_v48 = vld [vmem:[%s13578_s9 + $0x170] sm:$0xff]   ;;  %v13129_v50 = vld [vmem:[%s13578_s9 + $0x5f8] sm:$0xff]  }
  0x18   :  { %11919 = vmatmul.mubr.msk.bf16.gmra.mrb[4].mxu0 %vm2190_vm0, %v13053_v5  ;;  %v13127_v49 = vld [vmem:[%s13578_s9 + $0x5f0] sm:$0xff]   ;;  %v13097_v51 = vld [vmem:[%s13578_s9 + $0x178] sm:$0xff]   ;;  %v13098_v52 = vld [vmem:[%s13578_s9 + $0x180] sm:$0xff]  }
  0x19   :  { %11922 = vmatprep.mubr.msk.bf16.mxu0 %vm2190_vm0, %v13054_v6  ;;  %12294 = vmatprep.mubr.msk.bf16.mxu1 %vm2190_vm0, %v13127_v49  ;;  %v13131_v53 = vld [vmem:[%s13578_s9 + $0x600] sm:$0xff]   ;;  %v13133_v54 = vld [vmem:[%s13578_s9 + $0x608] sm:$0xff]   ;;  %v13100_v56 = vld [vmem:[%s13578_s9 + $0x190] sm:$0xff]  }
  0x1a   :  { %12295 = vmatmul.mubr.msk.bf16.vlgmr.msra.gmra.mrb[0].mxu1 %vm2190_vm0, %v13129_v50  ;;  %v13099_v55 = vld [vmem:[%s13578_s9 + $0x188] sm:$0xff]   ;;  %v13135_v57 = vld [vmem:[%s13578_s9 + $0x610] sm:$0xff]   ;;  %v13137_v58 = vld [vmem:[%s13578_s9 + $0x618] sm:$0xff]  }
  0x1b   :  { %12298 = vmatprep.mubr.msk.bf16.mxu1 %vm2190_vm0, %v13131_v53  ;;  %v13101_v59 = vld [vmem:[%s13578_s9 + $0x198] sm:$0xff]   ;;  %v13102_v60 = vld [vmem:[%s13578_s9 + $0x1a0] sm:$0xff]   ;;  %v13141_v62 = vld [vmem:[%s13578_s9 + $0x628] sm:$0xff]  }
  0x1c   :  { %v13139_v61 = vld [vmem:[%s13578_s9 + $0x620] sm:$0xff]   ;;  %v13103_v63 = vld [vmem:[%s13578_s9 + $0x1a8] sm:$0xff]   ;;  %v13104_v0 = vld [vmem:[%s13578_s9 + $0x1b0] sm:$0xff]  }
  0x1d   :  { %v13143_v1 = vld [vmem:[%s13578_s9 + $0x630] sm:$0xff]   ;;  %v13145_v2 = vld [vmem:[%s13578_s9 + $0x638] sm:$0xff]   ;;  %v13714_v3 = vld [vmem:[%s13703_s13] ss:$0 sm:$0xff] }
  0x1e   :  { %v13105_v6 = vld [vmem:[%s13578_s9 + $0x1b8] sm:$0xff]  }
  0x1f   :  { %v13109_v49 = vld [vmem:[%s13578_s9 + $0x1d8] sm:$0xff]  }
  0x20   :  { %11923 = vmatmul.mubr.msk.bf16.gmra.mrb[8].mxu0 %vm2190_vm0, %v13055_v7 }
  0x21   :  { %11926 = vmatprep.mubr.msk.bf16.mxu0 %vm2190_vm0, %v13056_v8 }
  0x22   :  { %12299 = vmatmul.mubr.msk.bf16.gmra.mrb[4].mxu1 %vm2190_vm0, %v13133_v54  ;;  %v13110_v54 = vld [vmem:[%s13578_s9 + $0x1e0] sm:$0xff]  }
  0x23   :  { %12302 = vmatprep.mubr.msk.bf16.mxu1 %vm2190_vm0, %v13135_v57 }
  0x28   :  { %11927 = vmatmul.mubr.msk.bf16.gmra.mrb[12].mxu0 %vm2190_vm0, %v13057_v9 }
  0x29   :  { %11930 = vmatprep.mubr.msk.bf16.mxu0 %vm2190_vm0, %v13058_v10  ;;  %v13106_v10 = vld [vmem:[%s13578_s9 + $0x1c0] sm:$0xff]  }
  0x2a   :  { %12303 = vmatmul.mubr.msk.bf16.gmra.mrb[8].mxu1 %vm2190_vm0, %v13137_v58  ;;  %v13157_v58 = vld [vmem:[%s13578_s9 + $0x668] sm:$0xff]  }
  0x2b   :  { %12306 = vmatprep.mubr.msk.bf16.mxu1 %vm2190_vm0, %v13139_v61 }
  0x30   :  { %11931 = vmatmul.mubr.msk.bf16.gmra.mrb[16].mxu0 %vm2190_vm0, %v13059_v11  ;;  %v13147_v11 = vld [vmem:[%s13578_s9 + $0x640] sm:$0xff]  }
  0x31   :  { %11934 = vmatprep.mubr.msk.bf16.mxu0 %vm2190_vm0, %v13060_v12 }
  0x32   :  { %12307 = vmatmul.mubr.msk.bf16.gmra.mrb[12].mxu1 %vm2190_vm0, %v13141_v62 }
  0x33   :  { %12310 = vmatprep.mubr.msk.bf16.mxu1 %vm2190_vm0, %v13143_v1 }
  0x38   :  { %11935 = vmatmul.mubr.msk.bf16.gmra.mrb[20].mxu0 %vm2190_vm0, %v13061_v13 }
  0x39   :  { %11938 = vmatprep.mubr.msk.bf16.mxu0 %vm2190_vm0, %v13062_v14  ;;  %v13149_v14 = vld [vmem:[%s13578_s9 + $0x648] sm:$0xff]  }
  0x3a   :  { %12311 = vmatmul.mubr.msk.bf16.gmra.mrb[16].mxu1 %vm2190_vm0, %v13145_v2 }
  0x3b   :  { %12314 = vmatprep.mubr.msk.bf16.mxu1 %vm2190_vm0, %v13147_v11 }
  0x40   :  { %11939 = vmatmul.mubr.msk.bf16.gmra.mrb[24].mxu0 %vm2190_vm0, %v13063_v15 }
  0x41   :  { %11942 = vmatprep.mubr.msk.bf16.mxu0 %vm2190_vm0, %v13064_v16 }
  0x42   :  { %12315 = vmatmul.mubr.msk.bf16.gmra.mrb[20].mxu1 %vm2190_vm0, %v13149_v14 }
  0x48   :  { %11943 = vmatmul.mubr.msk.bf16.gmra.mrb[28].mxu0 %vm2190_vm0, %v13065_v17 }
  0x49   :  { %11946 = vmatprep.mubr.msk.bf16.mxu0 %vm2190_vm0, %v13066_v18 }
  0x50   :  { %11947 = vmatmul.mubr.msk.bf16.gmra.mrb[32].mxu0 %vm2190_vm0, %v13067_v19 }
  0x51   :  { %11950 = vmatprep.mubr.msk.bf16.mxu0 %vm2190_vm0, %v13068_v20 }
  0x58   :  { %11951 = vmatmul.mubr.msk.bf16.gmra.mrb[36].mxu0 %vm2190_vm0, %v13069_v21 }
  0x59   :  { %11954 = vmatprep.mubr.msk.bf16.mxu0 %vm2190_vm0, %v13070_v22 }
  0x60   :  { %11955 = vmatmul.mubr.msk.bf16.gmra.mrb[40].mxu0 %vm2190_vm0, %v13071_v23 }
  0x61   :  { %11958 = vmatprep.mubr.msk.bf16.mxu0 %vm2190_vm0, %v13072_v24 }
  0x68   :  { %11959 = vmatmul.mubr.msk.bf16.gmra.mrb[44].mxu0 %vm2190_vm0, %v13073_v25  ;;  %v13107_v25 = vld [vmem:[%s13578_s9 + $0x1c8] sm:$0xff]  }
  0x69   :  { %11962 = vmatprep.mubr.msk.bf16.mxu0 %vm2190_vm0, %v13074_v26 }
  0x70   :  { %11963 = vmatmul.mubr.msk.bf16.gmra.mrb[48].mxu0 %vm2190_vm0, %v13075_v27 }
  0x71   :  { %11966 = vmatprep.mubr.msk.bf16.mxu0 %vm2190_vm0, %v13076_v28 }
  0x78   :  { %11967 = vmatmul.mubr.msk.bf16.gmra.mrb[52].mxu0 %vm2190_vm0, %v13077_v29 }
  0x79   :  { %11970 = vmatprep.mubr.msk.bf16.mxu0 %vm2190_vm0, %v13078_v30  ;;  %v13108_v30 = vld [vmem:[%s13578_s9 + $0x1d0] sm:$0xff]  }
  0x80   :  { %11971 = vmatmul.mubr.msk.bf16.gmra.mrb[56].mxu0 %vm2190_vm0, %v13079_v31  ;;  %v13151_v31 = vld [vmem:[%s13578_s9 + $0x650] sm:$0xff]  }
  0x81   :  { %11974 = vmatprep.mubr.msk.bf16.mxu0 %vm2190_vm0, %v13080_v32  ;;  %12318 = vmatprep.mubr.msk.bf16.mxu1 %vm2190_vm0, %v13151_v31 }
  0x88   :  { %11975 = vmatmul.mubr.msk.bf16.gmra.mrb[60].mxu0 %vm2190_vm0, %v13081_v33 }
  0x89   :  { %11978 = vmatprep.mubr.msk.bf16.mxu0 %vm2190_vm0, %v13082_v34  ;;  %v13153_v34 = vld [vmem:[%s13578_s9 + $0x658] sm:$0xff]  }
  0x8a   :  { %12319 = vmatmul.mubr.msk.bf16.gmra.mrb[24].mxu1 %vm2190_vm0, %v13153_v34  ;;  %v13113_v34 = vld [vmem:[%s13578_s9 + $0x1f8] sm:$0xff]  }
  0x90   :  { %11979 = vmatmul.mubr.msk.bf16.gmra.mrb[64].mxu0 %vm2190_vm0, %v13083_v35 }
  0x91   :  { %11982 = vmatprep.mubr.msk.bf16.mxu0 %vm2190_vm0, %v13084_v36 }
  0x98   :  { %11983 = vmatmul.mubr.msk.bf16.gmra.mrb[68].mxu0 %vm2190_vm0, %v13085_v37 }
  0x99   :  { %11986 = vmatprep.mubr.msk.bf16.mxu0 %vm2190_vm0, %v13086_v38 }
  0xa0   :  { %11987 = vmatmul.mubr.msk.bf16.gmra.mrb[72].mxu0 %vm2190_vm0, %v13087_v39 }
  0xa1   :  { %11990 = vmatprep.mubr.msk.bf16.mxu0 %vm2190_vm0, %v13088_v40 }
  0xa8   :  { %11991 = vmatmul.mubr.msk.bf16.gmra.mrb[76].mxu0 %vm2190_vm0, %v13089_v41 }
  0xa9   :  { %11994 = vmatprep.mubr.msk.bf16.mxu0 %vm2190_vm0, %v13090_v42 }
  0xb0   :  { %11995 = vmatmul.mubr.msk.bf16.gmra.mrb[80].mxu0 %vm2190_vm0, %v13091_v43 }
  0xb1   :  { %11998 = vmatprep.mubr.msk.bf16.mxu0 %vm2190_vm0, %v13092_v44 }
  0xb8   :  { %11999 = vmatmul.mubr.msk.bf16.gmra.mrb[84].mxu0 %vm2190_vm0, %v13093_v45 }
  0xb9   :  { %12002 = vmatprep.mubr.msk.bf16.mxu0 %vm2190_vm0, %v13094_v46 }
  0xc0   :  { %12003 = vmatmul.mubr.msk.bf16.gmra.mrb[88].mxu0 %vm2190_vm0, %v13095_v47 }
  0xc1   :  { %12006 = vmatprep.mubr.msk.bf16.mxu0 %vm2190_vm0, %v13096_v48 }
  0xc8   :  { %12007 = vmatmul.mubr.msk.bf16.gmra.mrb[92].mxu0 %vm2190_vm0, %v13097_v51 }
  0xc9   :  { %12010 = vmatprep.mubr.msk.bf16.mxu0 %vm2190_vm0, %v13098_v52 }
  0xd0   :  { %12011 = vmatmul.mubr.msk.bf16.gmra.mrb[96].mxu0 %vm2190_vm0, %v13099_v55  ;;  %v13155_v55 = vld [vmem:[%s13578_s9 + $0x660] sm:$0xff]  }
  0xd1   :  { %12014 = vmatprep.mubr.msk.bf16.mxu0 %vm2190_vm0, %v13100_v56  ;;  %12322 = vmatprep.mubr.msk.bf16.mxu1 %vm2190_vm0, %v13155_v55 }
  0xd2   :  { %12323 = vmatmul.mubr.msk.bf16.gmra.mrb[28].mxu1 %vm2190_vm0, %v13157_v58  ;;  %v13115_v58 = vld [vmem:[%s13578_s9 + $0x208] sm:$0xff]  }
  0xd8   :  { %12015 = vmatmul.mubr.msk.bf16.gmra.mrb[100].mxu0 %vm2190_vm0, %v13101_v59 }
  0xd9   :  { %12018 = vmatprep.mubr.msk.bf16.mxu0 %vm2190_vm0, %v13102_v60 }
  0xe0   :  { %12019 = vmatmul.mubr.msk.bf16.gmra.mrb[104].mxu0 %vm2190_vm0, %v13103_v63 }
  0xe1   :  { %12022 = vmatprep.mubr.msk.bf16.mxu0 %vm2190_vm0, %v13104_v0 }
  0xe3   :  { %v11916_v4 = vpop.f32.mrb[0].mxu0 }
  0xe4   :  { %v3089_v5 = vpop.f32.mrb[1].mxu0  ;;  %v3098_v7 = vadd.f32 %v11916_v4, %v13714_v3 }
  0xe5   :  { %v3090_v8 = vadd.f32 %v13714_v3, %v3089_v5  ;;  %v11917_v9 = vpop.f32.mrb[2].mxu0 }
  0xe6   :  { %v3101_v12 = vadd.f32 %v11917_v9, %v13714_v3  ;;  %v3092_v13 = vpop.f32.mrb[3].mxu0  ;;  %v5394_v17 = vmax.f32 %v3098_v7, 0.0 }
  0xe7   :  { %v5392_v15 = vmax.f32 %v3090_v8, 0.0  ;;  %v3093_v16 = vadd.f32 %v13714_v3, %v3092_v13 }
  0xe8   :  { %12023 = vmatmul.mubr.msk.bf16.gmra.mrb[108].mxu0 %vm2190_vm0, %v13105_v6  ;;  %v5395_v20 = vmax.f32 %v3101_v12, 0.0  ;;  %v5972_v26 = vsel %vm5968_vm1, %v5394_v17, 0.0 }
  0xe9   :  { %v5393_v18 = vmax.f32 %v3093_v16, 0.0  ;;  %12026 = vmatprep.mubr.msk.bf16.mxu0 %vm2190_vm0, %v13106_v10  ;;  %v5969_v19 = vsel %vm5968_vm1, %v5392_v15, 0.0  ;;  %v13111_v10 = vld [vmem:[%s13578_s9 + $0x1e8] sm:$0xff]   ;;  %v13112_v15 = vld [vmem:[%s13578_s9 + $0x1f0] sm:$0xff]  }
  0xea   :  { %v5974_v35 = vsel %vm5968_vm1, %v5395_v20, 0.0  ;;  %v13159_v16 = vld [vmem:[%s13578_s9 + $0x670] sm:$0xff]  }
  0xeb   :  { %v5970_v21 = vsel %vm5968_vm1, %v5393_v18, 0.0  ;;  %v11920_v22 = vpop.f32.mrb[4].mxu0  ;;  %12326 = vmatprep.mubr.msk.bf16.mxu1 %vm2190_vm0, %v13159_v16 }
  0xec   :  { %v5971_v23 = vadd.f32 %v5970_v21, %v5969_v19  ;;  %v3105_v24 = vpop.f32.mrb[5].mxu0  ;;  %v3114_v27 = vadd.f32 %v11920_v22, %v13714_v3  ;;  %v13161_v19 = vld [vmem:[%s13578_s9 + $0x678] sm:$0xff]  }
  0xed   :  { %v3106_v28 = vadd.f32 %v13714_v3, %v3105_v24  ;;  %v11921_v29 = vpop.f32.mrb[6].mxu0  ;;  %12327 = vmatmul.mubr.msk.bf16.gmra.mrb[32].mxu1 %vm2190_vm0, %v13161_v19  ;;  %v13117_v19 = vld [vmem:[%s13578_s9 + $0x218] sm:$0xff]  }
  0xee   :  { %v5973_v32 = vadd.f32 %v5972_v26, %v5971_v23  ;;  %v3108_v33 = vpop.f32.mrb[7].mxu0  ;;  %v3117_v37 = vadd.f32 %v11921_v29, %v13714_v3  ;;  %v5398_v40 = vmax.f32 %v3114_v27, 0.0 }
  0xef   :  { %v5396_v36 = vmax.f32 %v3106_v28, 0.0  ;;  %v3109_v38 = vadd.f32 %v13714_v3, %v3108_v33 }
  0xf0   :  { %v5975_v39 = vadd.f32 %v5974_v35, %v5973_v32  ;;  %12027 = vmatmul.mubr.msk.bf16.gmra.mrb[112].mxu0 %vm2190_vm0, %v13107_v25  ;;  %v5399_v44 = vmax.f32 %v3117_v37, 0.0  ;;  %v5980_v50 = vsel %vm5968_vm1, %v5398_v40, 0.0  ;;  %v13163_v40 = vld [vmem:[%s13578_s9 + $0x680] sm:$0xff]  }
  0xf1   :  { %v5976_v41 = vsel %vm5968_vm1, %v5396_v36, 0.0  ;;  %v5397_v42 = vmax.f32 %v3109_v38, 0.0  ;;  %12030 = vmatprep.mubr.msk.bf16.mxu0 %vm2190_vm0, %v13108_v30  ;;  %12330 = vmatprep.mubr.msk.bf16.mxu1 %vm2190_vm0, %v13163_v40 }
  0xf2   :  { %v5977_v43 = vadd.f32 %v5976_v41, %v5975_v39  ;;  %v5982_v59 = vsel %vm5968_vm1, %v5399_v44, 0.0  ;;  %v13114_v39 = vld [vmem:[%s13578_s9 + $0x200] sm:$0xff]  }
  0xf3   :  { %v5978_v45 = vsel %vm5968_vm1, %v5397_v42, 0.0  ;;  %v11924_v46 = vpop.f32.mrb[8].mxu0 }
  0xf4   :  { %v5979_v47 = vadd.f32 %v5978_v45, %v5977_v43  ;;  %v3121_v48 = vpop.f32.mrb[9].mxu0  ;;  %v3130_v51 = vadd.f32 %v11924_v46, %v13714_v3  ;;  %v13165_v43 = vld [vmem:[%s13578_s9 + $0x688] sm:$0xff]  }
  0xf5   :  { %v3122_v52 = vadd.f32 %v13714_v3, %v3121_v48  ;;  %v11925_v53 = vpop.f32.mrb[10].mxu0  ;;  %12331 = vmatmul.mubr.msk.bf16.gmra.mrb[36].mxu1 %vm2190_vm0, %v13165_v43  ;;  %v13119_v43 = vld [vmem:[%s13578_s9 + $0x228] sm:$0xff]  }
  0xf6   :  { %v5981_v56 = vadd.f32 %v5980_v50, %v5979_v47  ;;  %v3124_v57 = vpop.f32.mrb[11].mxu0  ;;  %v3133_v61 = vadd.f32 %v11925_v53, %v13714_v3  ;;  %v5402_v0 = vmax.f32 %v3130_v51, 0.0 }
  0xf7   :  { %v5400_v60 = vmax.f32 %v3122_v52, 0.0  ;;  %v3125_v62 = vadd.f32 %v13714_v3, %v3124_v57 }
  0xf8   :  { %v5983_v63 = vadd.f32 %v5982_v59, %v5981_v56  ;;  %12031 = vmatmul.mubr.msk.bf16.gmra.mrb[116].mxu0 %vm2190_vm0, %v13109_v49  ;;  %v5403_v5 = vmax.f32 %v3133_v61, 0.0  ;;  %v5988_v11 = vsel %vm5968_vm1, %v5402_v0, 0.0  ;;  %v13167_v0 = vld [vmem:[%s13578_s9 + $0x690] sm:$0xff]  }
  0xf9   :  { %v5984_v1 = vsel %vm5968_vm1, %v5400_v60, 0.0  ;;  %v5401_v2 = vmax.f32 %v3125_v62, 0.0  ;;  %12034 = vmatprep.mubr.msk.bf16.mxu0 %vm2190_vm0, %v13110_v54  ;;  %12334 = vmatprep.mubr.msk.bf16.mxu1 %vm2190_vm0, %v13167_v0 }
  0xfa   :  { %v5985_v4 = vadd.f32 %v5984_v1, %v5983_v63  ;;  %v5990_v20 = vsel %vm5968_vm1, %v5403_v5, 0.0  ;;  %v13116_v63 = vld [vmem:[%s13578_s9 + $0x210] sm:$0xff]  }
  0xfb   :  { %v5986_v6 = vsel %vm5968_vm1, %v5401_v2, 0.0  ;;  %v11928_v7 = vpop.f32.mrb[12].mxu0 }
  0xfc   :  { %v5987_v8 = vadd.f32 %v5986_v6, %v5985_v4  ;;  %v3137_v9 = vpop.f32.mrb[13].mxu0  ;;  %v3146_v12 = vadd.f32 %v11928_v7, %v13714_v3  ;;  %v13169_v4 = vld [vmem:[%s13578_s9 + $0x698] sm:$0xff]  }
  0xfd   :  { %v3138_v13 = vadd.f32 %v13714_v3, %v3137_v9  ;;  %v11929_v14 = vpop.f32.mrb[14].mxu0  ;;  %12335 = vmatmul.mubr.msk.bf16.gmra.mrb[40].mxu1 %vm2190_vm0, %v13169_v4  ;;  %v13121_v4 = vld [vmem:[%s13578_s9 + $0x238] sm:$0xff]  }
  0xfe   :  { %v5989_v17 = vadd.f32 %v5988_v11, %v5987_v8  ;;  %v3140_v18 = vpop.f32.mrb[15].mxu0  ;;  %v3149_v22 = vadd.f32 %v11929_v14, %v13714_v3  ;;  %v5406_v25 = vmax.f32 %v3146_v12, 0.0 }
  0xff   :  { %v5404_v21 = vmax.f32 %v3138_v13, 0.0  ;;  %v3141_v23 = vadd.f32 %v13714_v3, %v3140_v18 }
 0x100   :  { %v5991_v24 = vadd.f32 %v5990_v20, %v5989_v17  ;;  %12035 = vmatmul.mubr.msk.bf16.gmra.mrb[120].mxu0 %vm2190_vm0, %v13111_v10  ;;  %v5407_v29 = vmax.f32 %v3149_v22, 0.0  ;;  %v5996_v35 = vsel %vm5968_vm1, %v5406_v25, 0.0  ;;  %v13171_v25 = vld [vmem:[%s13578_s9 + $0x6a0] sm:$0xff]  }
 0x101   :  { %v5992_v26 = vsel %vm5968_vm1, %v5404_v21, 0.0  ;;  %v5405_v27 = vmax.f32 %v3141_v23, 0.0  ;;  %12038 = vmatprep.mubr.msk.bf16.mxu0 %vm2190_vm0, %v13112_v15  ;;  %12338 = vmatprep.mubr.msk.bf16.mxu1 %vm2190_vm0, %v13171_v25 }
 0x102   :  { %v5993_v28 = vadd.f32 %v5992_v26, %v5991_v24  ;;  %v5998_v44 = vsel %vm5968_vm1, %v5407_v29, 0.0  ;;  %v13118_v24 = vld [vmem:[%s13578_s9 + $0x220] sm:$0xff]  }
 0x103   :  { %v5994_v30 = vsel %vm5968_vm1, %v5405_v27, 0.0  ;;  %v11932_v31 = vpop.f32.mrb[16].mxu0 }
 0x104   :  { %v5995_v32 = vadd.f32 %v5994_v30, %v5993_v28  ;;  %v3153_v33 = vpop.f32.mrb[17].mxu0  ;;  %v3162_v36 = vadd.f32 %v11932_v31, %v13714_v3  ;;  %v13173_v28 = vld [vmem:[%s13578_s9 + $0x6a8] sm:$0xff]  }
 0x105   :  { %v3154_v37 = vadd.f32 %v13714_v3, %v3153_v33  ;;  %v11933_v38 = vpop.f32.mrb[18].mxu0  ;;  %12339 = vmatmul.mubr.msk.bf16.gmra.mrb[44].mxu1 %vm2190_vm0, %v13173_v28 }
 0x106   :  { %v5997_v41 = vadd.f32 %v5996_v35, %v5995_v32  ;;  %v3156_v42 = vpop.f32.mrb[19].mxu0  ;;  %v3165_v46 = vadd.f32 %v11933_v38, %v13714_v3  ;;  %v5410_v49 = vmax.f32 %v3162_v36, 0.0 }
 0x107   :  { %v5408_v45 = vmax.f32 %v3154_v37, 0.0  ;;  %v3157_v47 = vadd.f32 %v13714_v3, %v3156_v42 }
 0x108   :  { %v5999_v48 = vadd.f32 %v5998_v44, %v5997_v41  ;;  %12039 = vmatmul.mubr.msk.bf16.gmra.mrb[124].mxu0 %vm2190_vm0, %v13113_v34  ;;  %v5411_v53 = vmax.f32 %v3165_v46, 0.0  ;;  %v6004_v59 = vsel %vm5968_vm1, %v5410_v49, 0.0  ;;  %v13175_v49 = vld [vmem:[%s13578_s9 + $0x6b0] sm:$0xff]  }
 0x109   :  { %v6000_v50 = vsel %vm5968_vm1, %v5408_v45, 0.0  ;;  %v5409_v51 = vmax.f32 %v3157_v47, 0.0  ;;  %12042 = vmatprep.mubr.msk.bf16.mxu0 %vm2190_vm0, %v13114_v39  ;;  %12342 = vmatprep.mubr.msk.bf16.mxu1 %vm2190_vm0, %v13175_v49 }
 0x10a   :  { %v6001_v52 = vadd.f32 %v6000_v50, %v5999_v48  ;;  %v6006_v5 = vsel %vm5968_vm1, %v5411_v53, 0.0  ;;  %v13120_v48 = vld [vmem:[%s13578_s9 + $0x230] sm:$0xff]  }
 0x10b   :  { %v6002_v54 = vsel %vm5968_vm1, %v5409_v51, 0.0  ;;  %v11936_v55 = vpop.f32.mrb[20].mxu0 }
 0x10c   :  { %v6003_v56 = vadd.f32 %v6002_v54, %v6001_v52  ;;  %v3169_v57 = vpop.f32.mrb[21].mxu0  ;;  %v3178_v60 = vadd.f32 %v11936_v55, %v13714_v3  ;;  %v13177_v52 = vld [vmem:[%s13578_s9 + $0x6b8] sm:$0xff]  }
 0x10d   :  { %v3170_v61 = vadd.f32 %v13714_v3, %v3169_v57  ;;  %v11937_v62 = vpop.f32.mrb[22].mxu0  ;;  %12343 = vmatmul.mubr.msk.bf16.gmra.mrb[48].mxu1 %vm2190_vm0, %v13177_v52 }
 0x10e   :  { %v6005_v1 = vadd.f32 %v6004_v59, %v6003_v56  ;;  %v3172_v2 = vpop.f32.mrb[23].mxu0  ;;  %v3181_v7 = vadd.f32 %v11937_v62, %v13714_v3  ;;  %v5414_v10 = vmax.f32 %v3178_v60, 0.0 }
 0x10f   :  { %v5412_v6 = vmax.f32 %v3170_v61, 0.0  ;;  %v3173_v8 = vadd.f32 %v13714_v3, %v3172_v2 }
 0x110   :  { %v6007_v9 = vadd.f32 %v6006_v5, %v6005_v1  ;;  %12043 = vmatmul.mubr.msk.bf16.gmra.mrb[128].mxu0 %vm2190_vm0, %v13115_v58  ;;  %v5415_v14 = vmax.f32 %v3181_v7, 0.0  ;;  %v6012_v20 = vsel %vm5968_vm1, %v5414_v10, 0.0  ;;  %v13179_v10 = vld [vmem:[%s13578_s9 + $0x6c0] sm:$0xff]  }
 0x111   :  { %v6008_v11 = vsel %vm5968_vm1, %v5412_v6, 0.0  ;;  %v5413_v12 = vmax.f32 %v3173_v8, 0.0  ;;  %12046 = vmatprep.mubr.msk.bf16.mxu0 %vm2190_vm0, %v13116_v63  ;;  %12346 = vmatprep.mubr.msk.bf16.mxu1 %vm2190_vm0, %v13179_v10 }
 0x112   :  { %v6009_v13 = vadd.f32 %v6008_v11, %v6007_v9  ;;  %v6014_v29 = vsel %vm5968_vm1, %v5415_v14, 0.0  ;;  %v13122_v9 = vld [vmem:[%s13578_s9 + $0x240] sm:$0xff]  }
 0x113   :  { %v6010_v15 = vsel %vm5968_vm1, %v5413_v12, 0.0  ;;  %v11940_v16 = vpop.f32.mrb[24].mxu0 }
 0x114   :  { %v6011_v17 = vadd.f32 %v6010_v15, %v6009_v13  ;;  %v3185_v18 = vpop.f32.mrb[25].mxu0  ;;  %v3194_v21 = vadd.f32 %v11940_v16, %v13714_v3  ;;  %v13181_v13 = vld [vmem:[%s13578_s9 + $0x6c8] sm:$0xff]  }
 0x115   :  { %v3186_v22 = vadd.f32 %v13714_v3, %v3185_v18  ;;  %v11941_v23 = vpop.f32.mrb[26].mxu0  ;;  %12347 = vmatmul.mubr.msk.bf16.gmra.mrb[52].mxu1 %vm2190_vm0, %v13181_v13 }
 0x116   :  { %v6013_v26 = vadd.f32 %v6012_v20, %v6011_v17  ;;  %v3188_v27 = vpop.f32.mrb[27].mxu0  ;;  %v3197_v31 = vadd.f32 %v11941_v23, %v13714_v3  ;;  %v5418_v34 = vmax.f32 %v3194_v21, 0.0 }
 0x117   :  { %v5416_v30 = vmax.f32 %v3186_v22, 0.0  ;;  %v3189_v32 = vadd.f32 %v13714_v3, %v3188_v27  ;;  %v13123_v27 = vld [vmem:[%s13578_s9 + $0x248] sm:$0xff]  }
 0x118   :  { %v6015_v33 = vadd.f32 %v6014_v29, %v6013_v26  ;;  %12047 = vmatmul.mubr.msk.bf16.gmra.mrb[132].mxu0 %vm2190_vm0, %v13117_v19  ;;  %v5419_v38 = vmax.f32 %v3197_v31, 0.0  ;;  %v6020_v44 = vsel %vm5968_vm1, %v5418_v34, 0.0 }
 0x119   :  { %v6016_v35 = vsel %vm5968_vm1, %v5416_v30, 0.0  ;;  %v5417_v36 = vmax.f32 %v3189_v32, 0.0  ;;  %12050 = vmatprep.mubr.msk.bf16.mxu0 %vm2190_vm0, %v13118_v24  ;;  %v13124_v32 = vld [vmem:[%s13578_s9 + $0x250] sm:$0xff]  }
 0x11a   :  { %v6017_v37 = vadd.f32 %v6016_v35, %v6015_v33  ;;  %v6022_v53 = vsel %vm5968_vm1, %v5419_v38, 0.0  ;;  %v13183_v33 = vld [vmem:[%s13578_s9 + $0x6d0] sm:$0xff]  }
 0x11b   :  { %v6018_v39 = vsel %vm5968_vm1, %v5417_v36, 0.0  ;;  %v11944_v40 = vpop.f32.mrb[28].mxu0  ;;  %v13185_v36 = vld [vmem:[%s13578_s9 + $0x6d8] sm:$0xff]   ;;  %12350 = vmatprep.mubr.msk.bf16.mxu1 %vm2190_vm0, %v13183_v33 }
 0x11c   :  { %v6019_v41 = vadd.f32 %v6018_v39, %v6017_v37  ;;  %v3201_v42 = vpop.f32.mrb[29].mxu0  ;;  %v3210_v45 = vadd.f32 %v11944_v40, %v13714_v3 }
 0x11d   :  { %v3202_v46 = vadd.f32 %v13714_v3, %v3201_v42  ;;  %v11945_v47 = vpop.f32.mrb[30].mxu0  ;;  %12351 = vmatmul.mubr.msk.bf16.gmra.mrb[56].mxu1 %vm2190_vm0, %v13185_v36 }
 0x11e   :  { %v6021_v50 = vadd.f32 %v6020_v44, %v6019_v41  ;;  %v3204_v51 = vpop.f32.mrb[31].mxu0  ;;  %v3213_v55 = vadd.f32 %v11945_v47, %v13714_v3  ;;  %v5422_v58 = vmax.f32 %v3210_v45, 0.0 }
 0x11f   :  { %v5420_v54 = vmax.f32 %v3202_v46, 0.0  ;;  %v3205_v56 = vadd.f32 %v13714_v3, %v3204_v51  ;;  %v13125_v51 = vld [vmem:[%s13578_s9 + $0x258] sm:$0xff]  }
 0x120   :  { %v6023_v57 = vadd.f32 %v6022_v53, %v6021_v50  ;;  %12051 = vmatmul.mubr.msk.bf16.gmra.mrb[136].mxu0 %vm2190_vm0, %v13119_v43  ;;  %v5423_v62 = vmax.f32 %v3213_v55, 0.0  ;;  %v6028_v5 = vsel %vm5968_vm1, %v5422_v58, 0.0 }
 0x121   :  { %v6024_v59 = vsel %vm5968_vm1, %v5420_v54, 0.0  ;;  %v5421_v60 = vmax.f32 %v3205_v56, 0.0  ;;  %12054 = vmatprep.mubr.msk.bf16.mxu0 %vm2190_vm0, %v13120_v48  ;;  %v13126_v56 = vld [vmem:[%s13578_s9 + $0x260] sm:$0xff]  }
 0x122   :  { %v6025_v61 = vadd.f32 %v6024_v59, %v6023_v57  ;;  %v6030_v14 = vsel %vm5968_vm1, %v5423_v62, 0.0  ;;  %v13187_v57 = vld [vmem:[%s13578_s9 + $0x6e0] sm:$0xff]  }
 0x123   :  { %v6026_v63 = vsel %vm5968_vm1, %v5421_v60, 0.0  ;;  %v11948_v0 = vpop.f32.mrb[32].mxu0  ;;  %v13189_v60 = vld [vmem:[%s13578_s9 + $0x6e8] sm:$0xff]   ;;  %12354 = vmatprep.mubr.msk.bf16.mxu1 %vm2190_vm0, %v13187_v57 }
 0x124   :  { %v6027_v1 = vadd.f32 %v6026_v63, %v6025_v61  ;;  %v3217_v2 = vpop.f32.mrb[33].mxu0  ;;  %v3226_v6 = vadd.f32 %v11948_v0, %v13714_v3 }
 0x125   :  { %v3218_v7 = vadd.f32 %v13714_v3, %v3217_v2  ;;  %v11949_v8 = vpop.f32.mrb[34].mxu0  ;;  %12355 = vmatmul.mubr.msk.bf16.gmra.mrb[60].mxu1 %vm2190_vm0, %v13189_v60 }
 0x126   :  { %v6029_v11 = vadd.f32 %v6028_v5, %v6027_v1  ;;  %v3220_v12 = vpop.f32.mrb[35].mxu0  ;;  %v3229_v16 = vadd.f32 %v11949_v8, %v13714_v3  ;;  %v5426_v19 = vmax.f32 %v3226_v6, 0.0 }
 0x127   :  { %v5424_v15 = vmax.f32 %v3218_v7, 0.0  ;;  %v3221_v17 = vadd.f32 %v13714_v3, %v3220_v12  ;;  %v13128_v12 = vld [vmem:[%s13578_s9 + $0x268] sm:$0xff]  }
 0x128   :  { %v13855_v18 = vadd.f32 %v6030_v14, %v6029_v11  ;;  %12055 = vmatmul.mubr.msk.bf16.gmra.mrb[140].mxu0 %vm2190_vm0, %v13121_v4  ;;  %v5427_v22 = vmax.f32 %v3229_v16, 0.0  ;;  %v6041_v28 = vsel %vm5968_vm1, %v5426_v19, 0.0  ;;  %v13191_v19 = vld [vmem:[%s13578_s9 + $0x6f0] sm:$0xff]  }
 0x129   :  { %v5425_v20 = vmax.f32 %v3221_v17, 0.0  ;;  %12058 = vmatprep.mubr.msk.bf16.mxu0 %vm2190_vm0, %v13122_v9  ;;  %v6038_v21 = vsel %vm5968_vm1, %v5424_v15, 0.0  ;;  %v13130_v17 = vld [vmem:[%s13578_s9 + $0x270] sm:$0xff]   ;;  %12358 = vmatprep.mubr.msk.bf16.mxu1 %vm2190_vm0, %v13191_v19 }
 0x12a   :  { %v6043_v37 = vsel %vm5968_vm1, %v5427_v22, 0.0  ;;  %v13193_v22 = vld [vmem:[%s13578_s9 + $0x6f8] sm:$0xff]  }
 0x12b   :  { %v6039_v23 = vsel %vm5968_vm1, %v5425_v20, 0.0  ;;  %v11952_v24 = vpop.f32.mrb[36].mxu0 }
 0x12c   :  { %v6040_v25 = vadd.f32 %v6039_v23, %v6038_v21  ;;  %v3233_v26 = vpop.f32.mrb[37].mxu0  ;;  %v3242_v29 = vadd.f32 %v11952_v24, %v13714_v3 }
 0x12d   :  { %v3234_v30 = vadd.f32 %v13714_v3, %v3233_v26  ;;  %v11953_v31 = vpop.f32.mrb[38].mxu0  ;;  %12359 = vmatmul.mubr.msk.bf16.gmra.mrb[64].mxu1 %vm2190_vm0, %v13193_v22 }
 0x12e   :  { %v6042_v34 = vadd.f32 %v6041_v28, %v6040_v25  ;;  %v3236_v35 = vpop.f32.mrb[39].mxu0  ;;  %v3245_v39 = vadd.f32 %v11953_v31, %v13714_v3  ;;  %v5430_v42 = vmax.f32 %v3242_v29, 0.0 }
 0x12f   :  { %v5428_v38 = vmax.f32 %v3234_v30, 0.0  ;;  %v3237_v40 = vadd.f32 %v13714_v3, %v3236_v35 }
 0x130   :  { %v6044_v41 = vadd.f32 %v6043_v37, %v6042_v34  ;;  %12059 = vmatmul.mubr.msk.bf16.gmra.mrb[144].mxu0 %vm2190_vm0, %v13123_v27  ;;  %v5431_v46 = vmax.f32 %v3245_v39, 0.0  ;;  %v6049_v52 = vsel %vm5968_vm1, %v5430_v42, 0.0  ;;  %v13132_v37 = vld [vmem:[%s13578_s9 + $0x278] sm:$0xff]   ;;  %v13134_v42 = vld [vmem:[%s13578_s9 + $0x280] sm:$0xff]  }
 0x131   :  { %v6045_v43 = vsel %vm5968_vm1, %v5428_v38, 0.0  ;;  %v5429_v44 = vmax.f32 %v3237_v40, 0.0  ;;  %12062 = vmatprep.mubr.msk.bf16.mxu0 %vm2190_vm0, %v13124_v32 }
 0x132   :  { %v6046_v45 = vadd.f32 %v6045_v43, %v6044_v41  ;;  %v6051_v61 = vsel %vm5968_vm1, %v5431_v46, 0.0  ;;  %v13195_v43 = vld [vmem:[%s13578_s9 + $0x700] sm:$0xff]   ;;  %v13197_v46 = vld [vmem:[%s13578_s9 + $0x708] sm:$0xff]  }
 0x133   :  { %v6047_v47 = vsel %vm5968_vm1, %v5429_v44, 0.0  ;;  %v11956_v48 = vpop.f32.mrb[40].mxu0  ;;  %12362 = vmatprep.mubr.msk.bf16.mxu1 %vm2190_vm0, %v13195_v43 }
 0x134   :  { %v6048_v49 = vadd.f32 %v6047_v47, %v6046_v45  ;;  %v3249_v50 = vpop.f32.mrb[41].mxu0  ;;  %v3258_v53 = vadd.f32 %v11956_v48, %v13714_v3 }
 0x135   :  { %v3250_v54 = vadd.f32 %v13714_v3, %v3249_v50  ;;  %v11957_v55 = vpop.f32.mrb[42].mxu0  ;;  %12363 = vmatmul.mubr.msk.bf16.gmra.mrb[68].mxu1 %vm2190_vm0, %v13197_v46 }
 0x136   :  { %v6050_v58 = vadd.f32 %v6049_v52, %v6048_v49  ;;  %v3252_v59 = vpop.f32.mrb[43].mxu0  ;;  %v3261_v63 = vadd.f32 %v11957_v55, %v13714_v3  ;;  %v5434_v2 = vmax.f32 %v3258_v53, 0.0 }
 0x137   :  { %v5432_v62 = vmax.f32 %v3250_v54, 0.0  ;;  %v3253_v0 = vadd.f32 %v13714_v3, %v3252_v59 }
 0x138   :  { %v6052_v1 = vadd.f32 %v6051_v61, %v6050_v58  ;;  %12063 = vmatmul.mubr.msk.bf16.gmra.mrb[148].mxu0 %vm2190_vm0, %v13125_v51  ;;  %v5435_v7 = vmax.f32 %v3261_v63, 0.0  ;;  %v6057_v13 = vsel %vm5968_vm1, %v5434_v2, 0.0  ;;  %v13136_v61 = vld [vmem:[%s13578_s9 + $0x288] sm:$0xff]   ;;  %v13138_v2 = vld [vmem:[%s13578_s9 + $0x290] sm:$0xff]  }
 0x139   :  { %v6053_v4 = vsel %vm5968_vm1, %v5432_v62, 0.0  ;;  %v5433_v5 = vmax.f32 %v3253_v0, 0.0  ;;  %12066 = vmatprep.mubr.msk.bf16.mxu0 %vm2190_vm0, %v13126_v56 }
 0x13a   :  { %v6054_v6 = vadd.f32 %v6053_v4, %v6052_v1  ;;  %v6059_v23 = vsel %vm5968_vm1, %v5435_v7, 0.0  ;;  %v13199_v4 = vld [vmem:[%s13578_s9 + $0x710] sm:$0xff]   ;;  %v13201_v7 = vld [vmem:[%s13578_s9 + $0x718] sm:$0xff]  }
 0x13b   :  { %v6055_v8 = vsel %vm5968_vm1, %v5433_v5, 0.0  ;;  %v11960_v9 = vpop.f32.mrb[44].mxu0  ;;  %12366 = vmatprep.mubr.msk.bf16.mxu1 %vm2190_vm0, %v13199_v4 }
 0x13c   :  { %v6056_v10 = vadd.f32 %v6055_v8, %v6054_v6  ;;  %v3265_v11 = vpop.f32.mrb[45].mxu0  ;;  %v3274_v14 = vadd.f32 %v11960_v9, %v13714_v3 }
 0x13d   :  { %v3266_v15 = vadd.f32 %v13714_v3, %v3265_v11  ;;  %v11961_v16 = vpop.f32.mrb[46].mxu0  ;;  %12367 = vmatmul.mubr.msk.bf16.gmra.mrb[72].mxu1 %vm2190_vm0, %v13201_v7 }
 0x13e   :  { %v6058_v20 = vadd.f32 %v6057_v13, %v6056_v10  ;;  %v3268_v21 = vpop.f32.mrb[47].mxu0  ;;  %v3277_v25 = vadd.f32 %v11961_v16, %v13714_v3  ;;  %v5438_v28 = vmax.f32 %v3274_v14, 0.0 }
 0x13f   :  { %v5436_v24 = vmax.f32 %v3266_v15, 0.0  ;;  %v3269_v26 = vadd.f32 %v13714_v3, %v3268_v21 }
 0x140   :  { %v6060_v27 = vadd.f32 %v6059_v23, %v6058_v20  ;;  %12067 = vmatmul.mubr.msk.bf16.gmra.mrb[152].mxu0 %vm2190_vm0, %v13128_v12  ;;  %v5439_v32 = vmax.f32 %v3277_v25, 0.0  ;;  %v6065_v38 = vsel %vm5968_vm1, %v5438_v28, 0.0  ;;  %v13140_v23 = vld [vmem:[%s13578_s9 + $0x298] sm:$0xff]   ;;  %v13142_v28 = vld [vmem:[%s13578_s9 + $0x2a0] sm:$0xff]  }
 0x141   :  { %v6061_v29 = vsel %vm5968_vm1, %v5436_v24, 0.0  ;;  %v5437_v30 = vmax.f32 %v3269_v26, 0.0  ;;  %12070 = vmatprep.mubr.msk.bf16.mxu0 %vm2190_vm0, %v13130_v17 }
 0x142   :  { %v6062_v31 = vadd.f32 %v6061_v29, %v6060_v27  ;;  %v6067_v47 = vsel %vm5968_vm1, %v5439_v32, 0.0  ;;  %v13203_v29 = vld [vmem:[%s13578_s9 + $0x720] sm:$0xff]   ;;  %v13205_v32 = vld [vmem:[%s13578_s9 + $0x728] sm:$0xff]  }
 0x143   :  { %v6063_v33 = vsel %vm5968_vm1, %v5437_v30, 0.0  ;;  %v11964_v34 = vpop.f32.mrb[48].mxu0  ;;  %12370 = vmatprep.mubr.msk.bf16.mxu1 %vm2190_vm0, %v13203_v29 }
 0x144   :  { %v6064_v35 = vadd.f32 %v6063_v33, %v6062_v31  ;;  %v3281_v36 = vpop.f32.mrb[49].mxu0  ;;  %v3290_v39 = vadd.f32 %v11964_v34, %v13714_v3 }
 0x145   :  { %v3282_v40 = vadd.f32 %v13714_v3, %v3281_v36  ;;  %v11965_v41 = vpop.f32.mrb[50].mxu0  ;;  %12371 = vmatmul.mubr.msk.bf16.gmra.mrb[76].mxu1 %vm2190_vm0, %v13205_v32  ;;  %v13152_v32 = vld [vmem:[%s13578_s9 + $0x2c8] sm:$0xff]  }
 0x146   :  { %v6066_v44 = vadd.f32 %v6065_v38, %v6064_v35  ;;  %v3284_v45 = vpop.f32.mrb[51].mxu0  ;;  %v3293_v49 = vadd.f32 %v11965_v41, %v13714_v3  ;;  %v5442_v52 = vmax.f32 %v3290_v39, 0.0 }
 0x147   :  { %v5440_v48 = vmax.f32 %v3282_v40, 0.0  ;;  %v3285_v50 = vadd.f32 %v13714_v3, %v3284_v45 }
 0x148   :  { %v6068_v51 = vadd.f32 %v6067_v47, %v6066_v44  ;;  %12071 = vmatmul.mubr.msk.bf16.gmra.mrb[156].mxu0 %vm2190_vm0, %v13132_v37  ;;  %v5443_v56 = vmax.f32 %v3293_v49, 0.0  ;;  %v6073_v62 = vsel %vm5968_vm1, %v5442_v52, 0.0  ;;  %v13144_v47 = vld [vmem:[%s13578_s9 + $0x2a8] sm:$0xff]   ;;  %v13146_v52 = vld [vmem:[%s13578_s9 + $0x2b0] sm:$0xff]  }
 0x149   :  { %v6069_v53 = vsel %vm5968_vm1, %v5440_v48, 0.0  ;;  %v5441_v54 = vmax.f32 %v3285_v50, 0.0  ;;  %12074 = vmatprep.mubr.msk.bf16.mxu0 %vm2190_vm0, %v13134_v42 }
 0x14a   :  { %v6070_v55 = vadd.f32 %v6069_v53, %v6068_v51  ;;  %v6075_v8 = vsel %vm5968_vm1, %v5443_v56, 0.0  ;;  %v13207_v53 = vld [vmem:[%s13578_s9 + $0x730] sm:$0xff]   ;;  %v13209_v56 = vld [vmem:[%s13578_s9 + $0x738] sm:$0xff]  }
 0x14b   :  { %v6071_v57 = vsel %vm5968_vm1, %v5441_v54, 0.0  ;;  %v11968_v58 = vpop.f32.mrb[52].mxu0  ;;  %12374 = vmatprep.mubr.msk.bf16.mxu1 %vm2190_vm0, %v13207_v53 }
 0x14c   :  { %v6072_v59 = vadd.f32 %v6071_v57, %v6070_v55  ;;  %v3297_v60 = vpop.f32.mrb[53].mxu0  ;;  %v3306_v63 = vadd.f32 %v11968_v58, %v13714_v3 }
 0x14d   :  { %v3298_v0 = vadd.f32 %v13714_v3, %v3297_v60  ;;  %v11969_v1 = vpop.f32.mrb[54].mxu0  ;;  %12375 = vmatmul.mubr.msk.bf16.gmra.mrb[80].mxu1 %vm2190_vm0, %v13209_v56  ;;  %v13156_v56 = vld [vmem:[%s13578_s9 + $0x2d8] sm:$0xff]  }
 0x14e   :  { %v6074_v5 = vadd.f32 %v6073_v62, %v6072_v59  ;;  %v3300_v6 = vpop.f32.mrb[55].mxu0  ;;  %v3309_v10 = vadd.f32 %v11969_v1, %v13714_v3  ;;  %v5446_v13 = vmax.f32 %v3306_v63, 0.0 }
 0x14f   :  { %v5444_v9 = vmax.f32 %v3298_v0, 0.0  ;;  %v3301_v11 = vadd.f32 %v13714_v3, %v3300_v6 }
 0x150   :  { %v6076_v12 = vadd.f32 %v6075_v8, %v6074_v5  ;;  %12075 = vmatmul.mubr.msk.bf16.gmra.mrb[160].mxu0 %vm2190_vm0, %v13136_v61  ;;  %v5447_v17 = vmax.f32 %v3309_v10, 0.0  ;;  %v6081_v24 = vsel %vm5968_vm1, %v5446_v13, 0.0  ;;  %v13148_v8 = vld [vmem:[%s13578_s9 + $0x2b8] sm:$0xff]   ;;  %v13150_v13 = vld [vmem:[%s13578_s9 + $0x2c0] sm:$0xff]  }
 0x151   :  { %v6077_v14 = vsel %vm5968_vm1, %v5444_v9, 0.0  ;;  %v5445_v15 = vmax.f32 %v3301_v11, 0.0  ;;  %12078 = vmatprep.mubr.msk.bf16.mxu0 %vm2190_vm0, %v13138_v2 }
 0x152   :  { %v6078_v16 = vadd.f32 %v6077_v14, %v6076_v12  ;;  %v6083_v33 = vsel %vm5968_vm1, %v5447_v17, 0.0  ;;  %v13211_v14 = vld [vmem:[%s13578_s9 + $0x740] sm:$0xff]   ;;  %v13213_v17 = vld [vmem:[%s13578_s9 + $0x748] sm:$0xff]  }
 0x153   :  { %v6079_v19 = vsel %vm5968_vm1, %v5445_v15, 0.0  ;;  %v11972_v20 = vpop.f32.mrb[56].mxu0  ;;  %12378 = vmatprep.mubr.msk.bf16.mxu1 %vm2190_vm0, %v13211_v14 }
 0x154   :  { %v6080_v21 = vadd.f32 %v6079_v19, %v6078_v16  ;;  %v3313_v22 = vpop.f32.mrb[57].mxu0  ;;  %v3322_v25 = vadd.f32 %v11972_v20, %v13714_v3 }
 0x155   :  { %v3314_v26 = vadd.f32 %v13714_v3, %v3313_v22  ;;  %v11973_v27 = vpop.f32.mrb[58].mxu0  ;;  %12379 = vmatmul.mubr.msk.bf16.gmra.mrb[84].mxu1 %vm2190_vm0, %v13213_v17  ;;  %v13160_v17 = vld [vmem:[%s13578_s9 + $0x2e8] sm:$0xff]  }
 0x156   :  { %v6082_v30 = vadd.f32 %v6081_v24, %v6080_v21  ;;  %v3316_v31 = vpop.f32.mrb[59].mxu0  ;;  %v3325_v35 = vadd.f32 %v11973_v27, %v13714_v3  ;;  %v5450_v38 = vmax.f32 %v3322_v25, 0.0 }
 0x157   :  { %v5448_v34 = vmax.f32 %v3314_v26, 0.0  ;;  %v3317_v36 = vadd.f32 %v13714_v3, %v3316_v31 }
 0x158   :  { %v6084_v37 = vadd.f32 %v6083_v33, %v6082_v30  ;;  %12079 = vmatmul.mubr.msk.bf16.gmra.mrb[164].mxu0 %vm2190_vm0, %v13140_v23  ;;  %v5451_v42 = vmax.f32 %v3325_v35, 0.0  ;;  %v6089_v48 = vsel %vm5968_vm1, %v5450_v38, 0.0  ;;  %v13215_v38 = vld [vmem:[%s13578_s9 + $0x750] sm:$0xff]  }
 0x159   :  { %v6085_v39 = vsel %vm5968_vm1, %v5448_v34, 0.0  ;;  %v5449_v40 = vmax.f32 %v3317_v36, 0.0  ;;  %12082 = vmatprep.mubr.msk.bf16.mxu0 %vm2190_vm0, %v13142_v28  ;;  %12382 = vmatprep.mubr.msk.bf16.mxu1 %vm2190_vm0, %v13215_v38 }
 0x15a   :  { %v6086_v41 = vadd.f32 %v6085_v39, %v6084_v37  ;;  %v6091_v57 = vsel %vm5968_vm1, %v5451_v42, 0.0  ;;  %v13154_v37 = vld [vmem:[%s13578_s9 + $0x2d0] sm:$0xff]  }
 0x15b   :  { %v6087_v43 = vsel %vm5968_vm1, %v5449_v40, 0.0  ;;  %v11976_v44 = vpop.f32.mrb[60].mxu0 }
 0x15c   :  { %v6088_v45 = vadd.f32 %v6087_v43, %v6086_v41  ;;  %v3329_v46 = vpop.f32.mrb[61].mxu0  ;;  %v3338_v49 = vadd.f32 %v11976_v44, %v13714_v3  ;;  %v13217_v41 = vld [vmem:[%s13578_s9 + $0x758] sm:$0xff]   ;;  %v14001_v44 = vld [vmem:[%s13703_s13] ss:$0 sm:$0xff] }
 0x15d   :  { %v3330_v50 = vadd.f32 %v13714_v3, %v3329_v46  ;;  %v11977_v51 = vpop.f32.mrb[62].mxu0  ;;  %12383 = vmatmul.mubr.msk.bf16.gmra.mrb[88].mxu1 %vm2190_vm0, %v13217_v41 }
 0x15e   :  { %v6090_v54 = vadd.f32 %v6089_v48, %v6088_v45  ;;  %v3332_v55 = vpop.f32.mrb[63].mxu0  ;;  %v3341_v59 = vadd.f32 %v11977_v51, %v13714_v3  ;;  %v5454_v62 = vmax.f32 %v3338_v49, 0.0 }
 0x15f   :  { %v5452_v58 = vmax.f32 %v3330_v50, 0.0  ;;  %v3333_v60 = vadd.f32 %v13714_v3, %v3332_v55 }
 0x160   :  { %v6092_v61 = vadd.f32 %v6091_v57, %v6090_v54  ;;  %12083 = vmatmul.mubr.msk.bf16.gmra.mrb[168].mxu0 %vm2190_vm0, %v13144_v47  ;;  %v5455_v2 = vmax.f32 %v3341_v59, 0.0  ;;  %v6097_v9 = vsel %vm5968_vm1, %v5454_v62, 0.0  ;;  %v13219_v62 = vld [vmem:[%s13578_s9 + $0x760] sm:$0xff]  }
 0x161   :  { %v6093_v63 = vsel %vm5968_vm1, %v5452_v58, 0.0  ;;  %v5453_v0 = vmax.f32 %v3333_v60, 0.0  ;;  %12086 = vmatprep.mubr.msk.bf16.mxu0 %vm2190_vm0, %v13146_v52  ;;  %12386 = vmatprep.mubr.msk.bf16.mxu1 %vm2190_vm0, %v13219_v62 }
 0x162   :  { %v6094_v1 = vadd.f32 %v6093_v63, %v6092_v61  ;;  %v6099_v19 = vsel %vm5968_vm1, %v5455_v2, 0.0  ;;  %v13158_v61 = vld [vmem:[%s13578_s9 + $0x2e0] sm:$0xff]  }
 0x163   :  { %v6095_v4 = vsel %vm5968_vm1, %v5453_v0, 0.0  ;;  %v11980_v5 = vpop.f32.mrb[64].mxu0 }
 0x164   :  { %v6096_v6 = vadd.f32 %v6095_v4, %v6094_v1  ;;  %v3345_v7 = vpop.f32.mrb[65].mxu0  ;;  %v3354_v10 = vadd.f32 %v11980_v5, %v13714_v3  ;;  %v13221_v1 = vld [vmem:[%s13578_s9 + $0x768] sm:$0xff]  }
 0x165   :  { %v3346_v11 = vadd.f32 %v13714_v3, %v3345_v7  ;;  %v11981_v12 = vpop.f32.mrb[66].mxu0  ;;  %12387 = vmatmul.mubr.msk.bf16.gmra.mrb[92].mxu1 %vm2190_vm0, %v13221_v1 }
 0x166   :  { %v6098_v15 = vadd.f32 %v6097_v9, %v6096_v6  ;;  %v3348_v16 = vpop.f32.mrb[67].mxu0  ;;  %v3357_v21 = vadd.f32 %v11981_v12, %v13714_v3  ;;  %v5458_v24 = vmax.f32 %v3354_v10, 0.0 }
 0x167   :  { %v5456_v20 = vmax.f32 %v3346_v11, 0.0  ;;  %v3349_v22 = vadd.f32 %v13714_v3, %v3348_v16 }
 0x168   :  { %v13985_v23 = vadd.f32 %v6099_v19, %v6098_v15  ;;  %12087 = vmatmul.mubr.msk.bf16.gmra.mrb[172].mxu0 %vm2190_vm0, %v13148_v8  ;;  %v5459_v27 = vmax.f32 %v3357_v21, 0.0  ;;  %v6110_v33 = vsel %vm5968_vm1, %v5458_v24, 0.0  ;;  %v13162_v24 = vld [vmem:[%s13578_s9 + $0x2f0] sm:$0xff]  }
 0x169   :  { %v5457_v25 = vmax.f32 %v3349_v22, 0.0  ;;  %12090 = vmatprep.mubr.msk.bf16.mxu0 %vm2190_vm0, %v13150_v13  ;;  %v6107_v26 = vsel %vm5968_vm1, %v5456_v20, 0.0 }
 0x16a   :  { %v6112_v42 = vsel %vm5968_vm1, %v5459_v27, 0.0 }
 0x16b   :  { %v6108_v28 = vsel %vm5968_vm1, %v5457_v25, 0.0  ;;  %v11984_v29 = vpop.f32.mrb[68].mxu0  ;;  %v13223_v25 = vld [vmem:[%s13578_s9 + $0x770] sm:$0xff]  }
 0x16c   :  { %v6109_v30 = vadd.f32 %v6108_v28, %v6107_v26  ;;  %v3361_v31 = vpop.f32.mrb[69].mxu0  ;;  %v3370_v34 = vadd.f32 %v11984_v29, %v13714_v3  ;;  %v13225_v28 = vld [vmem:[%s13578_s9 + $0x778] sm:$0xff]   ;;  %12390 = vmatprep.mubr.msk.bf16.mxu1 %vm2190_vm0, %v13223_v25 }
 0x16d   :  { %v3362_v35 = vadd.f32 %v13714_v3, %v3361_v31  ;;  %v11985_v36 = vpop.f32.mrb[70].mxu0  ;;  %12391 = vmatmul.mubr.msk.bf16.gmra.mrb[96].mxu1 %vm2190_vm0, %v13225_v28 }
 0x16e   :  { %v6111_v39 = vadd.f32 %v6110_v33, %v6109_v30  ;;  %v3364_v40 = vpop.f32.mrb[71].mxu0  ;;  %v3373_v45 = vadd.f32 %v14001_v44, %v11985_v36  ;;  %v5462_v3 = vmax.f32 %v3370_v34, 0.0 }
 0x16f   :  { %v5460_v43 = vmax.f32 %v3362_v35, 0.0  ;;  %v3365_v46 = vadd.f32 %v14001_v44, %v3364_v40 }
 0x170   :  { %v6113_v47 = vadd.f32 %v6112_v42, %v6111_v39  ;;  %12091 = vmatmul.mubr.msk.bf16.gmra.mrb[176].mxu0 %vm2190_vm0, %v13152_v32  ;;  %v5463_v51 = vmax.f32 %v3373_v45, 0.0  ;;  %v6118_v57 = vsel %vm5968_vm1, %v5462_v3, 0.0 }
 0x171   :  { %v6114_v48 = vsel %vm5968_vm1, %v5460_v43, 0.0  ;;  %v5461_v49 = vmax.f32 %v3365_v46, 0.0  ;;  %12094 = vmatprep.mubr.msk.bf16.mxu0 %vm2190_vm0, %v13154_v37  ;;  %v13164_v43 = vld [vmem:[%s13578_s9 + $0x2f8] sm:$0xff]  }
 0x172   :  { %v6115_v50 = vadd.f32 %v6114_v48, %v6113_v47  ;;  %v6120_v2 = vsel %vm5968_vm1, %v5463_v51, 0.0  ;;  %v13166_v48 = vld [vmem:[%s13578_s9 + $0x300] sm:$0xff]  }
 0x173   :  { %v6116_v52 = vsel %vm5968_vm1, %v5461_v49, 0.0  ;;  %v11988_v53 = vpop.f32.mrb[72].mxu0  ;;  %v13227_v49 = vld [vmem:[%s13578_s9 + $0x780] sm:$0xff]  }
 0x174   :  { %v6117_v54 = vadd.f32 %v6116_v52, %v6115_v50  ;;  %v3377_v55 = vpop.f32.mrb[73].mxu0  ;;  %v3386_v58 = vadd.f32 %v14001_v44, %v11988_v53  ;;  %v13229_v52 = vld [vmem:[%s13578_s9 + $0x788] sm:$0xff]   ;;  %12394 = vmatprep.mubr.msk.bf16.mxu1 %vm2190_vm0, %v13227_v49 }
 0x175   :  { %v3378_v59 = vadd.f32 %v14001_v44, %v3377_v55  ;;  %v11989_v60 = vpop.f32.mrb[74].mxu0  ;;  %12395 = vmatmul.mubr.msk.bf16.gmra.mrb[100].mxu1 %vm2190_vm0, %v13229_v52 }
 0x176   :  { %v6119_v63 = vadd.f32 %v6118_v57, %v6117_v54  ;;  %v3380_v0 = vpop.f32.mrb[75].mxu0  ;;  %v3389_v5 = vadd.f32 %v14001_v44, %v11989_v60  ;;  %v5466_v8 = vmax.f32 %v3386_v58, 0.0 }
 0x177   :  { %v5464_v4 = vmax.f32 %v3378_v59, 0.0  ;;  %v3381_v6 = vadd.f32 %v14001_v44, %v3380_v0 }
 0x178   :  { %v6121_v7 = vadd.f32 %v6120_v2, %v6119_v63  ;;  %12095 = vmatmul.mubr.msk.bf16.gmra.mrb[180].mxu0 %vm2190_vm0, %v13156_v56  ;;  %v5467_v12 = vmax.f32 %v3389_v5, 0.0  ;;  %v6126_v19 = vsel %vm5968_vm1, %v5466_v8, 0.0 }
 0x179   :  { %v6122_v9 = vsel %vm5968_vm1, %v5464_v4, 0.0  ;;  %v5465_v10 = vmax.f32 %v3381_v6, 0.0  ;;  %12098 = vmatprep.mubr.msk.bf16.mxu0 %vm2190_vm0, %v13158_v61  ;;  %v13168_v4 = vld [vmem:[%s13578_s9 + $0x308] sm:$0xff]  }
 0x17a   :  { %v6123_v11 = vadd.f32 %v6122_v9, %v6121_v7  ;;  %v6128_v29 = vsel %vm5968_vm1, %v5467_v12, 0.0  ;;  %v13170_v9 = vld [vmem:[%s13578_s9 + $0x310] sm:$0xff]  }
 0x17b   :  { %v6124_v13 = vsel %vm5968_vm1, %v5465_v10, 0.0  ;;  %v11992_v14 = vpop.f32.mrb[76].mxu0  ;;  %v13231_v10 = vld [vmem:[%s13578_s9 + $0x790] sm:$0xff]  }
 0x17c   :  { %v6125_v15 = vadd.f32 %v6124_v13, %v6123_v11  ;;  %v3393_v16 = vpop.f32.mrb[77].mxu0  ;;  %v3402_v20 = vadd.f32 %v14001_v44, %v11992_v14  ;;  %v13233_v13 = vld [vmem:[%s13578_s9 + $0x798] sm:$0xff]   ;;  %12398 = vmatprep.mubr.msk.bf16.mxu1 %vm2190_vm0, %v13231_v10 }
 0x17d   :  { %v3394_v21 = vadd.f32 %v14001_v44, %v3393_v16  ;;  %v11993_v22 = vpop.f32.mrb[78].mxu0  ;;  %12399 = vmatmul.mubr.msk.bf16.gmra.mrb[104].mxu1 %vm2190_vm0, %v13233_v13 }
 0x17e   :  { %v6127_v26 = vadd.f32 %v6126_v19, %v6125_v15  ;;  %v3396_v27 = vpop.f32.mrb[79].mxu0  ;;  %v3405_v31 = vadd.f32 %v14001_v44, %v11993_v22  ;;  %v5470_v34 = vmax.f32 %v3402_v20, 0.0 }
 0x17f   :  { %v5468_v30 = vmax.f32 %v3394_v21, 0.0  ;;  %v3397_v32 = vadd.f32 %v14001_v44, %v3396_v27 }
 0x180   :  { %v6129_v33 = vadd.f32 %v6128_v29, %v6127_v26  ;;  %12099 = vmatmul.mubr.msk.bf16.gmra.mrb[184].mxu0 %vm2190_vm0, %v13160_v17  ;;  %v5471_v38 = vmax.f32 %v3405_v31, 0.0  ;;  %v6134_v45 = vsel %vm5968_vm1, %v5470_v34, 0.0 }
 0x181   :  { %v6130_v35 = vsel %vm5968_vm1, %v5468_v30, 0.0  ;;  %v5469_v36 = vmax.f32 %v3397_v32, 0.0  ;;  %12102 = vmatprep.mubr.msk.bf16.mxu0 %vm2190_vm0, %v13162_v24  ;;  %v13172_v30 = vld [vmem:[%s13578_s9 + $0x318] sm:$0xff]  }
 0x182   :  { %v6131_v37 = vadd.f32 %v6130_v35, %v6129_v33  ;;  %v6136_v53 = vsel %vm5968_vm1, %v5471_v38, 0.0  ;;  %v13174_v35 = vld [vmem:[%s13578_s9 + $0x320] sm:$0xff]  }
 0x183   :  { %v6132_v39 = vsel %vm5968_vm1, %v5469_v36, 0.0  ;;  %v11996_v40 = vpop.f32.mrb[80].mxu0  ;;  %v13235_v36 = vld [vmem:[%s13578_s9 + $0x7a0] sm:$0xff]  }
 0x184   :  { %v6133_v41 = vadd.f32 %v6132_v39, %v6131_v37  ;;  %v3409_v42 = vpop.f32.mrb[81].mxu0  ;;  %v3418_v46 = vadd.f32 %v14001_v44, %v11996_v40  ;;  %v13237_v39 = vld [vmem:[%s13578_s9 + $0x7a8] sm:$0xff]   ;;  %12402 = vmatprep.mubr.msk.bf16.mxu1 %vm2190_vm0, %v13235_v36 }
 0x185   :  { %v3410_v47 = vadd.f32 %v14001_v44, %v3409_v42  ;;  %v11997_v3 = vpop.f32.mrb[82].mxu0  ;;  %12403 = vmatmul.mubr.msk.bf16.gmra.mrb[108].mxu1 %vm2190_vm0, %v13237_v39 }
 0x186   :  { %v6135_v50 = vadd.f32 %v6134_v45, %v6133_v41  ;;  %v3412_v51 = vpop.f32.mrb[83].mxu0  ;;  %v3421_v55 = vadd.f32 %v14001_v44, %v11997_v3  ;;  %v5474_v58 = vmax.f32 %v3418_v46, 0.0 }
 0x187   :  { %v5472_v54 = vmax.f32 %v3410_v47, 0.0  ;;  %v3413_v56 = vadd.f32 %v14001_v44, %v3412_v51 }
 0x188   :  { %v6137_v57 = vadd.f32 %v6136_v53, %v6135_v50  ;;  %12103 = vmatmul.mubr.msk.bf16.gmra.mrb[188].mxu0 %vm2190_vm0, %v13164_v43  ;;  %v5475_v62 = vmax.f32 %v3421_v55, 0.0  ;;  %v6142_v5 = vsel %vm5968_vm1, %v5474_v58, 0.0 }
 0x189   :  { %v6138_v59 = vsel %vm5968_vm1, %v5472_v54, 0.0  ;;  %v5473_v60 = vmax.f32 %v3413_v56, 0.0  ;;  %12106 = vmatprep.mubr.msk.bf16.mxu0 %vm2190_vm0, %v13166_v48  ;;  %v13176_v54 = vld [vmem:[%s13578_s9 + $0x328] sm:$0xff]  }
 0x18a   :  { %v6139_v61 = vadd.f32 %v6138_v59, %v6137_v57  ;;  %v6144_v14 = vsel %vm5968_vm1, %v5475_v62, 0.0  ;;  %v13178_v59 = vld [vmem:[%s13578_s9 + $0x330] sm:$0xff]  }
 0x18b   :  { %v6140_v63 = vsel %vm5968_vm1, %v5473_v60, 0.0  ;;  %v12000_v0 = vpop.f32.mrb[84].mxu0  ;;  %v13239_v60 = vld [vmem:[%s13578_s9 + $0x7b0] sm:$0xff]  }
 0x18c   :  { %v6141_v1 = vadd.f32 %v6140_v63, %v6139_v61  ;;  %v3425_v2 = vpop.f32.mrb[85].mxu0  ;;  %v3434_v6 = vadd.f32 %v14001_v44, %v12000_v0  ;;  %v13241_v63 = vld [vmem:[%s13578_s9 + $0x7b8] sm:$0xff]   ;;  %12406 = vmatprep.mubr.msk.bf16.mxu1 %vm2190_vm0, %v13239_v60 }
 0x18d   :  { %v3426_v7 = vadd.f32 %v14001_v44, %v3425_v2  ;;  %v12001_v8 = vpop.f32.mrb[86].mxu0  ;;  %12407 = vmatmul.mubr.msk.bf16.gmra.mrb[112].mxu1 %vm2190_vm0, %v13241_v63 }
 0x18e   :  { %v6143_v11 = vadd.f32 %v6142_v5, %v6141_v1  ;;  %v3428_v12 = vpop.f32.mrb[87].mxu0  ;;  %v3437_v16 = vadd.f32 %v14001_v44, %v12001_v8  ;;  %v5478_v20 = vmax.f32 %v3434_v6, 0.0 }
 0x18f   :  { %v5476_v15 = vmax.f32 %v3426_v7, 0.0  ;;  %v3429_v17 = vadd.f32 %v14001_v44, %v3428_v12 }
 0x190   :  { %v6145_v19 = vadd.f32 %v6144_v14, %v6143_v11  ;;  %12107 = vmatmul.mubr.msk.bf16.gmra.mrb[192].mxu0 %vm2190_vm0, %v13168_v4  ;;  %v5479_v25 = vmax.f32 %v3437_v16, 0.0  ;;  %v6150_v31 = vsel %vm5968_vm1, %v5478_v20, 0.0 }
 0x191   :  { %v6146_v21 = vsel %vm5968_vm1, %v5476_v15, 0.0  ;;  %v5477_v22 = vmax.f32 %v3429_v17, 0.0  ;;  %12110 = vmatprep.mubr.msk.bf16.mxu0 %vm2190_vm0, %v13170_v9  ;;  %v13180_v15 = vld [vmem:[%s13578_s9 + $0x338] sm:$0xff]  }
 0x192   :  { %v6147_v24 = vadd.f32 %v6146_v21, %v6145_v19  ;;  %v6152_v40 = vsel %vm5968_vm1, %v5479_v25, 0.0  ;;  %v13182_v21 = vld [vmem:[%s13578_s9 + $0x340] sm:$0xff]  }
 0x193   :  { %v6148_v26 = vsel %vm5968_vm1, %v5477_v22, 0.0  ;;  %v12004_v27 = vpop.f32.mrb[88].mxu0  ;;  %v13243_v22 = vld [vmem:[%s13578_s9 + $0x7c0] sm:$0xff]  }
 0x194   :  { %v6149_v28 = vadd.f32 %v6148_v26, %v6147_v24  ;;  %v3441_v29 = vpop.f32.mrb[89].mxu0  ;;  %v3450_v32 = vadd.f32 %v14001_v44, %v12004_v27  ;;  %v13245_v26 = vld [vmem:[%s13578_s9 + $0x7c8] sm:$0xff]   ;;  %12410 = vmatprep.mubr.msk.bf16.mxu1 %vm2190_vm0, %v13243_v22 }
 0x195   :  { %v3442_v33 = vadd.f32 %v14001_v44, %v3441_v29  ;;  %v12005_v34 = vpop.f32.mrb[90].mxu0  ;;  %12411 = vmatmul.mubr.msk.bf16.gmra.mrb[116].mxu1 %vm2190_vm0, %v13245_v26 }
 0x196   :  { %v6151_v37 = vadd.f32 %v6150_v31, %v6149_v28  ;;  %v3444_v38 = vpop.f32.mrb[91].mxu0  ;;  %v3453_v42 = vadd.f32 %v14001_v44, %v12005_v34  ;;  %v5482_v46 = vmax.f32 %v3450_v32, 0.0 }
 0x197   :  { %v5480_v41 = vmax.f32 %v3442_v33, 0.0  ;;  %v3445_v43 = vadd.f32 %v14001_v44, %v3444_v38 }
 0x198   :  { %v6153_v45 = vadd.f32 %v6152_v40, %v6151_v37  ;;  %12111 = vmatmul.mubr.msk.bf16.gmra.mrb[196].mxu0 %vm2190_vm0, %v13172_v30  ;;  %v5483_v49 = vmax.f32 %v3453_v42, 0.0  ;;  %v6158_v55 = vsel %vm5968_vm1, %v5482_v46, 0.0  ;;  %v13184_v40 = vld [vmem:[%s13578_s9 + $0x348] sm:$0xff]   ;;  %v13186_v46 = vld [vmem:[%s13578_s9 + $0x350] sm:$0xff]  }
 0x199   :  { %v6154_v47 = vsel %vm5968_vm1, %v5480_v41, 0.0  ;;  %v5481_v3 = vmax.f32 %v3445_v43, 0.0  ;;  %12114 = vmatprep.mubr.msk.bf16.mxu0 %vm2190_vm0, %v13174_v35 }
 0x19a   :  { %v6155_v48 = vadd.f32 %v6154_v47, %v6153_v45  ;;  %v6160_v0 = vsel %vm5968_vm1, %v5483_v49, 0.0  ;;  %v13247_v47 = vld [vmem:[%s13578_s9 + $0x7d0] sm:$0xff]  }
 0x19b   :  { %v6156_v50 = vsel %vm5968_vm1, %v5481_v3, 0.0  ;;  %v12008_v51 = vpop.f32.mrb[92].mxu0  ;;  %v6101_v3 = vrot.slane %v13985_v23, 4  ;;  %12414 = vmatprep.mubr.msk.bf16.mxu1 %vm2190_vm0, %v13247_v47 }
 0x19c   :  { %v6157_v52 = vadd.f32 %v6156_v50, %v6155_v48  ;;  %v3457_v53 = vpop.f32.mrb[93].mxu0  ;;  %v3466_v56 = vadd.f32 %v14001_v44, %v12008_v51  ;;  %v13249_v50 = vld [vmem:[%s13578_s9 + $0x7d8] sm:$0xff]  }
 0x19d   :  { %v3458_v57 = vadd.f32 %v14001_v44, %v3457_v53  ;;  %v12009_v58 = vpop.f32.mrb[94].mxu0  ;;  %12415 = vmatmul.mubr.msk.bf16.gmra.mrb[120].mxu1 %vm2190_vm0, %v13249_v50  ;;  %v6102_v60 = vadd.f32 %v6101_v3, %v13985_v23  ;;  %v13251_v23 = vld [vmem:[%s13578_s9 + $0x7e0] sm:$0xff]  }
 0x19e   :  { %v6159_v61 = vadd.f32 %v6158_v55, %v6157_v52  ;;  %v3460_v62 = vpop.f32.mrb[95].mxu0  ;;  %v3469_v2 = vadd.f32 %v14001_v44, %v12009_v58  ;;  %v5486_v6 = vmax.f32 %v3466_v56, 0.0  ;;  %v6032_v56 = vrot.slane %v13855_v18, 4  ;;  %12418 = vmatprep.mubr.msk.bf16.mxu1 %vm2190_vm0, %v13251_v23 }
 0x19f   :  { %v5484_v1 = vmax.f32 %v3458_v57, 0.0  ;;  %v3461_v4 = vadd.f32 %v14001_v44, %v3460_v62 }
 0x1a0   :  { %v6161_v5 = vadd.f32 %v6160_v0, %v6159_v61  ;;  %12115 = vmatmul.mubr.msk.bf16.gmra.mrb[200].mxu0 %vm2190_vm0, %v13176_v54  ;;  %v5487_v10 = vmax.f32 %v3469_v2, 0.0  ;;  %v6166_v16 = vsel %vm5968_vm1, %v5486_v6, 0.0 }
 0x1a1   :  { %v6162_v7 = vsel %vm5968_vm1, %v5484_v1, 0.0  ;;  %v5485_v8 = vmax.f32 %v3461_v4, 0.0  ;;  %12118 = vmatprep.mubr.msk.bf16.mxu0 %vm2190_vm0, %v13178_v59  ;;  %v13188_v4 = vld [vmem:[%s13578_s9 + $0x358] sm:$0xff]  }
 0x1a2   :  { %v6163_v9 = vadd.f32 %v6162_v7, %v6161_v5  ;;  %v6168_v27 = vsel %vm5968_vm1, %v5487_v10, 0.0  ;;  %v6033_v5 = vadd.f32 %v6032_v56, %v13855_v18  ;;  %v13190_v10 = vld [vmem:[%s13578_s9 + $0x360] sm:$0xff]  }
 0x1a3   :  { %v6164_v11 = vsel %vm5968_vm1, %v5485_v8, 0.0  ;;  %v12012_v12 = vpop.f32.mrb[96].mxu0 }
 0x1a4   :  { %v6165_v13 = vadd.f32 %v6164_v11, %v6163_v9  ;;  %v3473_v14 = vpop.f32.mrb[97].mxu0  ;;  %v3482_v17 = vadd.f32 %v14001_v44, %v12012_v12  ;;  %v6103_v11 = vrot.slane %v6102_v60, 2 }
 0x1a5   :  { %v3474_v19 = vadd.f32 %v14001_v44, %v3473_v14  ;;  %v12013_v20 = vpop.f32.mrb[98].mxu0  ;;  %v13253_v14 = vld [vmem:[%s13578_s9 + $0x7e8] sm:$0xff]  }
 0x1a6   :  { %v6167_v24 = vadd.f32 %v6166_v16, %v6165_v13  ;;  %v3476_v25 = vpop.f32.mrb[99].mxu0  ;;  %v3485_v29 = vadd.f32 %v14001_v44, %v12013_v20  ;;  %v5490_v32 = vmax.f32 %v3482_v17, 0.0  ;;  %12419 = vmatmul.mubr.msk.bf16.gmra.mrb[124].mxu1 %vm2190_vm0, %v13253_v14  ;;  %v6034_v20 = vrot.slane %v6033_v5, 2 }
 0x1a7   :  { %v5488_v28 = vmax.f32 %v3474_v19, 0.0  ;;  %v3477_v30 = vadd.f32 %v14001_v44, %v3476_v25  ;;  %v6104_v25 = vadd.f32 %v6103_v11, %v6102_v60 }
 0x1a8   :  { %v14118_v31 = vadd.f32 %v6168_v27, %v6167_v24  ;;  %12119 = vmatmul.mubr.msk.bf16.gmra.mrb[204].mxu0 %vm2190_vm0, %v13180_v15  ;;  %v5491_v35 = vmax.f32 %v3485_v29, 0.0  ;;  %v6179_v41 = vsel %vm5968_vm1, %v5490_v32, 0.0 }
 0x1a9   :  { %v5489_v33 = vmax.f32 %v3477_v30, 0.0  ;;  %12122 = vmatprep.mubr.msk.bf16.mxu0 %vm2190_vm0, %v13182_v21  ;;  %v6176_v34 = vsel %vm5968_vm1, %v5488_v28, 0.0 }
 0x1aa   :  { %v6181_v51 = vsel %vm5968_vm1, %v5491_v35, 0.0 }
 0x1ab   :  { %v6177_v36 = vsel %vm5968_vm1, %v5489_v33, 0.0  ;;  %v12016_v37 = vpop.f32.mrb[100].mxu0  ;;  %v13192_v33 = vld [vmem:[%s13578_s9 + $0x368] sm:$0xff]  }
 0x1ac   :  { %v6178_v38 = vadd.f32 %v6177_v36, %v6176_v34  ;;  %v3489_v39 = vpop.f32.mrb[101].mxu0  ;;  %v3498_v42 = vadd.f32 %v14001_v44, %v12016_v37  ;;  %v6035_v34 = vadd.f32 %v6034_v20, %v6033_v5  ;;  %v13259_v5 = vld [vmem:[%s13578_s9 + $0x800] sm:$0xff]  }
 0x1ad   :  { %v3490_v43 = vadd.f32 %v14001_v44, %v3489_v39  ;;  %v12017_v45 = vpop.f32.mrb[102].mxu0  ;;  %v13194_v39 = vld [vmem:[%s13578_s9 + $0x370] sm:$0xff]  }
 0x1ae   :  { %v6180_v48 = vadd.f32 %v6179_v41, %v6178_v38  ;;  %v3492_v49 = vpop.f32.mrb[103].mxu0  ;;  %v3501_v53 = vadd.f32 %v14001_v44, %v12017_v45  ;;  %v5494_v57 = vmax.f32 %v3498_v42, 0.0  ;;  %v6105_v41 = vrot.slane %v6104_v25, 1  ;;  %v13257_v45 = vld [vmem:[%s13578_s9 + $0x7f8] sm:$0xff]  }
 0x1af   :  { %v5492_v52 = vmax.f32 %v3490_v43, 0.0  ;;  %v3493_v54 = vadd.f32 %v14001_v44, %v3492_v49  ;;  %v6036_v50 = vrot.slane %v6035_v34, 1 }
 0x1b0   :  { %v6182_v55 = vadd.f32 %v6181_v51, %v6180_v48  ;;  %12123 = vmatmul.mubr.msk.bf16.gmra.mrb[208].mxu0 %vm2190_vm0, %v13184_v40  ;;  %v5495_v62 = vmax.f32 %v3501_v53, 0.0  ;;  %v6187_v6 = vsel %vm5968_vm1, %v5494_v57, 0.0  ;;  %v13255_v40 = vld [vmem:[%s13578_s9 + $0x7f0] sm:$0xff]  }
 0x1b1   :  { %v6183_v58 = vsel %vm5968_vm1, %v5492_v52, 0.0  ;;  %v5493_v59 = vmax.f32 %v3493_v54, 0.0  ;;  %12126 = vmatprep.mubr.msk.bf16.mxu0 %vm2190_vm0, %v13186_v46  ;;  %12422 = vmatprep.mubr.msk.bf16.mxu1 %vm2190_vm0, %v13255_v40  ;;  %v6106_v54 = vadd.f32 %v6105_v41, %v6104_v25 }
 0x1b2   :  { %v6184_v61 = vadd.f32 %v6183_v58, %v6182_v55  ;;  %v6189_v15 = vsel %vm5968_vm1, %v5495_v62, 0.0  ;;  %12423 = vmatmul.mubr.msk.bf16.gmra.mrb[128].mxu1 %vm2190_vm0, %v13257_v45  ;;  %v6037_v62 = vadd.f32 %v6036_v50, %v6035_v34  ;;  %v13263_v34 = vld [vmem:[%s13578_s9 + $0x810] sm:$0xff]  }
 0x1b3   :  { %v6185_v63 = vsel %vm5968_vm1, %v5493_v59, 0.0  ;;  %v12020_v0 = vpop.f32.mrb[104].mxu0  ;;  %12426 = vmatprep.mubr.msk.bf16.mxu1 %vm2190_vm0, %v13259_v5 }
 0x1b4   :  { %v6186_v1 = vadd.f32 %v6185_v63, %v6184_v61  ;;  %v3505_v2 = vpop.f32.mrb[105].mxu0  ;;  %v3514_v7 = vadd.f32 %v14001_v44, %v12020_v0  ;;  %v13196_v61 = vld [vmem:[%s13578_s9 + $0x378] sm:$0xff]   ;;  %v7212_v14 = vmul.f32 0.00390625, %v6037_v62 }
 0x1b5   :  { %v3506_v8 = vadd.f32 %v14001_v44, %v3505_v2  ;;  %v12021_v9 = vpop.f32.mrb[106].mxu0 }
 0x1b6   :  { %v6188_v12 = vadd.f32 %v6187_v6, %v6186_v1  ;;  %v3508_v13 = vpop.f32.mrb[107].mxu0  ;;  %v3517_v17 = vadd.f32 %v14001_v44, %v12021_v9  ;;  %v5498_v21 = vmax.f32 %v3514_v7, 0.0  ;;  %v7213_v6 = vmul.f32 0.00390625, %v6106_v54  ;;  %v13261_v9 = vld [vmem:[%s13578_s9 + $0x808] sm:$0xff]  }
 0x1b7   :  { %v5496_v16 = vmax.f32 %v3506_v8, 0.0  ;;  %v3509_v18 = vadd.f32 %v14001_v44, %v3508_v13 }
 0x1b8   :  { %v6190_v19 = vadd.f32 %v6189_v15, %v6188_v12  ;;  %12127 = vmatmul.mubr.msk.bf16.gmra.mrb[212].mxu0 %vm2190_vm0, %v13188_v4  ;;  %v5499_v27 = vmax.f32 %v3517_v17, 0.0  ;;  %v6195_v35 = vsel %vm5968_vm1, %v5498_v21, 0.0  ;;  %v13198_v4 = vld [vmem:[%s13578_s9 + $0x380] sm:$0xff]  }
 0x1b9   :  { %v6191_v22 = vsel %vm5968_vm1, %v5496_v16, 0.0  ;;  %v5497_v24 = vmax.f32 %v3509_v18, 0.0  ;;  %12130 = vmatprep.mubr.msk.bf16.mxu0 %vm2190_vm0, %v13190_v10  ;;  %v7233_v18 = vpack.c.bf16 %v7213_v6, %v7213_v6  ;;  %v14222_v6 = vpop.f32.mrb[0].mxu1 }
 0x1ba   :  { %v6192_v26 = vadd.f32 %v6191_v22, %v6190_v19  ;;  %v6197_v46 = vsel %vm5968_vm1, %v5499_v27, 0.0  ;;  %12427 = vmatmul.mubr.msk.bf16.gmra.mrb[132].mxu1 %vm2190_vm0, %v13261_v9  ;;  %v7232_v27 = vpack.c.bf16 %v7212_v14, %v7212_v14  ;;  %16801 = vst [vmem:[#allocation3_spill] sm:$0xff] %v14222_v6 }
 0x1bb   :  { %v6193_v28 = vsel %vm5968_vm1, %v5497_v24, 0.0  ;;  %v12024_v29 = vpop.f32.mrb[108].mxu0  ;;  %12430 = vmatprep.mubr.msk.bf16.mxu1 %vm2190_vm0, %v13263_v34  ;;  %v13273_v34 = vld [vmem:[%s13578_s9 + $0x838] sm:$0xff]  }
 0x1bc   :  { %v6194_v30 = vadd.f32 %v6193_v28, %v6192_v26  ;;  %v3521_v32 = vpop.f32.mrb[109].mxu0  ;;  %v3530_v36 = vadd.f32 %v14001_v44, %v12024_v29  ;;  %v13200_v26 = vld [vmem:[%s13578_s9 + $0x388] sm:$0xff]   ;;  %v7275_v45 = vunpack.c.l.b16 %v7232_v27  ;;  %v13210_v27 = vld [vmem:[%s13578_s9 + $0x3b0] sm:$0xff]  }
 0x1bd   :  { %v3522_v37 = vadd.f32 %v14001_v44, %v3521_v32  ;;  %v12025_v38 = vpop.f32.mrb[110].mxu0 }
 0x1be   :  { %v6196_v42 = vadd.f32 %v6195_v35, %v6194_v30  ;;  %v3524_v43 = vpop.f32.mrb[111].mxu0  ;;  %v3533_v3 = vadd.f32 %v14001_v44, %v12025_v38  ;;  %v5502_v51 = vmax.f32 %v3530_v36, 0.0  ;;  %v7276_v35 = vunpack.c.l.b16 %v7233_v18  ;;  %v13265_v38 = vld [vmem:[%s13578_s9 + $0x818] sm:$0xff]  }
 0x1bf   :  { %v5500_v47 = vmax.f32 %v3522_v37, 0.0  ;;  %v3525_v48 = vadd.f32 %v14001_v44, %v3524_v43 }
 0x1c0   :  { %v6198_v49 = vadd.f32 %v6197_v46, %v6196_v42  ;;  %12131 = vmatmul.mubr.msk.bf16.gmra.mrb[216].mxu0 %vm2190_vm0, %v13192_v33  ;;  %v5503_v56 = vmax.f32 %v3533_v3, 0.0  ;;  %v6203_v63 = vsel %vm5968_vm1, %v5502_v51, 0.0  ;;  %v13202_v33 = vld [vmem:[%s13578_s9 + $0x390] sm:$0xff]  }
 0x1c1   :  { %v6199_v52 = vsel %vm5968_vm1, %v5500_v47, 0.0  ;;  %v5501_v53 = vmax.f32 %v3525_v48, 0.0  ;;  %12134 = vmatprep.mubr.msk.bf16.mxu0 %vm2190_vm0, %v13194_v39 }
 0x1c2   :  { %v6200_v55 = vadd.f32 %v6199_v52, %v6198_v49  ;;  %v6205_v10 = vsel %vm5968_vm1, %v5503_v56, 0.0  ;;  %12431 = vmatmul.mubr.msk.bf16.gmra.mrb[136].mxu1 %vm2190_vm0, %v13265_v38  ;;  %v14210_v52 = vsel %vm7293_vm2, %v7276_v35, %v7275_v45 }
 0x1c3   :  { %v6201_v57 = vsel %vm5968_vm1, %v5501_v53, 0.0  ;;  %v12028_v58 = vpop.f32.mrb[112].mxu0  ;;  %16800 = vst [vmem:[#allocation2_spill] sm:$0xff] %v14210_v52 }
 0x1c4   :  { %v6202_v59 = vadd.f32 %v6201_v57, %v6200_v55  ;;  %v3537_v60 = vpop.f32.mrb[113].mxu0  ;;  %v3546_v0 = vadd.f32 %v14001_v44, %v12028_v58  ;;  %v13204_v55 = vld [vmem:[%s13578_s9 + $0x398] sm:$0xff]  }
 0x1c5   :  { %v3538_v1 = vadd.f32 %v14001_v44, %v3537_v60  ;;  %v12029_v2 = vpop.f32.mrb[114].mxu0  ;;  %v13206_v60 = vld [vmem:[%s13578_s9 + $0x3a0] sm:$0xff]  }
 0x1c6   :  { %v6204_v7 = vadd.f32 %v6203_v63, %v6202_v59  ;;  %v3540_v8 = vpop.f32.mrb[115].mxu0  ;;  %v3549_v11 = vadd.f32 %v14001_v44, %v12029_v2  ;;  %v5506_v15 = vmax.f32 %v3546_v0, 0.0  ;;  %v13269_v0 = vld [vmem:[%s13578_s9 + $0x828] sm:$0xff]  }
 0x1c7   :  { %v5504_v23 = vmax.f32 %v3538_v1, 0.0  ;;  %v3541_v12 = vadd.f32 %v14001_v44, %v3540_v8  ;;  %v14226_v8 = vpop.f32.mrb[1].mxu1 }
 0x1c8   :  { %v6206_v13 = vadd.f32 %v6205_v10, %v6204_v7  ;;  %12135 = vmatmul.mubr.msk.bf16.gmra.mrb[220].mxu0 %vm2190_vm0, %v13196_v61  ;;  %v5507_v20 = vmax.f32 %v3549_v11, 0.0  ;;  %v6211_v28 = vsel %vm5968_vm1, %v5506_v15, 0.0  ;;  %v13267_v61 = vld [vmem:[%s13578_s9 + $0x820] sm:$0xff]   ;;  %16802 = vst [vmem:[#allocation4_spill] sm:$0xff] %v14226_v8  ;;  %v14231_v11 = vpop.f32.mrb[2].mxu1 }
 0x1c9   :  { %v6207_v16 = vsel %vm5968_vm1, %v5504_v23, 0.0  ;;  %v5505_v17 = vmax.f32 %v3541_v12, 0.0  ;;  %12138 = vmatprep.mubr.msk.bf16.mxu0 %vm2190_vm0, %v13198_v4  ;;  %12434 = vmatprep.mubr.msk.bf16.mxu1 %vm2190_vm0, %v13267_v61  ;;  %16803 = vst [vmem:[#allocation5_spill] sm:$0xff] %v14231_v11 }
 0x1ca   :  { %v6208_v19 = vadd.f32 %v6207_v16, %v6206_v13  ;;  %v6213_v39 = vsel %vm5968_vm1, %v5507_v20, 0.0  ;;  %12435 = vmatmul.mubr.msk.bf16.gmra.mrb[140].mxu1 %vm2190_vm0, %v13269_v0  ;;  %v14233_v13 = vpop.f32.mrb[3].mxu1  ;;  %v13208_v20 = vld [vmem:[%s13578_s9 + $0x3a8] sm:$0xff]  }
 0x1cb   :  { %v6209_v21 = vsel %vm5968_vm1, %v5505_v17, 0.0  ;;  %v12032_v22 = vpop.f32.mrb[116].mxu0  ;;  %16804 = vst [vmem:[#allocation6_spill] sm:$0xff] %v14233_v13  ;;  %v12300_v17 = vpop.f32.mrb[4].mxu1 }
 0x1cc   :  { %v6210_v24 = vadd.f32 %v6209_v21, %v6208_v19  ;;  %v3553_v25 = vpop.f32.mrb[117].mxu0  ;;  %v3562_v29 = vadd.f32 %v14001_v44, %v12032_v22  ;;  %v4625_v21 = vpop.f32.mrb[5].mxu1 }
 0x1cd   :  { %v3554_v30 = vadd.f32 %v14001_v44, %v3553_v25  ;;  %v12033_v32 = vpop.f32.mrb[118].mxu0 }
 0x1ce   :  { %v6212_v36 = vadd.f32 %v6211_v28, %v6210_v24  ;;  %v3556_v37 = vpop.f32.mrb[119].mxu0  ;;  %v3565_v41 = vadd.f32 %v14001_v44, %v12033_v32  ;;  %v5510_v46 = vmax.f32 %v3562_v29, 0.0  ;;  %v12301_v28 = vpop.f32.mrb[6].mxu1  ;;  %v13271_v29 = vld [vmem:[%s13578_s9 + $0x830] sm:$0xff]  }
 0x1cf   :  { %v5508_v40 = vmax.f32 %v3554_v30, 0.0  ;;  %v3557_v42 = vadd.f32 %v14001_v44, %v3556_v37  ;;  %12438 = vmatprep.mubr.msk.bf16.mxu1 %vm2190_vm0, %v13271_v29 }
 0x1d0   :  { %v6214_v43 = vadd.f32 %v6213_v39, %v6212_v36  ;;  %12139 = vmatmul.mubr.msk.bf16.gmra.mrb[224].mxu0 %vm2190_vm0, %v13200_v26  ;;  %v5511_v49 = vmax.f32 %v3565_v41, 0.0  ;;  %v6219_v56 = vsel %vm5968_vm1, %v5510_v46, 0.0 }
 0x1d1   :  { %v6215_v47 = vsel %vm5968_vm1, %v5508_v40, 0.0  ;;  %v5509_v3 = vmax.f32 %v3557_v42, 0.0  ;;  %12142 = vmatprep.mubr.msk.bf16.mxu0 %vm2190_vm0, %v13202_v33  ;;  %v4628_v33 = vpop.f32.mrb[7].mxu1 }
 0x1d2   :  { %v6216_v48 = vadd.f32 %v6215_v47, %v6214_v43  ;;  %v6221_v1 = vsel %vm5968_vm1, %v5511_v49, 0.0  ;;  %12439 = vmatmul.mubr.msk.bf16.gmra.mrb[144].mxu1 %vm2190_vm0, %v13273_v34 }
 0x1d3   :  { %v6217_v50 = vsel %vm5968_vm1, %v5509_v3, 0.0  ;;  %v12036_v51 = vpop.f32.mrb[120].mxu0  ;;  %v14252_v3 = vpop.f32.mrb[8].mxu1 }
 0x1d4   :  { %v6218_v53 = vadd.f32 %v6217_v50, %v6216_v48  ;;  %v3569_v54 = vpop.f32.mrb[121].mxu0  ;;  %v3578_v57 = vadd.f32 %v14001_v44, %v12036_v51  ;;  %v13212_v50 = vld [vmem:[%s13578_s9 + $0x3b8] sm:$0xff]   ;;  %v4634_v51 = vadd.f32 %v14001_v44, %v12300_v17 }
 0x1d5   :  { %v3570_v58 = vadd.f32 %v14001_v44, %v3569_v54  ;;  %v12037_v59 = vpop.f32.mrb[122].mxu0  ;;  %v4641_v54 = vpop.f32.mrb[9].mxu1 }
 0x1d6   :  { %v6220_v62 = vadd.f32 %v6219_v56, %v6218_v53  ;;  %v3572_v63 = vpop.f32.mrb[123].mxu0  ;;  %v3581_v4 = vadd.f32 %v14001_v44, %v12037_v59  ;;  %v5514_v9 = vmax.f32 %v3578_v57, 0.0  ;;  %v4626_v53 = vadd.f32 %v14001_v44, %v4625_v21  ;;  %v13214_v59 = vld [vmem:[%s13578_s9 + $0x3c0] sm:$0xff]   ;;  %v12305_v61 = vpop.f32.mrb[10].mxu1 }
 0x1d7   :  { %v5512_v2 = vmax.f32 %v3570_v58, 0.0  ;;  %v3573_v5 = vadd.f32 %v14001_v44, %v3572_v63 }
 0x1d8   :  { %v6222_v7 = vadd.f32 %v6221_v1, %v6220_v62  ;;  %12143 = vmatmul.mubr.msk.bf16.gmra.mrb[228].mxu0 %vm2190_vm0, %v13204_v55  ;;  %v5515_v14 = vmax.f32 %v3581_v4, 0.0  ;;  %v6227_v22 = vsel %vm5968_vm1, %v5514_v9, 0.0  ;;  %v13275_v62 = vld [vmem:[%s13578_s9 + $0x840] sm:$0xff]   ;;  %v14265_v4 = vpop.f32.mrb[11].mxu1 }
 0x1d9   :  { %v6223_v10 = vsel %vm5968_vm1, %v5512_v2, 0.0  ;;  %v5513_v23 = vmax.f32 %v3573_v5, 0.0  ;;  %12146 = vmatprep.mubr.msk.bf16.mxu0 %vm2190_vm0, %v13206_v60  ;;  %v4629_v60 = vadd.f32 %v14001_v44, %v4628_v33  ;;  %v4637_v2 = vadd.f32 %v14001_v44, %v12301_v28  ;;  %v13277_v5 = vld [vmem:[%s13578_s9 + $0x848] sm:$0xff]   ;;  %12442 = vmatprep.mubr.msk.bf16.mxu1 %vm2190_vm0, %v13275_v62 }
 0x1da   :  { %v6224_v12 = vadd.f32 %v6223_v10, %v6222_v7  ;;  %v6229_v35 = vsel %vm5968_vm1, %v5515_v14, 0.0  ;;  %v5778_v14 = vmax.f32 %v4634_v51, 0.0  ;;  %12443 = vmatmul.mubr.msk.bf16.gmra.mrb[148].mxu1 %vm2190_vm0, %v13277_v5 }
 0x1db   :  { %v6225_v15 = vsel %vm5968_vm1, %v5513_v23, 0.0  ;;  %v12040_v16 = vpop.f32.mrb[124].mxu0  ;;  %v5776_v23 = vmax.f32 %v4626_v53, 0.0 }
 0x1dc   :  { %v6226_v18 = vadd.f32 %v6225_v15, %v6224_v12  ;;  %v3585_v19 = vpop.f32.mrb[125].mxu0  ;;  %v3594_v24 = vadd.f32 %v14001_v44, %v12040_v16  ;;  %v6800_v33 = vsel %vm5968_vm1, %v5778_v14, 0.0  ;;  %v13220_v14 = vld [vmem:[%s13578_s9 + $0x3d8] sm:$0xff]  }
 0x1dd   :  { %v3586_v25 = vadd.f32 %v14001_v44, %v3585_v19  ;;  %v12041_v26 = vpop.f32.mrb[126].mxu0  ;;  %v6797_v17 = vsel %vm5968_vm1, %v5776_v23, 0.0 }
 0x1de   :  { %v6228_v30 = vadd.f32 %v6227_v22, %v6226_v18  ;;  %v3588_v32 = vpop.f32.mrb[127].mxu0  ;;  %v3597_v37 = vadd.f32 %v14001_v44, %v12041_v26  ;;  %v5518_v40 = vmax.f32 %v3594_v24, 0.0  ;;  %v5777_v18 = vmax.f32 %v4629_v60, 0.0 }
 0x1df   :  { %v5516_v36 = vmax.f32 %v3586_v25, 0.0  ;;  %v3589_v38 = vadd.f32 %v14001_v44, %v3588_v32  ;;  %v4642_v26 = vadd.f32 %v14001_v44, %v4641_v54  ;;  %v13216_v32 = vld [vmem:[%s13578_s9 + $0x3c8] sm:$0xff]   ;;  %v13281_v54 = vld [vmem:[%s13578_s9 + $0x858] sm:$0xff]  }
 0x1e0   :  { %v6230_v39 = vadd.f32 %v6229_v35, %v6228_v30  ;;  %12147 = vmatmul.mubr.msk.bf16.gmra.mrb[232].mxu0 %vm2190_vm0, %v13208_v20  ;;  %v5519_v45 = vmax.f32 %v3597_v37, 0.0  ;;  %v6235_v55 = vsel %vm5968_vm1, %v5518_v40, 0.0  ;;  %v5779_v20 = vmax.f32 %v4637_v2, 0.0 }
 0x1e1   :  { %v6231_v41 = vsel %vm5968_vm1, %v5516_v36, 0.0  ;;  %v5517_v42 = vmax.f32 %v3589_v38, 0.0  ;;  %12150 = vmatprep.mubr.msk.bf16.mxu0 %vm2190_vm0, %v13210_v27  ;;  %v6798_v25 = vsel %vm5968_vm1, %v5777_v18, 0.0  ;;  %v14281_v27 = vpop.f32.mrb[12].mxu1  ;;  %v5780_v40 = vmax.f32 %v4642_v26, 0.0 }
 0x1e2   :  { %v6232_v43 = vadd.f32 %v6231_v41, %v6230_v39  ;;  %v6237_v7 = vsel %vm5968_vm1, %v5519_v45, 0.0  ;;  %v6799_v34 = vadd.f32 %v6798_v25, %v6797_v17  ;;  %v4657_v35 = vpop.f32.mrb[13].mxu1  ;;  %v13218_v39 = vld [vmem:[%s13578_s9 + $0x3d0] sm:$0xff]   ;;  %v13283_v25 = vld [vmem:[%s13578_s9 + $0x860] sm:$0xff]  }
 0x1e3   :  { %v6233_v46 = vsel %vm5968_vm1, %v5517_v42, 0.0  ;;  %v12044_v47 = vpop.f32.mrb[128].mxu0  ;;  %v14289_v41 = vpop.f32.mrb[14].mxu1 }
 0x1e4   :  { %v6234_v48 = vadd.f32 %v6233_v46, %v6232_v43  ;;  %v3601_v49 = vpop.f32.mrb[129].mxu0  ;;  %v3610_v56 = vadd.f32 %v14001_v44, %v12044_v47  ;;  %v6802_v46 = vsel %vm5968_vm1, %v5779_v20, 0.0  ;;  %v14293_v47 = vpop.f32.mrb[15].mxu1  ;;  %v6801_v53 = vadd.f32 %v6800_v33, %v6799_v34  ;;  %v13285_v34 = vld [vmem:[%s13578_s9 + $0x868] sm:$0xff]  }
 0x1e5   :  { %v3602_v57 = vadd.f32 %v14001_v44, %v3601_v49  ;;  %v12045_v58 = vpop.f32.mrb[130].mxu0 }
 0x1e6   :  { %v6236_v63 = vadd.f32 %v6235_v55, %v6234_v48  ;;  %v3613_v0 = vadd.f32 %v14001_v44, %v12045_v58  ;;  %v3604_v1 = vpop.f32.mrb[131].mxu0  ;;  %v5522_v15 = vmax.f32 %v3610_v56, 0.0  ;;  %v13279_v48 = vld [vmem:[%s13578_s9 + $0x850] sm:$0xff]   ;;  %v4653_v58 = vadd.f32 %v14001_v44, %v12305_v61  ;;  %v14310_v61 = vld [vmem:[%s13703_s13] ss:$0 sm:$0xff] }
 0x1e7   :  { %v5520_v9 = vmax.f32 %v3602_v57, 0.0  ;;  %v3605_v10 = vadd.f32 %v14001_v44, %v3604_v1  ;;  %v4650_v57 = vadd.f32 %v14001_v44, %v14252_v3  ;;  %12446 = vmatprep.mubr.msk.bf16.mxu1 %vm2190_vm0, %v13279_v48  ;;  %v6803_v62 = vadd.f32 %v6802_v46, %v6801_v53 }
 0x1e8   :  { %v14271_v12 = vadd.f32 %v6237_v7, %v6236_v63  ;;  %12151 = vmatmul.mubr.msk.bf16.gmra.mrb[236].mxu0 %vm2190_vm0, %v13212_v50  ;;  %v5523_v19 = vmax.f32 %v3613_v0, 0.0  ;;  %v6248_v36 = vsel %vm5968_vm1, %v5522_v15, 0.0  ;;  %v6804_v63 = vsel %vm5968_vm1, %v5780_v40, 0.0  ;;  %12447 = vmatmul.mubr.msk.bf16.gmra.mrb[152].mxu1 %vm2190_vm0, %v13281_v54  ;;  %v14314_v7 = vpop.f32.mrb[16].mxu1 }
 0x1e9   :  { %v5521_v16 = vmax.f32 %v3605_v10, 0.0  ;;  %12154 = vmatprep.mubr.msk.bf16.mxu0 %vm2190_vm0, %v13214_v59  ;;  %v6245_v21 = vsel %vm5968_vm1, %v5520_v9, 0.0  ;;  %v4645_v5 = vadd.f32 %v14310_v61, %v14265_v4  ;;  %v5782_v15 = vmax.f32 %v4650_v57, 0.0  ;;  %v4673_v17 = vpop.f32.mrb[17].mxu1  ;;  %12450 = vmatprep.mubr.msk.bf16.mxu1 %vm2190_vm0, %v13283_v25 }
 0x1ea   :  { %v6250_v42 = vsel %vm5968_vm1, %v5523_v19, 0.0  ;;  %v4658_v4 = vadd.f32 %v14310_v61, %v4657_v35  ;;  %v4661_v57 = vadd.f32 %v14310_v61, %v14293_v47  ;;  %v4674_v47 = vadd.f32 %v14310_v61, %v4673_v17 }
 0x1eb   :  { %v6246_v22 = vsel %vm5968_vm1, %v5521_v16, 0.0  ;;  %v12048_v24 = vpop.f32.mrb[132].mxu0  ;;  %v5783_v16 = vmax.f32 %v4653_v58, 0.0 }
 0x1ec   :  { %v6247_v28 = vadd.f32 %v6246_v22, %v6245_v21  ;;  %v3626_v29 = vadd.f32 %v14001_v44, %v12048_v24  ;;  %v3617_v30 = vpop.f32.mrb[133].mxu0  ;;  %v13222_v21 = vld [vmem:[%s13578_s9 + $0x3e0] sm:$0xff]   ;;  %v5781_v22 = vmax.f32 %v4645_v5, 0.0  ;;  %v14322_v24 = vpop.f32.mrb[18].mxu1  ;;  %v5784_v48 = vmax.f32 %v4658_v4, 0.0  ;;  %v13226_v5 = vld [vmem:[%s13578_s9 + $0x3f0] sm:$0xff]  }
 0x1ed   :  { %v3618_v37 = vadd.f32 %v14001_v44, %v3617_v30  ;;  %v12049_v38 = vpop.f32.mrb[134].mxu0  ;;  %v14328_v33 = vpop.f32.mrb[19].mxu1 }
 0x1ee   :  { %v6249_v43 = vadd.f32 %v6248_v36, %v6247_v28  ;;  %v3620_v45 = vpop.f32.mrb[135].mxu0  ;;  %v3629_v50 = vadd.f32 %v14001_v44, %v12049_v38  ;;  %v5526_v55 = vmax.f32 %v3626_v29, 0.0  ;;  %v6806_v35 = vsel %vm5968_vm1, %v5781_v22, 0.0  ;;  %v12316_v58 = vpop.f32.mrb[20].mxu1  ;;  %v13289_v22 = vld [vmem:[%s13578_s9 + $0x878] sm:$0xff]  }
 0x1ef   :  { %v5524_v49 = vmax.f32 %v3618_v37, 0.0  ;;  %v3621_v51 = vadd.f32 %v14001_v44, %v3620_v45  ;;  %v6805_v44 = vadd.f32 %v6804_v63, %v6803_v62  ;;  %v13224_v63 = vld [vmem:[%s13578_s9 + $0x3e8] sm:$0xff]  }
 0x1f0   :  { %v6251_v56 = vadd.f32 %v6250_v42, %v6249_v43  ;;  %12155 = vmatmul.mubr.msk.bf16.gmra.mrb[240].mxu0 %vm2190_vm0, %v13216_v32  ;;  %v5527_v1 = vmax.f32 %v3629_v50, 0.0  ;;  %v6256_v18 = vsel %vm5968_vm1, %v5526_v55, 0.0  ;;  %v4666_v32 = vadd.f32 %v14310_v61, %v14281_v27  ;;  %12451 = vmatmul.mubr.msk.bf16.gmra.mrb[156].mxu1 %vm2190_vm0, %v13285_v34 }
 0x1f1   :  { %v6252_v59 = vsel %vm5968_vm1, %v5524_v49, 0.0  ;;  %v5525_v60 = vmax.f32 %v3621_v51, 0.0  ;;  %12158 = vmatprep.mubr.msk.bf16.mxu0 %vm2190_vm0, %v13218_v39  ;;  %v6808_v42 = vsel %vm5968_vm1, %v5782_v15, 0.0  ;;  %v4669_v27 = vadd.f32 %v14310_v61, %v14289_v41 }
 0x1f2   :  { %v6253_v0 = vadd.f32 %v6252_v59, %v6251_v56  ;;  %v6258_v36 = vsel %vm5968_vm1, %v5527_v1, 0.0  ;;  %v6807_v46 = vadd.f32 %v6806_v35, %v6805_v44  ;;  %v6810_v51 = vsel %vm5968_vm1, %v5783_v16, 0.0 }
 0x1f3   :  { %v6254_v2 = vsel %vm5968_vm1, %v5525_v60, 0.0  ;;  %v12052_v3 = vpop.f32.mrb[136].mxu0  ;;  %v5786_v53 = vmax.f32 %v4666_v32, 0.0  ;;  %v5787_v1 = vmax.f32 %v4669_v27, 0.0 }
 0x1f4   :  { %v6255_v9 = vadd.f32 %v6254_v2, %v6253_v0  ;;  %v3642_v10 = vadd.f32 %v14310_v61, %v12052_v3  ;;  %v3633_v23 = vpop.f32.mrb[137].mxu0  ;;  %v6809_v56 = vadd.f32 %v6808_v42, %v6807_v46  ;;  %v6812_v0 = vsel %vm5968_vm1, %v5784_v48, 0.0  ;;  %v4689_v2 = vpop.f32.mrb[21].mxu1 }
 0x1f5   :  { %v3634_v19 = vadd.f32 %v14310_v61, %v3633_v23  ;;  %v12053_v20 = vpop.f32.mrb[138].mxu0  ;;  %v14354_v23 = vpop.f32.mrb[22].mxu1  ;;  %v6818_v32 = vsel %vm5968_vm1, %v5787_v1, 0.0 }
 0x1f6   :  { %v6257_v26 = vadd.f32 %v6256_v18, %v6255_v9  ;;  %v5530_v28 = vmax.f32 %v3642_v10, 0.0  ;;  %v3645_v29 = vadd.f32 %v14310_v61, %v12053_v20  ;;  %v3636_v30 = vpop.f32.mrb[139].mxu0  ;;  %v6811_v9 = vadd.f32 %v6810_v51, %v6809_v56 }
 0x1f7   :  { %v5528_v37 = vmax.f32 %v3634_v19, 0.0  ;;  %v3637_v38 = vadd.f32 %v14310_v61, %v3636_v30  ;;  %v5785_v10 = vmax.f32 %v4661_v57, 0.0  ;;  %v4682_v20 = vadd.f32 %v14310_v61, %v14314_v7  ;;  %v13230_v57 = vld [vmem:[%s13578_s9 + $0x400] sm:$0xff]  }
 0x1f8   :  { %v6259_v39 = vadd.f32 %v6258_v36, %v6257_v26  ;;  %v5531_v40 = vmax.f32 %v3645_v29, 0.0  ;;  %12159 = vmatmul.mubr.msk.bf16.gmra.mrb[244].mxu0 %vm2190_vm0, %v13220_v14  ;;  %v6264_v49 = vsel %vm5968_vm1, %v5530_v28, 0.0  ;;  %v13287_v14 = vld [vmem:[%s13578_s9 + $0x870] sm:$0xff]   ;;  %v6813_v26 = vadd.f32 %v6812_v0, %v6811_v9 }
 0x1f9   :  { %v6260_v43 = vsel %vm5968_vm1, %v5528_v37, 0.0  ;;  %v5529_v45 = vmax.f32 %v3637_v38, 0.0  ;;  %12162 = vmatprep.mubr.msk.bf16.mxu0 %vm2190_vm0, %v13222_v21  ;;  %v14360_v21 = vpop.f32.mrb[23].mxu1  ;;  %v6814_v17 = vsel %vm5968_vm1, %v5785_v10, 0.0  ;;  %12454 = vmatprep.mubr.msk.bf16.mxu1 %vm2190_vm0, %v13287_v14  ;;  %v6816_v30 = vsel %vm5968_vm1, %v5786_v53, 0.0 }
 0x1fa   :  { %v6261_v50 = vadd.f32 %v6260_v43, %v6259_v39  ;;  %v6266_v54 = vsel %vm5968_vm1, %v5531_v40, 0.0  ;;  %v6815_v36 = vadd.f32 %v6814_v17, %v6813_v26  ;;  %v5788_v37 = vmax.f32 %v4674_v47, 0.0  ;;  %12455 = vmatmul.mubr.msk.bf16.gmra.mrb[160].mxu1 %vm2190_vm0, %v13289_v22  ;;  %v14379_v48 = vpop.f32.mrb[24].mxu1 }
 0x1fb   :  { %v6262_v41 = vsel %vm5968_vm1, %v5529_v45, 0.0  ;;  %v12056_v55 = vpop.f32.mrb[140].mxu0  ;;  %v5790_v35 = vmax.f32 %v4682_v20, 0.0  ;;  %v4685_v39 = vadd.f32 %v14310_v61, %v14322_v24  ;;  %v4677_v40 = vadd.f32 %v14310_v61, %v14328_v33  ;;  %v13228_v24 = vld [vmem:[%s13578_s9 + $0x3f8] sm:$0xff]  }
 0x1fc   :  { %v6263_v59 = vadd.f32 %v6262_v41, %v6261_v50  ;;  %v3658_v60 = vadd.f32 %v14310_v61, %v12056_v55  ;;  %v3649_v62 = vpop.f32.mrb[141].mxu0  ;;  %v6817_v45 = vadd.f32 %v6816_v30, %v6815_v36  ;;  %v6820_v46 = vsel %vm5968_vm1, %v5788_v37, 0.0 }
 0x1fd   :  { %v3650_v3 = vadd.f32 %v14310_v61, %v3649_v62  ;;  %v12057_v44 = vpop.f32.mrb[142].mxu0  ;;  %v5789_v53 = vmax.f32 %v4677_v40, 0.0  ;;  %v14384_v33 = vadd.f32 %v14310_v61, %v12316_v58  ;;  %v13232_v40 = vld [vmem:[%s13578_s9 + $0x408] sm:$0xff]  }
 0x1fe   :  { %v6265_v15 = vadd.f32 %v6264_v49, %v6263_v59  ;;  %v5534_v16 = vmax.f32 %v3658_v60, 0.0  ;;  %v3661_v18 = vadd.f32 %v14310_v61, %v12057_v44  ;;  %v3652_v19 = vpop.f32.mrb[143].mxu0  ;;  %v6819_v59 = vadd.f32 %v6818_v32, %v6817_v45 }
 0x1ff   :  { %v5532_v4 = vmax.f32 %v3650_v3, 0.0  ;;  %v3653_v25 = vadd.f32 %v14310_v61, %v3652_v19  ;;  %v4690_v60 = vadd.f32 %v14310_v61, %v4689_v2  ;;  %v5791_v44 = vmax.f32 %v4685_v39, 0.0  ;;  %v13294_v2 = vld [vmem:[%s13578_s9 + $0x888] sm:$0xff]  }
 0x200   :  { %v6267_v28 = vadd.f32 %v6266_v54, %v6265_v15  ;;  %v5535_v29 = vmax.f32 %v3661_v18, 0.0  ;;  %12163 = vmatmul.mubr.msk.bf16.gmra.mrb[248].mxu0 %vm2190_vm0, %v13224_v63  ;;  %v6272_v42 = vsel %vm5968_vm1, %v5534_v16, 0.0  ;;  %v4705_v54 = vpop.f32.mrb[25].mxu1  ;;  %v13292_v63 = vld [vmem:[%s13578_s9 + $0x880] sm:$0xff]   ;;  %v6821_v47 = vadd.f32 %v6820_v46, %v6819_v59 }
 0x201   :  { %v6268_v7 = vsel %vm5968_vm1, %v5532_v4, 0.0  ;;  %v5533_v34 = vmax.f32 %v3653_v25, 0.0  ;;  %12166 = vmatprep.mubr.msk.bf16.mxu0 %vm2190_vm0, %v13226_v5  ;;  %v14390_v62 = vpop.f32.mrb[26].mxu1  ;;  %v6822_v14 = vsel %vm5968_vm1, %v5789_v53, 0.0  ;;  %12458 = vmatprep.mubr.msk.bf16.mxu1 %vm2190_vm0, %v13292_v63  ;;  %v6824_v18 = vsel %vm5968_vm1, %v5790_v35, 0.0 }
 0x202   :  { %v6269_v38 = vadd.f32 %v6268_v7, %v6267_v28  ;;  %v6274_v41 = vsel %vm5968_vm1, %v5535_v29, 0.0  ;;  %v14394_v5 = vpop.f32.mrb[27].mxu1  ;;  %v5794_v19 = vmax.f32 %v14384_v33, 0.0  ;;  %v6823_v4 = vadd.f32 %v6822_v14, %v6821_v47  ;;  %12459 = vmatmul.mubr.msk.bf16.gmra.mrb[164].mxu1 %vm2190_vm0, %v13294_v2 }
 0x203   :  { %v6270_v27 = vsel %vm5968_vm1, %v5533_v34, 0.0  ;;  %v12060_v43 = vpop.f32.mrb[144].mxu0  ;;  %v5792_v25 = vmax.f32 %v4690_v60, 0.0  ;;  %v6826_v17 = vsel %vm5968_vm1, %v5791_v44, 0.0  ;;  %v4701_v28 = vadd.f32 %v14310_v61, %v14354_v23  ;;  %v14419_v37 = vpop.f32.mrb[28].mxu1  ;;  %v13234_v23 = vld [vmem:[%s13578_s9 + $0x410] sm:$0xff]  }
 0x204   :  { %v6271_v49 = vadd.f32 %v6270_v27, %v6269_v38  ;;  %v3674_v50 = vadd.f32 %v14310_v61, %v12060_v43  ;;  %v3665_v51 = vpop.f32.mrb[145].mxu0  ;;  %v4693_v29 = vadd.f32 %v14310_v61, %v14360_v21  ;;  %v6825_v36 = vadd.f32 %v6824_v18, %v6823_v4  ;;  %v4721_v27 = vpop.f32.mrb[29].mxu1 }
 0x205   :  { %v3666_v55 = vadd.f32 %v14310_v61, %v3665_v51  ;;  %v12061_v56 = vpop.f32.mrb[146].mxu0  ;;  %v6828_v21 = vsel %vm5968_vm1, %v5792_v25, 0.0  ;;  %v4706_v51 = vadd.f32 %v14310_v61, %v4705_v54  ;;  %v4717_v44 = vadd.f32 %v14310_v61, %v14390_v62 }
 0x206   :  { %v6273_v0 = vadd.f32 %v6272_v42, %v6271_v49  ;;  %v5538_v1 = vmax.f32 %v3674_v50, 0.0  ;;  %v3677_v3 = vadd.f32 %v14310_v61, %v12061_v56  ;;  %v3668_v58 = vpop.f32.mrb[147].mxu0  ;;  %v5793_v42 = vmax.f32 %v4693_v29, 0.0  ;;  %v13290_v49 = vld [vmem:[%s14401_s17] sm:$0xff]   ;;  %v14433_v56 = vpop.f32.mrb[30].mxu1  ;;  %v13236_v29 = vld [vmem:[%s13578_s9 + $0x418] sm:$0xff]  }
 0x207   :  { %v5536_v9 = vmax.f32 %v3666_v55, 0.0  ;;  %v3669_v10 = vadd.f32 %v14310_v61, %v3668_v58  ;;  %v6827_v46 = vadd.f32 %v6826_v17, %v6825_v36  ;;  %v14429_v50 = vadd.f32 %v14310_v61, %v14379_v48  ;;  %12490 = vmatprep.subr.bf16.mxu1 %v13290_v49  ;;  %v14438_v48 = vpop.f32.mrb[31].mxu1  ;;  %s13534_s17 = smov 80  }
 0x208   :  { %v6275_v15 = vadd.f32 %v6274_v41, %v6273_v0  ;;  %v5539_v16 = vmax.f32 %v3677_v3, 0.0  ;;  %12167 = vmatmul.mubr.msk.bf16.gmra.mrb[252].mxu0 %vm2190_vm0, %v13228_v24  ;;  %v6280_v30 = vsel %vm5968_vm1, %v5538_v1, 0.0  ;;  %v5795_v55 = vmax.f32 %v4701_v28, 0.0  ;;  %v13298_v1 = vld [vmem:[%s13578_s9 + $0x898] sm:$0xff]   ;;  %12491 = vmatpush3.bf16.msra.mxu1 %v13290_v49  ;;  %v14456_v25 = vpop.f32.mrb[32].mxu1 }
 0x209   :  { %v6276_v20 = vsel %vm5968_vm1, %v5536_v9, 0.0  ;;  %v5537_v22 = vmax.f32 %v3669_v10, 0.0  ;;  %12170 = vmatprep.mubr.msk.bf16.mxu0 %vm2190_vm0, %v13230_v57  ;;  %v13296_v57 = vld [vmem:[%s13578_s9 + $0x890] sm:$0xff]   ;;  %v6829_v63 = vadd.f32 %v6828_v21, %v6827_v46  ;;  %v6830_v0 = vsel %vm5968_vm1, %v5793_v42, 0.0 }
 0x20a   :  { %v6277_v26 = vadd.f32 %v6276_v20, %v6275_v15  ;;  %v6282_v32 = vsel %vm5968_vm1, %v5539_v16, 0.0  ;;  %v6832_v58 = vsel %vm5968_vm1, %v5794_v19, 0.0  ;;  %v5796_v14 = vmax.f32 %v4706_v51, 0.0  ;;  %12462 = vmatprep.mubr.msk.bf16.mxu1 %vm2190_vm0, %v13296_v57 }
 0x20b   :  { %v6278_v7 = vsel %vm5968_vm1, %v5537_v22, 0.0  ;;  %v12064_v34 = vpop.f32.mrb[148].mxu0  ;;  %v6831_v47 = vadd.f32 %v6830_v0, %v6829_v63  ;;  %v6834_v16 = vsel %vm5968_vm1, %v5795_v55, 0.0  ;;  %v5798_v18 = vmax.f32 %v14429_v50, 0.0  ;;  %12463 = vmatmul.mubr.msk.bf16.gmra.mrb[168].mxu1 %vm2190_vm0, %v13298_v1  ;;  %v13302_v50 = vld [vmem:[%s13578_s9 + $0x8a8] sm:$0xff]  }
 0x20c   :  { %v6279_v38 = vadd.f32 %v6278_v7, %v6277_v26  ;;  %v3690_v35 = vadd.f32 %v14310_v61, %v12064_v34  ;;  %v3681_v39 = vpop.f32.mrb[149].mxu0  ;;  %v4709_v4 = vadd.f32 %v14310_v61, %v14394_v5  ;;  %v4737_v7 = vpop.f32.mrb[33].mxu1  ;;  %v4722_v5 = vadd.f32 %v14310_v61, %v4721_v27 }
 0x20d   :  { %v3682_v43 = vadd.f32 %v14310_v61, %v3681_v39  ;;  %v12065_v45 = vpop.f32.mrb[150].mxu0  ;;  %v6833_v22 = vadd.f32 %v6832_v58, %v6831_v47  ;;  %v4730_v46 = vadd.f32 %v14310_v61, %v14419_v37  ;;  %v6840_v55 = vsel %vm5968_vm1, %v5798_v18, 0.0 }
 0x20e   :  { %v6281_v24 = vadd.f32 %v6280_v30, %v6279_v38  ;;  %v5542_v53 = vmax.f32 %v3690_v35, 0.0  ;;  %v3693_v33 = vadd.f32 %v14310_v61, %v12065_v45  ;;  %v3684_v41 = vpop.f32.mrb[151].mxu0  ;;  %v6836_v30 = vsel %vm5968_vm1, %v5796_v14, 0.0  ;;  %v13238_v38 = vld [vmem:[%s13578_s9 + $0x420] sm:$0xff]  }
 0x20f   :  { %v5540_v59 = vmax.f32 %v3682_v43, 0.0  ;;  %v3685_v60 = vadd.f32 %v14310_v61, %v3684_v41  ;;  %v6835_v35 = vadd.f32 %v6834_v16, %v6833_v22  ;;  %v5797_v39 = vmax.f32 %v4709_v4, 0.0  ;;  %v13242_v22 = vld [vmem:[%s13578_s9 + $0x430] sm:$0xff]  }
 0x210   :  { %v6283_v54 = vadd.f32 %v6282_v32, %v6281_v24  ;;  %v5543_v3 = vmax.f32 %v3693_v33, 0.0  ;;  %12171 = vmatmul.mubr.msk.bf16.gmra.mrb[0].mxu0 %vm2190_vm0, %v13232_v40  ;;  %v6288_v2 = vsel %vm5968_vm1, %v5542_v53, 0.0  ;;  %v5799_v32 = vmax.f32 %v4717_v44, 0.0  ;;  %v14464_v40 = vpop.f32.mrb[34].mxu1 }
 0x211   :  { %v6284_v9 = vsel %vm5968_vm1, %v5540_v59, 0.0  ;;  %v5541_v10 = vmax.f32 %v3685_v60, 0.0  ;;  %12174 = vmatprep.mubr.msk.bf16.mxu0 %vm2190_vm0, %v13234_v23  ;;  %v13300_v23 = vld [vmem:[%s13578_s9 + $0x8a0] sm:$0xff]   ;;  %v14470_v49 = vpop.f32.mrb[35].mxu1  ;;  %v6837_v53 = vadd.f32 %v6836_v30, %v6835_v35  ;;  %v6838_v27 = vsel %vm5968_vm1, %v5797_v39, 0.0  ;;  %v13306_v35 = vld [vmem:[%s13578_s9 + $0x8b8] sm:$0xff]  }
 0x212   :  { %v6285_v15 = vadd.f32 %v6284_v9, %v6283_v54  ;;  %v6290_v62 = vsel %vm5968_vm1, %v5543_v3, 0.0  ;;  %12466 = vmatprep.mubr.msk.bf16.mxu1 %vm2190_vm0, %v13300_v23  ;;  %v5800_v60 = vmax.f32 %v4722_v5, 0.0  ;;  %v6842_v0 = vsel %vm5968_vm1, %v5799_v32, 0.0  ;;  %v14488_v47 = vpop.f32.mrb[36].mxu1 }
 0x213   :  { %v6286_v19 = vsel %vm5968_vm1, %v5541_v10, 0.0  ;;  %v12068_v20 = vpop.f32.mrb[152].mxu0  ;;  %v6839_v59 = vadd.f32 %v6838_v27, %v6837_v53  ;;  %v4733_v1 = vadd.f32 %v14310_v61, %v14433_v56  ;;  %v4725_v54 = vadd.f32 %v14310_v61, %v14438_v48  ;;  %12467 = vmatmul.mubr.msk.bf16.gmra.mrb[172].mxu1 %vm2190_vm0, %v13302_v50  ;;  %v4753_v18 = vpop.f32.mrb[37].mxu1 }
 0x214   :  { %v6287_v26 = vadd.f32 %v6286_v19, %v6285_v15  ;;  %v3706_v17 = vadd.f32 %v14310_v61, %v12068_v20  ;;  %v3697_v28 = vpop.f32.mrb[153].mxu0  ;;  %v5802_v10 = vmax.f32 %v4730_v46, 0.0  ;;  %v13240_v15 = vld [vmem:[%s13578_s9 + $0x428] sm:$0xff]   ;;  %v6844_v48 = vsel %vm5968_vm1, %v5800_v60, 0.0 }
 0x215   :  { %v3698_v34 = vadd.f32 %v14310_v61, %v3697_v28  ;;  %v12069_v36 = vpop.f32.mrb[154].mxu0  ;;  %v6841_v9 = vadd.f32 %v6840_v55, %v6839_v59  ;;  %v5801_v16 = vmax.f32 %v4725_v54, 0.0  ;;  %v13304_v28 = vld [vmem:[%s13578_s9 + $0x8b0] sm:$0xff]   ;;  %v4749_v27 = vadd.f32 %v14310_v61, %v14464_v40 }
 0x216   :  { %v6289_v21 = vadd.f32 %v6288_v2, %v6287_v26  ;;  %v5546_v42 = vmax.f32 %v3706_v17, 0.0  ;;  %v3709_v43 = vadd.f32 %v14310_v61, %v12069_v36  ;;  %v3700_v45 = vpop.f32.mrb[155].mxu0  ;;  %v4738_v26 = vadd.f32 %v14310_v61, %v4737_v7  ;;  %v14497_v17 = vpop.f32.mrb[38].mxu1  ;;  %12470 = vmatprep.mubr.msk.bf16.mxu1 %vm2190_vm0, %v13304_v28 }
 0x217   :  { %v5544_v51 = vmax.f32 %v3698_v34, 0.0  ;;  %v3701_v24 = vadd.f32 %v14310_v61, %v3700_v45  ;;  %v6843_v4 = vadd.f32 %v6842_v0, %v6841_v9  ;;  %v5803_v34 = vmax.f32 %v4733_v1, 0.0  ;;  %v13244_v1 = vld [vmem:[%s13578_s9 + $0x438] sm:$0xff]  }
 0x218   :  { %v6291_v33 = vadd.f32 %v6290_v62, %v6289_v21  ;;  %v5547_v41 = vmax.f32 %v3709_v43, 0.0  ;;  %12175 = vmatmul.mubr.msk.bf16.gmra.mrb[4].mxu0 %vm2190_vm0, %v13236_v29  ;;  %v6296_v3 = vsel %vm5968_vm1, %v5546_v42, 0.0  ;;  %v4746_v36 = vadd.f32 %v14310_v61, %v14456_v25 }
 0x219   :  { %v6292_v57 = vsel %vm5968_vm1, %v5544_v51, 0.0  ;;  %v5545_v37 = vmax.f32 %v3701_v24, 0.0  ;;  %12178 = vmatprep.mubr.msk.bf16.mxu0 %vm2190_vm0, %v13238_v38  ;;  %v14503_v38 = vpop.f32.mrb[39].mxu1  ;;  %v6845_v23 = vadd.f32 %v6844_v48, %v6843_v4  ;;  %v6846_v7 = vsel %vm5968_vm1, %v5801_v16, 0.0 }
 0x21a   :  { %v6293_v63 = vadd.f32 %v6292_v57, %v6291_v33  ;;  %v6298_v62 = vsel %vm5968_vm1, %v5547_v41, 0.0  ;;  %v6848_v45 = vsel %vm5968_vm1, %v5802_v10, 0.0  ;;  %v5804_v51 = vmax.f32 %v4738_v26, 0.0  ;;  %v14520_v59 = vpop.f32.mrb[40].mxu1  ;;  %v13246_v10 = vld [vmem:[%s13578_s9 + $0x440] sm:$0xff]  }
 0x21b   :  { %v6294_v58 = vsel %vm5968_vm1, %v5545_v37, 0.0  ;;  %v12072_v44 = vpop.f32.mrb[156].mxu0  ;;  %v6847_v50 = vadd.f32 %v6846_v7, %v6845_v23  ;;  %v6850_v53 = vsel %vm5968_vm1, %v5803_v34, 0.0  ;;  %v4741_v33 = vadd.f32 %v14310_v61, %v14470_v49  ;;  %12471 = vmatmul.mubr.msk.bf16.gmra.mrb[176].mxu1 %vm2190_vm0, %v13306_v35  ;;  %v14525_v49 = vpop.f32.mrb[41].mxu1 }
 0x21c   :  { %v6295_v14 = vadd.f32 %v6294_v58, %v6293_v63  ;;  %v3722_v2 = vadd.f32 %v14310_v61, %v12072_v44  ;;  %v3713_v56 = vpop.f32.mrb[157].mxu0  ;;  %v5806_v37 = vmax.f32 %v4746_v36, 0.0  ;;  %v6852_v40 = vsel %vm5968_vm1, %v5804_v51, 0.0  ;;  %v13248_v51 = vld [vmem:[%s13578_s9 + $0x448] sm:$0xff]  }
 0x21d   :  { %v3714_v19 = vadd.f32 %v14310_v61, %v3713_v56  ;;  %v12073_v20 = vpop.f32.mrb[158].mxu0  ;;  %v6849_v57 = vadd.f32 %v6848_v45, %v6847_v50  ;;  %v5805_v54 = vmax.f32 %v4741_v33, 0.0  ;;  %v13308_v56 = vld [vmem:[%s13578_s9 + $0x8c0] sm:$0xff]   ;;  %v4757_v23 = vadd.f32 %v14310_v61, %v14503_v38 }
 0x21e   :  { %v6297_v29 = vadd.f32 %v6296_v3, %v6295_v14  ;;  %v3725_v30 = vadd.f32 %v14310_v61, %v12073_v20  ;;  %v3716_v32 = vpop.f32.mrb[159].mxu0  ;;  %v5550_v21 = vmax.f32 %v3722_v2, 0.0  ;;  %v14531_v2 = vpop.f32.mrb[42].mxu1  ;;  %12474 = vmatprep.mubr.msk.bf16.mxu1 %vm2190_vm0, %v13308_v56  ;;  %v6856_v34 = vsel %vm5968_vm1, %v5806_v37, 0.0 }
 0x21f   :  { %v5548_v39 = vmax.f32 %v3714_v19, 0.0  ;;  %v3717_v5 = vadd.f32 %v14310_v61, %v3716_v32  ;;  %v6851_v14 = vadd.f32 %v6850_v53, %v6849_v57  ;;  %v4754_v19 = vadd.f32 %v14310_v61, %v4753_v18  ;;  %v14536_v20 = vpop.f32.mrb[43].mxu1 }
 0x220   :  { %v6299_v42 = vadd.f32 %v6298_v62, %v6297_v29  ;;  %v5551_v43 = vmax.f32 %v3725_v30, 0.0  ;;  %12179 = vmatmul.mubr.msk.bf16.gmra.mrb[8].mxu0 %vm2190_vm0, %v13240_v15  ;;  %v6304_v3 = vsel %vm5968_vm1, %v5550_v21, 0.0  ;;  %v5807_v62 = vmax.f32 %v4749_v27, 0.0  ;;  %v14555_v45 = vpop.f32.mrb[44].mxu1 }
 0x221   :  { %v6300_v25 = vsel %vm5968_vm1, %v5548_v39, 0.0  ;;  %v5549_v46 = vmax.f32 %v3717_v5, 0.0  ;;  %12182 = vmatprep.mubr.msk.bf16.mxu0 %vm2190_vm0, %v13242_v22  ;;  %v13310_v22 = vld [vmem:[%s13578_s9 + $0x8c8] sm:$0xff]   ;;  %v6853_v28 = vadd.f32 %v6852_v40, %v6851_v14  ;;  %v6854_v29 = vsel %vm5968_vm1, %v5805_v54, 0.0  ;;  %v14561_v53 = vpop.f32.mrb[45].mxu1 }
 0x222   :  { %v6301_v24 = vadd.f32 %v6300_v25, %v6299_v42  ;;  %v6306_v58 = vsel %vm5968_vm1, %v5551_v43, 0.0  ;;  %v4762_v18 = vadd.f32 %v14310_v61, %v14488_v47  ;;  %v6858_v5 = vsel %vm5968_vm1, %v5807_v62, 0.0 }
 0x223   :  { %v6302_v41 = vsel %vm5968_vm1, %v5549_v46, 0.0  ;;  %v12076_v55 = vpop.f32.mrb[160].mxu0  ;;  %v6855_v35 = vadd.f32 %v6854_v29, %v6853_v28  ;;  %12475 = vmatmul.mubr.msk.bf16.gmra.mrb[180].mxu1 %vm2190_vm0, %v13310_v22  ;;  %v5808_v43 = vmax.f32 %v4754_v19, 0.0  ;;  %v5809_v37 = vmax.f32 %v4757_v23, 0.0 }
 0x224   :  { %v6303_v60 = vadd.f32 %v6302_v41, %v6301_v24  ;;  %v3738_v63 = vadd.f32 %v14310_v61, %v12076_v55  ;;  %v3729_v0 = vpop.f32.mrb[161].mxu0  ;;  %v5810_v38 = vmax.f32 %v4762_v18, 0.0  ;;  %v4765_v24 = vadd.f32 %v14310_v61, %v14497_v17  ;;  %v13250_v55 = vld [vmem:[%s13578_s9 + $0x450] sm:$0xff]   ;;  %v13314_v17 = vld [vmem:[%s13578_s9 + $0x8d8] sm:$0xff]  }
 0x225   :  { %v3730_v44 = vadd.f32 %v14310_v61, %v3729_v0  ;;  %v12077_v9 = vpop.f32.mrb[162].mxu0  ;;  %v6857_v47 = vadd.f32 %v6856_v34, %v6855_v35  ;;  %v6867_v62 = vsel %vm5968_vm1, %v5809_v37, 0.0  ;;  %v13252_v35 = vld [vmem:[%s13578_s9 + $0x458] sm:$0xff]  }
 0x226   :  { %v6305_v15 = vadd.f32 %v6304_v3, %v6303_v60  ;;  %v3741_v48 = vadd.f32 %v14310_v61, %v12077_v9  ;;  %v3732_v16 = vpop.f32.mrb[163].mxu0  ;;  %v5554_v32 = vmax.f32 %v3738_v63, 0.0  ;;  %v14568_v60 = vpop.f32.mrb[46].mxu1  ;;  %v13312_v63 = vld [vmem:[%s13578_s9 + $0x8d0] sm:$0xff]   ;;  %v6866_v9 = vsel %vm5968_vm1, %v5808_v43, 0.0 }
 0x227   :  { %v5552_v4 = vmax.f32 %v3730_v44, 0.0  ;;  %v3733_v26 = vadd.f32 %v14310_v61, %v3732_v16  ;;  %v14566_v57 = vadd.f32 %v6858_v5, %v6857_v47  ;;  %v14572_v54 = vpop.f32.mrb[47].mxu1  ;;  %12478 = vmatprep.mubr.msk.bf16.mxu1 %vm2190_vm0, %v13312_v63  ;;  %v6869_v14 = vsel %vm5968_vm1, %v5810_v38, 0.0  ;;  %v13254_v47 = vld [vmem:[%s13578_s9 + $0x460] sm:$0xff]  }
 0x228   :  { %v14542_v30 = vadd.f32 %v6306_v58, %v6305_v15  ;;  %12183 = vmatmul.mubr.msk.bf16.gmra.mrb[12].mxu0 %vm2190_vm0, %v13244_v1  ;;  %v5555_v39 = vmax.f32 %v3741_v48, 0.0  ;;  %v6317_v25 = vsel %vm5968_vm1, %v5554_v32, 0.0  ;;  %v5811_v56 = vmax.f32 %v4765_v24, 0.0  ;;  %v14590_v34 = vpop.f32.mrb[48].mxu1 }
 0x229   :  { %v5553_v36 = vmax.f32 %v3733_v26, 0.0  ;;  %12186 = vmatprep.mubr.msk.bf16.mxu0 %vm2190_vm0, %v13246_v10  ;;  %v6314_v7 = vsel %vm5968_vm1, %v5552_v4, 0.0  ;;  %16805 = vst [vmem:[#allocation7_spill] sm:$0xff] %v14566_v57  ;;  %v6868_v4 = vadd.f32 %v6867_v62, %v6866_v9  ;;  %v4778_v26 = vadd.f32 %v14310_v61, %v14520_v59  ;;  %v14594_v59 = vpop.f32.mrb[49].mxu1 }
 0x22a   :  { %v6319_v3 = vsel %vm5968_vm1, %v5555_v39, 0.0  ;;  %v4770_v32 = vadd.f32 %v14310_v61, %v14525_v49  ;;  %v6871_v39 = vsel %vm5968_vm1, %v5811_v56, 0.0  ;;  %v14600_v43 = vpop.f32.mrb[50].mxu1 }
 0x22b   :  { %v6315_v21 = vsel %vm5968_vm1, %v5553_v36, 0.0  ;;  %v12080_v42 = vpop.f32.mrb[164].mxu0  ;;  %12479 = vmatmul.mubr.msk.bf16.gmra.mrb[184].mxu1 %vm2190_vm0, %v13314_v17  ;;  %v6870_v5 = vadd.f32 %v6869_v14, %v6868_v4  ;;  %v5814_v38 = vmax.f32 %v4778_v26, 0.0  ;;  %v14604_v24 = vpop.f32.mrb[51].mxu1  ;;  %v4794_v26 = vadd.f32 %v14310_v61, %v14555_v45 }
 0x22c   :  { %v6316_v46 = vadd.f32 %v6315_v21, %v6314_v7  ;;  %v3745_v50 = vpop.f32.mrb[165].mxu0  ;;  %v3754_v27 = vadd.f32 %v14310_v61, %v12080_v42  ;;  %v5812_v49 = vmax.f32 %v4770_v32, 0.0 }
 0x22d   :  { %v3746_v33 = vadd.f32 %v14310_v61, %v3745_v50  ;;  %v12081_v41 = vpop.f32.mrb[166].mxu0  ;;  %v6872_v37 = vadd.f32 %v6871_v39, %v6870_v5  ;;  %v6877_v56 = vsel %vm5968_vm1, %v5814_v38, 0.0  ;;  %v13320_v5 = vld [vmem:[%s13578_s9 + $0x8f0] sm:$0xff]  }
 0x22e   :  { %v6318_v0 = vadd.f32 %v6317_v25, %v6316_v46  ;;  %v3757_v1 = vadd.f32 %v14310_v61, %v12081_v41  ;;  %v3748_v40 = vpop.f32.mrb[167].mxu0  ;;  %v5558_v15 = vmax.f32 %v3754_v27, 0.0  ;;  %v13316_v25 = vld [vmem:[%s13578_s9 + $0x8e0] sm:$0xff]   ;;  %v13318_v27 = vld [vmem:[%s13578_s9 + $0x8e8] sm:$0xff]  }
 0x22f   :  { %v5556_v58 = vmax.f32 %v3746_v33, 0.0  ;;  %v3749_v44 = vadd.f32 %v14310_v61, %v3748_v40  ;;  %12482 = vmatprep.mubr.msk.bf16.mxu1 %vm2190_vm0, %v13316_v25 }
 0x230   :  { %v6320_v10 = vadd.f32 %v6319_v3, %v6318_v0  ;;  %12187 = vmatmul.mubr.msk.bf16.gmra.mrb[16].mxu0 %vm2190_vm0, %v13248_v51  ;;  %v5559_v22 = vmax.f32 %v3757_v1, 0.0  ;;  %v6325_v23 = vsel %vm5968_vm1, %v5558_v15, 0.0  ;;  %v4781_v0 = vadd.f32 %v14310_v61, %v14531_v2 }
 0x231   :  { %v6321_v48 = vsel %vm5968_vm1, %v5556_v58, 0.0  ;;  %v5557_v16 = vmax.f32 %v3749_v44, 0.0  ;;  %12190 = vmatprep.mubr.msk.bf16.mxu0 %vm2190_vm0, %v13250_v55  ;;  %v6873_v3 = vsel %vm5968_vm1, %v5812_v49, 0.0  ;;  %v6170_v58 = vrot.slane %v14118_v31, 4  ;;  %v13322_v49 = vld [vmem:[%s13578_s9 + $0x8f8] sm:$0xff]  }
 0x232   :  { %v6322_v19 = vadd.f32 %v6321_v48, %v6320_v10  ;;  %v6327_v46 = vsel %vm5968_vm1, %v5559_v22, 0.0  ;;  %v6874_v9 = vadd.f32 %v6873_v3, %v6872_v37  ;;  %v4773_v15 = vadd.f32 %v14310_v61, %v14536_v20  ;;  %v14622_v48 = vpop.f32.mrb[52].mxu1  ;;  %v13256_v22 = vld [vmem:[%s13578_s9 + $0x468] sm:$0xff]  }
 0x233   :  { %v6323_v28 = vsel %vm5968_vm1, %v5557_v16, 0.0  ;;  %v12084_v29 = vpop.f32.mrb[168].mxu0  ;;  %12483 = vmatmul.mubr.msk.bf16.gmra.mrb[188].mxu1 %vm2190_vm0, %v13318_v27  ;;  %v5815_v4 = vmax.f32 %v4781_v0, 0.0 }
 0x234   :  { %v6324_v18 = vadd.f32 %v6323_v28, %v6322_v19  ;;  %v3761_v36 = vpop.f32.mrb[169].mxu0  ;;  %v3770_v7 = vadd.f32 %v14310_v61, %v12084_v29  ;;  %v14628_v28 = vpop.f32.mrb[53].mxu1  ;;  %12486 = vmatprep.mubr.msk.bf16.mxu1 %vm2190_vm0, %v13320_v5 }
 0x235   :  { %v3762_v21 = vadd.f32 %v14310_v61, %v3761_v36  ;;  %v12085_v42 = vpop.f32.mrb[170].mxu0  ;;  %v5813_v36 = vmax.f32 %v4773_v15, 0.0  ;;  %v14635_v39 = vpop.f32.mrb[54].mxu1  ;;  %v6879_v27 = vsel %vm5968_vm1, %v5815_v4, 0.0 }
 0x236   :  { %v6326_v50 = vadd.f32 %v6325_v23, %v6324_v18  ;;  %v3764_v51 = vpop.f32.mrb[171].mxu0  ;;  %v3773_v41 = vadd.f32 %v14310_v61, %v12085_v42  ;;  %v5562_v1 = vmax.f32 %v3770_v7, 0.0  ;;  %v13258_v18 = vld [vmem:[%s13578_s9 + $0x470] sm:$0xff]   ;;  %v5818_v42 = vmax.f32 %v4794_v26, 0.0 }
 0x237   :  { %v5560_v33 = vmax.f32 %v3762_v21, 0.0  ;;  %v3765_v55 = vadd.f32 %v14310_v61, %v3764_v51  ;;  %v6875_v51 = vsel %vm5968_vm1, %v5813_v36, 0.0 }
 0x238   :  { %v6328_v63 = vadd.f32 %v6327_v46, %v6326_v50  ;;  %12191 = vmatmul.mubr.msk.bf16.gmra.mrb[20].mxu0 %vm2190_vm0, %v13252_v35  ;;  %v5563_v10 = vmax.f32 %v3773_v41, 0.0  ;;  %v6333_v29 = vsel %vm5968_vm1, %v5562_v1, 0.0  ;;  %v4786_v35 = vadd.f32 %v14310_v61, %v14561_v53 }
 0x239   :  { %v6329_v40 = vsel %vm5968_vm1, %v5560_v33, 0.0  ;;  %v5561_v17 = vmax.f32 %v3765_v55, 0.0  ;;  %12194 = vmatprep.mubr.msk.bf16.mxu0 %vm2190_vm0, %v13254_v47  ;;  %v14639_v47 = vpop.f32.mrb[55].mxu1  ;;  %v6876_v33 = vadd.f32 %v6875_v51, %v6874_v9 }
 0x23a   :  { %v6330_v44 = vadd.f32 %v6329_v40, %v6328_v63  ;;  %v6335_v25 = vsel %vm5968_vm1, %v5563_v10, 0.0  ;;  %v5816_v63 = vmax.f32 %v4786_v35, 0.0  ;;  %v6885_v40 = vsel %vm5968_vm1, %v5818_v42, 0.0 }
 0x23b   :  { %v6331_v14 = vsel %vm5968_vm1, %v5561_v17, 0.0  ;;  %v12088_v2 = vpop.f32.mrb[172].mxu0  ;;  %v6878_v1 = vadd.f32 %v6877_v56, %v6876_v33  ;;  %v4797_v17 = vadd.f32 %v14310_v61, %v14568_v60  ;;  %12487 = vmatmul.mubr.msk.bf16.gmra.mrb[192].mxu1 %vm2190_vm0, %v13322_v49  ;;  %v4789_v10 = vadd.f32 %v14310_v61, %v14572_v54 }
 0x23c   :  { %v6332_v16 = vadd.f32 %v6331_v14, %v6330_v44  ;;  %v3786_v62 = vadd.f32 %v14310_v61, %v12088_v2  ;;  %v3777_v19 = vpop.f32.mrb[173].mxu0  ;;  %v6881_v9 = vsel %vm5968_vm1, %v5816_v63, 0.0  ;;  %v4810_v14 = vadd.f32 %v14310_v61, %v14590_v34  ;;  %v14661_v2 = vpop.f32.mrb[56].mxu1 }
 0x23d   :  { %v3778_v32 = vadd.f32 %v14310_v61, %v3777_v19  ;;  %v12089_v20 = vpop.f32.mrb[174].mxu0  ;;  %v5819_v19 = vmax.f32 %v4797_v17, 0.0  ;;  %v4802_v34 = vadd.f32 %v14310_v61, %v14594_v59  ;;  %v14690_v17 = vld [vmem:[%s13703_s13] ss:$0 sm:$0xff] }
 0x23e   :  { %v6334_v23 = vadd.f32 %v6333_v29, %v6332_v16  ;;  %v5566_v7 = vmax.f32 %v3786_v62, 0.0  ;;  %v3789_v45 = vadd.f32 %v14310_v61, %v12089_v20  ;;  %v3780_v21 = vpop.f32.mrb[175].mxu0  ;;  %v13260_v16 = vld [vmem:[%s13578_s9 + $0x478] sm:$0xff]   ;;  %v6880_v62 = vadd.f32 %v6879_v27, %v6878_v1  ;;  %v13262_v29 = vld [vmem:[%s13578_s9 + $0x480] sm:$0xff]  }
 0x23f   :  { %v5564_v46 = vmax.f32 %v3778_v32, 0.0  ;;  %v3781_v50 = vadd.f32 %v14310_v61, %v3780_v21  ;;  %v5817_v32 = vmax.f32 %v4789_v10, 0.0  ;;  %v5822_v54 = vmax.f32 %v4810_v14, 0.0 }
 0x240   :  { %v6341_v53 = vsel %vm5968_vm1, %v5566_v7, 0.0  ;;  %v6336_v38 = vadd.f32 %v6335_v25, %v6334_v23  ;;  %12195 = vmatmul.mubr.msk.bf16.gmra.mrb[24].mxu0 %vm2190_vm0, %v13256_v22  ;;  %v5567_v55 = vmax.f32 %v3789_v45, 0.0  ;;  %v14665_v22 = vpop.f32.mrb[57].mxu1  ;;  %v6882_v23 = vadd.f32 %v6881_v9, %v6880_v62  ;;  %v13266_v62 = vld [vmem:[%s13578_s9 + $0x490] sm:$0xff]  }
 0x241   :  { %v6337_v41 = vsel %vm5968_vm1, %v5564_v46, 0.0  ;;  %v5565_v37 = vmax.f32 %v3781_v50, 0.0  ;;  %12198 = vmatprep.mubr.msk.bf16.mxu0 %vm2190_vm0, %v13258_v18  ;;  %v14671_v20 = vpop.f32.mrb[58].mxu1  ;;  %v6883_v49 = vsel %vm5968_vm1, %v5817_v32, 0.0  ;;  %v6887_v46 = vsel %vm5968_vm1, %v5819_v19, 0.0 }
 0x242   :  { %v6338_v0 = vadd.f32 %v6337_v41, %v6336_v38  ;;  %v14674_v7 = vpop.f32.mrb[59].mxu1  ;;  %v6343_v45 = vsel %vm5968_vm1, %v5567_v55, 0.0  ;;  %v6884_v50 = vadd.f32 %v6883_v49, %v6882_v23  ;;  %v5820_v27 = vmax.f32 %v4802_v34, 0.0 }
 0x243   :  { %v6339_v3 = vsel %vm5968_vm1, %v5565_v37, 0.0  ;;  %v12092_v44 = vpop.f32.mrb[176].mxu0  ;;  %v6893_v55 = vsel %vm5968_vm1, %v5822_v54, 0.0  ;;  %v4813_v37 = vadd.f32 %v14310_v61, %v14600_v43  ;;  %v13264_v43 = vld [vmem:[%s13578_s9 + $0x488] sm:$0xff]  }
 0x244   :  { %v6340_v56 = vadd.f32 %v6339_v3, %v6338_v0  ;;  %v3802_v15 = vadd.f32 %v14310_v61, %v12092_v44  ;;  %v3793_v60 = vpop.f32.mrb[177].mxu0  ;;  %v6886_v41 = vadd.f32 %v6885_v40, %v6884_v50  ;;  %v6889_v1 = vsel %vm5968_vm1, %v5820_v27, 0.0  ;;  %v14696_v40 = vpop.f32.mrb[60].mxu1 }
 0x245   :  { %v3794_v4 = vadd.f32 %v14310_v61, %v3793_v60  ;;  %v12093_v26 = vpop.f32.mrb[178].mxu0  ;;  %v4805_v3 = vadd.f32 %v14690_v17, %v14604_v24  ;;  %v4826_v44 = vadd.f32 %v14690_v17, %v14622_v48  ;;  %v4818_v48 = vadd.f32 %v14690_v17, %v14628_v28 }
 0x246   :  { %v6342_v18 = vadd.f32 %v6341_v53, %v6340_v56  ;;  %v5570_v36 = vmax.f32 %v3802_v15, 0.0  ;;  %v3805_v35 = vadd.f32 %v14310_v61, %v12093_v26  ;;  %v3796_v5 = vpop.f32.mrb[179].mxu0  ;;  %v6888_v14 = vadd.f32 %v6887_v46, %v6886_v41  ;;  %v14700_v15 = vpop.f32.mrb[61].mxu1 }
 0x247   :  { %v5568_v21 = vmax.f32 %v3794_v4, 0.0  ;;  %v3797_v42 = vadd.f32 %v14310_v61, %v3796_v5  ;;  %v5823_v56 = vmax.f32 %v4813_v37, 0.0  ;;  %v5821_v19 = vmax.f32 %v4805_v3, 0.0  ;;  %v14706_v4 = vpop.f32.mrb[62].mxu1 }
 0x248   :  { %v6349_v25 = vsel %vm5968_vm1, %v5570_v36, 0.0  ;;  %v6344_v59 = vadd.f32 %v6343_v45, %v6342_v18  ;;  %12199 = vmatmul.mubr.msk.bf16.gmra.mrb[28].mxu0 %vm2190_vm0, %v13260_v16  ;;  %v5571_v53 = vmax.f32 %v3805_v35, 0.0  ;;  %v5826_v24 = vmax.f32 %v4826_v44, 0.0  ;;  %v14709_v18 = vpop.f32.mrb[63].mxu1  ;;  %v13268_v44 = vld [vmem:[%s13578_s9 + $0x498] sm:$0xff]  }
 0x249   :  { %v6345_v51 = vsel %vm5968_vm1, %v5568_v21, 0.0  ;;  %v5569_v38 = vmax.f32 %v3797_v42, 0.0  ;;  %12202 = vmatprep.mubr.msk.bf16.mxu0 %vm2190_vm0, %v13262_v29  ;;  %v6890_v34 = vadd.f32 %v6889_v1, %v6888_v14  ;;  %v6891_v23 = vsel %vm5968_vm1, %v5821_v19, 0.0 }
 0x24a   :  { %v6346_v33 = vadd.f32 %v6345_v51, %v6344_v59  ;;  %v6351_v36 = vsel %vm5968_vm1, %v5571_v53, 0.0  ;;  %v6895_v21 = vsel %vm5968_vm1, %v5823_v56, 0.0  ;;  %v5824_v46 = vmax.f32 %v4818_v48, 0.0 }
 0x24b   :  { %v6347_v63 = vsel %vm5968_vm1, %v5569_v38, 0.0  ;;  %v12096_v0 = vpop.f32.mrb[180].mxu0  ;;  %v6892_v42 = vadd.f32 %v6891_v23, %v6890_v34  ;;  %v6901_v53 = vsel %vm5968_vm1, %v5826_v24, 0.0  ;;  %v4829_v38 = vadd.f32 %v14690_v17, %v14635_v39 }
 0x24c   :  { %v6348_v9 = vadd.f32 %v6347_v63, %v6346_v33  ;;  %v3818_v10 = vadd.f32 %v14690_v17, %v12096_v0  ;;  %v3809_v61 = vpop.f32.mrb[181].mxu0  ;;  %v6897_v41 = vsel %vm5968_vm1, %v5824_v46, 0.0  ;;  %v4821_v37 = vadd.f32 %v14690_v17, %v14639_v47  ;;  %v14728_v0 = vpop.f32.mrb[64].mxu1  ;;  %v13270_v47 = vld [vmem:[%s13578_s9 + $0x4a0] sm:$0xff]  }
 0x24d   :  { %v3810_v60 = vadd.f32 %v14690_v17, %v3809_v61  ;;  %v12097_v16 = vpop.f32.mrb[182].mxu0  ;;  %v6894_v51 = vadd.f32 %v6893_v55, %v6892_v42  ;;  %v4842_v63 = vadd.f32 %v14690_v17, %v14661_v2  ;;  %v4834_v2 = vadd.f32 %v14690_v17, %v14665_v22 }
 0x24e   :  { %v6350_v26 = vadd.f32 %v6349_v25, %v6348_v9  ;;  %v5574_v29 = vmax.f32 %v3818_v10, 0.0  ;;  %v3821_v32 = vadd.f32 %v14690_v17, %v12097_v16  ;;  %v3812_v54 = vpop.f32.mrb[183].mxu0  ;;  %v5827_v9 = vmax.f32 %v4829_v38, 0.0  ;;  %v14732_v10 = vpop.f32.mrb[65].mxu1 }
 0x24f   :  { %v5572_v35 = vmax.f32 %v3810_v60, 0.0  ;;  %v3813_v5 = vadd.f32 %v14690_v17, %v3812_v54  ;;  %v6896_v39 = vadd.f32 %v6895_v21, %v6894_v51  ;;  %v5825_v56 = vmax.f32 %v4821_v37, 0.0  ;;  %v14739_v60 = vpop.f32.mrb[66].mxu1 }
 0x250   :  { %v6357_v45 = vsel %vm5968_vm1, %v5574_v29, 0.0  ;;  %v6352_v28 = vadd.f32 %v6351_v36, %v6350_v26  ;;  %12203 = vmatmul.mubr.msk.bf16.gmra.mrb[32].mxu0 %vm2190_vm0, %v13264_v43  ;;  %v5575_v25 = vmax.f32 %v3821_v32, 0.0  ;;  %v14742_v26 = vpop.f32.mrb[67].mxu1  ;;  %v5830_v34 = vmax.f32 %v4842_v63, 0.0 }
 0x251   :  { %v6353_v49 = vsel %vm5968_vm1, %v5572_v35, 0.0  ;;  %v5573_v59 = vmax.f32 %v3813_v5, 0.0  ;;  %12206 = vmatprep.mubr.msk.bf16.mxu0 %vm2190_vm0, %v13266_v62  ;;  %v6898_v48 = vadd.f32 %v6897_v41, %v6896_v39  ;;  %v6899_v54 = vsel %vm5968_vm1, %v5825_v56, 0.0  ;;  %v14763_v38 = vpop.f32.mrb[68].mxu1  ;;  %v13272_v41 = vld [vmem:[%s13578_s9 + $0x4a8] sm:$0xff]  }
 0x252   :  { %v6354_v50 = vadd.f32 %v6353_v49, %v6352_v28  ;;  %v6359_v61 = vsel %vm5968_vm1, %v5575_v25, 0.0  ;;  %v14749_v22 = vadd.f32 %v6170_v58, %v14118_v31  ;;  %v6903_v35 = vsel %vm5968_vm1, %v5827_v9, 0.0  ;;  %v14769_v63 = vpop.f32.mrb[69].mxu1 }
 0x253   :  { %v6355_v27 = vsel %vm5968_vm1, %v5573_v59, 0.0  ;;  %v12100_v33 = vpop.f32.mrb[184].mxu0  ;;  %v6900_v5 = vadd.f32 %v6899_v54, %v6898_v48  ;;  %v5828_v21 = vmax.f32 %v4834_v2, 0.0  ;;  %v4845_v31 = vadd.f32 %v14690_v17, %v14671_v20  ;;  %v14775_v9 = vpop.f32.mrb[70].mxu1 }
 0x254   :  { %v6356_v55 = vadd.f32 %v6355_v27, %v6354_v50  ;;  %v3834_v1 = vadd.f32 %v14690_v17, %v12100_v33  ;;  %v3825_v3 = vpop.f32.mrb[185].mxu0  ;;  %v6909_v46 = vsel %vm5968_vm1, %v5830_v34, 0.0  ;;  %v4837_v51 = vadd.f32 %v14690_v17, %v14674_v7  ;;  %v14779_v56 = vpop.f32.mrb[71].mxu1 }
 0x255   :  { %v3826_v43 = vadd.f32 %v14690_v17, %v3825_v3  ;;  %v12101_v14 = vpop.f32.mrb[186].mxu0  ;;  %v6902_v25 = vadd.f32 %v6901_v53, %v6900_v5  ;;  %v6905_v50 = vsel %vm5968_vm1, %v5828_v21, 0.0  ;;  %v4858_v20 = vadd.f32 %v14690_v17, %v14696_v40  ;;  %v13274_v3 = vld [vmem:[%s13578_s9 + $0x4b0] sm:$0xff]  }
 0x256   :  { %v6358_v16 = vadd.f32 %v6357_v45, %v6356_v55  ;;  %v5578_v62 = vmax.f32 %v3834_v1, 0.0  ;;  %v3837_v19 = vadd.f32 %v14690_v17, %v12101_v14  ;;  %v3828_v24 = vpop.f32.mrb[187].mxu0  ;;  %v5829_v39 = vmax.f32 %v4837_v51, 0.0 }
 0x257   :  { %v5576_v29 = vmax.f32 %v3826_v43, 0.0  ;;  %v3829_v32 = vadd.f32 %v14690_v17, %v3828_v24  ;;  %v6904_v37 = vadd.f32 %v6903_v35, %v6902_v25  ;;  %v4850_v7 = vadd.f32 %v14690_v17, %v14700_v15 }
 0x258   :  { %v6360_v36 = vadd.f32 %v6359_v61, %v6358_v16  ;;  %12207 = vmatmul.mubr.msk.bf16.gmra.mrb[36].mxu0 %vm2190_vm0, %v13268_v44  ;;  %v6365_v23 = vsel %vm5968_vm1, %v5578_v62, 0.0  ;;  %v5579_v49 = vmax.f32 %v3837_v19, 0.0  ;;  %v5831_v44 = vmax.f32 %v4845_v31, 0.0  ;;  %v14795_v31 = vpop.f32.mrb[72].mxu1 }
 0x259   :  { %v6361_v45 = vsel %vm5968_vm1, %v5576_v29, 0.0  ;;  %v5577_v28 = vmax.f32 %v3829_v32, 0.0  ;;  %12210 = vmatprep.mubr.msk.bf16.mxu0 %vm2190_vm0, %v13270_v47  ;;  %v6906_v40 = vadd.f32 %v6905_v50, %v6904_v37  ;;  %v6907_v19 = vsel %vm5968_vm1, %v5829_v39, 0.0  ;;  %v13276_v50 = vld [vmem:[%s13578_s9 + $0x4b8] sm:$0xff]  }
 0x25a   :  { %v6362_v42 = vadd.f32 %v6361_v45, %v6360_v36  ;;  %v6367_v61 = vsel %vm5968_vm1, %v5579_v49, 0.0  ;;  %v6172_v24 = vrot.slane %v14749_v22, 2  ;;  %v5834_v29 = vmax.f32 %v4858_v20, 0.0 }
 0x25b   :  { %v6363_v58 = vsel %vm5968_vm1, %v5577_v28, 0.0  ;;  %v12104_v59 = vpop.f32.mrb[188].mxu0  ;;  %v6908_v48 = vadd.f32 %v6907_v19, %v6906_v40  ;;  %v6911_v34 = vsel %vm5968_vm1, %v5831_v44, 0.0  ;;  %v5832_v36 = vmax.f32 %v4850_v7, 0.0 }
 0x25c   :  { %v6364_v27 = vadd.f32 %v6363_v58, %v6362_v42  ;;  %v3850_v33 = vadd.f32 %v14690_v17, %v12104_v59  ;;  %v3841_v53 = vpop.f32.mrb[189].mxu0  ;;  %v4861_v45 = vadd.f32 %v14690_v17, %v14706_v4  ;;  %v4853_v25 = vadd.f32 %v14690_v17, %v14709_v18 }
 0x25d   :  { %v3842_v55 = vadd.f32 %v14690_v17, %v3841_v53  ;;  %v12105_v1 = vpop.f32.mrb[190].mxu0  ;;  %v6913_v49 = vsel %vm5968_vm1, %v5832_v36, 0.0  ;;  %v6917_v4 = vsel %vm5968_vm1, %v5834_v29, 0.0  ;;  %v4866_v18 = vadd.f32 %v14690_v17, %v14732_v10 }
 0x25e   :  { %v6366_v43 = vadd.f32 %v6365_v23, %v6364_v27  ;;  %v3853_v14 = vadd.f32 %v14690_v17, %v12105_v1  ;;  %v3844_v47 = vpop.f32.mrb[191].mxu0  ;;  %v5582_v2 = vmax.f32 %v3850_v33, 0.0  ;;  %v6910_v23 = vadd.f32 %v6909_v46, %v6908_v48  ;;  %v14800_v27 = vpop.f32.mrb[73].mxu1 }
 0x25f   :  { %v5580_v16 = vmax.f32 %v3842_v55, 0.0  ;;  %v3845_v62 = vadd.f32 %v14690_v17, %v3844_v47  ;;  %v5835_v37 = vmax.f32 %v4861_v45, 0.0  ;;  %v5833_v20 = vmax.f32 %v4853_v25, 0.0  ;;  %v14806_v55 = vpop.f32.mrb[74].mxu1 }
 0x260   :  { %v6368_v15 = vadd.f32 %v6367_v61, %v6366_v43  ;;  %12211 = vmatmul.mubr.msk.bf16.gmra.mrb[40].mxu0 %vm2190_vm0, %v13272_v41  ;;  %v5583_v5 = vmax.f32 %v3853_v14, 0.0  ;;  %v6373_v28 = vsel %vm5968_vm1, %v5582_v2, 0.0  ;;  %v6912_v51 = vadd.f32 %v6911_v34, %v6910_v23  ;;  %v13278_v41 = vld [vmem:[%s13578_s9 + $0x4c0] sm:$0xff]   ;;  %v14811_v61 = vpop.f32.mrb[75].mxu1 }
 0x261   :  { %v6369_v32 = vsel %vm5968_vm1, %v5580_v16, 0.0  ;;  %v5581_v54 = vmax.f32 %v3845_v62, 0.0  ;;  %12214 = vmatprep.mubr.msk.bf16.mxu0 %vm2190_vm0, %v13274_v3  ;;  %v4874_v7 = vadd.f32 %v14690_v17, %v14728_v0  ;;  %v6915_v40 = vsel %vm5968_vm1, %v5833_v20, 0.0  ;;  %v14829_v23 = vpop.f32.mrb[76].mxu1 }
 0x262   :  { %v6370_v35 = vadd.f32 %v6369_v32, %v6368_v15  ;;  %v6375_v1 = vsel %vm5968_vm1, %v5583_v5, 0.0  ;;  %v6914_v39 = vadd.f32 %v6913_v49, %v6912_v51  ;;  %v6919_v0 = vsel %vm5968_vm1, %v5835_v37, 0.0  ;;  %v14835_v49 = vpop.f32.mrb[77].mxu1 }
 0x263   :  { %v6371_v21 = vsel %vm5968_vm1, %v5581_v54, 0.0  ;;  %v12108_v42 = vpop.f32.mrb[192].mxu0  ;;  %v5836_v19 = vmax.f32 %v4866_v18, 0.0  ;;  %v14822_v15 = vadd.f32 %v6172_v24, %v14749_v22  ;;  %v6239_v48 = vrot.slane %v14271_v12, 4  ;;  %v13280_v22 = vld [vmem:[%s13578_s9 + $0x4c8] sm:$0xff]  }
 0x264   :  { %v6372_v58 = vadd.f32 %v6371_v21, %v6370_v35  ;;  %v3866_v59 = vadd.f32 %v14690_v17, %v12108_v42  ;;  %v3857_v46 = vpop.f32.mrb[193].mxu0  ;;  %v6916_v2 = vadd.f32 %v6915_v40, %v6914_v39  ;;  %v5838_v32 = vmax.f32 %v4874_v7, 0.0 }
 0x265   :  { %v3858_v33 = vadd.f32 %v14690_v17, %v3857_v46  ;;  %v12109_v53 = vpop.f32.mrb[194].mxu0  ;;  %v4869_v5 = vadd.f32 %v14690_v17, %v14742_v26  ;;  %v6921_v21 = vsel %vm5968_vm1, %v5836_v19, 0.0  ;;  %v4877_v42 = vadd.f32 %v14690_v17, %v14739_v60  ;;  %v13282_v46 = vld [vmem:[%s13578_s9 + $0x4d0] sm:$0xff]  }
 0x266   :  { %v6374_v3 = vadd.f32 %v6373_v28, %v6372_v58  ;;  %v3860_v44 = vpop.f32.mrb[195].mxu0  ;;  %v3869_v14 = vadd.f32 %v14690_v17, %v12109_v53  ;;  %v5586_v16 = vmax.f32 %v3866_v59, 0.0  ;;  %v6918_v29 = vadd.f32 %v6917_v4, %v6916_v2  ;;  %v14841_v4 = vpop.f32.mrb[78].mxu1 }
 0x267   :  { %v5584_v43 = vmax.f32 %v3858_v33, 0.0  ;;  %v3861_v47 = vadd.f32 %v14690_v17, %v3860_v44  ;;  %v6240_v51 = vadd.f32 %v6239_v48, %v14271_v12  ;;  %v14845_v60 = vpop.f32.mrb[79].mxu1  ;;  %v6925_v39 = vsel %vm5968_vm1, %v5838_v32, 0.0 }
 0x268   :  { %v14816_v10 = vadd.f32 %v6375_v1, %v6374_v3  ;;  %12215 = vmatmul.mubr.msk.bf16.gmra.mrb[44].mxu0 %vm2190_vm0, %v13276_v50  ;;  %v5587_v34 = vmax.f32 %v3869_v14, 0.0  ;;  %v6920_v24 = vadd.f32 %v6919_v0, %v6918_v29  ;;  %v6386_v25 = vsel %vm5968_vm1, %v5586_v16, 0.0 }
 0x269   :  { %v5585_v62 = vmax.f32 %v3861_v47, 0.0  ;;  %12218 = vmatprep.mubr.msk.bf16.mxu0 %vm2190_vm0, %v13278_v41  ;;  %v6383_v54 = vsel %vm5968_vm1, %v5584_v43, 0.0  ;;  %v5837_v50 = vmax.f32 %v4869_v5, 0.0  ;;  %v6174_v3 = vrot.slane %v14822_v15, 1  ;;  %v13284_v5 = vld [vmem:[%s13578_s9 + $0x4d8] sm:$0xff]  }
 0x26a   :  { %v6388_v37 = vsel %vm5968_vm1, %v5587_v34, 0.0  ;;  %v6922_v1 = vadd.f32 %v6921_v21, %v6920_v24  ;;  %v5839_v12 = vmax.f32 %v4877_v42, 0.0  ;;  %v6241_v0 = vrot.slane %v6240_v51, 2  ;;  %v13286_v21 = vld [vmem:[%s13578_s9 + $0x4e0] sm:$0xff]  }
 0x26b   :  { %v6384_v36 = vsel %vm5968_vm1, %v5585_v62, 0.0  ;;  %v12112_v35 = vpop.f32.mrb[196].mxu0  ;;  %v6923_v47 = vsel %vm5968_vm1, %v5837_v50, 0.0  ;;  %v4890_v62 = vadd.f32 %v14690_v17, %v14763_v38  ;;  %v4882_v29 = vadd.f32 %v14690_v17, %v14769_v63 }
 0x26c   :  { %v6385_v45 = vadd.f32 %v6384_v36, %v6383_v54  ;;  %v3873_v28 = vpop.f32.mrb[197].mxu0  ;;  %v3882_v58 = vadd.f32 %v14690_v17, %v12112_v35  ;;  %v6924_v16 = vadd.f32 %v6923_v47, %v6922_v1  ;;  %v4885_v32 = vadd.f32 %v14690_v17, %v14779_v56  ;;  %v14862_v54 = vpop.f32.mrb[80].mxu1 }
 0x26d   :  { %v3874_v59 = vadd.f32 %v14690_v17, %v3873_v28  ;;  %v12113_v26 = vpop.f32.mrb[198].mxu0  ;;  %v6927_v38 = vsel %vm5968_vm1, %v5839_v12, 0.0  ;;  %v14867_v28 = vpop.f32.mrb[81].mxu1  ;;  %v5840_v42 = vmax.f32 %v4882_v29, 0.0  ;;  %v4893_v56 = vadd.f32 %v14690_v17, %v14775_v9 }
 0x26e   :  { %v6387_v33 = vadd.f32 %v6386_v25, %v6385_v45  ;;  %v3885_v53 = vadd.f32 %v14690_v17, %v12113_v26  ;;  %v3876_v41 = vpop.f32.mrb[199].mxu0  ;;  %v5590_v7 = vmax.f32 %v3882_v58, 0.0  ;;  %v6926_v45 = vadd.f32 %v6925_v39, %v6924_v16  ;;  %v14874_v25 = vpop.f32.mrb[82].mxu1 }
 0x26f   :  { %v5588_v20 = vmax.f32 %v3874_v59, 0.0  ;;  %v3877_v18 = vadd.f32 %v14690_v17, %v3876_v41  ;;  %v5841_v50 = vmax.f32 %v4885_v32, 0.0 }
 0x270   :  { %v6389_v44 = vadd.f32 %v6388_v37, %v6387_v33  ;;  %12219 = vmatmul.mubr.msk.bf16.gmra.mrb[48].mxu0 %vm2190_vm0, %v13280_v22  ;;  %v5591_v2 = vmax.f32 %v3885_v53, 0.0  ;;  %v6394_v22 = vsel %vm5968_vm1, %v5590_v7, 0.0  ;;  %v14877_v33 = vpop.f32.mrb[83].mxu1  ;;  %v5843_v7 = vmax.f32 %v4893_v56, 0.0 }
 0x271   :  { %v6390_v43 = vsel %vm5968_vm1, %v5588_v20, 0.0  ;;  %v5589_v14 = vmax.f32 %v3877_v18, 0.0  ;;  %12222 = vmatprep.mubr.msk.bf16.mxu0 %vm2190_vm0, %v13282_v46  ;;  %v5842_v46 = vmax.f32 %v4890_v62, 0.0  ;;  %v14881_v20 = vadd.f32 %v6927_v38, %v6926_v45  ;;  %v13291_v38 = vld [vmem:[%s13578_s9 + $0x4f0] sm:$0xff]  }
 0x272   :  { %v6391_v40 = vadd.f32 %v6390_v43, %v6389_v44  ;;  %v6396_v58 = vsel %vm5968_vm1, %v5591_v2, 0.0  ;;  %v6242_v18 = vadd.f32 %v6241_v0, %v6240_v51  ;;  %v6935_v44 = vsel %vm5968_vm1, %v5840_v42, 0.0  ;;  %v14891_v0 = vpop.f32.mrb[84].mxu1 }
 0x273   :  { %v6392_v19 = vsel %vm5968_vm1, %v5589_v14, 0.0  ;;  %v12116_v48 = vpop.f32.mrb[200].mxu0  ;;  %16806 = vst [vmem:[#allocation8_spill] sm:$0xff] %v14881_v20  ;;  %v6938_v14 = vsel %vm5968_vm1, %v5842_v46, 0.0  ;;  %v6936_v47 = vsel %vm5968_vm1, %v5841_v50, 0.0  ;;  %v6175_v51 = vadd.f32 %v6174_v3, %v14822_v15 }
 0x274   :  { %v6393_v34 = vadd.f32 %v6392_v19, %v6391_v40  ;;  %v3898_v36 = vadd.f32 %v14690_v17, %v12116_v48  ;;  %v3889_v35 = vpop.f32.mrb[201].mxu0  ;;  %v6937_v62 = vadd.f32 %v6936_v47, %v6935_v44  ;;  %v6243_v19 = vrot.slane %v6242_v18, 1 }
 0x275   :  { %v3890_v24 = vadd.f32 %v14690_v17, %v3889_v35  ;;  %v12117_v63 = vpop.f32.mrb[202].mxu0  ;;  %v14897_v35 = vpop.f32.mrb[85].mxu1  ;;  %v6940_v45 = vsel %vm5968_vm1, %v5843_v7, 0.0 }
 0x276   :  { %v6395_v59 = vadd.f32 %v6394_v22, %v6393_v34  ;;  %v3892_v26 = vpop.f32.mrb[203].mxu0  ;;  %v3901_v41 = vadd.f32 %v14690_v17, %v12117_v63  ;;  %v5594_v1 = vmax.f32 %v3898_v36, 0.0  ;;  %v13288_v34 = vld [vmem:[%s13578_s9 + $0x4e8] sm:$0xff]   ;;  %v4898_v36 = vadd.f32 %v14690_v17, %v14800_v27 }
 0x277   :  { %v5592_v53 = vmax.f32 %v3890_v24, 0.0  ;;  %v3893_v37 = vadd.f32 %v14690_v17, %v3892_v26  ;;  %v6939_v22 = vadd.f32 %v6938_v14, %v6937_v62  ;;  %v14903_v24 = vpop.f32.mrb[86].mxu1  ;;  %v4906_v27 = vadd.f32 %v14690_v17, %v14795_v31 }
 0x278   :  { %v6397_v9 = vadd.f32 %v6396_v58, %v6395_v59  ;;  %12223 = vmatmul.mubr.msk.bf16.gmra.mrb[52].mxu0 %vm2190_vm0, %v13284_v5  ;;  %v5595_v40 = vmax.f32 %v3901_v41, 0.0  ;;  %v6402_v48 = vsel %vm5968_vm1, %v5594_v1, 0.0  ;;  %v5844_v56 = vmax.f32 %v4898_v36, 0.0  ;;  %v14908_v58 = vpop.f32.mrb[87].mxu1 }
 0x279   :  { %v6398_v39 = vsel %vm5968_vm1, %v5592_v53, 0.0  ;;  %v5593_v12 = vmax.f32 %v3893_v37, 0.0  ;;  %12226 = vmatprep.mubr.msk.bf16.mxu0 %vm2190_vm0, %v13286_v21  ;;  %v6308_v59 = vrot.slane %v14542_v30, 4  ;;  %v14913_v53 = vmul.f32 0.00390625, %v6175_v51 }
 0x27a   :  { %v6399_v43 = vadd.f32 %v6398_v39, %v6397_v9  ;;  %v6404_v26 = vsel %vm5968_vm1, %v5595_v40, 0.0  ;;  %v6941_v37 = vadd.f32 %v6940_v45, %v6939_v22  ;;  %v4909_v1 = vadd.f32 %v14690_v17, %v14806_v55 }
 0x27b   :  { %v6400_v2 = vsel %vm5968_vm1, %v5593_v12, 0.0  ;;  %v12120_v16 = vpop.f32.mrb[204].mxu0  ;;  %v6942_v39 = vsel %vm5968_vm1, %v5844_v56, 0.0  ;;  %v14921_v47 = vadd.f32 %v6243_v19, %v6242_v18  ;;  %v14924_v51 = vadd.f32 %v6308_v59, %v14542_v30 }
 0x27c   :  { %v6401_v29 = vadd.f32 %v6400_v2, %v6399_v43  ;;  %v3905_v32 = vpop.f32.mrb[205].mxu0  ;;  %v3914_v15 = vadd.f32 %v14690_v17, %v12120_v16  ;;  %v5846_v43 = vmax.f32 %v4906_v27, 0.0  ;;  %v6943_v14 = vadd.f32 %v6942_v39, %v6941_v37  ;;  %v14929_v16 = vpop.f32.mrb[88].mxu1 }
 0x27d   :  { %v3906_v3 = vadd.f32 %v14690_v17, %v3905_v32  ;;  %v12121_v5 = vpop.f32.mrb[206].mxu0  ;;  %v4901_v2 = vadd.f32 %v14690_v17, %v14811_v61  ;;  %v5847_v32 = vmax.f32 %v4909_v1, 0.0  ;;  %v4922_v18 = vadd.f32 %v14690_v17, %v14829_v23  ;;  %v14936_v19 = vpop.f32.mrb[89].mxu1 }
 0x27e   :  { %v6403_v63 = vadd.f32 %v6402_v48, %v6401_v29  ;;  %v3917_v21 = vadd.f32 %v14690_v17, %v12121_v5  ;;  %v3908_v42 = vpop.f32.mrb[207].mxu0  ;;  %v5598_v31 = vmax.f32 %v3914_v15, 0.0  ;;  %v13293_v29 = vld [vmem:[%s13578_s9 + $0x4f8] sm:$0xff]   ;;  %v4914_v30 = vadd.f32 %v14690_v17, %v14835_v49 }
 0x27f   :  { %v5596_v46 = vmax.f32 %v3906_v3, 0.0  ;;  %v3909_v50 = vadd.f32 %v14690_v17, %v3908_v42  ;;  %v13295_v3 = vld [vmem:[%s13578_s9 + $0x500] sm:$0xff]   ;;  %v5845_v5 = vmax.f32 %v4901_v2, 0.0  ;;  %v6946_v49 = vsel %vm5968_vm1, %v5846_v43, 0.0 }
 0x280   :  { %v6405_v41 = vadd.f32 %v6404_v26, %v6403_v63  ;;  %12227 = vmatmul.mubr.msk.bf16.gmra.mrb[56].mxu0 %vm2190_vm0, %v13288_v34  ;;  %v5599_v7 = vmax.f32 %v3917_v21, 0.0  ;;  %v6410_v34 = vsel %vm5968_vm1, %v5598_v31, 0.0  ;;  %v5848_v59 = vmax.f32 %v4914_v30, 0.0 }
 0x281   :  { %v6406_v9 = vsel %vm5968_vm1, %v5596_v46, 0.0  ;;  %v5597_v44 = vmax.f32 %v3909_v50, 0.0  ;;  %12230 = vmatprep.mubr.msk.bf16.mxu0 %vm2190_vm0, %v13291_v38  ;;  %v14942_v38 = vpop.f32.mrb[90].mxu1  ;;  %v6944_v56 = vsel %vm5968_vm1, %v5845_v5, 0.0  ;;  %v6948_v46 = vsel %vm5968_vm1, %v5847_v32, 0.0 }
 0x282   :  { %v6407_v12 = vadd.f32 %v6406_v9, %v6405_v41  ;;  %v6412_v45 = vsel %vm5968_vm1, %v5599_v7, 0.0  ;;  %v14947_v21 = vpop.f32.mrb[91].mxu1  ;;  %v6945_v50 = vadd.f32 %v6944_v56, %v6943_v14  ;;  %v5850_v41 = vmax.f32 %v4922_v18, 0.0 }
 0x283   :  { %v6408_v55 = vsel %vm5968_vm1, %v5597_v44, 0.0  ;;  %v12124_v40 = vpop.f32.mrb[208].mxu0  ;;  %v4925_v9 = vadd.f32 %v14690_v17, %v14841_v4  ;;  %v4917_v7 = vadd.f32 %v14690_v17, %v14845_v60  ;;  %v4930_v2 = vadd.f32 %v14690_v17, %v14867_v28  ;;  %v13299_v28 = vld [vmem:[%s13578_s9 + $0x510] sm:$0xff]  }
 0x284   :  { %v6409_v62 = vadd.f32 %v6408_v55, %v6407_v12  ;;  %v3921_v48 = vpop.f32.mrb[209].mxu0  ;;  %v3930_v36 = vadd.f32 %v14690_v17, %v12124_v40  ;;  %v6947_v12 = vadd.f32 %v6946_v49, %v6945_v50  ;;  %v6950_v55 = vsel %vm5968_vm1, %v5848_v59, 0.0 }
 0x285   :  { %v3922_v61 = vadd.f32 %v14690_v17, %v3921_v48  ;;  %v12125_v15 = vpop.f32.mrb[210].mxu0  ;;  %v5851_v40 = vmax.f32 %v4925_v9, 0.0  ;;  %v5849_v18 = vmax.f32 %v4917_v7, 0.0  ;;  %v4938_v60 = vadd.f32 %v14690_v17, %v14862_v54 }
 0x286   :  { %v6411_v22 = vadd.f32 %v6410_v34, %v6409_v62  ;;  %v3933_v23 = vadd.f32 %v14690_v17, %v12125_v15  ;;  %v3924_v63 = vpop.f32.mrb[211].mxu0  ;;  %v5602_v37 = vmax.f32 %v3930_v36, 0.0  ;;  %v14963_v62 = vpop.f32.mrb[92].mxu1  ;;  %v6949_v32 = vadd.f32 %v6948_v46, %v6947_v12 }
 0x287   :  { %v5600_v42 = vmax.f32 %v3922_v61, 0.0  ;;  %v3925_v27 = vadd.f32 %v14690_v17, %v3924_v63  ;;  %v14968_v30 = vpop.f32.mrb[93].mxu1  ;;  %v6952_v56 = vsel %vm5968_vm1, %v5849_v18, 0.0  ;;  %v5852_v59 = vmax.f32 %v4930_v2, 0.0 }
 0x288   :  { %v6413_v26 = vadd.f32 %v6412_v45, %v6411_v22  ;;  %12231 = vmatmul.mubr.msk.bf16.gmra.mrb[60].mxu0 %vm2190_vm0, %v13293_v29  ;;  %v5603_v39 = vmax.f32 %v3933_v23, 0.0  ;;  %v13297_v29 = vld [vmem:[%s13578_s9 + $0x508] sm:$0xff]   ;;  %v6418_v34 = vsel %vm5968_vm1, %v5602_v37, 0.0  ;;  %v14975_v5 = vpop.f32.mrb[94].mxu1  ;;  %v6951_v63 = vadd.f32 %v6950_v55, %v6949_v32 }
 0x289   :  { %v6414_v1 = vsel %vm5968_vm1, %v5600_v42, 0.0  ;;  %v5601_v31 = vmax.f32 %v3925_v27, 0.0  ;;  %12234 = vmatprep.mubr.msk.bf16.mxu0 %vm2190_vm0, %v13295_v3  ;;  %v6954_v3 = vsel %vm5968_vm1, %v5850_v41, 0.0  ;;  %v14979_v49 = vpop.f32.mrb[95].mxu1  ;;  %v6956_v46 = vsel %vm5968_vm1, %v5851_v40, 0.0 }
 0x28a   :  { %v6415_v44 = vadd.f32 %v6414_v1, %v6413_v26  ;;  %v6420_v45 = vsel %vm5968_vm1, %v5603_v39, 0.0  ;;  %v6953_v50 = vadd.f32 %v6952_v56, %v6951_v63  ;;  %v5854_v41 = vmax.f32 %v4938_v60, 0.0 }
 0x28b   :  { %v6416_v43 = vsel %vm5968_vm1, %v5601_v31, 0.0  ;;  %v12128_v14 = vpop.f32.mrb[212].mxu0  ;;  %v4941_v9 = vadd.f32 %v14690_v17, %v14874_v25  ;;  %v4933_v7 = vadd.f32 %v14690_v17, %v14877_v33  ;;  %v6958_v55 = vsel %vm5968_vm1, %v5852_v59, 0.0 }
 0x28c   :  { %v6417_v48 = vadd.f32 %v6416_v43, %v6415_v44  ;;  %v3937_v4 = vpop.f32.mrb[213].mxu0  ;;  %v3946_v36 = vadd.f32 %v14690_v17, %v12128_v14  ;;  %v6955_v12 = vadd.f32 %v6954_v3, %v6953_v50  ;;  %v4946_v2 = vadd.f32 %v14690_v17, %v14897_v35  ;;  %v13303_v35 = vld [vmem:[%s13578_s9 + $0x520] sm:$0xff]  }
 0x28d   :  { %v3938_v61 = vadd.f32 %v14690_v17, %v3937_v4  ;;  %v12129_v15 = vpop.f32.mrb[214].mxu0  ;;  %v5855_v40 = vmax.f32 %v4941_v9, 0.0  ;;  %v5853_v18 = vmax.f32 %v4933_v7, 0.0  ;;  %v4954_v33 = vadd.f32 %v14690_v17, %v14891_v0 }
 0x28e   :  { %v6419_v22 = vadd.f32 %v6418_v34, %v6417_v48  ;;  %v3949_v23 = vadd.f32 %v14690_v17, %v12129_v15  ;;  %v3940_v54 = vpop.f32.mrb[215].mxu0  ;;  %v5606_v37 = vmax.f32 %v3946_v36, 0.0  ;;  %v14995_v48 = vpop.f32.mrb[96].mxu1  ;;  %v6957_v32 = vadd.f32 %v6956_v46, %v6955_v12 }
 0x28f   :  { %v5604_v42 = vmax.f32 %v3938_v61, 0.0  ;;  %v3941_v27 = vadd.f32 %v14690_v17, %v3940_v54  ;;  %v15000_v60 = vpop.f32.mrb[97].mxu1  ;;  %v6960_v56 = vsel %vm5968_vm1, %v5853_v18, 0.0  ;;  %v5856_v59 = vmax.f32 %v4946_v2, 0.0 }
 0x290   :  { %v6421_v26 = vadd.f32 %v6420_v45, %v6419_v22  ;;  %12235 = vmatmul.mubr.msk.bf16.gmra.mrb[64].mxu0 %vm2190_vm0, %v13297_v29  ;;  %v5607_v39 = vmax.f32 %v3949_v23, 0.0  ;;  %v13301_v29 = vld [vmem:[%s13578_s9 + $0x518] sm:$0xff]   ;;  %v6426_v34 = vsel %vm5968_vm1, %v5606_v37, 0.0  ;;  %v15007_v3 = vpop.f32.mrb[98].mxu1  ;;  %v6959_v54 = vadd.f32 %v6958_v55, %v6957_v32 }
 0x291   :  { %v6422_v1 = vsel %vm5968_vm1, %v5604_v42, 0.0  ;;  %v5605_v31 = vmax.f32 %v3941_v27, 0.0  ;;  %12238 = vmatprep.mubr.msk.bf16.mxu0 %vm2190_vm0, %v13299_v28  ;;  %v6962_v28 = vsel %vm5968_vm1, %v5854_v41, 0.0  ;;  %v15011_v63 = vpop.f32.mrb[99].mxu1  ;;  %v6964_v46 = vsel %vm5968_vm1, %v5855_v40, 0.0 }
 0x292   :  { %v6423_v44 = vadd.f32 %v6422_v1, %v6421_v26  ;;  %v6428_v45 = vsel %vm5968_vm1, %v5607_v39, 0.0  ;;  %v6961_v50 = vadd.f32 %v6960_v56, %v6959_v54  ;;  %v5858_v41 = vmax.f32 %v4954_v33, 0.0 }
 0x293   :  { %v6424_v43 = vsel %vm5968_vm1, %v5605_v31, 0.0  ;;  %v12132_v14 = vpop.f32.mrb[216].mxu0  ;;  %v4957_v9 = vadd.f32 %v14690_v17, %v14903_v24  ;;  %v4949_v7 = vadd.f32 %v14690_v17, %v14908_v58  ;;  %v6966_v55 = vsel %vm5968_vm1, %v5856_v59, 0.0 }
 0x294   :  { %v6425_v4 = vadd.f32 %v6424_v43, %v6423_v44  ;;  %v3953_v25 = vpop.f32.mrb[217].mxu0  ;;  %v3962_v36 = vadd.f32 %v14690_v17, %v12132_v14  ;;  %v6963_v12 = vadd.f32 %v6962_v28, %v6961_v50  ;;  %v4962_v2 = vadd.f32 %v14690_v17, %v14936_v19  ;;  %v13307_v19 = vld [vmem:[%s13578_s9 + $0x530] sm:$0xff]  }
 0x295   :  { %v3954_v61 = vadd.f32 %v14690_v17, %v3953_v25  ;;  %v12133_v15 = vpop.f32.mrb[218].mxu0  ;;  %v5859_v40 = vmax.f32 %v4957_v9, 0.0  ;;  %v5857_v18 = vmax.f32 %v4949_v7, 0.0  ;;  %v4970_v58 = vadd.f32 %v14690_v17, %v14929_v16 }
 0x296   :  { %v6427_v22 = vadd.f32 %v6426_v34, %v6425_v4  ;;  %v3965_v23 = vadd.f32 %v14690_v17, %v12133_v15  ;;  %v3956_v0 = vpop.f32.mrb[219].mxu0  ;;  %v5610_v37 = vmax.f32 %v3962_v36, 0.0  ;;  %v15027_v4 = vpop.f32.mrb[100].mxu1  ;;  %v6965_v32 = vadd.f32 %v6964_v46, %v6963_v12 }
 0x297   :  { %v5608_v42 = vmax.f32 %v3954_v61, 0.0  ;;  %v3957_v27 = vadd.f32 %v14690_v17, %v3956_v0  ;;  %v15032_v33 = vpop.f32.mrb[101].mxu1  ;;  %v6968_v56 = vsel %vm5968_vm1, %v5857_v18, 0.0  ;;  %v5860_v59 = vmax.f32 %v4962_v2, 0.0 }
 0x298   :  { %v6429_v26 = vadd.f32 %v6428_v45, %v6427_v22  ;;  %12239 = vmatmul.mubr.msk.bf16.gmra.mrb[68].mxu0 %vm2190_vm0, %v13301_v29  ;;  %v5611_v39 = vmax.f32 %v3965_v23, 0.0  ;;  %v13305_v29 = vld [vmem:[%s13578_s9 + $0x528] sm:$0xff]   ;;  %v6434_v34 = vsel %vm5968_vm1, %v5610_v37, 0.0  ;;  %v15039_v28 = vpop.f32.mrb[102].mxu1  ;;  %v6967_v0 = vadd.f32 %v6966_v55, %v6965_v32 }
 0x299   :  { %v6430_v1 = vsel %vm5968_vm1, %v5608_v42, 0.0  ;;  %v5609_v31 = vmax.f32 %v3957_v27, 0.0  ;;  %12242 = vmatprep.mubr.msk.bf16.mxu0 %vm2190_vm0, %v13303_v35  ;;  %v6970_v35 = vsel %vm5968_vm1, %v5858_v41, 0.0  ;;  %v15043_v54 = vpop.f32.mrb[103].mxu1  ;;  %v6972_v50 = vsel %vm5968_vm1, %v5859_v40, 0.0 }
 0x29a   :  { %v6431_v44 = vadd.f32 %v6430_v1, %v6429_v26  ;;  %v6436_v45 = vsel %vm5968_vm1, %v5611_v39, 0.0  ;;  %v15047_v26 = vpop.f32.mrb[104].mxu1  ;;  %v6969_v41 = vadd.f32 %v6968_v56, %v6967_v0  ;;  %v5862_v37 = vmax.f32 %v4970_v58, 0.0 }
 0x29b   :  { %v6432_v43 = vsel %vm5968_vm1, %v5609_v31, 0.0  ;;  %v12136_v14 = vpop.f32.mrb[220].mxu0  ;;  %v15051_v1 = vpop.f32.mrb[105].mxu1  ;;  %v4973_v39 = vadd.f32 %v14690_v17, %v14942_v38  ;;  %v4965_v55 = vadd.f32 %v14690_v17, %v14947_v21  ;;  %v6310_v2 = vrot.slane %v14924_v51, 2  ;;  %v13309_v21 = vld [vmem:[%s13578_s9 + $0x538] sm:$0xff]  }
 0x29c   :  { %v6433_v25 = vadd.f32 %v6432_v43, %v6431_v44  ;;  %v3969_v24 = vpop.f32.mrb[221].mxu0  ;;  %v3978_v36 = vadd.f32 %v14690_v17, %v12136_v14  ;;  %v15057_v12 = vpop.f32.mrb[106].mxu1  ;;  %v6971_v14 = vadd.f32 %v6970_v35, %v6969_v41  ;;  %v4978_v38 = vadd.f32 %v14690_v17, %v14968_v30 }
 0x29d   :  { %v3970_v61 = vadd.f32 %v14690_v17, %v3969_v24  ;;  %v12137_v15 = vpop.f32.mrb[222].mxu0  ;;  %v15061_v40 = vpop.f32.mrb[107].mxu1  ;;  %v5863_v30 = vmax.f32 %v4973_v39, 0.0 }
 0x29e   :  { %v6435_v22 = vadd.f32 %v6434_v34, %v6433_v25  ;;  %v3981_v23 = vadd.f32 %v14690_v17, %v12137_v15  ;;  %v3972_v16 = vpop.f32.mrb[223].mxu0  ;;  %v5614_v31 = vmax.f32 %v3978_v36, 0.0  ;;  %v15068_v32 = vpop.f32.mrb[108].mxu1  ;;  %v6973_v36 = vadd.f32 %v6972_v50, %v6971_v14 }
 0x29f   :  { %v5612_v42 = vmax.f32 %v3970_v61, 0.0  ;;  %v3973_v27 = vadd.f32 %v14690_v17, %v3972_v16  ;;  %v5861_v61 = vmax.f32 %v4965_v55, 0.0  ;;  %v15072_v15 = vpop.f32.mrb[109].mxu1 }
 0x2a0   :  { %v6437_v46 = vadd.f32 %v6436_v45, %v6435_v22  ;;  %12243 = vmatmul.mubr.msk.bf16.gmra.mrb[72].mxu0 %vm2190_vm0, %v13305_v29  ;;  %v5615_v43 = vmax.f32 %v3981_v23, 0.0  ;;  %v6974_v29 = vsel %vm5968_vm1, %v5860_v59, 0.0  ;;  %v13311_v22 = vld [vmem:[%s13578_s9 + $0x540] sm:$0xff]   ;;  %v6978_v23 = vsel %vm5968_vm1, %v5862_v37, 0.0  ;;  %v15078_v16 = vpop.f32.mrb[110].mxu1 }
 0x2a1   :  { %v6438_v9 = vsel %vm5968_vm1, %v5612_v42, 0.0  ;;  %v5613_v44 = vmax.f32 %v3973_v27, 0.0  ;;  %12246 = vmatprep.mubr.msk.bf16.mxu0 %vm2190_vm0, %v13307_v19  ;;  %v6442_v19 = vsel %vm5968_vm1, %v5614_v31, 0.0  ;;  %v6975_v59 = vadd.f32 %v6974_v29, %v6973_v36 }
 0x2a2   :  { %v6439_v7 = vadd.f32 %v6438_v9, %v6437_v46  ;;  %v6444_v0 = vsel %vm5968_vm1, %v5615_v43, 0.0  ;;  %v15082_v46 = vpop.f32.mrb[111].mxu1  ;;  %v6976_v31 = vsel %vm5968_vm1, %v5861_v61, 0.0  ;;  %v4986_v37 = vadd.f32 %v14690_v17, %v14963_v62 }
 0x2a3   :  { %v6440_v25 = vsel %vm5968_vm1, %v5613_v44, 0.0  ;;  %v12140_v24 = vpop.f32.mrb[224].mxu0  ;;  %v15088_v9 = vpop.f32.mrb[112].mxu1  ;;  %v5864_v43 = vmax.f32 %v4978_v38, 0.0  ;;  %v15102_v29 = vmul.f32 0.00390625, %v14921_v47  ;;  %v15114_v36 = vadd.f32 %v6310_v2, %v14924_v51 }
 0x2a4   :  { %v6441_v18 = vadd.f32 %v6440_v25, %v6439_v7  ;;  %v3994_v58 = vadd.f32 %v14690_v17, %v12140_v24  ;;  %v3985_v34 = vpop.f32.mrb[225].mxu0  ;;  %v6977_v7 = vadd.f32 %v6976_v31, %v6975_v59  ;;  %v15093_v14 = vpop.f32.mrb[113].mxu1  ;;  %v13315_v59 = vld [vmem:[%s13578_s9 + $0x550] sm:$0xff]  }
 0x2a5   :  { %v3986_v35 = vadd.f32 %v14690_v17, %v3985_v34  ;;  %v12141_v45 = vpop.f32.mrb[226].mxu0  ;;  %v15099_v62 = vpop.f32.mrb[114].mxu1  ;;  %16807 = vst [vmem:[#allocation9_spill] sm:$0xff] %v15102_v29 }
 0x2a6   :  { %v6443_v42 = vadd.f32 %v6442_v19, %v6441_v18  ;;  %v3997_v27 = vadd.f32 %v14690_v17, %v12141_v45  ;;  %v3988_v56 = vpop.f32.mrb[227].mxu0  ;;  %v5618_v39 = vmax.f32 %v3994_v58, 0.0  ;;  %v6979_v18 = vadd.f32 %v6978_v23, %v6977_v7  ;;  %v15105_v58 = vld [vmem:[%s13703_s13] ss:$0 sm:$0xff] }
 0x2a7   :  { %v5616_v50 = vmax.f32 %v3986_v35, 0.0  ;;  %v3989_v41 = vadd.f32 %v14690_v17, %v3988_v56  ;;  %v6980_v17 = vsel %vm5968_vm1, %v5863_v30, 0.0  ;;  %v4989_v38 = vadd.f32 %v15105_v58, %v14975_v5  ;;  %v13313_v30 = vld [vmem:[%s13578_s9 + $0x548] sm:$0xff]  }
 0x2a8   :  { %v15090_v44 = vadd.f32 %v6444_v0, %v6443_v42  ;;  %12247 = vmatmul.mubr.msk.bf16.gmra.mrb[76].mxu0 %vm2190_vm0, %v13309_v21  ;;  %v5619_v25 = vmax.f32 %v3997_v27, 0.0  ;;  %v4981_v34 = vadd.f32 %v15105_v58, %v14979_v49  ;;  %v15111_v21 = vpop.f32.mrb[115].mxu1  ;;  %v5866_v35 = vmax.f32 %v4986_v37, 0.0 }
 0x2a9   :  { %v5617_v24 = vmax.f32 %v3989_v41, 0.0  ;;  %12250 = vmatprep.mubr.msk.bf16.mxu0 %vm2190_vm0, %v13311_v22  ;;  %v6452_v61 = vsel %vm5968_vm1, %v5616_v50, 0.0  ;;  %v15118_v45 = vpop.f32.mrb[116].mxu1  ;;  %v6455_v22 = vsel %vm5968_vm1, %v5618_v39, 0.0  ;;  %v6981_v49 = vadd.f32 %v6980_v17, %v6979_v18 }
 0x2aa   :  { %v6982_v0 = vsel %vm5968_vm1, %v5864_v43, 0.0  ;;  %v15123_v42 = vpop.f32.mrb[117].mxu1  ;;  %v6457_v51 = vsel %vm5968_vm1, %v5619_v25, 0.0  ;;  %v5865_v50 = vmax.f32 %v4981_v34, 0.0  ;;  %v5867_v7 = vmax.f32 %v4989_v38, 0.0 }
 0x2ab   :  { %v6453_v47 = vsel %vm5968_vm1, %v5617_v24, 0.0  ;;  %v12144_v19 = vpop.f32.mrb[228].mxu0  ;;  %v15129_v41 = vpop.f32.mrb[118].mxu1  ;;  %v4994_v43 = vadd.f32 %v15105_v58, %v15000_v60  ;;  %v6983_v18 = vadd.f32 %v6982_v0, %v6981_v49  ;;  %v6312_v34 = vrot.slane %v15114_v36, 1 }
 0x2ac   :  { %v6454_v5 = vadd.f32 %v6453_v47, %v6452_v61  ;;  %v4001_v23 = vpop.f32.mrb[229].mxu0  ;;  %v4010_v2 = vadd.f32 %v15105_v58, %v12144_v19  ;;  %v15134_v24 = vpop.f32.mrb[119].mxu1  ;;  %v6984_v61 = vsel %vm5968_vm1, %v5865_v50, 0.0  ;;  %v6986_v38 = vsel %vm5968_vm1, %v5866_v35, 0.0 }
 0x2ad   :  { %v4002_v27 = vadd.f32 %v15105_v58, %v4001_v23  ;;  %v12145_v56 = vpop.f32.mrb[230].mxu0  ;;  %v15138_v47 = vpop.f32.mrb[120].mxu1  ;;  %v5002_v60 = vadd.f32 %v15105_v58, %v14995_v48  ;;  %v6985_v0 = vadd.f32 %v6984_v61, %v6983_v18  ;;  %v5868_v35 = vmax.f32 %v4994_v43, 0.0  ;;  %v13317_v43 = vld [vmem:[%s13578_s9 + $0x558] sm:$0xff]  }
 0x2ae   :  { %v6456_v31 = vadd.f32 %v6455_v22, %v6454_v5  ;;  %v4013_v37 = vadd.f32 %v15105_v58, %v12145_v56  ;;  %v4004_v39 = vpop.f32.mrb[231].mxu0  ;;  %v15145_v22 = vpop.f32.mrb[121].mxu1  ;;  %v5622_v5 = vmax.f32 %v4010_v2, 0.0 }
 0x2af   :  { %v5620_v25 = vmax.f32 %v4002_v27, 0.0  ;;  %v4005_v17 = vadd.f32 %v15105_v58, %v4004_v39  ;;  %v15149_v27 = vpop.f32.mrb[122].mxu1  ;;  %v5005_v39 = vadd.f32 %v15105_v58, %v15007_v3  ;;  %v5870_v18 = vmax.f32 %v5002_v60, 0.0 }
 0x2b0   :  { %v6458_v19 = vadd.f32 %v6457_v51, %v6456_v31  ;;  %12251 = vmatmul.mubr.msk.bf16.gmra.mrb[80].mxu0 %vm2190_vm0, %v13313_v30  ;;  %v5623_v56 = vmax.f32 %v4013_v37, 0.0  ;;  %v6988_v30 = vsel %vm5968_vm1, %v5867_v7, 0.0  ;;  %v15152_v50 = vpop.f32.mrb[123].mxu1  ;;  %v6987_v31 = vadd.f32 %v6986_v38, %v6985_v0 }
 0x2b1   :  { %v6459_v23 = vsel %vm5968_vm1, %v5620_v25, 0.0  ;;  %v5621_v49 = vmax.f32 %v4005_v17, 0.0  ;;  %12254 = vmatprep.mubr.msk.bf16.mxu0 %vm2190_vm0, %v13315_v59  ;;  %v4997_v59 = vadd.f32 %v15105_v58, %v15011_v63  ;;  %v15159_v25 = vpop.f32.mrb[124].mxu1  ;;  %v6990_v61 = vsel %vm5968_vm1, %v5868_v35, 0.0 }
 0x2b2   :  { %v6460_v51 = vadd.f32 %v6459_v23, %v6458_v19  ;;  %v15164_v19 = vpop.f32.mrb[125].mxu1  ;;  %v6463_v38 = vsel %vm5968_vm1, %v5622_v5, 0.0  ;;  %v6989_v0 = vadd.f32 %v6988_v30, %v6987_v31  ;;  %v5871_v35 = vmax.f32 %v5005_v39, 0.0 }
 0x2b3   :  { %v6461_v48 = vsel %vm5968_vm1, %v5621_v49, 0.0  ;;  %v12148_v2 = vpop.f32.mrb[232].mxu0  ;;  %v13319_v49 = vld [vmem:[%s13578_s9 + $0x560] sm:$0xff]   ;;  %v5869_v63 = vmax.f32 %v4997_v59, 0.0  ;;  %v15169_v55 = vpop.f32.mrb[126].mxu1  ;;  %v6377_v31 = vrot.slane %v14816_v10, 4 }
 0x2b4   :  { %v6462_v17 = vadd.f32 %v6461_v48, %v6460_v51  ;;  %v4026_v37 = vadd.f32 %v15105_v58, %v12148_v2  ;;  %v4017_v7 = vpop.f32.mrb[233].mxu0  ;;  %v15172_v51 = vadd.f32 %v6312_v34, %v15114_v36  ;;  %v6465_v48 = vsel %vm5968_vm1, %v5623_v56, 0.0  ;;  %v15175_v11 = vpop.f32.mrb[127].mxu1 }
 0x2b5   :  { %v4018_v23 = vadd.f32 %v15105_v58, %v4017_v7  ;;  %v12149_v3 = vpop.f32.mrb[234].mxu0  ;;  %v6991_v20 = vadd.f32 %v6990_v61, %v6989_v0  ;;  %v15179_v30 = vpop.f32.mrb[128].mxu1  ;;  %v6994_v34 = vsel %vm5968_vm1, %v5870_v18, 0.0  ;;  %v5018_v61 = vadd.f32 %v15105_v58, %v15027_v4 }
 0x2b6   :  { %v6464_v60 = vadd.f32 %v6463_v38, %v6462_v17  ;;  %v4020_v2 = vpop.f32.mrb[235].mxu0  ;;  %v4029_v5 = vadd.f32 %v15105_v58, %v12149_v3  ;;  %v5626_v59 = vmax.f32 %v4026_v37, 0.0  ;;  %v15184_v56 = vpop.f32.mrb[129].mxu1  ;;  %v6992_v38 = vsel %vm5968_vm1, %v5869_v63, 0.0 }
 0x2b7   :  { %v5624_v6 = vmax.f32 %v4018_v23, 0.0  ;;  %v4021_v7 = vadd.f32 %v15105_v58, %v4020_v2  ;;  %v15191_v23 = vpop.f32.mrb[130].mxu1  ;;  %v6993_v3 = vadd.f32 %v6992_v38, %v6991_v20  ;;  %v5010_v18 = vadd.f32 %v15105_v58, %v15032_v33 }
 0x2b8   :  { %v6466_v36 = vadd.f32 %v6465_v48, %v6464_v60  ;;  %12255 = vmatmul.mubr.msk.bf16.gmra.mrb[84].mxu0 %vm2190_vm0, %v13317_v43  ;;  %v6996_v43 = vsel %vm5968_vm1, %v5871_v35, 0.0  ;;  %v15196_v0 = vpop.f32.mrb[131].mxu1  ;;  %v5874_v48 = vmax.f32 %v5018_v61, 0.0  ;;  %v5013_v4 = vadd.f32 %v15105_v58, %v15043_v54  ;;  %v13321_v35 = vld [vmem:[%s13578_s9 + $0x568] sm:$0xff]   ;;  %v13323_v54 = vld [vmem:[%s13578_s9 + $0x570] sm:$0xff]  }
 0x2b9   :  { %v6467_v39 = vsel %vm5968_vm1, %v5624_v6, 0.0  ;;  %v5625_v17 = vmax.f32 %v4021_v7, 0.0  ;;  %12258 = vmatprep.mubr.msk.bf16.mxu0 %vm2190_vm0, %v13319_v49  ;;  %v5627_v6 = vmax.f32 %v4029_v5, 0.0  ;;  %v15201_v60 = vpop.f32.mrb[132].mxu1  ;;  %v6995_v20 = vadd.f32 %v6994_v34, %v6993_v3 }
 0x2ba   :  { %v6468_v37 = vadd.f32 %v6467_v39, %v6466_v36  ;;  %v5872_v36 = vmax.f32 %v5010_v18, 0.0  ;;  %v5021_v33 = vadd.f32 %v15105_v58, %v15039_v28  ;;  %v15206_v39 = vpop.f32.mrb[133].mxu1  ;;  %v6471_v5 = vsel %vm5968_vm1, %v5626_v59, 0.0 }
 0x2bb   :  { %v6469_v49 = vsel %vm5968_vm1, %v5625_v17, 0.0  ;;  %v12152_v63 = vpop.f32.mrb[236].mxu0  ;;  %v5873_v57 = vmax.f32 %v5013_v4, 0.0  ;;  %v15212_v13 = vpop.f32.mrb[134].mxu1  ;;  %v15216_v28 = vadd.f32 %v6996_v43, %v6995_v20  ;;  %v6473_v59 = vsel %vm5968_vm1, %v5627_v6, 0.0 }
 0x2bc   :  { %v6470_v2 = vadd.f32 %v6469_v49, %v6468_v37  ;;  %v4033_v7 = vpop.f32.mrb[237].mxu0  ;;  %v4042_v17 = vadd.f32 %v15105_v58, %v12152_v63  ;;  %v6378_v37 = vadd.f32 %v6377_v31, %v14816_v10  ;;  %v15218_v49 = vpop.f32.mrb[135].mxu1  ;;  %v7004_v8 = vsel %vm5968_vm1, %v5872_v36, 0.0 }
 0x2bd   :  { %v4034_v38 = vadd.f32 %v15105_v58, %v4033_v7  ;;  %v12153_v61 = vpop.f32.mrb[238].mxu0  ;;  %16808 = vst [vmem:[#allocation10_spill] sm:$0xff] %v15216_v28  ;;  %v15223_v4 = vpop.f32.mrb[136].mxu1  ;;  %v16809_v10 = vpack.c.bf16 %v14913_v53, %v14913_v53  ;;  %v7007_v43 = vsel %vm5968_vm1, %v5874_v48, 0.0  ;;  %v5875_v20 = vmax.f32 %v5021_v33, 0.0 }
 0x2be   :  { %v6472_v34 = vadd.f32 %v6471_v5, %v6470_v2  ;;  %v4045_v3 = vadd.f32 %v15105_v58, %v12153_v61  ;;  %v4036_v18 = vpop.f32.mrb[239].mxu0  ;;  %v15232_v5 = vpop.f32.mrb[137].mxu1  ;;  %v5630_v6 = vmax.f32 %v4042_v17, 0.0  ;;  %v7005_v36 = vsel %vm5968_vm1, %v5873_v57, 0.0 }
 0x2bf   :  { %v5628_v63 = vmax.f32 %v4034_v38, 0.0  ;;  %v4037_v7 = vadd.f32 %v15105_v58, %v4036_v18  ;;  %v15228_v31 = vunpack.c.l.b16 %v16809_v10  ;;  %v15237_v53 = vpop.f32.mrb[138].mxu1  ;;  %v6379_v18 = vrot.slane %v6378_v37, 2 }
 0x2c0   :  { %v6474_v2 = vadd.f32 %v6473_v59, %v6472_v34  ;;  %12259 = vmatmul.mubr.msk.bf16.gmra.mrb[88].mxu0 %vm2190_vm0, %v13321_v35  ;;  %v5631_v59 = vmax.f32 %v4045_v3, 0.0  ;;  %v7006_v35 = vadd.f32 %v7005_v36, %v7004_v8  ;;  %v15239_v10 = vpop.f32.mrb[139].mxu1  ;;  %v15244_v33 = vmul.f32 0.00390625, %v15172_v51  ;;  %v13324_v8 = vld [vmem:[%s13578_s9 + $0x578] sm:$0xff]  }
 0x2c1   :  { %16810 = vst [vmem:[#allocation11_spill] sm:$0xff] %v15228_v31  ;;  %v6475_v38 = vsel %vm5968_vm1, %v5628_v63, 0.0  ;;  %v5629_v61 = vmax.f32 %v4037_v7, 0.0  ;;  %12262 = vmatprep.mubr.msk.bf16.mxu0 %vm2190_vm0, %v13323_v54  ;;  %v5026_v57 = vadd.f32 %v15105_v58, %v15051_v1  ;;  %v15249_v63 = vpop.f32.mrb[140].mxu1  ;;  %v5034_v36 = vadd.f32 %v15105_v58, %v15047_v26  ;;  %v13325_v31 = vld [vmem:[%s13578_s9 + $0x580] sm:$0xff]  }
 0x2c2   :  { %v6476_v34 = vadd.f32 %v6475_v38, %v6474_v2  ;;  %16811 = vst [vmem:[#allocation12_spill] sm:$0xff] %v15244_v33  ;;  %16812 = vst [vmem:[#allocation13_spill] sm:$0xff] %v15249_v63  ;;  %v7009_v2 = vsel %vm5968_vm1, %v5875_v20, 0.0  ;;  %v7008_v38 = vadd.f32 %v7007_v43, %v7006_v35  ;;  %v15255_v51 = vpop.f32.mrb[141].mxu1  ;;  %v6479_v48 = vsel %vm5968_vm1, %v5630_v6, 0.0 }
 0x2c3   :  { %v6477_v17 = vsel %vm5968_vm1, %v5629_v61, 0.0  ;;  %v12156_v54 = vpop.f32.mrb[240].mxu0  ;;  %16813 = vst [vmem:[#allocation14_spill] sm:$0xff] %v15255_v51  ;;  %v5876_v52 = vmax.f32 %v5026_v57, 0.0  ;;  %v6481_v43 = vsel %vm5968_vm1, %v5631_v59, 0.0  ;;  %v5878_v59 = vmax.f32 %v5034_v36, 0.0 }
 0x2c4   :  { %v6478_v7 = vadd.f32 %v6477_v17, %v6476_v34  ;;  %v4049_v3 = vpop.f32.mrb[241].mxu0  ;;  %v4058_v61 = vadd.f32 %v15105_v58, %v12156_v54  ;;  %v15261_v34 = vpop.f32.mrb[142].mxu1  ;;  %v15263_v17 = vadd.f32 %v6379_v18, %v6378_v37  ;;  %v7010_v51 = vadd.f32 %v7009_v2, %v7008_v38 }
 0x2c5   :  { %v4050_v28 = vadd.f32 %v15105_v58, %v4049_v3  ;;  %v12157_v1 = vpop.f32.mrb[242].mxu0  ;;  %v15267_v29 = vpop.f32.mrb[143].mxu1  ;;  %v7011_v3 = vsel %vm5968_vm1, %v5876_v52, 0.0  ;;  %v5029_v36 = vadd.f32 %v15105_v58, %v15061_v40  ;;  %v7015_v33 = vsel %vm5968_vm1, %v5878_v59, 0.0 }
 0x2c6   :  { %v6480_v20 = vadd.f32 %v6479_v48, %v6478_v7  ;;  %v4061_v26 = vadd.f32 %v15105_v58, %v12157_v1  ;;  %v4052_v35 = vpop.f32.mrb[243].mxu0  ;;  %v15271_v63 = vpop.f32.mrb[144].mxu1  ;;  %v5037_v48 = vadd.f32 %v15105_v58, %v15057_v12  ;;  %v7012_v52 = vadd.f32 %v7011_v3, %v7010_v51  ;;  %v13326_v3 = vld [vmem:[%s13578_s9 + $0x588] sm:$0xff]  }
 0x2c7   :  { %v5632_v6 = vmax.f32 %v4050_v28, 0.0  ;;  %v4053_v54 = vadd.f32 %v15105_v58, %v4052_v35  ;;  %v15278_v57 = vpop.f32.mrb[145].mxu1  ;;  %v5634_v28 = vmax.f32 %v4058_v61, 0.0  ;;  %v5042_v51 = vadd.f32 %v15105_v58, %v15072_v15 }
 0x2c8   :  { %v6482_v18 = vadd.f32 %v6481_v43, %v6480_v20  ;;  %12263 = vmatmul.mubr.msk.bf16.gmra.mrb[92].mxu0 %vm2190_vm0, %v13324_v8  ;;  %16814 = vst [vmem:[#allocation15_spill] sm:$0xff] %v15278_v57  ;;  %v15282_v38 = vpop.f32.mrb[146].mxu1  ;;  %v5635_v8 = vmax.f32 %v4061_v26, 0.0  ;;  %v15307_v15 = vadd.f32 %v15105_v58, %v15078_v16 }
 0x2c9   :  { %v6483_v7 = vsel %vm5968_vm1, %v5632_v6, 0.0  ;;  %v5633_v2 = vmax.f32 %v4053_v54, 0.0  ;;  %12266 = vmatprep.mubr.msk.bf16.mxu0 %vm2190_vm0, %v13325_v31  ;;  %16815 = vst [vmem:[#allocation16_spill] sm:$0xff] %v15282_v38  ;;  %v15287_v12 = vpop.f32.mrb[147].mxu1  ;;  %v5050_v31 = vadd.f32 %v15105_v58, %v15068_v32  ;;  %v13327_v32 = vld [vmem:[%s13578_s9 + $0x590] sm:$0xff]  }
 0x2ca   :  { %v6484_v43 = vadd.f32 %v6483_v7, %v6482_v18  ;;  %16816 = vst [vmem:[#allocation17_spill] sm:$0xff] %v15287_v12  ;;  %v15295_v6 = vpop.f32.mrb[148].mxu1  ;;  %v5879_v18 = vmax.f32 %v5037_v48, 0.0  ;;  %v5877_v7 = vmax.f32 %v5029_v36, 0.0  ;;  %v5880_v12 = vmax.f32 %v5042_v51, 0.0 }
 0x2cb   :  { %v6485_v20 = vsel %vm5968_vm1, %v5633_v2, 0.0  ;;  %v12160_v35 = vpop.f32.mrb[244].mxu0  ;;  %16817 = vst [vmem:[#allocation18_spill] sm:$0xff] %v15295_v6  ;;  %v15299_v37 = vpop.f32.mrb[149].mxu1  ;;  %v6487_v2 = vsel %vm5968_vm1, %v5634_v28, 0.0 }
 0x2cc   :  { %v6486_v26 = vadd.f32 %v6485_v20, %v6484_v43  ;;  %v4074_v54 = vadd.f32 %v15105_v58, %v12160_v35  ;;  %v4065_v40 = vpop.f32.mrb[245].mxu0  ;;  %16818 = vst [vmem:[#allocation19_spill] sm:$0xff] %v15299_v37  ;;  %v15309_v43 = vpop.f32.mrb[150].mxu1  ;;  %v6489_v20 = vsel %vm5968_vm1, %v5635_v8, 0.0  ;;  %v5882_v37 = vmax.f32 %v5050_v31, 0.0 }
 0x2cd   :  { %v4066_v1 = vadd.f32 %v15105_v58, %v4065_v40  ;;  %v12161_v61 = vpop.f32.mrb[246].mxu0  ;;  %v15313_v28 = vpop.f32.mrb[151].mxu1  ;;  %v7013_v59 = vsel %vm5968_vm1, %v5877_v7, 0.0  ;;  %v7017_v8 = vsel %vm5968_vm1, %v5879_v18, 0.0  ;;  %v5883_v7 = vmax.f32 %v15307_v15, 0.0 }
 0x2ce   :  { %v6488_v48 = vadd.f32 %v6487_v2, %v6486_v26  ;;  %v4077_v36 = vadd.f32 %v15105_v58, %v12161_v61  ;;  %v4068_v35 = vpop.f32.mrb[247].mxu0  ;;  %v15317_v38 = vpop.f32.mrb[152].mxu1  ;;  %v5638_v16 = vmax.f32 %v4074_v54, 0.0  ;;  %v7014_v26 = vadd.f32 %v7013_v59, %v7012_v52 }
 0x2cf   :  { %v5636_v40 = vmax.f32 %v4066_v1, 0.0  ;;  %v4069_v6 = vadd.f32 %v15105_v58, %v4068_v35  ;;  %v15321_v61 = vpop.f32.mrb[153].mxu1  ;;  %v5045_v52 = vadd.f32 %v15105_v58, %v15082_v46  ;;  %v13328_v35 = vld [vmem:[%s13578_s9 + $0x598] sm:$0xff]  }
 0x2d0   :  { %v6490_v57 = vadd.f32 %v6489_v20, %v6488_v48  ;;  %12267 = vmatmul.mubr.msk.bf16.gmra.mrb[96].mxu0 %vm2190_vm0, %v13326_v3  ;;  %v5639_v2 = vmax.f32 %v4077_v36, 0.0  ;;  %v15326_v51 = vpop.f32.mrb[154].mxu1  ;;  %v7016_v20 = vadd.f32 %v7015_v33, %v7014_v26  ;;  %v7023_v3 = vsel %vm5968_vm1, %v5882_v37, 0.0 }
 0x2d1   :  { %v6491_v31 = vsel %vm5968_vm1, %v5636_v40, 0.0  ;;  %v5637_v1 = vmax.f32 %v4069_v6, 0.0  ;;  %12270 = vmatprep.mubr.msk.bf16.mxu0 %vm2190_vm0, %v13327_v32  ;;  %16819 = vst [vmem:[#allocation20_spill] sm:$0xff] %v15326_v51  ;;  %v15331_v18 = vpop.f32.mrb[155].mxu1  ;;  %v7019_v6 = vsel %vm5968_vm1, %v5880_v12, 0.0  ;;  %v5066_v32 = vadd.f32 %v15105_v58, %v15088_v9 }
 0x2d2   :  { %v6492_v54 = vadd.f32 %v6491_v31, %v6490_v57  ;;  %16820 = vst [vmem:[#allocation21_spill] sm:$0xff] %v15331_v18  ;;  %v5058_v57 = vadd.f32 %v15105_v58, %v15093_v14  ;;  %v15339_v33 = vpop.f32.mrb[156].mxu1  ;;  %v6495_v37 = vsel %vm5968_vm1, %v5638_v16, 0.0  ;;  %v7018_v40 = vadd.f32 %v7017_v8, %v7016_v20  ;;  %v13329_v18 = vld [vmem:[%s13578_s9 + $0x5a0] sm:$0xff]  }
 0x2d3   :  { %v6493_v48 = vsel %vm5968_vm1, %v5637_v1, 0.0  ;;  %v12164_v36 = vpop.f32.mrb[248].mxu0  ;;  %16821 = vst [vmem:[#allocation22_spill] sm:$0xff] %v15339_v33  ;;  %v5881_v59 = vmax.f32 %v5045_v52, 0.0  ;;  %v15343_v26 = vpop.f32.mrb[157].mxu1  ;;  %v6497_v31 = vsel %vm5968_vm1, %v5639_v2, 0.0  ;;  %v15351_v14 = vadd.f32 %v15105_v58, %v15099_v62 }
 0x2d4   :  { %v6494_v15 = vadd.f32 %v6493_v48, %v6492_v54  ;;  %v4081_v46 = vpop.f32.mrb[249].mxu0  ;;  %16822 = vst [vmem:[#allocation23_spill] sm:$0xff] %v15343_v26  ;;  %v4090_v12 = vadd.f32 %v15105_v58, %v12164_v36  ;;  %v15353_v16 = vpop.f32.mrb[158].mxu1  ;;  %v7020_v52 = vadd.f32 %v7019_v6, %v7018_v40  ;;  %v5886_v48 = vmax.f32 %v5066_v32, 0.0 }
 0x2d5   :  { %v4082_v9 = vadd.f32 %v15105_v58, %v4081_v46  ;;  %v12165_v1 = vpop.f32.mrb[250].mxu0  ;;  %16823 = vst [vmem:[#allocation24_spill] sm:$0xff] %v15353_v16  ;;  %v15356_v33 = vpop.f32.mrb[159].mxu1  ;;  %v7021_v46 = vsel %vm5968_vm1, %v5881_v59, 0.0  ;;  %v5884_v26 = vmax.f32 %v5058_v57, 0.0  ;;  %v16824_v62 = vrot.slane %v15090_v44, 4 }
 0x2d6   :  { %v6496_v54 = vadd.f32 %v6495_v37, %v6494_v15  ;;  %v4093_v8 = vadd.f32 %v15105_v58, %v12165_v1  ;;  %v4084_v20 = vpop.f32.mrb[251].mxu0  ;;  %v15360_v51 = vpop.f32.mrb[160].mxu1  ;;  %v7025_v6 = vsel %vm5968_vm1, %v5883_v7, 0.0  ;;  %v7022_v32 = vadd.f32 %v7021_v46, %v7020_v52 }
 0x2d7   :  { %v5640_v2 = vmax.f32 %v4082_v9, 0.0  ;;  %v4085_v36 = vadd.f32 %v15105_v58, %v4084_v20  ;;  %v15365_v16 = vadd.f32 %v16824_v62, %v15090_v44  ;;  %v15369_v15 = vpop.f32.mrb[161].mxu1  ;;  %v5642_v40 = vmax.f32 %v4090_v12, 0.0 }
 0x2d8   :  { %v6498_v37 = vadd.f32 %v6497_v31, %v6496_v54  ;;  %12271 = vmatmul.mubr.msk.bf16.gmra.mrb[100].mxu0 %vm2190_vm0, %v13328_v35  ;;  %v5643_v59 = vmax.f32 %v4093_v8, 0.0  ;;  %v15373_v1 = vpop.f32.mrb[162].mxu1  ;;  %v7024_v20 = vadd.f32 %v7023_v3, %v7022_v32  ;;  %v5887_v31 = vmax.f32 %v15351_v14, 0.0 }
 0x2d9   :  { %v6499_v9 = vsel %vm5968_vm1, %v5640_v2, 0.0  ;;  %v5641_v57 = vmax.f32 %v4085_v36, 0.0  ;;  %12274 = vmatprep.mubr.msk.bf16.mxu0 %vm2190_vm0, %v13329_v18  ;;  %v5061_v7 = vadd.f32 %v15105_v58, %v15111_v21  ;;  %v15378_v35 = vpop.f32.mrb[163].mxu1  ;;  %v7031_v8 = vsel %vm5968_vm1, %v5886_v48, 0.0  ;;  %v13330_v36 = vld [vmem:[%s13578_s9 + $0x5a8] sm:$0xff]  }
 0x2da   :  { %v6500_v44 = vadd.f32 %v6499_v9, %v6498_v37  ;;  %16825 = vst [vmem:[#allocation25_spill] sm:$0xff] %v15378_v35  ;;  %v7027_v52 = vsel %vm5968_vm1, %v5884_v26, 0.0  ;;  %v5074_v18 = vadd.f32 %v15105_v58, %v15123_v42  ;;  %v7026_v14 = vadd.f32 %v7025_v6, %v7024_v20  ;;  %v15388_v62 = vpop.f32.mrb[164].mxu1  ;;  %v13331_v42 = vld [vmem:[%s13578_s9 + $0x5b0] sm:$0xff]  }
 0x2db   :  { %v6501_v12 = vsel %vm5968_vm1, %v5641_v57, 0.0  ;;  %v12168_v54 = vpop.f32.mrb[252].mxu0  ;;  %v5885_v46 = vmax.f32 %v5061_v7, 0.0  ;;  %v5082_v21 = vadd.f32 %v15105_v58, %v15118_v45  ;;  %16826 = vst [vmem:[#allocation26_spill] sm:$0xff] %v15388_v62  ;;  %v6503_v37 = vsel %vm5968_vm1, %v5642_v40, 0.0  ;;  %v15395_v57 = vpop.f32.mrb[165].mxu1 }
 0x2dc   :  { %v6502_v2 = vadd.f32 %v6501_v12, %v6500_v44  ;;  %v4097_v3 = vpop.f32.mrb[253].mxu0  ;;  %v6505_v32 = vsel %vm5968_vm1, %v5643_v59, 0.0  ;;  %v4106_v48 = vadd.f32 %v15105_v58, %v12168_v54  ;;  %v7028_v7 = vadd.f32 %v7027_v52, %v7026_v14  ;;  %v15400_v12 = vpop.f32.mrb[166].mxu1 }
 0x2dd   :  { %v4098_v26 = vadd.f32 %v15105_v58, %v4097_v3  ;;  %v12169_v9 = vpop.f32.mrb[254].mxu0  ;;  %v5085_v45 = vadd.f32 %v15105_v58, %v15129_v41  ;;  %v7029_v54 = vsel %vm5968_vm1, %v5885_v46, 0.0  ;;  %v5888_v3 = vmax.f32 %v5074_v18, 0.0  ;;  %v15404_v62 = vpop.f32.mrb[167].mxu1 }
 0x2de   :  { %v6504_v44 = vadd.f32 %v6503_v37, %v6502_v2  ;;  %v4109_v6 = vadd.f32 %v15105_v58, %v12169_v9  ;;  %v4100_v20 = vpop.f32.mrb[255].mxu0  ;;  %v7033_v2 = vsel %vm5968_vm1, %v5887_v31, 0.0  ;;  %v7030_v37 = vadd.f32 %v7029_v54, %v7028_v7 }
 0x2df   :  { %v5644_v40 = vmax.f32 %v4098_v26, 0.0  ;;  %v4101_v59 = vadd.f32 %v15105_v58, %v4100_v20  ;;  %v5890_v52 = vmax.f32 %v5082_v21, 0.0  ;;  %v5646_v14 = vmax.f32 %v4106_v48, 0.0 }
 0x2e0   :  { %v6506_v35 = vadd.f32 %v6505_v32, %v6504_v44  ;;  %12275 = vmatmul.mubr.msk.bf16.gmra.mrb[104].mxu0 %vm2190_vm0, %v13330_v36  ;;  %v5647_v9 = vmax.f32 %v4109_v6, 0.0  ;;  %v6448_v46 = vrot.slane %v15365_v16, 2  ;;  %v7032_v20 = vadd.f32 %v7031_v8, %v7030_v37 }
 0x2e1   :  { %v6507_v41 = vsel %vm5968_vm1, %v5644_v40, 0.0  ;;  %v5645_v26 = vmax.f32 %v4101_v59, 0.0  ;;  %12278 = vmatprep.mubr.msk.bf16.mxu0 %vm2190_vm0, %v13331_v42  ;;  %v5077_v32 = vadd.f32 %v15105_v58, %v15134_v24  ;;  %v7035_v21 = vsel %vm5968_vm1, %v5888_v3, 0.0  ;;  %v13332_v40 = vld [vmem:[%s13578_s9 + $0x5b8] sm:$0xff]   ;;  %v15424_v3 = vpop.f32.mrb[168].mxu1 }
 0x2e2   :  { %v6508_v18 = vadd.f32 %v6507_v41, %v6506_v35  ;;  %v5891_v48 = vmax.f32 %v5085_v45, 0.0  ;;  %v5090_v44 = vadd.f32 %v15105_v58, %v15145_v22  ;;  %v7034_v35 = vadd.f32 %v7033_v2, %v7032_v20  ;;  %v13333_v41 = vld [vmem:[%s13578_s9 + $0x5c0] sm:$0xff]   ;;  %v15429_v20 = vpop.f32.mrb[169].mxu1 }
 0x2e3   :  { %v6509_v31 = vsel %vm5968_vm1, %v5645_v26, 0.0  ;;  %v12172_v36 = vpop.f32.mrb[0].mxu0  ;;  %v5889_v8 = vmax.f32 %v5077_v32, 0.0  ;;  %v6511_v59 = vsel %vm5968_vm1, %v5646_v14, 0.0  ;;  %v6513_v24 = vsel %vm5968_vm1, %v5647_v9, 0.0 }
 0x2e4   :  { %v6510_v6 = vadd.f32 %v6509_v31, %v6508_v18  ;;  %v4122_v42 = vadd.f32 %v15105_v58, %v12172_v36  ;;  %v4113_v7 = vpop.f32.mrb[1].mxu0  ;;  %v7039_v45 = vsel %vm5968_vm1, %v5890_v52, 0.0  ;;  %v7036_v31 = vadd.f32 %v7035_v21, %v7034_v35  ;;  %v15435_v36 = vpop.f32.mrb[170].mxu1 }
 0x2e5   :  { %v4114_v54 = vadd.f32 %v15105_v58, %v4113_v7  ;;  %v12173_v37 = vpop.f32.mrb[2].mxu0  ;;  %v5098_v2 = vadd.f32 %v15105_v58, %v15138_v47  ;;  %v7037_v32 = vsel %vm5968_vm1, %v5889_v8, 0.0  ;;  %v5101_v52 = vadd.f32 %v15105_v58, %v15149_v27  ;;  %v15440_v47 = vpop.f32.mrb[171].mxu1 }
 0x2e6   :  { %v6512_v22 = vadd.f32 %v6511_v59, %v6510_v6  ;;  %v4125_v26 = vadd.f32 %v15105_v58, %v12173_v37  ;;  %v4116_v18 = vpop.f32.mrb[3].mxu0  ;;  %v5650_v7 = vmax.f32 %v4122_v42, 0.0  ;;  %v7038_v21 = vadd.f32 %v7037_v32, %v7036_v31 }
 0x2e7   :  { %v5648_v14 = vmax.f32 %v4114_v54, 0.0  ;;  %v4117_v9 = vadd.f32 %v15105_v58, %v4116_v18  ;;  %v5892_v35 = vmax.f32 %v5090_v44, 0.0  ;;  %v16827_v59 = vrot.slane %v15263_v17, 1 }
 0x2e8   :  { %v15437_v6 = vadd.f32 %v6513_v24, %v6512_v22  ;;  %12279 = vmatmul.mubr.msk.bf16.gmra.mrb[108].mxu0 %vm2190_vm0, %v13332_v40  ;;  %v5651_v8 = vmax.f32 %v4125_v26, 0.0  ;;  %v7041_v27 = vsel %vm5968_vm1, %v5891_v48, 0.0  ;;  %v15450_v42 = vadd.f32 %v6448_v46, %v15365_v16  ;;  %v13334_v46 = vld [vmem:[%s13578_s9 + $0x5c8] sm:$0xff]  }
 0x2e9   :  { %v15445_v54 = vadd.f32 %v16827_v59, %v15263_v17  ;;  %v5649_v37 = vmax.f32 %v4117_v9, 0.0  ;;  %12282 = vmatprep.mubr.msk.bf16.mxu0 %vm2190_vm0, %v13333_v41  ;;  %v7040_v40 = vadd.f32 %v7039_v45, %v7038_v21  ;;  %v5894_v24 = vmax.f32 %v5098_v2, 0.0  ;;  %v13335_v21 = vld [vmem:[%s13578_s9 + $0x5d0] sm:$0xff]   ;;  %v15465_v59 = vpop.f32.mrb[172].mxu1 }
 0x2ea   :  { %v5093_v44 = vadd.f32 %v15105_v58, %v15152_v50  ;;  %v6521_v22 = vsel %vm5968_vm1, %v5648_v14, 0.0  ;;  %v5895_v18 = vmax.f32 %v5101_v52, 0.0  ;;  %v5106_v41 = vadd.f32 %v15105_v58, %v15164_v19 }
 0x2eb   :  { %v6522_v17 = vsel %vm5968_vm1, %v5649_v37, 0.0  ;;  %v12176_v26 = vpop.f32.mrb[4].mxu0  ;;  %v6524_v48 = vsel %vm5968_vm1, %v5650_v7, 0.0  ;;  %v7042_v45 = vadd.f32 %v7041_v27, %v7040_v40  ;;  %v7043_v2 = vsel %vm5968_vm1, %v5892_v35, 0.0  ;;  %v15470_v35 = vpop.f32.mrb[173].mxu1 }
 0x2ec   :  { %v6523_v31 = vadd.f32 %v6522_v17, %v6521_v22  ;;  %v4129_v16 = vpop.f32.mrb[5].mxu0  ;;  %v6526_v50 = vsel %vm5968_vm1, %v5651_v8, 0.0  ;;  %v4138_v9 = vadd.f32 %v15105_v58, %v12176_v26  ;;  %v5893_v52 = vmax.f32 %v5093_v44, 0.0 }
 0x2ed   :  { %v4130_v14 = vadd.f32 %v15105_v58, %v4129_v16  ;;  %v12177_v32 = vpop.f32.mrb[6].mxu0  ;;  %v5114_v27 = vadd.f32 %v15105_v58, %v15159_v25  ;;  %v5896_v40 = vmax.f32 %v5106_v41, 0.0  ;;  %v7044_v17 = vadd.f32 %v7043_v2, %v7042_v45  ;;  %v15474_v16 = vpop.f32.mrb[174].mxu1 }
 0x2ee   :  { %v6525_v19 = vadd.f32 %v6524_v48, %v6523_v31  ;;  %v4141_v7 = vadd.f32 %v15105_v58, %v12177_v32  ;;  %v4132_v37 = vpop.f32.mrb[7].mxu0  ;;  %v7045_v26 = vsel %vm5968_vm1, %v5893_v52, 0.0  ;;  %v7047_v31 = vsel %vm5968_vm1, %v5894_v24, 0.0  ;;  %v15481_v41 = vpop.f32.mrb[175].mxu1 }
 0x2ef   :  { %v5652_v8 = vmax.f32 %v4130_v14, 0.0  ;;  %v4133_v22 = vadd.f32 %v15105_v58, %v4132_v37  ;;  %v5117_v25 = vadd.f32 %v15105_v58, %v15169_v55  ;;  %16828 = vst [vmem:[#allocation27_spill] sm:$0xff] %v15481_v41  ;;  %v5654_v14 = vmax.f32 %v4138_v9, 0.0 }
 0x2f0   :  { %v6527_v48 = vadd.f32 %v6526_v50, %v6525_v19  ;;  %12283 = vmatmul.mubr.msk.bf16.gmra.mrb[112].mxu0 %vm2190_vm0, %v13334_v46  ;;  %v7046_v2 = vadd.f32 %v7045_v26, %v7044_v17  ;;  %v5655_v37 = vmax.f32 %v4141_v7, 0.0  ;;  %v7049_v50 = vsel %vm5968_vm1, %v5895_v18, 0.0  ;;  %v13336_v17 = vld [vmem:[%s13578_s9 + $0x5d8] sm:$0xff]  }
 0x2f1   :  { %v6528_v32 = vsel %vm5968_vm1, %v5652_v8, 0.0  ;;  %v5653_v45 = vmax.f32 %v4133_v22, 0.0  ;;  %12286 = vmatprep.mubr.msk.bf16.mxu0 %vm2190_vm0, %v13335_v21  ;;  %v5898_v46 = vmax.f32 %v5114_v27, 0.0  ;;  %v7051_v44 = vsel %vm5968_vm1, %v5896_v40, 0.0 }
 0x2f2   :  { %v6529_v52 = vadd.f32 %v6528_v32, %v6527_v48  ;;  %v7048_v55 = vadd.f32 %v7047_v31, %v7046_v2  ;;  %v5109_v9 = vadd.f32 %v15105_v58, %v15175_v11  ;;  %v5899_v26 = vmax.f32 %v5117_v25, 0.0  ;;  %v13337_v31 = vld [vmem:[%s13578_s9 + $0x5e0] sm:$0xff]  }
 0x2f3   :  { %v6530_v24 = vsel %vm5968_vm1, %v5653_v45, 0.0  ;;  %v12180_v19 = vpop.f32.mrb[8].mxu0  ;;  %v5130_v18 = vadd.f32 %v15105_v58, %v15179_v30  ;;  %v6532_v7 = vsel %vm5968_vm1, %v5654_v14, 0.0  ;;  %v15497_v45 = vpop.f32.mrb[176].mxu1  ;;  %v6534_v11 = vsel %vm5968_vm1, %v5655_v37, 0.0 }
 0x2f4   :  { %v6531_v8 = vadd.f32 %v6530_v24, %v6529_v52  ;;  %v4154_v22 = vadd.f32 %v15105_v58, %v12180_v19  ;;  %v4145_v21 = vpop.f32.mrb[9].mxu0  ;;  %v7050_v32 = vadd.f32 %v7049_v50, %v7048_v55  ;;  %v5897_v40 = vmax.f32 %v5109_v9, 0.0  ;;  %v15502_v19 = vpop.f32.mrb[177].mxu1 }
 0x2f5   :  { %v4146_v27 = vadd.f32 %v15105_v58, %v4145_v21  ;;  %v12181_v48 = vpop.f32.mrb[10].mxu0  ;;  %v7055_v25 = vsel %vm5968_vm1, %v5898_v46, 0.0  ;;  %v15506_v50 = vpop.f32.mrb[178].mxu1  ;;  %v7057_v37 = vsel %vm5968_vm1, %v5899_v26, 0.0  ;;  %v5125_v26 = vadd.f32 %v15105_v58, %v15196_v0 }
 0x2f6   :  { %v6533_v2 = vadd.f32 %v6532_v7, %v6531_v8  ;;  %v4157_v52 = vadd.f32 %v15105_v58, %v12181_v48  ;;  %v4148_v24 = vpop.f32.mrb[11].mxu0  ;;  %v7052_v21 = vadd.f32 %v7051_v44, %v7050_v32  ;;  %v7053_v41 = vsel %vm5968_vm1, %v5897_v40, 0.0  ;;  %v15510_v7 = vpop.f32.mrb[179].mxu1 }
 0x2f7   :  { %v5656_v30 = vmax.f32 %v4146_v27, 0.0  ;;  %v4149_v14 = vadd.f32 %v15105_v58, %v4148_v24  ;;  %v5658_v55 = vmax.f32 %v4154_v22, 0.0  ;;  %v5902_v8 = vmax.f32 %v5130_v18, 0.0 }
 0x2f8   :  { %v6535_v9 = vadd.f32 %v6534_v11, %v6533_v2  ;;  %12287 = vmatmul.mubr.msk.bf16.gmra.mrb[116].mxu0 %vm2190_vm0, %v13336_v17  ;;  %v7054_v44 = vadd.f32 %v7053_v41, %v7052_v21  ;;  %v5122_v27 = vadd.f32 %v15105_v58, %v15184_v56  ;;  %v5659_v22 = vmax.f32 %v4157_v52, 0.0 }
 0x2f9   :  { %v6536_v46 = vsel %vm5968_vm1, %v5656_v30, 0.0  ;;  %v5657_v48 = vmax.f32 %v4149_v14, 0.0  ;;  %12290 = vmatprep.mubr.msk.bf16.mxu0 %vm2190_vm0, %v13337_v31  ;;  %v5133_v17 = vadd.f32 %v15105_v58, %v15191_v23  ;;  %v5146_v31 = vadd.f32 %v15105_v58, %v15201_v60  ;;  %v13338_v30 = vld [vmem:[%s13578_s9 + $0x5e8] sm:$0xff]   ;;  %s13528_s9 = smov 2  }
 0x2fa   :  { %v6537_v32 = vadd.f32 %v6536_v46, %v6535_v9  ;;  %v7056_v11 = vadd.f32 %v7055_v25, %v7054_v44  ;;  %v5900_v2 = vmax.f32 %v5122_v27, 0.0  ;;  %v5901_v14 = vmax.f32 %v5125_v26, 0.0  ;;  %v15528_v25 = vpop.f32.mrb[180].mxu1  ;;  %s10671_s12 = sld [smem:[%s16791_s0 + %s13528_s9]]   ;;  %s13559_s9 = smov 29  }
 0x2fb   :  { %v6538_v18 = vsel %vm5968_vm1, %v5657_v48, 0.0  ;;  %v12184_v40 = vpop.f32.mrb[12].mxu0  ;;  %v5903_v52 = vmax.f32 %v5133_v17, 0.0  ;;  %v6540_v23 = vsel %vm5968_vm1, %v5658_v55, 0.0  ;;  %v6542_v48 = vsel %vm5968_vm1, %v5659_v22, 0.0  ;;  %v15533_v17 = vpop.f32.mrb[181].mxu1 }
 0x2fc   :  { %v6539_v41 = vadd.f32 %v6538_v18, %v6537_v32  ;;  %v4170_v24 = vadd.f32 %v15105_v58, %v12184_v40  ;;  %v4161_v56 = vpop.f32.mrb[13].mxu0  ;;  %v7058_v9 = vadd.f32 %v7057_v37, %v7056_v11  ;;  %v7059_v46 = vsel %vm5968_vm1, %v5900_v2, 0.0  ;;  %v15537_v40 = vpop.f32.mrb[182].mxu1 }
 0x2fd   :  { %v4162_v21 = vadd.f32 %v15105_v58, %v4161_v56  ;;  %v12185_v0 = vpop.f32.mrb[14].mxu0  ;;  %v7063_v32 = vsel %vm5968_vm1, %v5902_v8, 0.0  ;;  %v7061_v37 = vsel %vm5968_vm1, %v5901_v14, 0.0  ;;  %v7065_v22 = vsel %vm5968_vm1, %v5903_v52, 0.0  ;;  %v15541_v56 = vpop.f32.mrb[183].mxu1 }
 0x2fe   :  { %v6541_v60 = vadd.f32 %v6540_v23, %v6539_v41  ;;  %v4173_v44 = vadd.f32 %v15105_v58, %v12185_v0  ;;  %v4164_v27 = vpop.f32.mrb[15].mxu0  ;;  %v7060_v18 = vadd.f32 %v7059_v46, %v7058_v9  ;;  %v5662_v11 = vmax.f32 %v4170_v24, 0.0 }
 0x2ff   :  { %v5660_v26 = vmax.f32 %v4162_v21, 0.0  ;;  %v4165_v55 = vadd.f32 %v15105_v58, %v4164_v27  ;;  %v5906_v41 = vmax.f32 %v5146_v31, 0.0  ;;  %v5138_v0 = vadd.f32 %v15105_v58, %v15206_v39 }
 0x300   :  { %v6543_v2 = vadd.f32 %v6542_v48, %v6541_v60  ;;  %12291 = vmatmul.mubr.msk.bf16.gmra.mrb[120].mxu0 %vm2190_vm0, %v13338_v30  ;;  %v7062_v21 = vadd.f32 %v7061_v37, %v7060_v18  ;;  %v5663_v9 = vmax.f32 %v4173_v44, 0.0  ;;  %v5149_v24 = vadd.f32 %v15105_v58, %v15212_v13 }
 0x301   :  { %v6544_v8 = vsel %vm5968_vm1, %v5660_v26, 0.0  ;;  %v5661_v23 = vmax.f32 %v4165_v55, 0.0  ;;  %v5141_v30 = vadd.f32 %v15105_v58, %v15218_v49  ;;  %v16829_v31 = vrot.slane %v15450_v42, 1  ;;  %v15556_v55 = vld [vmem:[%s13703_s13] ss:$0 sm:$0xff] }
 0x302   :  { %v6545_v14 = vadd.f32 %v6544_v8, %v6543_v2  ;;  %v7064_v60 = vadd.f32 %v7063_v32, %v7062_v21  ;;  %v5904_v27 = vmax.f32 %v5138_v0, 0.0  ;;  %v6548_v26 = vsel %vm5968_vm1, %v5662_v11, 0.0  ;;  %v15563_v8 = vpop.f32.mrb[184].mxu1 }
 0x303   :  { %v6451_v52 = vadd.f32 %v16829_v31, %v15450_v42  ;;  %v6546_v46 = vsel %vm5968_vm1, %v5661_v23, 0.0  ;;  %v12188_v48 = vpop.f32.mrb[16].mxu0  ;;  %v5905_v18 = vmax.f32 %v5141_v30, 0.0  ;;  %v5907_v2 = vmax.f32 %v5149_v24, 0.0 }
 0x304   :  { %v6547_v39 = vadd.f32 %v6546_v46, %v6545_v14  ;;  %v4186_v44 = vadd.f32 %v15556_v55, %v12188_v48  ;;  %v4177_v13 = vpop.f32.mrb[17].mxu0  ;;  %v15560_v37 = vadd.f32 %v7065_v22, %v7064_v60  ;;  %v7073_v42 = vsel %vm5968_vm1, %v5904_v27, 0.0  ;;  %v15569_v14 = vpop.f32.mrb[185].mxu1 }
 0x305   :  { %v4178_v58 = vadd.f32 %v15556_v55, %v4177_v13  ;;  %v12189_v49 = vpop.f32.mrb[18].mxu0  ;;  %v6550_v32 = vsel %vm5968_vm1, %v5663_v9, 0.0  ;;  %v7076_v21 = vsel %vm5968_vm1, %v5906_v41, 0.0  ;;  %v5162_v0 = vadd.f32 %v15556_v55, %v15223_v4  ;;  %v15574_v46 = vpop.f32.mrb[186].mxu1 }
 0x306   :  { %16830 = vst [vmem:[#allocation28_spill] sm:$0xff] %v15560_v37  ;;  %v6549_v11 = vadd.f32 %v6548_v26, %v6547_v39  ;;  %v4180_v23 = vpop.f32.mrb[19].mxu0  ;;  %v4189_v22 = vadd.f32 %v15556_v55, %v12189_v49  ;;  %v7074_v24 = vsel %vm5968_vm1, %v5905_v18, 0.0  ;;  %v15577_v9 = vmul.f32 0.00390625, %v15445_v54  ;;  %v15581_v27 = vpop.f32.mrb[187].mxu1 }
 0x307   :  { %v5664_v30 = vmax.f32 %v4178_v58, 0.0  ;;  %v4181_v31 = vadd.f32 %v15556_v55, %v4180_v23  ;;  %v15579_v48 = vmul.f32 0.00390625, %v6451_v52  ;;  %v7075_v60 = vadd.f32 %v7074_v24, %v7073_v42 }
 0x308   :  { %v6551_v41 = vadd.f32 %v6550_v32, %v6549_v11  ;;  %v5666_v4 = vmax.f32 %v4186_v44, 0.0  ;;  %v7078_v13 = vsel %vm5968_vm1, %v5907_v2, 0.0  ;;  %v5910_v18 = vmax.f32 %v5162_v0, 0.0 }
 0x309   :  { %v6552_v26 = vsel %vm5968_vm1, %v5664_v30, 0.0  ;;  %v5665_v39 = vmax.f32 %v4181_v31, 0.0  ;;  %v7077_v49 = vadd.f32 %v7076_v21, %v7075_v60  ;;  %v5154_v23 = vadd.f32 %v15556_v55, %v15232_v5 }
 0x30a   :  { %v6553_v58 = vadd.f32 %v6552_v26, %v6551_v41  ;;  %v5667_v54 = vmax.f32 %v4189_v22, 0.0  ;;  %v5165_v42 = vadd.f32 %v15556_v55, %v15237_v53  ;;  %v5157_v44 = vadd.f32 %v15556_v55, %v15239_v10  ;;  %v15595_v41 = vpop.f32.mrb[188].mxu1 }
 0x30b   :  { %v6554_v52 = vsel %vm5968_vm1, %v5665_v39, 0.0  ;;  %v12192_v37 = vpop.f32.mrb[20].mxu0  ;;  %v5908_v30 = vmax.f32 %v5154_v23, 0.0  ;;  %v7079_v21 = vadd.f32 %v7078_v13, %v7077_v49  ;;  %v6556_v0 = vsel %vm5968_vm1, %v5666_v4, 0.0 }
 0x30c   :  { %v6555_v32 = vadd.f32 %v6554_v52, %v6553_v58  ;;  %v4202_v11 = vadd.f32 %v15556_v55, %v12192_v37  ;;  %v4193_v2 = vpop.f32.mrb[21].mxu0  ;;  %v5911_v31 = vmax.f32 %v5165_v42, 0.0  ;;  %v5909_v24 = vmax.f32 %v5157_v44, 0.0  ;;  %v15599_v37 = vpop.f32.mrb[189].mxu1 }
 0x30d   :  { %v4194_v5 = vadd.f32 %v15556_v55, %v4193_v2  ;;  %v12193_v22 = vpop.f32.mrb[22].mxu0  ;;  %v7080_v39 = vsel %vm5968_vm1, %v5908_v30, 0.0  ;;  %v6558_v13 = vsel %vm5968_vm1, %v5667_v54, 0.0  ;;  %v15603_v23 = vpop.f32.mrb[190].mxu1 }
 0x30e   :  { %v6557_v60 = vadd.f32 %v6556_v0, %v6555_v32  ;;  %v5670_v53 = vmax.f32 %v4202_v11, 0.0  ;;  %v4205_v26 = vadd.f32 %v15556_v55, %v12193_v22  ;;  %v4196_v10 = vpop.f32.mrb[23].mxu0  ;;  %v7081_v49 = vadd.f32 %v7080_v39, %v7079_v21  ;;  %16831 = vst [vmem:[#allocation29_spill] sm:$0xff] %v15603_v23  ;;  %v15608_v11 = vpop.f32.mrb[191].mxu1 }
 0x30f   :  { %v5668_v58 = vmax.f32 %v4194_v5, 0.0  ;;  %v4197_v4 = vadd.f32 %v15556_v55, %v4196_v10  ;;  %v7084_v32 = vsel %vm5968_vm1, %v5910_v18, 0.0  ;;  %16832 = vst [vmem:[#allocation30_spill] sm:$0xff] %v15608_v11  ;;  %v7082_v54 = vsel %vm5968_vm1, %v5909_v24, 0.0  ;;  %v16833_v10 = vld [vmem:[#allocation13_spill] sm:$0xff] }
 0x310   :  { %v6564_v42 = vsel %vm5968_vm1, %v5670_v53, 0.0  ;;  %v6559_v44 = vadd.f32 %v6558_v13, %v6557_v60  ;;  %v5671_v30 = vmax.f32 %v4205_v26, 0.0  ;;  %v7086_v21 = vsel %vm5968_vm1, %v5911_v31, 0.0  ;;  %v16834_v13 = vld [vmem:[#allocation14_spill] sm:$0xff] }
 0x311   :  { %v6560_v2 = vsel %vm5968_vm1, %v5668_v58, 0.0  ;;  %v5669_v0 = vmax.f32 %v4197_v4, 0.0  ;;  %v7083_v22 = vadd.f32 %v7082_v54, %v7081_v49  ;;  %v5178_v39 = vadd.f32 %v15556_v55, %v16833_v10 }
 0x312   :  { %v6561_v5 = vadd.f32 %v6560_v2, %v6559_v44  ;;  %v5170_v18 = vadd.f32 %v15556_v55, %v16834_v13  ;;  %v5181_v58 = vadd.f32 %v15556_v55, %v15261_v34  ;;  %v5173_v26 = vadd.f32 %v15556_v55, %v15267_v29  ;;  %v15625_v13 = vpop.f32.mrb[192].mxu1 }
 0x313   :  { %v6562_v53 = vsel %vm5968_vm1, %v5669_v0, 0.0  ;;  %v12196_v60 = vpop.f32.mrb[24].mxu0  ;;  %v7085_v49 = vadd.f32 %v7084_v32, %v7083_v22  ;;  %v5914_v44 = vmax.f32 %v5178_v39, 0.0  ;;  %v6566_v2 = vsel %vm5968_vm1, %v5671_v30, 0.0  ;;  %16835 = vst [vmem:[#allocation13_spill] sm:$0xff] %v15625_v13 }
 0x314   :  { %v6563_v24 = vadd.f32 %v6562_v53, %v6561_v5  ;;  %v4218_v4 = vadd.f32 %v15556_v55, %v12196_v60  ;;  %v4209_v31 = vpop.f32.mrb[25].mxu0  ;;  %v5912_v10 = vmax.f32 %v5170_v18, 0.0  ;;  %v5913_v52 = vmax.f32 %v5173_v26, 0.0  ;;  %v15628_v53 = vpop.f32.mrb[193].mxu1 }
 0x315   :  { %v4210_v0 = vadd.f32 %v15556_v55, %v4209_v31  ;;  %v12197_v54 = vpop.f32.mrb[26].mxu0  ;;  %v5915_v5 = vmax.f32 %v5181_v58, 0.0  ;;  %16836 = vst [vmem:[#allocation14_spill] sm:$0xff] %v15628_v53  ;;  %v7087_v22 = vadd.f32 %v7086_v21, %v7085_v49  ;;  %v15632_v39 = vpop.f32.mrb[194].mxu1  ;;  %v5194_v49 = vadd.f32 %v15556_v55, %v15271_v63 }
 0x316   :  { %v6565_v11 = vadd.f32 %v6564_v42, %v6563_v24  ;;  %v5674_v34 = vmax.f32 %v4218_v4, 0.0  ;;  %v4221_v23 = vadd.f32 %v15556_v55, %v12197_v54  ;;  %v4212_v29 = vpop.f32.mrb[27].mxu0  ;;  %v7088_v30 = vsel %vm5968_vm1, %v5912_v10, 0.0  ;;  %16837 = vst [vmem:[#allocation31_spill] sm:$0xff] %v15632_v39  ;;  %v15636_v24 = vpop.f32.mrb[195].mxu1  ;;  %v16839_v10 = vld [vmem:[#allocation15_spill] sm:$0xff] }
 0x317   :  { %v5672_v60 = vmax.f32 %v4210_v0, 0.0  ;;  %v4213_v32 = vadd.f32 %v15556_v55, %v4212_v29  ;;  %v7092_v42 = vsel %vm5968_vm1, %v5914_v44, 0.0  ;;  %16838 = vst [vmem:[#allocation32_spill] sm:$0xff] %v15636_v24  ;;  %v7089_v54 = vadd.f32 %v7088_v30, %v7087_v22 }
 0x318   :  { %v6572_v18 = vsel %vm5968_vm1, %v5674_v34, 0.0  ;;  %v6567_v26 = vadd.f32 %v6566_v2, %v6565_v11  ;;  %v5675_v31 = vmax.f32 %v4221_v23, 0.0  ;;  %v7090_v0 = vsel %vm5968_vm1, %v5913_v52, 0.0  ;;  %v16840_v34 = vld [vmem:[#allocation16_spill] sm:$0xff] }
 0x319   :  { %v6568_v58 = vsel %vm5968_vm1, %v5672_v60, 0.0  ;;  %v5673_v4 = vmax.f32 %v4213_v32, 0.0  ;;  %v7094_v21 = vsel %vm5968_vm1, %v5915_v5, 0.0  ;;  %v5186_v11 = vadd.f32 %v15556_v55, %v16839_v10  ;;  %v16841_v32 = vld [vmem:[#allocation17_spill] sm:$0xff] }
 0x31a   :  { %v6569_v29 = vadd.f32 %v6568_v58, %v6567_v26  ;;  %v7091_v2 = vadd.f32 %v7090_v0, %v7089_v54  ;;  %v5197_v60 = vadd.f32 %v15556_v55, %v16840_v34  ;;  %v5189_v22 = vadd.f32 %v15556_v55, %v16841_v32 }
 0x31b   :  { %v6570_v23 = vsel %vm5968_vm1, %v5673_v4, 0.0  ;;  %v12200_v44 = vpop.f32.mrb[28].mxu0  ;;  %v5918_v26 = vmax.f32 %v5194_v49, 0.0  ;;  %v5916_v58 = vmax.f32 %v5186_v11, 0.0  ;;  %v6574_v63 = vsel %vm5968_vm1, %v5675_v31, 0.0 }
 0x31c   :  { %v6571_v52 = vadd.f32 %v6570_v23, %v6569_v29  ;;  %v4234_v30 = vadd.f32 %v15556_v55, %v12200_v44  ;;  %v4225_v5 = vpop.f32.mrb[29].mxu0  ;;  %v7093_v4 = vadd.f32 %v7092_v42, %v7091_v2  ;;  %v5917_v39 = vmax.f32 %v5189_v22, 0.0 }
 0x31d   :  { %v4226_v10 = vadd.f32 %v15556_v55, %v4225_v5  ;;  %v12201_v24 = vpop.f32.mrb[30].mxu0  ;;  %v5919_v13 = vmax.f32 %v5197_v60, 0.0  ;;  %v7096_v49 = vsel %vm5968_vm1, %v5916_v58, 0.0  ;;  %v7100_v5 = vsel %vm5968_vm1, %v5918_v26, 0.0 }
 0x31e   :  { %v6573_v54 = vadd.f32 %v6572_v18, %v6571_v52  ;;  %v5678_v0 = vmax.f32 %v4234_v30, 0.0  ;;  %v4237_v34 = vadd.f32 %v15556_v55, %v12201_v24  ;;  %v4228_v53 = vpop.f32.mrb[31].mxu0  ;;  %v7095_v23 = vadd.f32 %v7094_v21, %v7093_v4  ;;  %v16842_v52 = vld [vmem:[#allocation18_spill] sm:$0xff]  ;;  %v16843_v21 = vld [vmem:[#allocation19_spill] sm:$0xff] }
 0x31f   :  { %v5676_v32 = vmax.f32 %v4226_v10, 0.0  ;;  %v4229_v29 = vadd.f32 %v15556_v55, %v4228_v53  ;;  %v7098_v24 = vsel %vm5968_vm1, %v5917_v39, 0.0  ;;  %v7102_v60 = vsel %vm5968_vm1, %v5919_v13, 0.0 }
 0x320   :  { %v6580_v11 = vsel %vm5968_vm1, %v5678_v0, 0.0  ;;  %v6575_v31 = vadd.f32 %v6574_v63, %v6573_v54  ;;  %v5679_v44 = vmax.f32 %v4237_v34, 0.0  ;;  %v7097_v2 = vadd.f32 %v7096_v49, %v7095_v23 }
 0x321   :  { %v6576_v42 = vsel %vm5968_vm1, %v5676_v32, 0.0  ;;  %v5677_v18 = vmax.f32 %v4229_v29, 0.0  ;;  %v5210_v53 = vadd.f32 %v15556_v55, %v16842_v52  ;;  %v5202_v30 = vadd.f32 %v15556_v55, %v16843_v21 }
 0x322   :  { %v6577_v22 = vadd.f32 %v6576_v42, %v6575_v31  ;;  %v7099_v10 = vadd.f32 %v7098_v24, %v7097_v2  ;;  %v5213_v26 = vadd.f32 %v15556_v55, %v15309_v43  ;;  %v5205_v4 = vadd.f32 %v15556_v55, %v15313_v28 }
 0x323   :  { %v6578_v58 = vsel %vm5968_vm1, %v5677_v18, 0.0  ;;  %v12204_v63 = vpop.f32.mrb[32].mxu0  ;;  %v6582_v39 = vsel %vm5968_vm1, %v5679_v44, 0.0  ;;  %v5920_v34 = vmax.f32 %v5202_v30, 0.0  ;;  %v5922_v49 = vmax.f32 %v5210_v53, 0.0 }
 0x324   :  { %v6579_v54 = vadd.f32 %v6578_v58, %v6577_v22  ;;  %v4250_v13 = vadd.f32 %v15556_v55, %v12204_v63  ;;  %v4241_v0 = vpop.f32.mrb[33].mxu0  ;;  %v7101_v23 = vadd.f32 %v7100_v5, %v7099_v10  ;;  %v5921_v31 = vmax.f32 %v5205_v4, 0.0 }
 0x325   :  { %v4242_v32 = vadd.f32 %v15556_v55, %v4241_v0  ;;  %v12205_v29 = vpop.f32.mrb[34].mxu0  ;;  %v5923_v24 = vmax.f32 %v5213_v26, 0.0  ;;  %v7104_v52 = vsel %vm5968_vm1, %v5920_v34, 0.0  ;;  %v7237_v21 = vpack.c.bf16 %v15577_v9, %v15577_v9 }
 0x326   :  { %v6581_v42 = vadd.f32 %v6580_v11, %v6579_v54  ;;  %v5682_v18 = vmax.f32 %v4250_v13, 0.0  ;;  %v4253_v43 = vadd.f32 %v15556_v55, %v12205_v29  ;;  %v4244_v2 = vpop.f32.mrb[35].mxu0  ;;  %v7103_v22 = vadd.f32 %v7102_v60, %v7101_v23 }
 0x327   :  { %v5680_v28 = vmax.f32 %v4242_v32, 0.0  ;;  %v4245_v44 = vadd.f32 %v15556_v55, %v4244_v2  ;;  %v7238_v5 = vpack.c.bf16 %v15579_v48, %v15579_v48  ;;  %v16844_v11 = vrot.slane %v15437_v6, 4 }
 0x328   :  { %v6583_v30 = vadd.f32 %v6582_v39, %v6581_v42  ;;  %v5683_v58 = vmax.f32 %v4253_v43, 0.0  ;;  %v7105_v10 = vadd.f32 %v7104_v52, %v7103_v22  ;;  %v7106_v26 = vsel %vm5968_vm1, %v5921_v31, 0.0 }
 0x329   :  { %v15683_v53 = vadd.f32 %v16844_v11, %v15437_v6  ;;  %v5681_v63 = vmax.f32 %v4245_v44, 0.0  ;;  %v6593_v4 = vsel %vm5968_vm1, %v5682_v18, 0.0  ;;  %v7108_v54 = vsel %vm5968_vm1, %v5922_v49, 0.0  ;;  %v16845_v11 = vld [vmem:[#allocation20_spill] sm:$0xff] }
 0x32a   :  { %v6584_v60 = vrot.slane %v6583_v30, 4  ;;  %v5218_v13 = vadd.f32 %v15556_v55, %v15321_v61  ;;  %v6590_v0 = vsel %vm5968_vm1, %v5680_v28, 0.0  ;;  %v7110_v39 = vsel %vm5968_vm1, %v5923_v24, 0.0 }
 0x32b   :  { %v6591_v34 = vsel %vm5968_vm1, %v5681_v63, 0.0  ;;  %v12208_v6 = vpop.f32.mrb[36].mxu0  ;;  %v7107_v32 = vadd.f32 %v7106_v26, %v7105_v10  ;;  %v5226_v18 = vadd.f32 %v15556_v55, %v15317_v38  ;;  %v6595_v49 = vsel %vm5968_vm1, %v5683_v58, 0.0  ;;  %v16846_v38 = vld [vmem:[#allocation21_spill] sm:$0xff] }
 0x32c   :  { %v6585_v29 = vadd.f32 %v6584_v60, %v6583_v30  ;;  %v6592_v23 = vadd.f32 %v6591_v34, %v6590_v0  ;;  %v4266_v31 = vadd.f32 %v15556_v55, %v12208_v6  ;;  %v4257_v42 = vpop.f32.mrb[37].mxu0  ;;  %v5924_v28 = vmax.f32 %v5218_v13, 0.0 }
 0x32d   :  { %v4258_v61 = vadd.f32 %v15556_v55, %v4257_v42  ;;  %v12209_v43 = vpop.f32.mrb[38].mxu0  ;;  %v7109_v2 = vadd.f32 %v7108_v54, %v7107_v32  ;;  %v5229_v30 = vadd.f32 %v15556_v55, %v16845_v11  ;;  %v5221_v58 = vadd.f32 %v15556_v55, %v16846_v38 }
 0x32e   :  { %v6586_v44 = vrot.slane %v6585_v29, 2  ;;  %v6594_v22 = vadd.f32 %v6593_v4, %v6592_v23  ;;  %v4269_v24 = vadd.f32 %v15556_v55, %v12209_v43  ;;  %v4260_v52 = vpop.f32.mrb[39].mxu0  ;;  %v5686_v0 = vmax.f32 %v4266_v31, 0.0 }
 0x32f   :  { %v5684_v63 = vmax.f32 %v4258_v61, 0.0  ;;  %v4261_v10 = vadd.f32 %v15556_v55, %v4260_v52  ;;  %v7111_v26 = vadd.f32 %v7110_v39, %v7109_v2  ;;  %v5926_v54 = vmax.f32 %v5226_v18, 0.0 }
 0x330   :  { %v6587_v60 = vadd.f32 %v6586_v44, %v6585_v29  ;;  %v6596_v34 = vadd.f32 %v6595_v49, %v6594_v22  ;;  %v5687_v4 = vmax.f32 %v4269_v24, 0.0  ;;  %v7112_v32 = vsel %vm5968_vm1, %v5924_v28, 0.0  ;;  %v16847_v29 = vld [vmem:[#allocation23_spill] sm:$0xff] }
 0x331   :  { %v6597_v13 = vsel %vm5968_vm1, %v5684_v63, 0.0  ;;  %v5685_v6 = vmax.f32 %v4261_v10, 0.0  ;;  %v6517_v23 = vrot.slane %v15683_v53, 2  ;;  %v7113_v43 = vadd.f32 %v7112_v32, %v7111_v26 }
 0x332   :  { %v6588_v42 = vrot.slane %v6587_v60, 1  ;;  %v6598_v61 = vadd.f32 %v6597_v13, %v6596_v34  ;;  %v5927_v52 = vmax.f32 %v5229_v30, 0.0  ;;  %v5925_v11 = vmax.f32 %v5221_v58, 0.0  ;;  %v16848_v30 = vld [vmem:[#allocation22_spill] sm:$0xff] }
 0x333   :  { %v6599_v39 = vsel %vm5968_vm1, %v5685_v6, 0.0  ;;  %v12212_v2 = vpop.f32.mrb[40].mxu0  ;;  %v5234_v31 = vadd.f32 %v15556_v55, %v16847_v29  ;;  %v6601_v18 = vsel %vm5968_vm1, %v5686_v0, 0.0  ;;  %v7116_v28 = vsel %vm5968_vm1, %v5926_v54, 0.0  ;;  %v16849_v29 = vld [vmem:[#allocation24_spill] sm:$0xff] }
 0x334   :  { %v6600_v49 = vadd.f32 %v6599_v39, %v6598_v61  ;;  %v4282_v44 = vadd.f32 %v15556_v55, %v12212_v2  ;;  %v4273_v22 = vpop.f32.mrb[41].mxu0  ;;  %v6603_v24 = vsel %vm5968_vm1, %v5687_v4, 0.0  ;;  %v7114_v26 = vsel %vm5968_vm1, %v5925_v11, 0.0 }
 0x335   :  { %v4274_v63 = vadd.f32 %v15556_v55, %v4273_v22  ;;  %v12213_v10 = vpop.f32.mrb[42].mxu0  ;;  %v5242_v38 = vadd.f32 %v15556_v55, %v16848_v30  ;;  %v6589_v58 = vadd.f32 %v6588_v42, %v6587_v60  ;;  %v5928_v6 = vmax.f32 %v5234_v31, 0.0 }
 0x336   :  { %v6602_v34 = vadd.f32 %v6601_v18, %v6600_v49  ;;  %v4285_v0 = vadd.f32 %v15556_v55, %v12213_v10  ;;  %v4276_v13 = vpop.f32.mrb[43].mxu0  ;;  %v5690_v32 = vmax.f32 %v4282_v44, 0.0  ;;  %v7115_v39 = vadd.f32 %v7114_v26, %v7113_v43 }
 0x337   :  { %v5688_v61 = vmax.f32 %v4274_v63, 0.0  ;;  %v4277_v54 = vadd.f32 %v15556_v55, %v4276_v13  ;;  %v15721_v4 = vadd.f32 %v6517_v23, %v15683_v53  ;;  %v7118_v11 = vsel %vm5968_vm1, %v5927_v52, 0.0 }
 0x338   :  { %v6604_v2 = vadd.f32 %v6603_v24, %v6602_v34  ;;  %v5245_v22 = vadd.f32 %v15556_v55, %v16849_v29  ;;  %v7117_v18 = vadd.f32 %v7116_v28, %v7115_v39  ;;  %v5930_v49 = vmax.f32 %v5242_v38, 0.0 }
 0x339   :  { %v6605_v60 = vsel %vm5968_vm1, %v5688_v61, 0.0  ;;  %v5689_v42 = vmax.f32 %v4277_v54, 0.0  ;;  %v15727_v31 = vmul.f32 0.00390625, %v6589_v58  ;;  %v5691_v63 = vmax.f32 %v4285_v0, 0.0 }
 0x33a   :  { %v6606_v44 = vadd.f32 %v6605_v60, %v6604_v2  ;;  %v7120_v43 = vsel %vm5968_vm1, %v5928_v6, 0.0  ;;  %v6609_v53 = vsel %vm5968_vm1, %v5690_v32, 0.0  ;;  %v7119_v52 = vadd.f32 %v7118_v11, %v7117_v18 }
 0x33b   :  { %v6607_v23 = vsel %vm5968_vm1, %v5689_v42, 0.0  ;;  %v12216_v24 = vpop.f32.mrb[44].mxu0  ;;  %v5237_v10 = vadd.f32 %v15556_v55, %v15356_v33  ;;  %v5931_v34 = vmax.f32 %v5245_v22, 0.0  ;;  %v5258_v28 = vadd.f32 %v15556_v55, %v15360_v51 }
 0x33c   :  { %v6608_v26 = vadd.f32 %v6607_v23, %v6606_v44  ;;  %v4289_v30 = vpop.f32.mrb[45].mxu0  ;;  %v5250_v38 = vadd.f32 %v15556_v55, %v15369_v15  ;;  %v4298_v58 = vadd.f32 %v15556_v55, %v12216_v24  ;;  %v7121_v6 = vadd.f32 %v7120_v43, %v7119_v52  ;;  %v16850_v52 = vld [vmem:[#allocation25_spill] sm:$0xff] }
 0x33d   :  { %v4290_v0 = vadd.f32 %v15556_v55, %v4289_v30  ;;  %v12217_v13 = vpop.f32.mrb[46].mxu0  ;;  %v5929_v32 = vmax.f32 %v5237_v10, 0.0  ;;  %v6611_v61 = vsel %vm5968_vm1, %v5691_v63, 0.0  ;;  %v7124_v2 = vsel %vm5968_vm1, %v5930_v49, 0.0 }
 0x33e   :  { %v6610_v54 = vadd.f32 %v6609_v53, %v6608_v26  ;;  %v4301_v33 = vadd.f32 %v15556_v55, %v12217_v13  ;;  %v4292_v39 = vpop.f32.mrb[47].mxu0  ;;  %v5932_v29 = vmax.f32 %v5250_v38, 0.0  ;;  %v7126_v60 = vsel %vm5968_vm1, %v5931_v34, 0.0 }
 0x33f   :  { %v5692_v11 = vmax.f32 %v4290_v0, 0.0  ;;  %v4293_v51 = vadd.f32 %v15556_v55, %v4292_v39  ;;  %v7122_v15 = vsel %vm5968_vm1, %v5929_v32, 0.0  ;;  %v5934_v18 = vmax.f32 %v5258_v28, 0.0 }
 0x340   :  { %v6612_v22 = vadd.f32 %v6611_v61, %v6610_v54  ;;  %v7123_v42 = vadd.f32 %v7122_v15, %v7121_v6  ;;  %v5694_v44 = vmax.f32 %v4298_v58, 0.0  ;;  %v5261_v53 = vadd.f32 %v15556_v55, %v15373_v1 }
 0x341   :  { %v6613_v63 = vsel %vm5968_vm1, %v5692_v11, 0.0  ;;  %v5693_v43 = vmax.f32 %v4293_v51, 0.0  ;;  %v5695_v49 = vmax.f32 %v4301_v33, 0.0  ;;  %v5253_v10 = vadd.f32 %v15556_v55, %v16850_v52 }
 0x342   :  { %v6614_v23 = vadd.f32 %v6613_v63, %v6612_v22  ;;  %v7125_v24 = vadd.f32 %v7124_v2, %v7123_v42  ;;  %v7240_v26 = vpack.c.bf16 %v15727_v31, %v15727_v31  ;;  %v7128_v28 = vsel %vm5968_vm1, %v5932_v29, 0.0 }
 0x343   :  { %v6615_v30 = vsel %vm5968_vm1, %v5693_v43, 0.0  ;;  %v12220_v34 = vpop.f32.mrb[48].mxu0  ;;  %v5935_v38 = vmax.f32 %v5261_v53, 0.0  ;;  %v5933_v6 = vmax.f32 %v5253_v10, 0.0  ;;  %v5266_v1 = vadd.f32 %v15556_v55, %v15395_v57 }
 0x344   :  { %v6616_v58 = vadd.f32 %v6615_v30, %v6614_v23  ;;  %v4305_v0 = vpop.f32.mrb[49].mxu0  ;;  %v7127_v13 = vadd.f32 %v7126_v60, %v7125_v24  ;;  %v6617_v32 = vsel %vm5968_vm1, %v5694_v44, 0.0  ;;  %v4314_v61 = vadd.f32 %v15556_v55, %v12220_v34  ;;  %v16851_v60 = vld [vmem:[#allocation26_spill] sm:$0xff] }
 0x345   :  { %v4306_v54 = vadd.f32 %v15556_v55, %v4305_v0  ;;  %v12221_v31 = vpop.f32.mrb[50].mxu0  ;;  %v7132_v33 = vsel %vm5968_vm1, %v5934_v18, 0.0  ;;  %v6619_v39 = vsel %vm5968_vm1, %v5695_v49, 0.0  ;;  %v7130_v57 = vsel %vm5968_vm1, %v5933_v6, 0.0 }
 0x346   :  { %v6618_v2 = vadd.f32 %v6617_v32, %v6616_v58  ;;  %v4317_v11 = vadd.f32 %v15556_v55, %v12221_v31  ;;  %v4308_v51 = vpop.f32.mrb[51].mxu0  ;;  %v7129_v15 = vadd.f32 %v7128_v28, %v7127_v13  ;;  %v5274_v42 = vadd.f32 %v15556_v55, %v16851_v60 }
 0x347   :  { %v5696_v29 = vmax.f32 %v4306_v54, 0.0  ;;  %v4309_v22 = vadd.f32 %v15556_v55, %v4308_v51  ;;  %v7134_v63 = vsel %vm5968_vm1, %v5935_v38, 0.0  ;;  %v5936_v18 = vmax.f32 %v5266_v1, 0.0 }
 0x348   :  { %v6620_v44 = vadd.f32 %v6619_v39, %v6618_v2  ;;  %v7131_v43 = vadd.f32 %v7130_v57, %v7129_v15  ;;  %v5698_v53 = vmax.f32 %v4314_v61, 0.0  ;;  %v5699_v49 = vmax.f32 %v4317_v11, 0.0 }
 0x349   :  { %v6621_v23 = vsel %vm5968_vm1, %v5696_v29, 0.0  ;;  %v5697_v24 = vmax.f32 %v4309_v22, 0.0  ;;  %v5277_v30 = vadd.f32 %v15556_v55, %v15400_v12  ;;  %v5269_v34 = vadd.f32 %v15556_v55, %v15404_v62 }
 0x34a   :  { %v6622_v52 = vadd.f32 %v6621_v23, %v6620_v44  ;;  %v7133_v10 = vadd.f32 %v7132_v33, %v7131_v43  ;;  %v6519_v28 = vrot.slane %v15721_v4, 1  ;;  %v15774_v58 = vunpack.c.l.b16 %v7240_v26 }
 0x34b   :  { %v6623_v38 = vsel %vm5968_vm1, %v5697_v24, 0.0  ;;  %v12224_v0 = vpop.f32.mrb[52].mxu0  ;;  %v5938_v13 = vmax.f32 %v5274_v42, 0.0  ;;  %v5937_v61 = vmax.f32 %v5269_v34, 0.0  ;;  %v5282_v54 = vadd.f32 %v15556_v55, %v15429_v20 }
 0x34c   :  { %v6624_v6 = vadd.f32 %v6623_v38, %v6622_v52  ;;  %v4321_v1 = vpop.f32.mrb[53].mxu0  ;;  %v7135_v32 = vadd.f32 %v7134_v63, %v7133_v10  ;;  %v6625_v12 = vsel %vm5968_vm1, %v5698_v53, 0.0  ;;  %v4330_v31 = vadd.f32 %v15556_v55, %v12224_v0 }
 0x34d   :  { %v4322_v62 = vadd.f32 %v15556_v55, %v4321_v1  ;;  %v12225_v33 = vpop.f32.mrb[54].mxu0  ;;  %v7142_v26 = vsel %vm5968_vm1, %v5936_v18, 0.0  ;;  %v6627_v39 = vsel %vm5968_vm1, %v5699_v49, 0.0  ;;  %v5939_v51 = vmax.f32 %v5277_v30, 0.0 }
 0x34e   :  { %v6626_v2 = vadd.f32 %v6625_v12, %v6624_v6  ;;  %v4324_v11 = vpop.f32.mrb[55].mxu0  ;;  %v5290_v15 = vadd.f32 %v15556_v55, %v15424_v3  ;;  %v4333_v20 = vadd.f32 %v15556_v55, %v12225_v33  ;;  %v7143_v57 = vsel %vm5968_vm1, %v5937_v61, 0.0 }
 0x34f   :  { %v5700_v29 = vmax.f32 %v4322_v62, 0.0  ;;  %v4325_v22 = vadd.f32 %v15556_v55, %v4324_v11  ;;  %v7136_v42 = vrot.slane %v7135_v32, 4  ;;  %v7145_v44 = vsel %vm5968_vm1, %v5938_v13, 0.0 }
 0x350   :  { %v6628_v60 = vadd.f32 %v6627_v39, %v6626_v2  ;;  %v5940_v63 = vmax.f32 %v5282_v54, 0.0  ;;  %v5702_v43 = vmax.f32 %v4330_v31, 0.0  ;;  %v7144_v23 = vadd.f32 %v7143_v57, %v7142_v26 }
 0x351   :  { %v6629_v18 = vsel %vm5968_vm1, %v5700_v29, 0.0  ;;  %v5701_v53 = vmax.f32 %v4325_v22, 0.0  ;;  %v7147_v3 = vsel %vm5968_vm1, %v5939_v51, 0.0  ;;  %v5942_v24 = vmax.f32 %v5290_v15, 0.0 }
 0x352   :  { %v6630_v49 = vadd.f32 %v6629_v18, %v6628_v60  ;;  %v5293_v52 = vadd.f32 %v15556_v55, %v15435_v36  ;;  %v5703_v10 = vmax.f32 %v4333_v20, 0.0  ;;  %v7146_v38 = vadd.f32 %v7145_v44, %v7144_v23 }
 0x353   :  { %v6631_v30 = vsel %vm5968_vm1, %v5701_v53, 0.0  ;;  %v12228_v34 = vpop.f32.mrb[56].mxu0  ;;  %v5285_v0 = vadd.f32 %v15556_v55, %v15440_v47  ;;  %v15798_v61 = vadd.f32 %v7136_v42, %v7135_v32  ;;  %v7149_v54 = vsel %vm5968_vm1, %v5940_v63, 0.0 }
 0x354   :  { %v6632_v13 = vadd.f32 %v6631_v30, %v6630_v49  ;;  %v4346_v6 = vadd.f32 %v15556_v55, %v12228_v34  ;;  %v4337_v1 = vpop.f32.mrb[57].mxu0  ;;  %v6633_v12 = vsel %vm5968_vm1, %v5702_v43, 0.0  ;;  %v7148_v62 = vadd.f32 %v7147_v3, %v7146_v38 }
 0x355   :  { %v4338_v36 = vadd.f32 %v15556_v55, %v4337_v1  ;;  %v12229_v31 = vpop.f32.mrb[58].mxu0  ;;  %v5941_v33 = vmax.f32 %v5285_v0, 0.0  ;;  %v5943_v47 = vmax.f32 %v5293_v52, 0.0  ;;  %v5306_v11 = vadd.f32 %v15556_v55, %v15465_v59 }
 0x356   :  { %v6634_v26 = vadd.f32 %v6633_v12, %v6632_v13  ;;  %v4349_v39 = vadd.f32 %v15556_v55, %v12229_v31  ;;  %v4340_v2 = vpop.f32.mrb[59].mxu0  ;;  %v6635_v32 = vsel %vm5968_vm1, %v5703_v10, 0.0  ;;  %v7150_v29 = vadd.f32 %v7149_v54, %v7148_v62  ;;  %v16852_v10 = vld [vmem:[#allocation27_spill] sm:$0xff] }
 0x357   :  { %v5704_v51 = vmax.f32 %v4338_v36, 0.0  ;;  %v4341_v15 = vadd.f32 %v15556_v55, %v4340_v2  ;;  %v5706_v20 = vmax.f32 %v4346_v6, 0.0  ;;  %v7138_v57 = vrot.slane %v15798_v61, 2 }
 0x358   :  { %v6636_v22 = vadd.f32 %v6635_v32, %v6634_v26  ;;  %v7153_v60 = vsel %vm5968_vm1, %v5942_v24, 0.0  ;;  %v5707_v44 = vmax.f32 %v4349_v39, 0.0  ;;  %v7151_v43 = vsel %vm5968_vm1, %v5941_v33, 0.0 }
 0x359   :  { %v6637_v42 = vsel %vm5968_vm1, %v5704_v51, 0.0  ;;  %v5705_v63 = vmax.f32 %v4341_v15, 0.0  ;;  %v7155_v59 = vsel %vm5968_vm1, %v5943_v47, 0.0  ;;  %v7152_v53 = vadd.f32 %v7151_v43, %v7150_v29 }
 0x35a   :  { %v6638_v18 = vadd.f32 %v6637_v42, %v6636_v22  ;;  %v5946_v23 = vmax.f32 %v5306_v11, 0.0  ;;  %v5298_v52 = vadd.f32 %v15556_v55, %v15470_v35  ;;  %v5309_v24 = vadd.f32 %v15556_v55, %v15474_v16 }
 0x35b   :  { %v6639_v49 = vsel %vm5968_vm1, %v5705_v63, 0.0  ;;  %v12232_v3 = vpop.f32.mrb[60].mxu0  ;;  %v5301_v30 = vadd.f32 %v15556_v55, %v16852_v10  ;;  %v6641_v34 = vsel %vm5968_vm1, %v5706_v20, 0.0  ;;  %v7154_v6 = vadd.f32 %v7153_v60, %v7152_v53 }
 0x35c   :  { %v6640_v38 = vadd.f32 %v6639_v49, %v6638_v18  ;;  %v4362_v0 = vadd.f32 %v15556_v55, %v12232_v3  ;;  %v4353_v13 = vpop.f32.mrb[61].mxu0  ;;  %v6643_v1 = vsel %vm5968_vm1, %v5707_v44, 0.0  ;;  %v5944_v36 = vmax.f32 %v5298_v52, 0.0 }
 0x35d   :  { %v4354_v54 = vadd.f32 %v15556_v55, %v4353_v13  ;;  %v12233_v12 = vpop.f32.mrb[62].mxu0  ;;  %v5945_v35 = vmax.f32 %v5301_v30, 0.0  ;;  %v5947_v26 = vmax.f32 %v5309_v24, 0.0  ;;  %v7156_v47 = vadd.f32 %v7155_v59, %v7154_v6 }
 0x35e   :  { %v6642_v31 = vadd.f32 %v6641_v34, %v6640_v38  ;;  %v5710_v62 = vmax.f32 %v4362_v0, 0.0  ;;  %v4365_v16 = vadd.f32 %v15556_v55, %v12233_v12  ;;  %v4356_v33 = vpop.f32.mrb[63].mxu0  ;;  %v7157_v11 = vsel %vm5968_vm1, %v5944_v36, 0.0 }
 0x35f   :  { %v5708_v39 = vmax.f32 %v4354_v54, 0.0  ;;  %v4357_v2 = vadd.f32 %v15556_v55, %v4356_v33  ;;  %v7161_v29 = vsel %vm5968_vm1, %v5946_v23, 0.0  ;;  %v7158_v60 = vadd.f32 %v7157_v11, %v7156_v47 }
 0x360   :  { %v6649_v32 = vsel %vm5968_vm1, %v5710_v62, 0.0  ;;  %v6644_v51 = vadd.f32 %v6643_v1, %v6642_v31  ;;  %v5711_v15 = vmax.f32 %v4365_v16, 0.0  ;;  %v7159_v42 = vsel %vm5968_vm1, %v5945_v35, 0.0 }
 0x361   :  { %v6645_v20 = vsel %vm5968_vm1, %v5708_v39, 0.0  ;;  %v5709_v22 = vmax.f32 %v4357_v2, 0.0  ;;  %v7163_v63 = vsel %vm5968_vm1, %v5947_v26, 0.0  ;;  %v5322_v43 = vadd.f32 %v15556_v55, %v15497_v45 }
 0x362   :  { %v6646_v44 = vadd.f32 %v6645_v20, %v6644_v51  ;;  %v5314_v18 = vadd.f32 %v15556_v55, %v15502_v19  ;;  %v7160_v49 = vadd.f32 %v7159_v42, %v7158_v60  ;;  %v5325_v23 = vadd.f32 %v15556_v55, %v15506_v50 }
 0x363   :  { %v6647_v59 = vsel %vm5968_vm1, %v5709_v22, 0.0  ;;  %v12236_v53 = vpop.f32.mrb[64].mxu0  ;;  %v5317_v3 = vadd.f32 %v15556_v55, %v15510_v7  ;;  %v5950_v30 = vmax.f32 %v5322_v43, 0.0  ;;  %v6651_v45 = vsel %vm5968_vm1, %v5711_v15, 0.0 }
 0x364   :  { %v6648_v52 = vadd.f32 %v6647_v59, %v6646_v44  ;;  %v4378_v24 = vadd.f32 %v15556_v55, %v12236_v53  ;;  %v4369_v10 = vpop.f32.mrb[65].mxu0  ;;  %v5948_v34 = vmax.f32 %v5314_v18, 0.0  ;;  %v7162_v0 = vadd.f32 %v7161_v29, %v7160_v49 }
 0x365   :  { %v4370_v19 = vadd.f32 %v15556_v55, %v4369_v10  ;;  %v12237_v38 = vpop.f32.mrb[66].mxu0  ;;  %v5949_v13 = vmax.f32 %v5317_v3, 0.0  ;;  %v5951_v12 = vmax.f32 %v5325_v23, 0.0  ;;  %v15850_v62 = vadd.f32 %v7138_v57, %v15798_v61 }
 0x366   :  { %v6650_v6 = vadd.f32 %v6649_v32, %v6648_v52  ;;  %v5714_v1 = vmax.f32 %v4378_v24, 0.0  ;;  %v4381_v50 = vadd.f32 %v15556_v55, %v12237_v38  ;;  %v4372_v54 = vpop.f32.mrb[67].mxu0  ;;  %v7164_v35 = vadd.f32 %v7163_v63, %v7162_v0 }
 0x367   :  { %v5712_v7 = vmax.f32 %v4370_v19, 0.0  ;;  %v4373_v36 = vadd.f32 %v15556_v55, %v4372_v54  ;;  %v7165_v31 = vsel %vm5968_vm1, %v5948_v34, 0.0  ;;  %v7169_v26 = vsel %vm5968_vm1, %v5950_v30, 0.0 }
 0x368   :  { %v6652_v16 = vadd.f32 %v6651_v45, %v6650_v6  ;;  %v6662_v33 = vsel %vm5968_vm1, %v5714_v1, 0.0  ;;  %v5715_v39 = vmax.f32 %v4381_v50, 0.0  ;;  %v7166_v47 = vadd.f32 %v7165_v31, %v7164_v35 }
 0x369   :  { %v5713_v2 = vmax.f32 %v4373_v36, 0.0  ;;  %v7167_v11 = vsel %vm5968_vm1, %v5949_v13, 0.0  ;;  %v7171_v51 = vsel %vm5968_vm1, %v5951_v12, 0.0  ;;  %v5338_v15 = vadd.f32 %v15556_v55, %v15528_v25 }
 0x36a   :  { %v6653_v32 = vrot.slane %v6652_v16, 4  ;;  %v5330_v61 = vadd.f32 %v15556_v55, %v15533_v17  ;;  %v6659_v57 = vsel %vm5968_vm1, %v5712_v7, 0.0  ;;  %v7168_v22 = vadd.f32 %v7167_v11, %v7166_v47 }
 0x36b   :  { %v6660_v29 = vsel %vm5968_vm1, %v5713_v2, 0.0  ;;  %v12240_v20 = vpop.f32.mrb[68].mxu0  ;;  %v5341_v60 = vadd.f32 %v15556_v55, %v15537_v40  ;;  %v5954_v18 = vmax.f32 %v5338_v15, 0.0  ;;  %v6664_v25 = vsel %vm5968_vm1, %v5715_v39, 0.0 }
 0x36c   :  { %v6654_v42 = vadd.f32 %v6653_v32, %v6652_v16  ;;  %v6661_v44 = vadd.f32 %v6660_v29, %v6659_v57  ;;  %v4394_v63 = vadd.f32 %v15556_v55, %v12240_v20  ;;  %v4385_v43 = vpop.f32.mrb[69].mxu0  ;;  %v7170_v53 = vadd.f32 %v7169_v26, %v7168_v22  ;;  %v15877_v16 = vld [vmem:[%s13703_s13] ss:$0 sm:$0xff]  ;;  %s13530_s13 = smov 64  }
 0x36d   :  { %v4386_v59 = vadd.f32 %v15556_v55, %v4385_v43  ;;  %v12241_v17 = vpop.f32.mrb[70].mxu0  ;;  %v5952_v49 = vmax.f32 %v5330_v61, 0.0  ;;  %v5333_v45 = vadd.f32 %v15556_v55, %v15541_v56  ;;  %v7177_v0 = vsel %vm5968_vm1, %v5954_v18, 0.0 }
 0x36e   :  { %v6655_v23 = vrot.slane %v6654_v42, 2  ;;  %v6663_v3 = vadd.f32 %v6662_v33, %v6661_v44  ;;  %v5718_v52 = vmax.f32 %v4394_v63, 0.0  ;;  %v4397_v24 = vadd.f32 %v15556_v55, %v12241_v17  ;;  %v4388_v10 = vpop.f32.mrb[71].mxu0 }
 0x36f   :  { %v5716_v40 = vmax.f32 %v4386_v59, 0.0  ;;  %v4389_v30 = vadd.f32 %v15556_v55, %v4388_v10  ;;  %v7172_v34 = vadd.f32 %v7171_v51, %v7170_v53  ;;  %v5955_v13 = vmax.f32 %v5341_v60, 0.0 }
 0x370   :  { %v6656_v19 = vadd.f32 %v6655_v23, %v6654_v42  ;;  %v6665_v38 = vadd.f32 %v6664_v25, %v6663_v3  ;;  %v6670_v6 = vsel %vm5968_vm1, %v5718_v52, 0.0  ;;  %v7173_v54 = vsel %vm5968_vm1, %v5952_v49, 0.0 }
 0x371   :  { %v6666_v1 = vsel %vm5968_vm1, %v5716_v40, 0.0  ;;  %v5717_v50 = vmax.f32 %v4389_v30, 0.0  ;;  %v5719_v36 = vmax.f32 %v4397_v24, 0.0  ;;  %v7174_v35 = vadd.f32 %v7173_v54, %v7172_v34 }
 0x372   :  { %v6657_v12 = vrot.slane %v6656_v19, 1  ;;  %v6667_v7 = vadd.f32 %v6666_v1, %v6665_v38  ;;  %v5953_v55 = vmax.f32 %v5333_v45, 0.0  ;;  %v5354_v33 = vadd.f32 %v15877_v16, %v15563_v8 }
 0x373   :  { %v6668_v31 = vsel %vm5968_vm1, %v5717_v50, 0.0  ;;  %v12244_v56 = vpop.f32.mrb[72].mxu0  ;;  %v5346_v26 = vadd.f32 %v15877_v16, %v15569_v14  ;;  %v7179_v32 = vsel %vm5968_vm1, %v5955_v13, 0.0  ;;  %v5357_v29 = vadd.f32 %v15877_v16, %v15574_v46 }
 0x374   :  { %v6658_v39 = vadd.f32 %v6657_v12, %v6656_v19  ;;  %v6669_v2 = vadd.f32 %v6668_v31, %v6667_v7  ;;  %v4410_v47 = vadd.f32 %v15877_v16, %v12244_v56  ;;  %v4401_v11 = vpop.f32.mrb[73].mxu0  ;;  %v7175_v61 = vsel %vm5968_vm1, %v5953_v55, 0.0 }
 0x375   :  { %v4402_v51 = vadd.f32 %v15877_v16, %v4401_v11  ;;  %v12245_v15 = vpop.f32.mrb[74].mxu0  ;;  %v5958_v57 = vmax.f32 %v5354_v33, 0.0  ;;  %v5956_v60 = vmax.f32 %v5346_v26, 0.0  ;;  %v6672_v42 = vsel %vm5968_vm1, %v5719_v36, 0.0 }
 0x376   :  { %v7221_v8 = vmul.f32 0.00390625, %v6658_v39  ;;  %v6671_v20 = vadd.f32 %v6670_v6, %v6669_v2  ;;  %v4413_v14 = vadd.f32 %v15877_v16, %v12245_v15  ;;  %v4404_v22 = vpop.f32.mrb[75].mxu0  ;;  %v7176_v43 = vadd.f32 %v7175_v61, %v7174_v35  ;;  %v16853_v61 = vld [vmem:[#allocation29_spill] sm:$0xff] }
 0x377   :  { %v5720_v44 = vmax.f32 %v4402_v51, 0.0  ;;  %v4405_v63 = vadd.f32 %v15877_v16, %v4404_v22  ;;  %v5722_v25 = vmax.f32 %v4410_v47, 0.0  ;;  %v7185_v17 = vsel %vm5968_vm1, %v5958_v57, 0.0 }
 0x378   :  { %v7241_v18 = vpack.c.bf16 %v7221_v8, %v7221_v8  ;;  %v6673_v59 = vadd.f32 %v6672_v42, %v6671_v20  ;;  %v5723_v46 = vmax.f32 %v4413_v14, 0.0  ;;  %v7178_v23 = vadd.f32 %v7177_v0, %v7176_v43  ;;  %v16854_v20 = vld [vmem:[#allocation30_spill] sm:$0xff] }
 0x379   :  { %v6674_v53 = vsel %vm5968_vm1, %v5720_v44, 0.0  ;;  %v5721_v49 = vmax.f32 %v4405_v63, 0.0  ;;  %v7181_v24 = vsel %vm5968_vm1, %v5956_v60, 0.0  ;;  %v5959_v10 = vmax.f32 %v5357_v29, 0.0  ;;  %v16855_v63 = vld [vmem:[#allocation13_spill] sm:$0xff] }
 0x37a   :  { %v7284_v3 = vunpack.c.l.b16 %v7241_v18  ;;  %v6675_v52 = vadd.f32 %v6674_v53, %v6673_v59  ;;  %v7180_v34 = vadd.f32 %v7179_v32, %v7178_v23  ;;  %v5349_v45 = vadd.f32 %v15877_v16, %v15581_v27 }
 0x37b   :  { %v6676_v40 = vsel %vm5968_vm1, %v5721_v49, 0.0  ;;  %v12248_v30 = vpop.f32.mrb[76].mxu0  ;;  %v5370_v19 = vadd.f32 %v15877_v16, %v15595_v41  ;;  %v6678_v0 = vsel %vm5968_vm1, %v5722_v25, 0.0  ;;  %v6680_v50 = vsel %vm5968_vm1, %v5723_v46, 0.0 }
 0x37c   :  { %v15902_v38 = vsel %vm7293_vm2, %v7284_v3, %v15774_v58  ;;  %v6677_v13 = vadd.f32 %v6676_v40, %v6675_v52  ;;  %v4426_v6 = vadd.f32 %v15877_v16, %v12248_v30  ;;  %v4417_v1 = vpop.f32.mrb[77].mxu0  ;;  %v7182_v7 = vadd.f32 %v7181_v24, %v7180_v34  ;;  %v16856_v52 = vld [vmem:[#allocation14_spill] sm:$0xff] }
 0x37d   :  { %v4418_v54 = vadd.f32 %v15877_v16, %v4417_v1  ;;  %v12249_v12 = vpop.f32.mrb[78].mxu0  ;;  %v5957_v27 = vmax.f32 %v5349_v45, 0.0  ;;  %v5962_v31 = vmax.f32 %v5370_v19, 0.0  ;;  %v5362_v58 = vadd.f32 %v15877_v16, %v15599_v37 }
 0x37e   :  { %v6679_v36 = vadd.f32 %v6678_v0, %v6677_v13  ;;  %v4429_v41 = vadd.f32 %v15877_v16, %v12249_v12  ;;  %v4420_v35 = vpop.f32.mrb[79].mxu0  ;;  %v7187_v33 = vsel %vm5968_vm1, %v5959_v10, 0.0  ;;  %v5726_v39 = vmax.f32 %v4426_v6, 0.0 }
 0x37f   :  { %v5724_v56 = vmax.f32 %v4418_v54, 0.0  ;;  %v4421_v55 = vadd.f32 %v15877_v16, %v4420_v35  ;;  %v7183_v26 = vsel %vm5968_vm1, %v5957_v27, 0.0  ;;  %v5960_v15 = vmax.f32 %v5362_v58, 0.0 }
 0x380   :  { %v6681_v2 = vadd.f32 %v6680_v50, %v6679_v36  ;;  %v5727_v47 = vmax.f32 %v4429_v41, 0.0  ;;  %v7184_v11 = vadd.f32 %v7183_v26, %v7182_v7  ;;  %v5373_v57 = vadd.f32 %v15877_v16, %v16853_v61  ;;  %v16857_v41 = vld [vmem:[#allocation31_spill] sm:$0xff] }
 0x381   :  { %v6682_v32 = vsel %vm5968_vm1, %v5724_v56, 0.0  ;;  %v5725_v51 = vmax.f32 %v4421_v55, 0.0  ;;  %v7193_v8 = vsel %vm5968_vm1, %v5962_v31, 0.0  ;;  %v5365_v14 = vadd.f32 %v15877_v16, %v16854_v20  ;;  %v16858_v55 = vld [vmem:[#allocation32_spill] sm:$0xff] }
 0x382   :  { %v6683_v29 = vadd.f32 %v6682_v32, %v6681_v2  ;;  %v7186_v37 = vadd.f32 %v7185_v17, %v7184_v11  ;;  %v7189_v42 = vsel %vm5968_vm1, %v5960_v15, 0.0  ;;  %v5963_v44 = vmax.f32 %v5373_v57, 0.0 }
 0x383   :  { %v6684_v22 = vsel %vm5968_vm1, %v5725_v51, 0.0  ;;  %v12252_v60 = vpop.f32.mrb[80].mxu0  ;;  %v5386_v43 = vadd.f32 %v15877_v16, %v16855_v63  ;;  %v5961_v17 = vmax.f32 %v5365_v14, 0.0  ;;  %v6686_v46 = vsel %vm5968_vm1, %v5726_v39, 0.0 }
 0x384   :  { %v6685_v18 = vadd.f32 %v6684_v22, %v6683_v29  ;;  %v4442_v25 = vadd.f32 %v15877_v16, %v12252_v60  ;;  %v4433_v59 = vpop.f32.mrb[81].mxu0  ;;  %v7188_v53 = vadd.f32 %v7187_v33, %v7186_v37  ;;  %v6688_v49 = vsel %vm5968_vm1, %v5727_v47, 0.0 }
 0x385   :  { %v4434_v23 = vadd.f32 %v15877_v16, %v4433_v59  ;;  %v12253_v3 = vpop.f32.mrb[82].mxu0  ;;  %v5378_v24 = vadd.f32 %v15877_v16, %v16856_v52  ;;  %v7195_v45 = vsel %vm5968_vm1, %v5963_v44, 0.0  ;;  %v7191_v13 = vsel %vm5968_vm1, %v5961_v17, 0.0  ;;  %v16861_v17 = vld [vmem:[#allocation12_spill] sm:$0xff] }
 0x386   :  { %v6687_v10 = vadd.f32 %v6686_v46, %v6685_v18  ;;  %v4445_v40 = vadd.f32 %v15877_v16, %v12253_v3  ;;  %v4436_v30 = vpop.f32.mrb[83].mxu0  ;;  %v7190_v34 = vadd.f32 %v7189_v42, %v7188_v53  ;;  %v5966_v6 = vmax.f32 %v5386_v43, 0.0 }
 0x387   :  { %v5728_v19 = vmax.f32 %v4434_v23, 0.0  ;;  %v4437_v0 = vadd.f32 %v15877_v16, %v4436_v30  ;;  %v5730_v1 = vmax.f32 %v4442_v25, 0.0  ;;  %v5964_v36 = vmax.f32 %v5378_v24, 0.0  ;;  %v16859_v25 = vld [vmem:[#allocation9_spill] sm:$0xff] }
 0x388   :  { %v6689_v50 = vadd.f32 %v6688_v49, %v6687_v10  ;;  %v5731_v54 = vmax.f32 %v4445_v40, 0.0  ;;  %v7192_v12 = vadd.f32 %v7191_v13, %v7190_v34  ;;  %v5389_v35 = vadd.f32 %v15877_v16, %v16857_v41  ;;  %v16864_v41 = vld [vmem:[#allocation11_spill] sm:$0xff] }
 0x389   :  { %v6690_v7 = vsel %vm5968_vm1, %v5728_v19, 0.0  ;;  %v5729_v27 = vmax.f32 %v4437_v0, 0.0  ;;  %v6520_v31 = vadd.f32 %v6519_v28, %v15721_v4  ;;  %v5381_v33 = vadd.f32 %v15877_v16, %v16858_v55 }
 0x38a   :  { %v6691_v58 = vadd.f32 %v6690_v7, %v6689_v50  ;;  %v7194_v56 = vadd.f32 %v7193_v8, %v7192_v12  ;;  %v7140_v26 = vrot.slane %v15850_v62, 1  ;;  %v7201_v47 = vsel %vm5968_vm1, %v5966_v6, 0.0 }
 0x38b   :  { %v6692_v39 = vsel %vm5968_vm1, %v5729_v27, 0.0  ;;  %v12256_v2 = vpop.f32.mrb[84].mxu0  ;;  %v7197_v11 = vsel %vm5968_vm1, %v5964_v36, 0.0  ;;  %v5965_v4 = vmax.f32 %v5381_v33, 0.0  ;;  %v6694_v28 = vsel %vm5968_vm1, %v5730_v1, 0.0  ;;  %v16863_v36 = vld [vmem:[#allocation2_spill] sm:$0xff] }
 0x38c   :  { %v6693_v32 = vadd.f32 %v6692_v39, %v6691_v58  ;;  %v4458_v51 = vadd.f32 %v15877_v16, %v12256_v2  ;;  %v4449_v15 = vpop.f32.mrb[85].mxu0  ;;  %v7196_v61 = vadd.f32 %v7195_v45, %v7194_v56  ;;  %v6696_v57 = vsel %vm5968_vm1, %v5731_v54, 0.0 }
 0x38d   :  { %v4450_v29 = vadd.f32 %v15877_v16, %v4449_v15  ;;  %v12257_v37 = vpop.f32.mrb[86].mxu0  ;;  %v5967_v8 = vmax.f32 %v5389_v35, 0.0  ;;  %v7219_v42 = vmul.f32 0.00390625, %v6520_v31  ;;  %v7199_v18 = vsel %vm5968_vm1, %v5965_v4, 0.0 }
 0x38e   :  { %v6695_v20 = vadd.f32 %v6694_v28, %v6693_v32  ;;  %v4461_v14 = vadd.f32 %v15877_v16, %v12257_v37  ;;  %v4452_v22 = vpop.f32.mrb[87].mxu0  ;;  %v7198_v60 = vadd.f32 %v7197_v11, %v7196_v61  ;;  %v5734_v44 = vmax.f32 %v4458_v51, 0.0 }
 0x38f   :  { %v5732_v63 = vmax.f32 %v4450_v29, 0.0  ;;  %v4453_v43 = vadd.f32 %v15877_v16, %v4452_v22  ;;  %v16860_v59 = vpack.c.bf16 %v16859_v25, %v16859_v25  ;;  %v16862_v46 = vpack.c.bf16 %v16861_v17, %v16861_v17 }
 0x390   :  { %v6697_v23 = vadd.f32 %v6696_v57, %v6695_v20  ;;  %v7200_v3 = vadd.f32 %v7199_v18, %v7198_v60  ;;  %v5735_v24 = vmax.f32 %v4461_v14, 0.0  ;;  %v7203_v40 = vsel %vm5968_vm1, %v5967_v8, 0.0 }
 0x391   :  { %v7278_v53 = vunpack.c.l.b16 %v16860_v59  ;;  %v7279_v49 = vunpack.c.l.b16 %v16862_v46  ;;  %v6698_v52 = vsel %vm5968_vm1, %v5732_v63, 0.0  ;;  %v5733_v10 = vmax.f32 %v4453_v43, 0.0 }
 0x392   :  { %v7280_v30 = vunpack.c.l.b16 %v7237_v21  ;;  %v7141_v34 = vadd.f32 %v7140_v26, %v15850_v62  ;;  %v6699_v45 = vadd.f32 %v6698_v52, %v6697_v23  ;;  %v7202_v19 = vadd.f32 %v7201_v47, %v7200_v3 }
 0x393   :  { %v6702_v0 = vsel %vm5968_vm1, %v5734_v44, 0.0  ;;  %v6700_v13 = vsel %vm5968_vm1, %v5733_v10, 0.0  ;;  %v12260_v6 = vpop.f32.mrb[88].mxu0  ;;  %v7239_v1 = vpack.c.bf16 %v7219_v42, %v7219_v42  ;;  %v7281_v50 = vunpack.c.l.b16 %v7238_v5 }
 0x394   :  { %v6701_v54 = vadd.f32 %v6700_v13, %v6699_v45  ;;  %v4474_v12 = vadd.f32 %v15877_v16, %v12260_v6  ;;  %v4465_v7 = vpop.f32.mrb[89].mxu0  ;;  %v7204_v9 = vadd.f32 %v7203_v40, %v7202_v19  ;;  %v6704_v21 = vsel %vm5968_vm1, %v5735_v24, 0.0 }
 0x395   :  { %v4466_v62 = vadd.f32 %v15877_v16, %v4465_v7  ;;  %v12261_v27 = vpop.f32.mrb[90].mxu0  ;;  %v7296_v35 = vsel %vm7295_vm3, %v16864_v41, %v16863_v36  ;;  %v7282_v47 = vunpack.c.l.b16 %v7239_v1  ;;  %v7228_v8 = vmul.f32 0.00390625, %v7141_v34 }
 0x396   :  { %v6703_v31 = vadd.f32 %v6702_v0, %v6701_v54  ;;  %v4477_v48 = vadd.f32 %v15877_v16, %v12261_v27  ;;  %v4468_v5 = vpop.f32.mrb[91].mxu0  ;;  %v7205_v58 = vrot.slane %v7204_v9, 4  ;;  %v7298_v33 = vsel %vm7297_vm4, %v7278_v53, %v7296_v35 }
 0x397   :  { %v5736_v56 = vmax.f32 %v4466_v62, 0.0  ;;  %v4469_v55 = vadd.f32 %v15877_v16, %v4468_v5  ;;  %v5738_v26 = vmax.f32 %v4474_v12, 0.0  ;;  %v7300_v51 = vsel %vm7299_vm5, %v7279_v49, %v7298_v33 }
 0x398   :  { %v6705_v39 = vadd.f32 %v6704_v21, %v6703_v31  ;;  %v7206_v2 = vadd.f32 %v7205_v58, %v7204_v9  ;;  %v7302_v4 = vsel %vm7301_vm6, %v7280_v30, %v7300_v51  ;;  %v5739_v28 = vmax.f32 %v4477_v48, 0.0 }
 0x399   :  { %v6706_v11 = vsel %vm5968_vm1, %v5736_v56, 0.0  ;;  %v5737_v32 = vmax.f32 %v4469_v55, 0.0  ;;  %v7304_v37 = vsel %vm7303_vm7, %v7281_v50, %v7302_v4  ;;  %v6710_v42 = vsel %vm5968_vm1, %v5738_v26, 0.0 }
 0x39a   :  { %v6707_v15 = vadd.f32 %v6706_v11, %v6705_v39  ;;  %v7207_v61 = vrot.slane %v7206_v2, 2  ;;  %v15985_v60 = vsel %vm7305_vm8, %v7282_v47, %v7304_v37  ;;  %v6712_v53 = vsel %vm5968_vm1, %v5739_v28, 0.0 }
 0x39b   :  { %v6708_v57 = vsel %vm5968_vm1, %v5737_v32, 0.0  ;;  %v12264_v29 = vpop.f32.mrb[92].mxu0  ;;  %v7248_v23 = vpack.c.bf16 %v7228_v8, %v7228_v8 }
 0x39c   :  { %v6709_v20 = vadd.f32 %v6708_v57, %v6707_v15  ;;  %v7208_v14 = vadd.f32 %v7207_v61, %v7206_v2  ;;  %v4481_v22 = vpop.f32.mrb[93].mxu0  ;;  %v4490_v44 = vadd.f32 %v15877_v16, %v12264_v29 }
 0x39d   :  { %v4482_v63 = vadd.f32 %v15877_v16, %v4481_v22  ;;  %v12265_v43 = vpop.f32.mrb[94].mxu0  ;;  %v7291_v13 = vunpack.c.l.b16 %v7248_v23 }
 0x39e   :  { %v6711_v18 = vadd.f32 %v6710_v42, %v6709_v20  ;;  %v7209_v25 = vrot.slane %v7208_v14, 1  ;;  %v4484_v59 = vpop.f32.mrb[95].mxu0  ;;  %v4493_v46 = vadd.f32 %v15877_v16, %v12265_v43  ;;  %v5742_v24 = vmax.f32 %v4490_v44, 0.0 }
 0x39f   :  { %v5740_v17 = vmax.f32 %v4482_v63, 0.0  ;;  %v4485_v49 = vadd.f32 %v15877_v16, %v4484_v59 }
 0x3a0   :  { %v7210_v3 = vadd.f32 %v7209_v25, %v7208_v14  ;;  %v6713_v52 = vadd.f32 %v6712_v53, %v6711_v18  ;;  %v5743_v45 = vmax.f32 %v4493_v46, 0.0  ;;  %v6718_v54 = vsel %vm5968_vm1, %v5742_v24, 0.0 }
 0x3a1   :  { %v6714_v10 = vsel %vm5968_vm1, %v5740_v17, 0.0  ;;  %v5741_v40 = vmax.f32 %v4485_v49, 0.0 }
 0x3a2   :  { %v7229_v30 = vmul.f32 0.00390625, %v7210_v3  ;;  %v6715_v34 = vadd.f32 %v6714_v10, %v6713_v52  ;;  %v6720_v36 = vsel %vm5968_vm1, %v5743_v45, 0.0 }
 0x3a3   :  { %v6716_v19 = vsel %vm5968_vm1, %v5741_v40, 0.0  ;;  %v12268_v0 = vpop.f32.mrb[96].mxu0 }
 0x3a4   :  { %v7249_v6 = vpack.c.bf16 %v7229_v30, %v7229_v30  ;;  %v6717_v1 = vadd.f32 %v6716_v19, %v6715_v34  ;;  %v4497_v50 = vpop.f32.mrb[97].mxu0  ;;  %v4506_v12 = vadd.f32 %v15877_v16, %v12268_v0 }
 0x3a5   :  { %v4498_v7 = vadd.f32 %v15877_v16, %v4497_v50  ;;  %v12269_v9 = vpop.f32.mrb[98].mxu0 }
 0x3a6   :  { %v7292_v21 = vunpack.c.l.b16 %v7249_v6  ;;  %v6719_v62 = vadd.f32 %v6718_v54, %v6717_v1  ;;  %v4500_v27 = vpop.f32.mrb[99].mxu0  ;;  %v4509_v35 = vadd.f32 %v15877_v16, %v12269_v9  ;;  %v5746_v58 = vmax.f32 %v4506_v12, 0.0 }
 0x3a7   :  { %v5744_v41 = vmax.f32 %v4498_v7, 0.0  ;;  %v4501_v31 = vadd.f32 %v15877_v16, %v4500_v27 }
 0x3a8   :  { %v6721_v48 = vadd.f32 %v6720_v36, %v6719_v62  ;;  %v16002_v5 = vsel %vm7293_vm2, %v7292_v21, %v7291_v13  ;;  %v5747_v26 = vmax.f32 %v4509_v35, 0.0  ;;  %v6731_v51 = vsel %vm5968_vm1, %v5746_v58, 0.0 }
 0x3a9   :  { %v5745_v56 = vmax.f32 %v4501_v31, 0.0  ;;  %v6728_v33 = vsel %vm5968_vm1, %v5744_v41, 0.0  ;;  %vm7608_vm2 = vcmask 140288  }
 0x3aa   :  { %v6722_v55 = vrot.slane %v6721_v48, 4  ;;  %v6733_v37 = vsel %vm5968_vm1, %v5747_v26, 0.0 }
 0x3ab   :  { %v6729_v39 = vsel %vm5968_vm1, %v5745_v56, 0.0  ;;  %v12272_v2 = vpop.f32.mrb[100].mxu0 }
 0x3ac   :  { %v6723_v47 = vadd.f32 %v6722_v55, %v6721_v48  ;;  %v6730_v11 = vadd.f32 %v6729_v39, %v6728_v33  ;;  %v4513_v32 = vpop.f32.mrb[101].mxu0  ;;  %v4522_v15 = vadd.f32 %v15877_v16, %v12272_v2 }
 0x3ad   :  { %v4514_v61 = vadd.f32 %v15877_v16, %v4513_v32  ;;  %v12273_v4 = vpop.f32.mrb[102].mxu0 }
 0x3ae   :  { %v6724_v28 = vrot.slane %v6723_v47, 2  ;;  %v6732_v57 = vadd.f32 %v6731_v51, %v6730_v11  ;;  %v4516_v29 = vpop.f32.mrb[103].mxu0  ;;  %v4525_v20 = vadd.f32 %v15877_v16, %v12273_v4  ;;  %v5750_v44 = vmax.f32 %v4522_v15, 0.0 }
 0x3af   :  { %v5748_v8 = vmax.f32 %v4514_v61, 0.0  ;;  %v4517_v14 = vadd.f32 %v15877_v16, %v4516_v29 }
 0x3b0   :  { %v6725_v22 = vadd.f32 %v6724_v28, %v6723_v47  ;;  %v6734_v42 = vadd.f32 %v6733_v37, %v6732_v57  ;;  %v5751_v59 = vmax.f32 %v4525_v20, 0.0  ;;  %v6739_v3 = vsel %vm5968_vm1, %v5750_v44, 0.0 }
 0x3b1   :  { %v6735_v63 = vsel %vm5968_vm1, %v5748_v8, 0.0  ;;  %v5749_v43 = vmax.f32 %v4517_v14, 0.0 }
 0x3b2   :  { %v6726_v18 = vrot.slane %v6725_v22, 1  ;;  %v6736_v25 = vadd.f32 %v6735_v63, %v6734_v42  ;;  %v6741_v45 = vsel %vm5968_vm1, %v5751_v59, 0.0 }
 0x3b3   :  { %v6737_v53 = vsel %vm5968_vm1, %v5749_v43, 0.0  ;;  %v12276_v17 = vpop.f32.mrb[104].mxu0 }
 0x3b4   :  { %v6727_v46 = vadd.f32 %v6726_v18, %v6725_v22  ;;  %v6738_v49 = vadd.f32 %v6737_v53, %v6736_v25  ;;  %v4529_v23 = vpop.f32.mrb[105].mxu0  ;;  %v4538_v52 = vadd.f32 %v15877_v16, %v12276_v17 }
 0x3b5   :  { %v4530_v24 = vadd.f32 %v15877_v16, %v4529_v23  ;;  %v12277_v10 = vpop.f32.mrb[106].mxu0 }
 0x3b6   :  { %v7222_v40 = vmul.f32 0.00390625, %v6727_v46  ;;  %v6740_v30 = vadd.f32 %v6739_v3, %v6738_v49  ;;  %v4532_v34 = vpop.f32.mrb[107].mxu0  ;;  %v4541_v0 = vadd.f32 %v15877_v16, %v12277_v10  ;;  %v5754_v50 = vmax.f32 %v4538_v52, 0.0 }
 0x3b7   :  { %v5752_v19 = vmax.f32 %v4530_v24, 0.0  ;;  %v4533_v13 = vadd.f32 %v15877_v16, %v4532_v34 }
 0x3b8   :  { %v7242_v6 = vpack.c.bf16 %v7222_v40, %v7222_v40  ;;  %v6742_v1 = vadd.f32 %v6741_v45, %v6740_v30  ;;  %v5755_v21 = vmax.f32 %v4541_v0, 0.0  ;;  %v6747_v31 = vsel %vm5968_vm1, %v5754_v50, 0.0 }
 0x3b9   :  { %v6743_v54 = vsel %vm5968_vm1, %v5752_v19, 0.0  ;;  %v5753_v12 = vmax.f32 %v4533_v13, 0.0 }
 0x3ba   :  { %v7285_v7 = vunpack.c.l.b16 %v7242_v6  ;;  %v6744_v9 = vadd.f32 %v6743_v54, %v6742_v1  ;;  %v6749_v26 = vsel %vm5968_vm1, %v5755_v21, 0.0 }
 0x3bb   :  { %v6745_v62 = vsel %vm5968_vm1, %v5753_v12, 0.0  ;;  %v12280_v27 = vpop.f32.mrb[108].mxu0 }
 0x3bc   :  { %v6746_v36 = vadd.f32 %v6745_v62, %v6744_v9  ;;  %v4545_v41 = vpop.f32.mrb[109].mxu0  ;;  %v16024_v35 = vsel %vm7295_vm3, %v7285_v7, %v15902_v38  ;;  %v4554_v48 = vadd.f32 %v15877_v16, %v12280_v27  ;;  %vm7653_vm3 = vcmask 1041408  }
 0x3bd   :  { %v4546_v58 = vadd.f32 %v15877_v16, %v4545_v41  ;;  %v12281_v56 = vpop.f32.mrb[110].mxu0 }
 0x3be   :  { %v6748_v55 = vadd.f32 %v6747_v31, %v6746_v36  ;;  %v4548_v33 = vpop.f32.mrb[111].mxu0  ;;  %v4557_v2 = vadd.f32 %v15877_v16, %v12281_v56  ;;  %v5758_v32 = vmax.f32 %v4554_v48, 0.0 }
 0x3bf   :  { %v5756_v39 = vmax.f32 %v4546_v58, 0.0  ;;  %v4549_v47 = vadd.f32 %v15877_v16, %v4548_v33 }
 0x3c0   :  { %v6750_v11 = vadd.f32 %v6749_v26, %v6748_v55  ;;  %v5759_v61 = vmax.f32 %v4557_v2, 0.0  ;;  %v6755_v37 = vsel %vm5968_vm1, %v5758_v32, 0.0  ;;  %v16865_v32 = vld [vmem:[#allocation4_spill] sm:$0xff] }
 0x3c1   :  { %v6751_v38 = vsel %vm5968_vm1, %v5756_v39, 0.0  ;;  %v5757_v51 = vmax.f32 %v4549_v47, 0.0 }
 0x3c2   :  { %v6752_v15 = vadd.f32 %v6751_v38, %v6750_v11  ;;  %v6757_v44 = vsel %vm5968_vm1, %v5759_v61, 0.0  ;;  %v4610_v38 = vadd.f32 %v15877_v16, %v16865_v32 }
 0x3c3   :  { %v6753_v4 = vsel %vm5968_vm1, %v5757_v51, 0.0  ;;  %v12284_v28 = vpop.f32.mrb[112].mxu0 }
 0x3c4   :  { %v6754_v57 = vadd.f32 %v6753_v4, %v6752_v15  ;;  %v4561_v29 = vpop.f32.mrb[113].mxu0  ;;  %v4570_v8 = vadd.f32 %v15877_v16, %v12284_v28  ;;  %v16866_v28 = vld [vmem:[#allocation6_spill] sm:$0xff] }
 0x3c5   :  { %v4562_v20 = vadd.f32 %v15877_v16, %v4561_v29  ;;  %v12285_v14 = vpop.f32.mrb[114].mxu0  ;;  %v16867_v29 = vld [vmem:[#allocation7_spill] sm:$0xff] }
 0x3c6   :  { %v6756_v22 = vadd.f32 %v6755_v37, %v6754_v57  ;;  %v4564_v42 = vpop.f32.mrb[115].mxu0  ;;  %v4573_v43 = vadd.f32 %v15877_v16, %v12285_v14  ;;  %v5762_v59 = vmax.f32 %v4570_v8, 0.0  ;;  %v4613_v57 = vadd.f32 %v15877_v16, %v16866_v28  ;;  %v16868_v14 = vld [vmem:[#allocation8_spill] sm:$0xff] }
 0x3c7   :  { %v5760_v63 = vmax.f32 %v4562_v20, 0.0  ;;  %v4565_v18 = vadd.f32 %v15877_v16, %v4564_v42  ;;  %v6860_v37 = vrot.slane %v16867_v29, 4 }
 0x3c8   :  { %v6758_v25 = vadd.f32 %v6757_v44, %v6756_v22  ;;  %v5763_v49 = vmax.f32 %v4573_v43, 0.0  ;;  %v6763_v10 = vsel %vm5968_vm1, %v5762_v59, 0.0  ;;  %v6929_v22 = vrot.slane %v16868_v14, 4  ;;  %v16869_v44 = vld [vmem:[#allocation3_spill] sm:$0xff] }
 0x3c9   :  { %v6759_v53 = vsel %vm5968_vm1, %v5760_v63, 0.0  ;;  %v5761_v17 = vmax.f32 %v4565_v18, 0.0  ;;  %v4618_v63 = vadd.f32 %v15877_v16, %v16869_v44  ;;  %v5772_v43 = vmax.f32 %v4610_v38, 0.0  ;;  %v16870_v18 = vld [vmem:[#allocation10_spill] sm:$0xff] }
 0x3ca   :  { %v6760_v46 = vadd.f32 %v6759_v53, %v6758_v25  ;;  %v6765_v0 = vsel %vm5968_vm1, %v5763_v49, 0.0  ;;  %v6998_v25 = vrot.slane %v16870_v18, 4  ;;  %v16871_v53 = vld [vmem:[#allocation28_spill] sm:$0xff]  ;;  %v16872_v49 = vld [vmem:[#allocation5_spill] sm:$0xff] }
 0x3cb   :  { %v6761_v23 = vsel %vm5968_vm1, %v5761_v17, 0.0  ;;  %v12288_v3 = vpop.f32.mrb[116].mxu0  ;;  %v7067_v17 = vrot.slane %v16871_v53, 4 }
 0x3cc   :  { %v6762_v52 = vadd.f32 %v6761_v23, %v6760_v46  ;;  %v4577_v24 = vpop.f32.mrb[117].mxu0  ;;  %v4586_v40 = vadd.f32 %v15877_v16, %v12288_v3  ;;  %v4621_v23 = vadd.f32 %v15877_v16, %v16872_v49  ;;  %v5773_v3 = vmax.f32 %v4613_v57, 0.0 }
 0x3cd   :  { %v4578_v30 = vadd.f32 %v15877_v16, %v4577_v24  ;;  %v12289_v34 = vpop.f32.mrb[118].mxu0 }
 0x3ce   :  { %v6764_v45 = vadd.f32 %v6763_v10, %v6762_v52  ;;  %v4580_v19 = vpop.f32.mrb[119].mxu0  ;;  %v4589_v6 = vadd.f32 %v15877_v16, %v12289_v34  ;;  %v5766_v54 = vmax.f32 %v4586_v40, 0.0  ;;  %v6861_v52 = vadd.f32 %v6860_v37, %v16867_v29 }
 0x3cf   :  { %v5764_v13 = vmax.f32 %v4578_v30, 0.0  ;;  %v4581_v1 = vadd.f32 %v15877_v16, %v4580_v19  ;;  %v6930_v10 = vadd.f32 %v6929_v22, %v16868_v14  ;;  %v5774_v30 = vmax.f32 %v4618_v63, 0.0 }
 0x3d0   :  { %v6766_v50 = vadd.f32 %v6765_v0, %v6764_v45  ;;  %v5767_v21 = vmax.f32 %v4589_v6, 0.0  ;;  %v6771_v31 = vsel %vm5968_vm1, %v5766_v54, 0.0  ;;  %v6783_v34 = vsel %vm5968_vm1, %v5772_v43, 0.0 }
 0x3d1   :  { %v6767_v12 = vsel %vm5968_vm1, %v5764_v13, 0.0  ;;  %v5765_v7 = vmax.f32 %v4581_v1, 0.0  ;;  %v6999_v45 = vadd.f32 %v6998_v25, %v16870_v18  ;;  %v7068_v19 = vadd.f32 %v7067_v17, %v16871_v53 }
 0x3d2   :  { %v6768_v9 = vadd.f32 %v6767_v12, %v6766_v50  ;;  %v6773_v26 = vsel %vm5968_vm1, %v5767_v21, 0.0  ;;  %v5775_v13 = vmax.f32 %v4621_v23, 0.0  ;;  %v6785_v6 = vsel %vm5968_vm1, %v5773_v3, 0.0  ;;  %v13340_v3 = vld [vmem:[%s10677_s21 + $0x8] sm:$0xff]  }
 0x3d3   :  { %v6769_v62 = vsel %vm5968_vm1, %v5765_v7, 0.0  ;;  %v12292_v27 = vpop.f32.mrb[120].mxu0  ;;  %v6931_v1 = vrot.slane %v6930_v10, 2  ;;  %v6787_v54 = vsel %vm5968_vm1, %v5774_v30, 0.0  ;;  %v7000_v12 = vrot.slane %v6999_v45, 2 }
 0x3d4   :  { %v6770_v36 = vadd.f32 %v6769_v62, %v6768_v9  ;;  %v4593_v41 = vpop.f32.mrb[121].mxu0  ;;  %v4602_v48 = vadd.f32 %v15877_v16, %v12292_v27  ;;  %v7069_v7 = vrot.slane %v7068_v19, 2  ;;  %v6789_v21 = vsel %vm5968_vm1, %v5775_v13, 0.0 }
 0x3d5   :  { %v4594_v58 = vadd.f32 %v15877_v16, %v4593_v41  ;;  %v12293_v56 = vpop.f32.mrb[122].mxu0  ;;  %v6932_v27 = vadd.f32 %v6931_v1, %v6930_v10  ;;  %v7001_v41 = vadd.f32 %v7000_v12, %v6999_v45  ;;  %v7316_v23 = vpack.c.b16 %v16002_v5, %v16002_v5  ;;  %v7379_v10 = vld [vmem:[%s10676_s29 + $0x10] sm:$0x3] }
 0x3d6   :  { %v6772_v55 = vadd.f32 %v6771_v31, %v6770_v36  ;;  %v4596_v33 = vpop.f32.mrb[123].mxu0  ;;  %v4605_v2 = vadd.f32 %v15877_v16, %v12293_v56  ;;  %v5770_v51 = vmax.f32 %v4602_v48, 0.0  ;;  %v7070_v31 = vadd.f32 %v7069_v7, %v7068_v19  ;;  %v7378_v19 = vld [vmem:[%s10676_s29 + $0x8] sm:$0xff]  ;;  %v11290_v7 = vld [vmem:[%s10678_s3] ss:$0 sm:$0xff]  ;;  %s13543_s3 = smov 11  }
 0x3d7   :  { %v5768_v39 = vmax.f32 %v4594_v58, 0.0  ;;  %v4597_v47 = vadd.f32 %v15877_v16, %v4596_v33  ;;  %v6862_v16 = vrot.slane %v6861_v52, 2  ;;  %v6933_v56 = vrot.slane %v6932_v27, 1  ;;  %s10680_s7 = sld [smem:[%s16791_s0 + %s13543_s3]]  }
 0x3d8   :  { %v6774_v11 = vadd.f32 %v6773_v26, %v6772_v55  ;;  %v5771_v8 = vmax.f32 %v4605_v2, 0.0  ;;  %v6779_v59 = vsel %vm5968_vm1, %v5770_v51, 0.0  ;;  %v7002_v33 = vrot.slane %v7001_v41, 1 }
 0x3d9   :  { %v6775_v15 = vsel %vm5968_vm1, %v5768_v39, 0.0  ;;  %v5769_v61 = vmax.f32 %v4597_v47, 0.0  ;;  %v6863_v62 = vadd.f32 %v6862_v16, %v6861_v52  ;;  %v7071_v26 = vrot.slane %v7070_v31, 1 }
 0x3da   :  { %v6776_v4 = vadd.f32 %v6775_v15, %v6774_v11  ;;  %v6781_v24 = vsel %vm5968_vm1, %v5771_v8, 0.0  ;;  %v6934_v47 = vadd.f32 %v6933_v56, %v6932_v27  ;;  %v7003_v32 = vadd.f32 %v7002_v33, %v7001_v41  ;;  %v7383_v56 = vld [vmem:[%s10670_s8] sm:$0xff]  ;;  %v7384_v33 = vld [vmem:[%s10670_s8 + $0x8] sm:$0xff] }
 0x3db   :  { %v6777_v20 = vsel %vm5968_vm1, %v5769_v61, 0.0  ;;  %v6864_v58 = vrot.slane %v6863_v62, 1  ;;  %v7072_v38 = vadd.f32 %v7071_v26, %v7070_v31  ;;  %v13525_v31 = vmov 0.0  }
 0x3dc   :  { %v6778_v42 = vadd.f32 %v6777_v20, %v6776_v4  ;;  %v7225_v61 = vmul.f32 0.00390625, %v6934_v47  ;;  %v7226_v28 = vmul.f32 0.00390625, %v7003_v32 }
 0x3dd   :  { %v6865_v2 = vadd.f32 %v6864_v58, %v6863_v62  ;;  %v7227_v29 = vmul.f32 0.00390625, %v7072_v38  ;;  %v13526_v58 = vmov 0  }
 0x3de   :  { %v6780_v46 = vadd.f32 %v6779_v59, %v6778_v42  ;;  %v7245_v20 = vpack.c.bf16 %v7225_v61, %v7225_v61  ;;  %v7246_v14 = vpack.c.bf16 %v7226_v28, %v7226_v28  ;;  %12941 = vset.pattern.permute.xlu1 %v13526_v58  ;;  %12942 = vset.pattern.permute.xlu0 %v13526_v58  ;;  %v11289_v61 = vld [vmem:[%s10671_s12] ss:$0 sm:$0xff]  ;;  %v13529_v28 = vmov -1e+30   ;;  %s13545_s12 = smov 12  }
 0x3df   :  { %v7224_v15 = vmul.f32 0.00390625, %v6865_v2  ;;  %v7247_v22 = vpack.c.bf16 %v7227_v29, %v7227_v29  ;;  %7389 = vperm.xlu1 %12941, %v7383_v56   ;;  %s10681_s28 = sld [smem:[%s16791_s0 + %s13545_s12]]   ;;  %s13549_s12 = smov 20  }
 0x3e0   :  { %v6782_v40 = vadd.f32 %v6781_v24, %v6780_v46  ;;  %v7288_v63 = vunpack.c.l.b16 %v7245_v20  ;;  %v7289_v18 = vunpack.c.l.b16 %v7246_v14 }
 0x3e1   :  { %v7244_v37 = vpack.c.bf16 %v7224_v15, %v7224_v15  ;;  %v7290_v59 = vunpack.c.l.b16 %v7247_v22 }
 0x3e2   :  { %v6784_v0 = vadd.f32 %v6783_v34, %v6782_v40  ;;  %v7377_v34 = vld [vmem:[%s10676_s29] sm:$0xff]  ;;  %s13546_s29 = smov 13  }
 0x3e3   :  { %v7287_v44 = vunpack.c.l.b16 %v7244_v37  ;;  %7394 = vperm.xlu1 %12941, %v7384_v33   ;;  %s10682_s3 = sld [smem:[%s16791_s0 + %s13546_s29]]   ;;  %s13550_s29 = smov 18  }
 0x3e4   :  { %v6786_v50 = vadd.f32 %v6785_v6, %v6784_v0 }
 0x3e6   :  { %v6788_v9 = vadd.f32 %v6787_v54, %v6786_v50  ;;  %v13522_v54 = vmov 0.0|0.0  }
 0x3e8   :  { %v6790_v36 = vadd.f32 %v6789_v21, %v6788_v9 }
 0x3ea   :  { %v6791_v48 = vrot.slane %v6790_v36, 4 }
 0x3ec   :  { %v6792_v55 = vadd.f32 %v6791_v48, %v6790_v36 }
 0x3ee   :  { %v6793_v39 = vrot.slane %v6792_v55, 2 }
 0x3f0   :  { %v6794_v11 = vadd.f32 %v6793_v39, %v6792_v55  ;;  %v7385_v55 = vld [vmem:[%s10670_s8 + $0x10] sm:$0x3]  ;;  %s13544_s8 = smov 14  }
 0x3f1   :  { %s10683_s11 = sld [smem:[%s16791_s0 + %s13544_s8]]  }
 0x3f2   :  { %v6795_v51 = vrot.slane %v6794_v11, 1  ;;  %s10684_s8 = sld [smem:[%s16791_s0 + %s13547_s5]]   ;;  %s13551_s5 = smov 19  }
 0x3f4   :  { %v6796_v4 = vadd.f32 %v6795_v51, %v6794_v11 }
 0x3f6   :  { %v7223_v57 = vmul.f32 0.00390625, %v6796_v4 }
 0x3f8   :  { %v7243_v8 = vpack.c.bf16 %v7223_v57, %v7223_v57 }
 0x3fa   :  { %v7286_v42 = vunpack.c.l.b16 %v7243_v8 }
 0x3fc   :  { %v7309_v43 = vsel %vm7297_vm4, %v7286_v42, %v16024_v35  ;;  %v13339_v35 = vld [vmem:[%s10677_s21] sm:$0xff]   ;;  %s13537_s21 = smov 72   ;;  %vm8486_vm4 = vcmask 195584  }
 0x3fd   :  { %v7310_v25 = vsel %vm7299_vm5, %v7287_v44, %v7309_v43  ;;  %12496 = vmatprep.subr.bf16.mxu1 %v13339_v35  ;;  %vm8580_vm5 = vcmask 254976  }
 0x3fe   :  { %v7311_v53 = vsel %vm7301_vm6, %v7288_v63, %v7310_v25 }
 0x3ff   :  { %v7312_v17 = vsel %vm7303_vm7, %v7289_v18, %v7311_v53 }
 0x400   :  { %v7313_v46 = vsel %vm7305_vm8, %v7290_v59, %v7312_v17 }
 0x401   :  { %v7315_v49 = vpack.c.b16 %v7313_v46, %v15985_v60  ;;  %v11285_v60 = vld [vmem:[%s10675_s25] ss:$0 sm:$0xff] }
 0x403   :  { %12492 = vmatprep.mubr.msk.bf16.mxu1 %vm5968_vm1, %v7315_v49 }
 0x404   :  { %12493 = vmatmul.mubr.msk.bf16.vlgmr.msra.gmra.mrb[196].mxu1 %vm5968_vm1, %v7316_v23 }
 0x405   :  { %12497 = vmatpush3.bf16.msra.mxu1 %v13339_v35 }
 0x406   :  { %12498 = vmatprep.subr.bf16.mxu1 %v13340_v3 }
 0x409   :  { %12499 = vmatpush3.bf16.msra.mxu1 %v13340_v3 }
 0x40a   :  { %12824 = vmatprep.subr.bf16.mxu1 %v13522_v54 }
 0x45e   :  { %v7390_v4 = vpop.permute.xlu1 %7389 }
 0x45f   :  { %vm7408_vm12 = vcmp.eq.f32.partialorder %v7390_v4, %v11289_v61 }
 0x460   :  { %v16165_v57 = vsel %vm7408_vm12, 0.0, %v13529_v28 }
 0x462   :  { %v7395_v29 = vpop.permute.xlu1 %7394 }
 0x463   :  { %vm7409_vm14 = vcmp.eq.f32.partialorder %v7395_v29, %v11289_v61 }
 0x464   :  { %v16169_v42 = vsel %vm7409_vm14, 0.0, %v13529_v28 }
 0x4d7   :  { %v12494_v5 = vpop.f32.mrb[196].mxu1 }
 0x4d8   :  { %v7372_v52 = vadd.f32 %v12494_v5, %v11285_v60  ;;  %v7363_v24 = vpop.f32.mrb[197].mxu1 }
 0x4d9   :  { %v7364_v40 = vadd.f32 %v11285_v60, %v7363_v24  ;;  %v12495_v30 = vpop.f32.mrb[198].mxu1 }
 0x4da   :  { %v7366_v45 = vpop.f32.mrb[199].mxu1  ;;  %v16101_v13 = vadd.f32 %v7379_v10, %v7372_v52 }
 0x4db   :  { %v7367_v0 = vadd.f32 %v11285_v60, %v7366_v45  ;;  %v16103_v6 = vadd.f32 %v7377_v34, %v7364_v40 }
 0x4dc   :  { %v7419_v50 = vpack.c.bf16 %v16101_v13, %v16101_v13 }
 0x4dd   :  { %v16105_v16 = vadd.f32 %v7378_v19, %v7367_v0 }
 0x4df   :  { %v7418_v1 = vpack.c.bf16 %v16105_v16, %v16103_v6 }
 0x4e1   :  { %12500 = vmatprep.mubr.msk.bf16.mxu1 %vm2190_vm0, %v7418_v1 }
 0x4e2   :  { %12501 = vmatmul.mubr.msk.bf16.vlgmr.msra.gmra.mrb[200].mxu1 %vm2190_vm0, %v7419_v50 }
 0x4e3   :  { %12510 = vmatprep.mubr.msk.f32.mxu1 %vm13524_vm9, %v13525_v31 }
 0x5b5   :  { %v12502_v12 = vpop.f32.mrb[200].mxu1 }
 0x5b6   :  { %v7479_v9 = vpop.f32.mrb[201].mxu1  ;;  %v16123_v48 = vadd.f32 %v12502_v12, %v11290_v7 }
 0x5b7   :  { %v12503_v21 = vpop.f32.mrb[202].mxu1  ;;  %v7480_v27 = vadd.f32 %v11290_v7, %v7479_v9 }
 0x5b8   :  { %v7482_v62 = vpop.f32.mrb[203].mxu1  ;;  %v16156_v15 = vmul.f32 0.35355338, %v16123_v48 }
 0x5b9   :  { %v7483_v36 = vadd.f32 %v11290_v7, %v7482_v62  ;;  %v16142_v38 = vmul.f32 0.35355338, %v7480_v27 }
 0x5bb   :  { %v16117_v41 = vpack.i.bf16 %v7483_v36, %v7480_v27  ;;  %v16149_v51 = vmul.f32 0.35355338, %v7483_v36 }
 0x5bd   :  { %12937 = vrot.lane.b32.xlu0 %v16117_v41, %s13523_s4 }
 0x5c1   :  { %7503 = vrot.lane.b32.xlu0 %v16123_v48, %s13523_s4 }
 0x5c5   :  { %7399 = vperm.xlu0 %12942, %v7385_v55  }
 0x62f   :  { %v12938_v26 = vpop.permute.xlu0 %12937 }
 0x630   :  { %v12940_v39 = vunpack.i.h.bf16 %v12938_v26  ;;  %v12939_v2 = vunpack.i.l.bf16 %v12938_v26 }
 0x632   :  { %v12825_v11 = vpack.c.bf16 %v12940_v39, %v12939_v2 }
 0x633   :  { %v7504_v32 = vpop.permute.xlu0 %7503 }
 0x634   :  { %12827 = vmatpush3.bf16.xpose.msk.msra.mxu1 %vm16134_vm11, %v12825_v11 }
 0x635   :  { %12508 = vmatprep.subr.mxu1 %v13525_v31 }
 0x63c   :  { %12509 = vmatpush3.xpose.msk.msra.mxu1 %vm7505_vm10, %v7504_v32 }
 0x63d   :  { %12828 = vmatprep.subr.bf16.mxu1 %v13522_v54 }
 0x63f   :  { %12511 = vmatmul.mubr.msk.f32.vlgmr.msra.gmra.mrb[204].mxu1 %vm7505_vm10, %v16142_v38 }
 0x640   :  { %12513 = vmatprep.mubr.msk.f32.mxu1 %vm13524_vm9, %v13525_v31 }
 0x643   :  { %12514 = vmatmul.mubr.msk.f32.gmra.mrb[206].mxu1 %vm7505_vm10, %v16149_v51 }
 0x644   :  { %12516 = vmatprep.mubr.msk.f32.mxu1 %vm13524_vm9, %v13525_v31  ;;  %v7400_v8 = vpop.permute.xlu0 %7399 }
 0x645   :  { %vm7410_vm15 = vcmp.eq.f32.partialorder %v7400_v8, %v11289_v61 }
 0x646   :  { %v16172_v18 = vsel %vm7410_vm15, 0.0, %v13529_v28 }
 0x647   :  { %12517 = vmatmul.mubr.msk.f32.gmra.mrb[208].mxu1 %vm7505_vm10, %v16156_v15 }
 0x648   :  { %12525 = vmatprep.mubr.msk.f32.mxu1 %vm13524_vm9, %v13525_v31 }
 0x712   :  { %v7587_v37 = vpop.f32.mrb[204].mxu1 }
 0x713   :  { %v7588_v20 = vadd.f32 %v7587_v37, %v16165_v57  ;;  %v12512_v14 = vpop.f32.mrb[205].mxu1 }
 0x715   :  { %v7602_v22 = vsel %vm7601_vm13, %v7588_v20, -inf }
 0x716   :  { %7603 = vmax.xlane.f32.xlu1 %v7602_v22  ;;  %v7592_v44 = vpop.f32.mrb[206].mxu1 }
 0x717   :  { %v7593_v63 = vadd.f32 %v7592_v44, %v16169_v42  ;;  %v12515_v43 = vpop.f32.mrb[207].mxu1 }
 0x719   :  { %v7605_v25 = vsel %vm7601_vm13, %v7593_v63, -inf }
 0x71a   :  { %7606 = vmax.xlane.f32.xlu0 %v7605_v25  ;;  %v7597_v59 = vpop.f32.mrb[208].mxu1 }
 0x71b   :  { %v7598_v53 = vadd.f32 %v7597_v59, %v16172_v18  ;;  %v12518_v17 = vpop.f32.mrb[209].mxu1 }
 0x71d   :  { %v7609_v46 = vsel %vm7608_vm2, %v7598_v53, -inf }
 0x71e   :  { %7610 = vmax.xlane.f32.xlu1 %v7609_v46 }
 0x72f   :  { %12944 = vrot.lane.b32.xlu1 %v16117_v41, %s13530_s13 }
 0x733   :  { %12949 = vrot.lane.b32.xlu1 %v16117_v41, %s13531_s14 }
 0x7a3   :  { %v7604_v49 = vpop.xlane.xlu1 %7603 }
 0x7a4   :  { %v7612_v23 = vsub.f32 %v7588_v20, %v7604_v49 }
 0x7a6   :  { %v7615_v35 = vmul.f32 1.442695, %v7612_v23 }
 0x7a7   :  { %v7607_v3 = vpop.xlane.xlu0 %7606 }
 0x7a8   :  { %13389 = vpow2.f32 %v7615_v35  ;;  %v7613_v60 = vsub.f32 %v7593_v63, %v7607_v3 }
 0x7aa   :  { %v7617_v5 = vmul.f32 1.442695, %v7613_v60 }
 0x7ab   :  { %v7611_v52 = vpop.xlane.xlu1 %7610 }
 0x7ac   :  { %13391 = vpow2.f32 %v7617_v5  ;;  %v7614_v1 = vsub.f32 %v7598_v53, %v7611_v52 }
 0x7ae   :  { %v7619_v50 = vmul.f32 1.442695, %v7614_v1 }
 0x7af   :  { %v12945_v24 = vpop.permute.xlu1 %12944 }
 0x7b0   :  { %v12947_v10 = vunpack.i.h.bf16 %v12945_v24  ;;  %v12946_v40 = vunpack.i.l.bf16 %v12945_v24  ;;  %13393 = vpow2.f32 %v7619_v50 }
 0x7b2   :  { %v13390_v30 = vpop.eup %13389  ;;  %v12829_v34 = vpack.c.bf16 %v12947_v10, %v12946_v40 }
 0x7b3   :  { %v7621_v45 = vsel %vm7601_vm13, %v13390_v30, 0.0  ;;  %v12950_v9 = vpop.permute.xlu1 %12949 }
 0x7b4   :  { %7622 = vadd.xlane.f32.xlu0 %v7621_v45  ;;  %12830 = vmatpush3.bf16.msra.mxu1 %v12829_v34  ;;  %v12952_v36 = vunpack.i.h.bf16 %v12950_v9  ;;  %v12951_v56 = vunpack.i.l.bf16 %v12950_v9 }
 0x7b5   :  { %12523 = vmatprep.subr.mxu1 %v13525_v31 }
 0x7b6   :  { %v13392_v19 = vpop.eup %13391  ;;  %v12832_v26 = vpack.c.bf16 %v12952_v36, %v12951_v56 }
 0x7b7   :  { %v7624_v0 = vsel %vm7601_vm13, %v13392_v19, 0.0 }
 0x7b8   :  { %7625 = vadd.xlane.f32.xlu1 %v7624_v0 }
 0x7ba   :  { %v13394_v12 = vpop.eup %13393 }
 0x7bb   :  { %v7627_v7 = vsel %vm7608_vm2, %v13394_v12, 0.0 }
 0x7c9   :  { %7746 = vrot.lane.b32.xlu1 %v16123_v48, %s13531_s14 }
 0x7ca   :  { %7640 = vrot.lane.b32.xlu0 %v16123_v48, %s13530_s13 }
 0x7cd   :  { %7738 = vrot.lane.b32.xlu1 %v16149_v51, %s13532_s15 }
 0x7e9   :  { %7628 = vadd.xlane.f32.xlu0 %v7627_v7 }
 0x7ff   :  { %7736 = vrot.lane.b32.xlu0 %v16142_v38, %s13532_s15 }
 0x803   :  { %7740 = vrot.lane.b32.xlu0 %v16156_v15, %s13532_s15 }
 0x841   :  { %v7623_v21 = vpop.xlane.xlu0 %7622 }
 0x842   :  { %13395 = vrcp.f32 %v7623_v21 }
 0x845   :  { %v7641_v62 = vpop.permute.xlu0 %7640  ;;  %v7626_v27 = vpop.xlane.xlu1 %7625 }
 0x846   :  { %13397 = vrcp.f32 %v7626_v27  ;;  %12524 = vmatpush3.msk.msra.mxu1 %vm7653_vm3, %v7641_v62 }
 0x847   :  { %12831 = vmatprep.subr.bf16.mxu1 %v13522_v54 }
 0x849   :  { %v7747_v11 = vpop.permute.xlu1 %7746 }
 0x84c   :  { %v13396_v55 = vpop.eup %13395 }
 0x84d   :  { %v7633_v33 = vmul.f32 %v13396_v55, %v13390_v30  ;;  %v7739_v29 = vpop.permute.xlu1 %7738 }
 0x84f   :  { %12526 = vmatmul.mubr.msk.f32.vlgmr.msra.gmra.mrb[210].mxu1 %vm7601_vm13, %v7633_v33 }
 0x850   :  { %v13398_v39 = vpop.eup %13397  ;;  %12834 = vmatpush3.bf16.xpose.msk.msra.mxu1 %vm16134_vm11, %v12832_v26  ;;  %12528 = vmatprep.mubr.msk.f32.mxu1 %vm13524_vm9, %v13525_v31 }
 0x851   :  { %v7634_v2 = vmul.f32 %v13398_v39, %v13392_v19  ;;  %12538 = vmatprep.subr.mxu1 %v13525_v31 }
 0x853   :  { %12529 = vmatmul.mubr.msk.f32.gmra.mrb[212].mxu1 %vm7601_vm13, %v7634_v2 }
 0x854   :  { %12531 = vmatprep.mubr.msk.f32.mxu1 %vm13524_vm9, %v13525_v31 }
 0x858   :  { %12539 = vmatpush3.xpose.msk.msra.mxu1 %vm7505_vm10, %v7747_v11 }
 0x859   :  { %12835 = vmatprep.subr.bf16.mxu1 %v13522_v54 }
 0x876   :  { %v7629_v32 = vpop.xlane.xlu0 %7628 }
 0x877   :  { %13399 = vrcp.f32 %v7629_v32 }
 0x87a   :  { %v7737_v28 = vpop.permute.xlu0 %7736 }
 0x87e   :  { %v7741_v37 = vpop.permute.xlu0 %7740 }
 0x881   :  { %v13400_v61 = vpop.eup %13399 }
 0x882   :  { %v7635_v4 = vmul.f32 %v13400_v61, %v13394_v12 }
 0x884   :  { %12532 = vmatmul.mubr.msk.f32.gmra.mrb[214].mxu1 %vm7601_vm13, %v7635_v4 }
 0x885   :  { %12540 = vmatprep.mubr.msk.f32.mxu1 %vm13524_vm9, %v13525_v31 }
 0x888   :  { %12541 = vmatmul.mubr.msk.f32.vlgmr.msra.gmra.mrb[216].mxu1 %vm7505_vm10, %v7737_v28 }
 0x889   :  { %12543 = vmatprep.mubr.msk.f32.mxu1 %vm13524_vm9, %v13525_v31 }
 0x88c   :  { %12544 = vmatmul.mubr.msk.f32.gmra.mrb[218].mxu1 %vm7505_vm10, %v7739_v29 }
 0x88d   :  { %12546 = vmatprep.mubr.msk.f32.mxu1 %vm13524_vm9, %v13525_v31 }
 0x890   :  { %12547 = vmatmul.mubr.msk.f32.gmra.mrb[220].mxu1 %vm7505_vm10, %v7741_v37 }
 0x891   :  { %12555 = vmatprep.mubr.msk.f32.mxu1 %vm13524_vm9, %v13525_v31 }
 0x922   :  { %v16220_v8 = vpop.f32.mrb[210].mxu1 }
 0x923   :  { %v12527_v20 = vpop.f32.mrb[211].mxu1 }
 0x926   :  { %v16222_v14 = vpop.f32.mrb[212].mxu1 }
 0x927   :  { %v12530_v22 = vpop.f32.mrb[213].mxu1 }
 0x957   :  { %v16224_v44 = vpop.f32.mrb[214].mxu1 }
 0x958   :  { %v12533_v63 = vpop.f32.mrb[215].mxu1 }
 0x95b   :  { %v7826_v43 = vpop.f32.mrb[216].mxu1 }
 0x95c   :  { %v7827_v25 = vadd.f32 %v7826_v43, %v16165_v57  ;;  %v12542_v59 = vpop.f32.mrb[217].mxu1 }
 0x95e   :  { %v7840_v53 = vsel %vm7601_vm13, %v7827_v25, -inf }
 0x95f   :  { %7841 = vmax.xlane.f32.xlu1 %v7840_v53  ;;  %v7831_v17 = vpop.f32.mrb[218].mxu1 }
 0x960   :  { %v7832_v46 = vadd.f32 %v7831_v17, %v16169_v42  ;;  %v12545_v49 = vpop.f32.mrb[219].mxu1 }
 0x962   :  { %v7843_v23 = vsel %vm7601_vm13, %v7832_v46, -inf }
 0x963   :  { %7844 = vmax.xlane.f32.xlu0 %v7843_v23  ;;  %v7836_v35 = vpop.f32.mrb[220].mxu1 }
 0x964   :  { %v7837_v3 = vadd.f32 %v7836_v35, %v16172_v18  ;;  %v12548_v60 = vpop.f32.mrb[221].mxu1 }
 0x966   :  { %v7846_v5 = vsel %vm7608_vm2, %v7837_v3, -inf }
 0x967   :  { %7847 = vmax.xlane.f32.xlu0 %v7846_v5 }
 0x9ec   :  { %v7842_v52 = vpop.xlane.xlu1 %7841 }
 0x9ed   :  { %v7849_v24 = vsub.f32 %v7827_v25, %v7842_v52 }
 0x9ef   :  { %v7852_v10 = vmul.f32 1.442695, %v7849_v24 }
 0x9f0   :  { %v7845_v40 = vpop.xlane.xlu0 %7844 }
 0x9f1   :  { %13401 = vpow2.f32 %v7852_v10  ;;  %v7850_v30 = vsub.f32 %v7832_v46, %v7845_v40 }
 0x9f3   :  { %v7854_v34 = vmul.f32 1.442695, %v7850_v30 }
 0x9f4   :  { %v7848_v50 = vpop.xlane.xlu0 %7847 }
 0x9f5   :  { %13403 = vpow2.f32 %v7854_v34  ;;  %v7851_v12 = vsub.f32 %v7837_v3, %v7848_v50 }
 0x9f7   :  { %v7856_v7 = vmul.f32 1.442695, %v7851_v12 }
 0x9f9   :  { %13405 = vpow2.f32 %v7856_v7 }
 0x9fb   :  { %v13402_v45 = vpop.eup %13401 }
 0x9fc   :  { %v7858_v19 = vsel %vm7601_vm13, %v13402_v45, 0.0 }
 0x9fd   :  { %7859 = vadd.xlane.f32.xlu1 %v7858_v19 }
 0x9ff   :  { %v13404_v0 = vpop.eup %13403 }
 0xa00   :  { %v7861_v1 = vsel %vm7601_vm13, %v13404_v0, 0.0 }
 0xa01   :  { %7862 = vadd.xlane.f32.xlu0 %v7861_v1 }
 0xa03   :  { %v13406_v9 = vpop.eup %13405 }
 0xa04   :  { %v7864_v21 = vsel %vm7608_vm2, %v13406_v9, 0.0 }
 0xa0e   :  { %7877 = vrot.lane.b32.xlu1 %v16123_v48, %s13533_s16 }
 0xa12   :  { %12959 = vrot.lane.b32.xlu1 %v16117_v41, %s13534_s17 }
 0xa17   :  { %12954 = vrot.lane.b32.xlu0 %v16117_v41, %s13533_s16 }
 0xa1b   :  { %7982 = vrot.lane.b32.xlu0 %v16123_v48, %s13534_s17 }
 0xa1f   :  { %7974 = vrot.lane.b32.xlu0 %v16149_v51, %s13535_s19 }
 0xa36   :  { %7865 = vadd.xlane.f32.xlu1 %v7864_v21 }
 0xa47   :  { %7972 = vrot.lane.b32.xlu1 %v16142_v38, %s13535_s19 }
 0xa4b   :  { %7976 = vrot.lane.b32.xlu1 %v16156_v15, %s13535_s19 }
 0xa8a   :  { %v7860_v62 = vpop.xlane.xlu1 %7859 }
 0xa8b   :  { %13407 = vrcp.f32 %v7860_v62 }
 0xa8e   :  { %v7863_v27 = vpop.xlane.xlu0 %7862  ;;  %v7878_v56 = vpop.permute.xlu1 %7877 }
 0xa8f   :  { %13409 = vrcp.f32 %v7863_v27 }
 0xa92   :  { %v12955_v36 = vpop.permute.xlu0 %12954  ;;  %v12960_v2 = vpop.permute.xlu1 %12959 }
 0xa93   :  { %v12957_v55 = vunpack.i.h.bf16 %v12955_v36  ;;  %v12956_v33 = vunpack.i.l.bf16 %v12955_v36  ;;  %v12962_v61 = vunpack.i.h.bf16 %v12960_v2  ;;  %v12961_v4 = vunpack.i.l.bf16 %v12960_v2 }
 0xa95   :  { %v12836_v26 = vpack.c.bf16 %v12957_v55, %v12956_v33  ;;  %v13408_v39 = vpop.eup %13407  ;;  %v12839_v29 = vpack.c.bf16 %v12962_v61, %v12961_v4 }
 0xa96   :  { %v7870_v11 = vmul.f32 %v13408_v39, %v13402_v45  ;;  %v7983_v37 = vpop.permute.xlu0 %7982 }
 0xa97   :  { %12837 = vmatpush3.bf16.msra.mxu1 %v12836_v26 }
 0xa98   :  { %12553 = vmatprep.subr.mxu1 %v13525_v31 }
 0xa99   :  { %v13410_v32 = vpop.eup %13409 }
 0xa9a   :  { %v7871_v28 = vmul.f32 %v13410_v32, %v13404_v0  ;;  %v7975_v25 = vpop.permute.xlu0 %7974 }
 0xa9b   :  { %12554 = vmatpush3.msk.msra.mxu1 %vm7653_vm3, %v7878_v56 }
 0xa9c   :  { %12556 = vmatmul.mubr.msk.f32.vlgmr.msra.gmra.mrb[222].mxu1 %vm7601_vm13, %v7870_v11  ;;  %12838 = vmatprep.subr.bf16.mxu1 %v13522_v54 }
 0xa9d   :  { %12558 = vmatprep.mubr.msk.f32.mxu1 %vm13524_vm9, %v13525_v31 }
 0xaa0   :  { %12559 = vmatmul.mubr.msk.f32.gmra.mrb[224].mxu1 %vm7601_vm13, %v7871_v28 }
 0xaa1   :  { %12561 = vmatprep.mubr.msk.f32.mxu1 %vm13524_vm9, %v13525_v31 }
 0xaa2   :  { %12841 = vmatpush3.bf16.xpose.msk.msra.mxu1 %vm16134_vm11, %v12839_v29 }
 0xaa3   :  { %12568 = vmatprep.subr.mxu1 %v13525_v31 }
 0xaaa   :  { %12569 = vmatpush3.xpose.msk.msra.mxu1 %vm7505_vm10, %v7983_v37 }
 0xaab   :  { %12842 = vmatprep.subr.bf16.mxu1 %v13522_v54 }
 0xac3   :  { %v7866_v20 = vpop.xlane.xlu1 %7865 }
 0xac4   :  { %13411 = vrcp.f32 %v7866_v20 }
 0xac7   :  { %v7973_v43 = vpop.permute.xlu1 %7972 }
 0xacb   :  { %v7977_v59 = vpop.permute.xlu1 %7976 }
 0xace   :  { %v13412_v22 = vpop.eup %13411 }
 0xacf   :  { %v7872_v63 = vmul.f32 %v13412_v22, %v13406_v9 }
 0xad1   :  { %12562 = vmatmul.mubr.msk.f32.gmra.mrb[226].mxu1 %vm7601_vm13, %v7872_v63 }
 0xad2   :  { %12570 = vmatprep.mubr.msk.f32.mxu1 %vm13524_vm9, %v13525_v31 }
 0xad5   :  { %12571 = vmatmul.mubr.msk.f32.vlgmr.msra.gmra.mrb[228].mxu1 %vm7505_vm10, %v7973_v43 }
 0xad6   :  { %12573 = vmatprep.mubr.msk.f32.mxu1 %vm13524_vm9, %v13525_v31 }
 0xad9   :  { %12574 = vmatmul.mubr.msk.f32.gmra.mrb[230].mxu1 %vm7505_vm10, %v7975_v25 }
 0xada   :  { %12576 = vmatprep.mubr.msk.f32.mxu1 %vm13524_vm9, %v13525_v31 }
 0xadd   :  { %12577 = vmatmul.mubr.msk.f32.gmra.mrb[232].mxu1 %vm7505_vm10, %v7977_v59 }
 0xade   :  { %12585 = vmatprep.mubr.msk.f32.mxu1 %vm13524_vm9, %v13525_v31 }
 0xb6f   :  { %v16275_v53 = vpop.f32.mrb[222].mxu1 }
 0xb70   :  { %v12557_v17 = vpop.f32.mrb[223].mxu1 }
 0xb73   :  { %v16277_v46 = vpop.f32.mrb[224].mxu1 }
 0xb74   :  { %v12978_v49 = vpack.i.bf16 %v16277_v46, %v16275_v53  ;;  %v12560_v23 = vpop.f32.mrb[225].mxu1 }
 0xba4   :  { %v16281_v35 = vpop.f32.mrb[226].mxu1 }
 0xba5   :  { %v12563_v3 = vpop.f32.mrb[227].mxu1 }
 0xba8   :  { %v8062_v60 = vpop.f32.mrb[228].mxu1 }
 0xba9   :  { %v8063_v5 = vadd.f32 %v8062_v60, %v16165_v57  ;;  %v12572_v52 = vpop.f32.mrb[229].mxu1 }
 0xbab   :  { %v8076_v24 = vsel %vm7601_vm13, %v8063_v5, -inf }
 0xbac   :  { %8077 = vmax.xlane.f32.xlu0 %v8076_v24  ;;  %v8067_v10 = vpop.f32.mrb[230].mxu1 }
 0xbad   :  { %v8068_v40 = vadd.f32 %v8067_v10, %v16169_v42  ;;  %v12575_v30 = vpop.f32.mrb[231].mxu1 }
 0xbaf   :  { %v8079_v34 = vsel %vm7601_vm13, %v8068_v40, -inf }
 0xbb0   :  { %8080 = vmax.xlane.f32.xlu1 %v8079_v34  ;;  %v8072_v45 = vpop.f32.mrb[232].mxu1 }
 0xbb1   :  { %v8073_v19 = vadd.f32 %v8072_v45, %v16172_v18  ;;  %v12578_v0 = vpop.f32.mrb[233].mxu1 }
 0xbb3   :  { %v8082_v1 = vsel %vm7608_vm2, %v8073_v19, -inf }
 0xbb4   :  { %8083 = vmax.xlane.f32.xlu0 %v8082_v1 }
 0xbc1   :  { %12964 = vrot.lane.b32.xlu1 %v16117_v41, %s13536_s20 }
 0xbc5   :  { %12969 = vrot.lane.b32.xlu1 %v16117_v41, %s13537_s21 }
 0xc39   :  { %v8078_v50 = vpop.xlane.xlu0 %8077 }
 0xc3a   :  { %v8085_v12 = vsub.f32 %v8063_v5, %v8078_v50 }
 0xc3c   :  { %v8088_v7 = vmul.f32 1.442695, %v8085_v12 }
 0xc3d   :  { %v8081_v9 = vpop.xlane.xlu1 %8080 }
 0xc3e   :  { %13413 = vpow2.f32 %v8088_v7  ;;  %v8086_v21 = vsub.f32 %v8068_v40, %v8081_v9 }
 0xc40   :  { %v8090_v62 = vmul.f32 1.442695, %v8086_v21 }
 0xc41   :  { %v12965_v27 = vpop.permute.xlu1 %12964  ;;  %v8084_v11 = vpop.xlane.xlu0 %8083 }
 0xc42   :  { %13415 = vpow2.f32 %v8090_v62  ;;  %v12967_v36 = vunpack.i.h.bf16 %v12965_v27  ;;  %v12966_v56 = vunpack.i.l.bf16 %v12965_v27  ;;  %v8087_v32 = vsub.f32 %v8073_v19, %v8084_v11 }
 0xc44   :  { %v12843_v55 = vpack.c.bf16 %v12967_v36, %v12966_v56  ;;  %v8092_v61 = vmul.f32 1.442695, %v8087_v32 }
 0xc45   :  { %v12970_v29 = vpop.permute.xlu1 %12969 }
 0xc46   :  { %12844 = vmatpush3.bf16.msra.mxu1 %v12843_v55  ;;  %13417 = vpow2.f32 %v8092_v61  ;;  %v12971_v63 = vunpack.i.l.bf16 %v12970_v29 }
 0xc47   :  { %12583 = vmatprep.subr.mxu1 %v13525_v31 }
 0xc48   :  { %v13414_v33 = vpop.eup %13413 }
 0xc49   :  { %v8094_v26 = vsel %vm7601_vm13, %v13414_v33, 0.0 }
 0xc4a   :  { %8095 = vadd.xlane.f32.xlu0 %v8094_v26 }
 0xc4c   :  { %v13416_v39 = vpop.eup %13415 }
 0xc4d   :  { %v8097_v2 = vsel %vm7601_vm13, %v13416_v39, 0.0 }
 0xc4e   :  { %8098 = vadd.xlane.f32.xlu1 %v8097_v2 }
 0xc50   :  { %v13418_v4 = vpop.eup %13417 }
 0xc51   :  { %v8100_v28 = vsel %vm7608_vm2, %v13418_v4, 0.0 }
 0xc5f   :  { %8218 = vrot.lane.b32.xlu1 %v16123_v48, %s13537_s21 }
 0xc60   :  { %8113 = vrot.lane.b32.xlu0 %v16123_v48, %s13536_s20 }
 0xc63   :  { %8210 = vrot.lane.b32.xlu1 %v16149_v51, %s13538_s22  ;;  %v12972_v51 = vunpack.i.h.bf16 %v12970_v29 }
 0xc65   :  { %v12846_v59 = vpack.c.bf16 %v12972_v51, %v12971_v63 }
 0xc7f   :  { %8101 = vadd.xlane.f32.xlu0 %v8100_v28 }
 0xc95   :  { %8208 = vrot.lane.b32.xlu0 %v16142_v38, %s13538_s22 }
 0xc99   :  { %8212 = vrot.lane.b32.xlu0 %v16156_v15, %s13538_s22 }
 0xcd7   :  { %v8096_v37 = vpop.xlane.xlu0 %8095 }
 0xcd8   :  { %13419 = vrcp.f32 %v8096_v37 }
 0xcdb   :  { %v8099_v20 = vpop.xlane.xlu1 %8098  ;;  %v8114_v22 = vpop.permute.xlu0 %8113 }
 0xcdc   :  { %13421 = vrcp.f32 %v8099_v20  ;;  %12584 = vmatpush3.msk.msra.mxu1 %vm7653_vm3, %v8114_v22 }
 0xcdd   :  { %12845 = vmatprep.subr.bf16.mxu1 %v13522_v54 }
 0xcdf   :  { %v8219_v17 = vpop.permute.xlu1 %8218 }
 0xce2   :  { %v13420_v43 = vpop.eup %13419 }
 0xce3   :  { %v8106_v25 = vmul.f32 %v13420_v43, %v13414_v33  ;;  %v8211_v52 = vpop.permute.xlu1 %8210 }
 0xce5   :  { %12586 = vmatmul.mubr.msk.f32.vlgmr.msra.gmra.mrb[234].mxu1 %vm7601_vm13, %v8106_v25 }
 0xce6   :  { %v13422_v38 = vpop.eup %13421  ;;  %12848 = vmatpush3.bf16.xpose.msk.msra.mxu1 %vm16134_vm11, %v12846_v59  ;;  %12588 = vmatprep.mubr.msk.f32.mxu1 %vm13524_vm9, %v13525_v31 }
 0xce7   :  { %v8107_v15 = vmul.f32 %v13422_v38, %v13416_v39  ;;  %12598 = vmatprep.subr.mxu1 %v13525_v31 }
 0xce9   :  { %12589 = vmatmul.mubr.msk.f32.gmra.mrb[236].mxu1 %vm7601_vm13, %v8107_v15 }
 0xcea   :  { %12591 = vmatprep.mubr.msk.f32.mxu1 %vm13524_vm9, %v13525_v31 }
 0xcee   :  { %12599 = vmatpush3.xpose.msk.msra.mxu1 %vm7505_vm10, %v8219_v17 }
 0xcef   :  { %12849 = vmatprep.subr.bf16.mxu1 %v13522_v54 }
 0xd0c   :  { %v8102_v23 = vpop.xlane.xlu0 %8101 }
 0xd0d   :  { %13423 = vrcp.f32 %v8102_v23 }
 0xd10   :  { %v8209_v5 = vpop.permute.xlu0 %8208 }
 0xd14   :  { %v8213_v24 = vpop.permute.xlu0 %8212 }
 0xd17   :  { %v13424_v3 = vpop.eup %13423 }
 0xd18   :  { %v8108_v60 = vmul.f32 %v13424_v3, %v13418_v4 }
 0xd1a   :  { %12592 = vmatmul.mubr.msk.f32.gmra.mrb[238].mxu1 %vm7601_vm13, %v8108_v60 }
 0xd1b   :  { %12600 = vmatprep.mubr.msk.f32.mxu1 %vm13524_vm9, %v13525_v31 }
 0xd1e   :  { %12601 = vmatmul.mubr.msk.f32.vlgmr.msra.gmra.mrb[240].mxu1 %vm7505_vm10, %v8209_v5  ;;  %v13341_v5 = vld [vmem:[%s10679_s1] sm:$0xff]  }
 0xd1f   :  { %12603 = vmatprep.mubr.msk.f32.mxu1 %vm13524_vm9, %v13525_v31 }
 0xd22   :  { %12604 = vmatmul.mubr.msk.f32.gmra.mrb[242].mxu1 %vm7505_vm10, %v8211_v52  ;;  %v13342_v52 = vld [vmem:[%s10679_s1 + $0x8] sm:$0xff]   ;;  %s13557_s1 = smov 25  }
 0xd23   :  { %12606 = vmatprep.mubr.msk.f32.mxu1 %vm13524_vm9, %v13525_v31  ;;  %s10694_s6 = sld [smem:[%s16791_s0 + %s13557_s1]]  }
 0xd26   :  { %12607 = vmatmul.mubr.msk.f32.gmra.mrb[244].mxu1 %vm7505_vm10, %v8213_v24 }
 0xd27   :  { %12615 = vmatprep.mubr.msk.f32.mxu1 %vm13524_vm9, %v13525_v31 }
 0xdb8   :  { %v8194_v10 = vpop.f32.mrb[234].mxu1 }
 0xdb9   :  { %v12587_v40 = vpop.f32.mrb[235].mxu1 }
 0xdbc   :  { %v8199_v30 = vpop.f32.mrb[236].mxu1 }
 0xdbd   :  { %v12983_v34 = vpack.i.bf16 %v8199_v30, %v8194_v10  ;;  %v12590_v45 = vpop.f32.mrb[237].mxu1 }
 0xded   :  { %v8204_v19 = vpop.f32.mrb[238].mxu1 }
 0xdee   :  { %v12593_v0 = vpop.f32.mrb[239].mxu1 }
 0xdf1   :  { %v8298_v1 = vpop.f32.mrb[240].mxu1 }
 0xdf2   :  { %v8299_v50 = vadd.f32 %v8298_v1, %v16165_v57  ;;  %v12602_v12 = vpop.f32.mrb[241].mxu1 }
 0xdf4   :  { %v8312_v7 = vsel %vm7601_vm13, %v8299_v50, -inf }
 0xdf5   :  { %8313 = vmax.xlane.f32.xlu1 %v8312_v7  ;;  %v8303_v9 = vpop.f32.mrb[242].mxu1 }
 0xdf6   :  { %v8304_v21 = vadd.f32 %v8303_v9, %v16169_v42  ;;  %v12605_v62 = vpop.f32.mrb[243].mxu1 }
 0xdf8   :  { %v8315_v27 = vsel %vm7601_vm13, %v8304_v21, -inf }
 0xdf9   :  { %8316 = vmax.xlane.f32.xlu0 %v8315_v27  ;;  %v8308_v36 = vpop.f32.mrb[244].mxu1 }
 0xdfa   :  { %v8309_v56 = vadd.f32 %v8308_v36, %v16172_v18  ;;  %v12608_v55 = vpop.f32.mrb[245].mxu1 }
 0xdfc   :  { %v8318_v33 = vsel %vm7608_vm2, %v8309_v56, -inf }
 0xdfd   :  { %8319 = vmax.xlane.f32.xlu0 %v8318_v33 }
 0xe82   :  { %v8314_v26 = vpop.xlane.xlu1 %8313 }
 0xe83   :  { %v8321_v39 = vsub.f32 %v8299_v50, %v8314_v26 }
 0xe85   :  { %v8324_v2 = vmul.f32 1.442695, %v8321_v39 }
 0xe86   :  { %v8317_v11 = vpop.xlane.xlu0 %8316 }
 0xe87   :  { %13425 = vpow2.f32 %v8324_v2  ;;  %v8322_v32 = vsub.f32 %v8304_v21, %v8317_v11 }
 0xe89   :  { %v8326_v61 = vmul.f32 1.442695, %v8322_v32 }
 0xe8a   :  { %v8320_v4 = vpop.xlane.xlu0 %8319 }
 0xe8b   :  { %13427 = vpow2.f32 %v8326_v61  ;;  %v8323_v28 = vsub.f32 %v8309_v56, %v8320_v4 }
 0xe8d   :  { %v8328_v29 = vmul.f32 1.442695, %v8323_v28 }
 0xe8f   :  { %13429 = vpow2.f32 %v8328_v29 }
 0xe91   :  { %v13426_v37 = vpop.eup %13425 }
 0xe92   :  { %v8330_v20 = vsel %vm7601_vm13, %v13426_v37, 0.0 }
 0xe93   :  { %8331 = vadd.xlane.f32.xlu1 %v8330_v20 }
 0xe95   :  { %v13428_v22 = vpop.eup %13427 }
 0xe96   :  { %v8333_v51 = vsel %vm7601_vm13, %v13428_v22, 0.0 }
 0xe97   :  { %8334 = vadd.xlane.f32.xlu0 %v8333_v51 }
 0xe99   :  { %v13430_v63 = vpop.eup %13429 }
 0xe9a   :  { %v8336_v43 = vsel %vm7608_vm2, %v13430_v63, 0.0 }
 0xe9b   :  { %8337 = vadd.xlane.f32.xlu1 %v8336_v43 }
 0xeac   :  { %8349 = vrot.lane.b32.xlu1 %v16123_v48, %s13540_s27 }
 0xead   :  { %12974 = vrot.lane.b32.xlu0 %v16117_v41, %s13540_s27 }
 0xeb0   :  { %12979 = vrot.lane.b32.xlu1 %v12978_v49, %s13518_s18 }
 0xeb1   :  { %8451 = vrot.lane.b32.xlu0 %v16281_v35, %s13518_s18 }
 0xeb4   :  { %12984 = vrot.lane.b32.xlu1 %v12983_v34, %s13539_s23 }
 0xeb5   :  { %8463 = vrot.lane.b32.xlu0 %v8204_v19, %s13539_s23 }
 0xf20   :  { %v8332_v25 = vpop.xlane.xlu1 %8331 }
 0xf21   :  { %13431 = vrcp.f32 %v8332_v25 }
 0xf24   :  { %v8335_v59 = vpop.xlane.xlu0 %8334 }
 0xf25   :  { %13433 = vrcp.f32 %v8335_v59 }
 0xf28   :  { %v8338_v48 = vpop.xlane.xlu1 %8337  ;;  %v12975_v38 = vpop.permute.xlu0 %12974 }
 0xf29   :  { %v12977_v15 = vunpack.i.h.bf16 %v12975_v38  ;;  %v12976_v41 = vunpack.i.l.bf16 %v12975_v38  ;;  %13435 = vrcp.f32 %v8338_v48 }
 0xf2b   :  { %v12850_v17 = vpack.c.bf16 %v12977_v15, %v12976_v41  ;;  %v13432_v23 = vpop.eup %13431 }
 0xf2c   :  { %v8342_v53 = vmul.f32 %v13432_v23, %v13426_v37  ;;  %v8350_v46 = vpop.permute.xlu1 %8349  ;;  %v8452_v1 = vpop.permute.xlu0 %8451 }
 0xf2d   :  { %12851 = vmatpush3.bf16.msra.mxu1 %v12850_v17  ;;  %v8482_v27 = vsel %vm7505_vm10, %v16224_v44, %v8452_v1 }
 0xf2e   :  { %12613 = vmatprep.subr.mxu1 %v13525_v31 }
 0xf2f   :  { %v13434_v49 = vpop.eup %13433 }
 0xf30   :  { %v8343_v35 = vmul.f32 %v13434_v49, %v13428_v22  ;;  %v12980_v0 = vpop.permute.xlu1 %12979  ;;  %v8464_v9 = vpop.permute.xlu0 %8463 }
 0xf31   :  { %12614 = vmatpush3.msk.msra.mxu1 %vm7653_vm3, %v8350_v46  ;;  %v12982_v12 = vunpack.i.h.bf16 %v12980_v0  ;;  %v12981_v7 = vunpack.i.l.bf16 %v12980_v0  ;;  %v8485_v39 = vsel %vm5968_vm1, %v8482_v27, %v8464_v9  ;;  %v11340_v27 = vld [vmem:[%s10681_s28] ss:$0 sm:$0xff]  ;;  %s10689_s28 = sld [smem:[%s16791_s0 + %s13549_s12]]   ;;  %s13563_s12 = smov 31  }
 0xf32   :  { %12616 = vmatmul.mubr.msk.f32.vlgmr.msra.gmra.mrb[246].mxu1 %vm7601_vm13, %v8342_v53  ;;  %12624 = vmatprep.subr.bf16.mxu1 %v13341_v5 }
 0xf33   :  { %12618 = vmatprep.mubr.msk.f32.mxu1 %vm13524_vm9, %v13525_v31  ;;  %v13436_v3 = vpop.eup %13435  ;;  %12625 = vmatpush3.bf16.msra.mxu1 %v13341_v5  ;;  %v8481_v56 = vsel %vm7505_vm10, %v16222_v14, %v12982_v12  ;;  %v8480_v55 = vsel %vm7505_vm10, %v16220_v8, %v12981_v7  ;;  %v11335_v8 = vld [vmem:[%s10680_s7] ss:$0 sm:$0xff] }
 0xf34   :  { %v8344_v60 = vmul.f32 %v13436_v3, %v13430_v63  ;;  %12626 = vmatprep.subr.bf16.mxu1 %v13342_v52  ;;  %v12985_v50 = vpop.permute.xlu1 %12984 }
 0xf35   :  { %v12987_v21 = vunpack.i.h.bf16 %v12985_v50  ;;  %v12986_v62 = vunpack.i.l.bf16 %v12985_v50 }
 0xf36   :  { %12619 = vmatmul.mubr.msk.f32.gmra.mrb[248].mxu1 %vm7601_vm13, %v8343_v35 }
 0xf37   :  { %12621 = vmatprep.mubr.msk.f32.mxu1 %vm13524_vm9, %v13525_v31  ;;  %12627 = vmatpush3.bf16.msra.mxu1 %v13342_v52  ;;  %v8483_v2 = vsel %vm5968_vm1, %v8480_v55, %v12986_v62  ;;  %v8484_v11 = vsel %vm5968_vm1, %v8481_v56, %v12987_v21 }
 0xf3a   :  { %12622 = vmatmul.mubr.msk.f32.gmra.mrb[250].mxu1 %vm7601_vm13, %v8344_v60 }
0x1005   :  { %v8430_v24 = vpop.f32.mrb[246].mxu1 }
0x1006   :  { %v12617_v10 = vpop.f32.mrb[247].mxu1 }
0x1009   :  { %v8435_v40 = vpop.f32.mrb[248].mxu1 }
0x100a   :  { %v12988_v30 = vpack.i.bf16 %v8435_v40, %v8430_v24  ;;  %v12620_v34 = vpop.f32.mrb[249].mxu1  ;;  %v13343_v40 = vld [vmem:[%s10683_s11] sm:$0xff]  }
0x100b   :  { %12632 = vmatprep.subr.bf16.mxu1 %v13343_v40  ;;  %v13345_v34 = vld [vmem:[%s16342_s26] sm:$0xff]  }
0x100c   :  { %12989 = vrot.lane.b32.xlu1 %v12988_v30, %s13542_s2  ;;  %v13344_v30 = vld [vmem:[%s10683_s11 + $0x8] sm:$0xff]  }
0x100d   :  { %v8440_v45 = vpop.f32.mrb[250].mxu1 }
0x100e   :  { %8475 = vrot.lane.b32.xlu0 %v8440_v45, %s13542_s2  ;;  %v12623_v19 = vpop.f32.mrb[251].mxu1 }
0x107e   :  { %v12990_v36 = vpop.permute.xlu1 %12989 }
0x107f   :  { %v12992_v33 = vunpack.i.h.bf16 %v12990_v36  ;;  %v12991_v26 = vunpack.i.l.bf16 %v12990_v36 }
0x1080   :  { %v8476_v32 = vpop.permute.xlu0 %8475 }
0x1081   :  { %v8488_v61 = vsel %vm8486_vm4, %v8484_v11, %v12992_v33  ;;  %v8487_v44 = vsel %vm8486_vm4, %v8483_v2, %v12991_v26  ;;  %v8489_v4 = vsel %vm8486_vm4, %v8485_v39, %v8476_v32  ;;  %v11341_v26 = vld [vmem:[%s10682_s3] ss:$0 sm:$0xff]  ;;  %s10687_s3 = sld [smem:[%s16791_s0 + %s13550_s29]]   ;;  %s13564_s29 = smov 33  }
0x1082   :  { %v8494_v28 = vpack.c.bf16 %v8488_v61, %v8487_v44  ;;  %v8495_v14 = vpack.c.bf16 %v8489_v4, %v8489_v4 }
0x1084   :  { %12628 = vmatprep.mubr.msk.bf16.mxu1 %vm2190_vm0, %v8494_v28 }
0x1085   :  { %12629 = vmatmul.mubr.msk.bf16.vlgmr.msra.gmra.mrb[252].mxu1 %vm2190_vm0, %v8495_v14 }
0x1086   :  { %12633 = vmatpush3.bf16.msra.mxu1 %v13343_v40 }
0x1087   :  { %12634 = vmatprep.subr.bf16.mxu1 %v13344_v30 }
0x108a   :  { %12635 = vmatpush3.bf16.msra.mxu1 %v13344_v30 }
0x108b   :  { %12640 = vmatprep.subr.bf16.mxu1 %v13345_v34 }
0x1158   :  { %v12630_v29 = vpop.f32.mrb[252].mxu1 }
0x1159   :  { %v8555_v37 = vpop.f32.mrb[253].mxu1  ;;  %v8564_v63 = vadd.f32 %v12630_v29, %v11335_v8  ;;  %v13347_v29 = vld [vmem:[%s16342_s26 + $0x10] sm:$0xff]  }
0x115a   :  { %v8556_v20 = vadd.f32 %v11335_v8, %v8555_v37  ;;  %v12631_v22 = vpop.f32.mrb[254].mxu1  ;;  %v13348_v37 = vld [vmem:[%s16342_s26 + $0x18] sm:$0xff]  }
0x115b   :  { %v8558_v51 = vpop.f32.mrb[255].mxu1  ;;  %v8571_v15 = vadd.f32 %v8564_v63, %v16101_v13  ;;  %v13350_v22 = vld [vmem:[%s16342_s26 + $0x28] sm:$0xff]   ;;  %v13352_v63 = vld [vmem:[%s16342_s26 + $0x38] sm:$0xff]  }
0x115c   :  { %v8559_v43 = vadd.f32 %v11335_v8, %v8558_v51  ;;  %v8569_v25 = vadd.f32 %v8556_v20, %v16103_v6  ;;  %v13346_v8 = vld [vmem:[%s16342_s26 + $0x8] sm:$0xff]   ;;  %v13349_v20 = vld [vmem:[%s16342_s26 + $0x20] sm:$0xff]   ;;  %v13351_v51 = vld [vmem:[%s16342_s26 + $0x30] sm:$0xff]   ;;  %s13548_s26 = smov 17  }
0x115d   :  { %v8581_v41 = vsel %vm8580_vm5, %v8571_v15, 0.0  ;;  %s10686_s11 = sld [smem:[%s16791_s0 + %s13548_s26]]   ;;  %s13552_s26 = smov 21  }
0x115e   :  { %v8574_v59 = vsel %vm2190_vm0, %v8569_v25, 0.0  ;;  %v8570_v48 = vadd.f32 %v8559_v43, %v16105_v16  ;;  %v11342_v43 = vld [vmem:[%s10684_s8] ss:$0 sm:$0xff]  ;;  %s10688_s8 = sld [smem:[%s16791_s0 + %s13551_s5]]   ;;  %s13565_s5 = smov 35  }
0x115f   :  { %8575 = vadd.xlane.f32.xlu1 %v8574_v59  ;;  %s10704_s7 = sld [smem:[%s16791_s0 + %s13565_s5]]  }
0x1160   :  { %v8577_v38 = vsel %vm2190_vm0, %v8570_v48, 0.0 }
0x1161   :  { %8578 = vadd.xlane.f32.xlu0 %v8577_v38 }
0x1165   :  { %8582 = vadd.xlane.f32.xlu0 %v8581_v41 }
0x11ec   :  { %v8576_v17 = vpop.xlane.xlu1 %8575 }
0x11ed   :  { %v8585_v23 = vmul.f32 0.03125, %v8576_v17 }
0x11ee   :  { %v8579_v53 = vpop.xlane.xlu0 %8578 }
0x11ef   :  { %v8588_v46 = vsub.f32 %v8569_v25, %v8585_v23  ;;  %v8586_v49 = vmul.f32 0.03125, %v8579_v53 }
0x11f1   :  { %v8589_v6 = vsub.f32 %v8570_v48, %v8586_v49  ;;  %v8591_v35 = vmul.f32 %v8588_v46, %v8588_v46 }
0x11f2   :  { %v8583_v3 = vpop.xlane.xlu0 %8582 }
0x11f3   :  { %v8587_v60 = vmul.f32 0.03125, %v8583_v3  ;;  %v8594_v16 = vsel %vm2190_vm0, %v8591_v35, 0.0  ;;  %v8592_v5 = vmul.f32 %v8589_v6, %v8589_v6  ;;  %v11347_v35 = vld [vmem:[%s10686_s11] ss:$0 sm:$0xff]  ;;  %s10690_s11 = sld [smem:[%s16791_s0 + %s13552_s26]]  }
0x11f4   :  { %8595 = vadd.xlane.f32.xlu1 %v8594_v16 }
0x11f5   :  { %v8590_v13 = vsub.f32 %v8571_v15, %v8587_v60  ;;  %v8597_v52 = vsel %vm2190_vm0, %v8592_v5, 0.0 }
0x11f6   :  { %8598 = vadd.xlane.f32.xlu0 %v8597_v52 }
0x11f7   :  { %v8593_v24 = vmul.f32 %v8590_v13, %v8590_v13 }
0x11f9   :  { %v8600_v10 = vsel %vm8580_vm5, %v8593_v24, 0.0 }
0x11fa   :  { %8601 = vadd.xlane.f32.xlu1 %v8600_v10 }
0x1281   :  { %v8596_v45 = vpop.xlane.xlu1 %8595 }
0x1282   :  { %v8603_v19 = vmul.f32 0.03125, %v8596_v45 }
0x1283   :  { %v8599_v0 = vpop.xlane.xlu0 %8598 }
0x1284   :  { %v8606_v1 = vadd.f32 1e-05, %v8603_v19  ;;  %v8604_v50 = vmul.f32 0.03125, %v8599_v0 }
0x1286   :  { %13437 = vrsqrt.f32 %v8606_v1  ;;  %v8607_v12 = vadd.f32 1e-05, %v8604_v50 }
0x1287   :  { %v8602_v7 = vpop.xlane.xlu1 %8601 }
0x1288   :  { %13439 = vrsqrt.f32 %v8607_v12  ;;  %v8605_v9 = vmul.f32 0.03125, %v8602_v7 }
0x128a   :  { %v8608_v21 = vadd.f32 1e-05, %v8605_v9 }
0x128c   :  { %13441 = vrsqrt.f32 %v8608_v21 }
0x1290   :  { %v13438_v62 = vpop.eup %13437 }
0x1291   :  { %v8612_v36 = vmul.f32 %v13438_v62, %v8588_v46 }
0x1292   :  { %v13440_v56 = vpop.eup %13439 }
0x1293   :  { %v8613_v55 = vmul.f32 %v13440_v56, %v8589_v6  ;;  %v8621_v33 = vmul.f32 %v11340_v27, %v8612_v36 }
0x1295   :  { %v8622_v39 = vmul.f32 %v11340_v27, %v8613_v55  ;;  %v8630_v32 = vadd.f32 %v11341_v26, %v8621_v33 }
0x1296   :  { %v13442_v2 = vpop.eup %13441 }
0x1297   :  { %v8614_v11 = vmul.f32 %v13442_v2, %v8590_v13  ;;  %v8631_v61 = vadd.f32 %v11341_v26, %v8622_v39  ;;  %v13353_v2 = vld [vmem:[%s10689_s28] sm:$0xff]  }
0x1299   :  { %v8623_v44 = vmul.f32 %v11340_v27, %v8614_v11  ;;  %v8637_v4 = vpack.c.bf16 %v8631_v61, %v8630_v32  ;;  %v13354_v11 = vld [vmem:[%s10689_s28 + $0x8] sm:$0xff]   ;;  %s10700_s28 = sld [smem:[%s16791_s0 + %s13563_s12]]  }
0x129b   :  { %v8632_v28 = vadd.f32 %v11341_v26, %v8623_v44  ;;  %12636 = vmatprep.mubr.msk.bf16.mxu1 %vm2190_vm0, %v8637_v4 }
0x129d   :  { %v8638_v14 = vpack.c.bf16 %v8632_v28, %v8632_v28 }
0x129f   :  { %12637 = vmatmul.mubr.msk.bf16.vlgmr.msra.gmra.mrb[0].mxu1 %vm2190_vm0, %v8638_v14 }
0x12a0   :  { %12641 = vmatpush3.bf16.msra.mxu1 %v13345_v34 }
0x12a1   :  { %12642 = vmatprep.subr.bf16.mxu1 %v13346_v8 }
0x12a4   :  { %12643 = vmatpush3.bf16.msra.mxu1 %v13346_v8 }
0x12a5   :  { %12644 = vmatprep.subr.bf16.mxu1 %v13347_v29 }
0x12a8   :  { %12645 = vmatpush3.bf16.msra.mxu1 %v13347_v29 }
0x12a9   :  { %12646 = vmatprep.subr.bf16.mxu1 %v13348_v37 }
0x12ac   :  { %12647 = vmatpush3.bf16.msra.mxu1 %v13348_v37 }
0x12ad   :  { %12648 = vmatprep.subr.bf16.mxu1 %v13349_v20 }
0x12b0   :  { %12649 = vmatpush3.bf16.msra.mxu1 %v13349_v20 }
0x12b1   :  { %12650 = vmatprep.subr.bf16.mxu1 %v13350_v22 }
0x12b4   :  { %12651 = vmatpush3.bf16.msra.mxu1 %v13350_v22  ;;  %v11356_v22 = vld [vmem:[%s10687_s3] ss:$0 sm:$0xff]  ;;  %s10702_s3 = sld [smem:[%s16791_s0 + %s13564_s29]]  }
0x12b5   :  { %12652 = vmatprep.subr.bf16.mxu1 %v13351_v51 }
0x12b8   :  { %12653 = vmatpush3.bf16.msra.mxu1 %v13351_v51 }
0x12b9   :  { %12654 = vmatprep.subr.bf16.mxu1 %v13352_v63 }
0x12bc   :  { %12655 = vmatpush3.bf16.msra.mxu1 %v13352_v63 }
0x12bd   :  { %12660 = vmatprep.subr.bf16.mxu1 %v13353_v2 }
0x1372   :  { %v12638_v25 = vpop.f32.mrb[0].mxu1 }
0x1373   :  { %v8707_v59 = vadd.f32 %v12638_v25, %v11342_v43  ;;  %v8698_v48 = vpop.f32.mrb[1].mxu1 }
0x1374   :  { %v8699_v38 = vadd.f32 %v11342_v43, %v8698_v48  ;;  %v12639_v15 = vpop.f32.mrb[2].mxu1  ;;  %v11357_v48 = vld [vmem:[%s10688_s8] ss:$0 sm:$0xff]  ;;  %s13566_s8 = smov 36  }
0x1375   :  { %v8701_v41 = vpop.f32.mrb[3].mxu1  ;;  %v8714_v23 = vmax.f32 %v8707_v59, 0.0  ;;  %s10705_s10 = sld [smem:[%s16791_s0 + %s13566_s8]]  }
0x1376   :  { %v8702_v17 = vadd.f32 %v11342_v43, %v8701_v41  ;;  %v8712_v53 = vmax.f32 %v8699_v38, 0.0 }
0x1377   :  { %v8732_v6 = vpack.c.bf16 %v8714_v23, %v8714_v23 }
0x1378   :  { %v8713_v46 = vmax.f32 %v8702_v17, 0.0 }
0x137a   :  { %v8731_v49 = vpack.c.bf16 %v8713_v46, %v8712_v53 }
0x137c   :  { %12656 = vmatprep.mubr.bf16.mxu1 %v8731_v49 }
0x137d   :  { %12657 = vmatmul.mubr.bf16.vlgmr.msra.gmra.mrb[4].mxu1 %v8732_v6  ;;  %v11358_v6 = vld [vmem:[%s10690_s11] ss:$0 sm:$0xff] }
0x137e   :  { %12661 = vmatpush3.bf16.msra.mxu1 %v13353_v2 }
0x137f   :  { %12662 = vmatprep.subr.bf16.mxu1 %v13354_v11 }
0x1382   :  { %12663 = vmatpush3.bf16.msra.mxu1 %v13354_v11 }
0x1383   :  { %12852 = vmatprep.subr.bf16.mxu1 %v13522_v54 }
0x1450   :  { %v12658_v3 = vpop.f32.mrb[4].mxu1 }
0x1451   :  { %v8822_v60 = vpop.f32.mrb[5].mxu1  ;;  %v8831_v16 = vadd.f32 %v12658_v3, %v11347_v35 }
0x1452   :  { %v8823_v5 = vadd.f32 %v11347_v35, %v8822_v60  ;;  %v12659_v13 = vpop.f32.mrb[6].mxu1 }
0x1453   :  { %v8825_v52 = vpop.f32.mrb[7].mxu1  ;;  %v8838_v34 = vadd.f32 %v8831_v16, %v8632_v28 }
0x1454   :  { %v8826_v24 = vadd.f32 %v11347_v35, %v8825_v52  ;;  %v8836_v10 = vadd.f32 %v8823_v5, %v8630_v32 }
0x1455   :  { %v8847_v19 = vsel %vm8580_vm5, %v8838_v34, 0.0 }
0x1456   :  { %v8841_v40 = vsel %vm2190_vm0, %v8836_v10, 0.0  ;;  %v8837_v30 = vadd.f32 %v8826_v24, %v8631_v61 }
0x1457   :  { %8842 = vadd.xlane.f32.xlu0 %v8841_v40 }
0x1458   :  { %v8844_v45 = vsel %vm2190_vm0, %v8837_v30, 0.0 }
0x1459   :  { %8845 = vadd.xlane.f32.xlu1 %v8844_v45 }
0x145b   :  { %8848 = vadd.xlane.f32.xlu0 %v8847_v19 }
0x14e4   :  { %v8843_v0 = vpop.xlane.xlu0 %8842 }
0x14e5   :  { %v8850_v1 = vmul.f32 0.03125, %v8843_v0 }
0x14e6   :  { %v8846_v50 = vpop.xlane.xlu1 %8845 }
0x14e7   :  { %v8853_v12 = vsub.f32 %v8836_v10, %v8850_v1  ;;  %v8851_v7 = vmul.f32 0.03125, %v8846_v50 }
0x14e8   :  { %v8849_v9 = vpop.xlane.xlu0 %8848 }
0x14e9   :  { %v8854_v21 = vsub.f32 %v8837_v30, %v8851_v7  ;;  %v8852_v62 = vmul.f32 0.03125, %v8849_v9  ;;  %v8856_v27 = vmul.f32 %v8853_v12, %v8853_v12 }
0x14eb   :  { %v8855_v36 = vsub.f32 %v8838_v34, %v8852_v62  ;;  %v8859_v56 = vsel %vm2190_vm0, %v8856_v27, 0.0  ;;  %v8857_v55 = vmul.f32 %v8854_v21, %v8854_v21 }
0x14ec   :  { %8860 = vadd.xlane.f32.xlu1 %v8859_v56 }
0x14ed   :  { %v8862_v33 = vsel %vm2190_vm0, %v8857_v55, 0.0  ;;  %v8858_v26 = vmul.f32 %v8855_v36, %v8855_v36 }
0x14ee   :  { %8863 = vadd.xlane.f32.xlu0 %v8862_v33 }
0x14ef   :  { %v8865_v39 = vsel %vm8580_vm5, %v8858_v26, 0.0 }
0x14f0   :  { %8866 = vadd.xlane.f32.xlu1 %v8865_v39 }
0x1579   :  { %v8861_v32 = vpop.xlane.xlu1 %8860 }
0x157a   :  { %v8868_v61 = vmul.f32 0.03125, %v8861_v32 }
0x157b   :  { %v8864_v44 = vpop.xlane.xlu0 %8863 }
0x157c   :  { %v8871_v4 = vadd.f32 1e-05, %v8868_v61  ;;  %v8869_v28 = vmul.f32 0.03125, %v8864_v44 }
0x157d   :  { %v8867_v14 = vpop.xlane.xlu1 %8866 }
0x157e   :  { %13443 = vrsqrt.f32 %v8871_v4  ;;  %v8872_v8 = vadd.f32 1e-05, %v8869_v28  ;;  %v8870_v29 = vmul.f32 0.03125, %v8867_v14 }
0x1580   :  { %13445 = vrsqrt.f32 %v8872_v8  ;;  %v8873_v37 = vadd.f32 1e-05, %v8870_v29 }
0x1582   :  { %13447 = vrsqrt.f32 %v8873_v37 }
0x1588   :  { %v13444_v20 = vpop.eup %13443 }
0x1589   :  { %v8877_v51 = vmul.f32 %v13444_v20, %v8853_v12 }
0x158a   :  { %v13446_v63 = vpop.eup %13445 }
0x158b   :  { %v8878_v43 = vmul.f32 %v13446_v63, %v8854_v21  ;;  %v8886_v25 = vmul.f32 %v11356_v22, %v8877_v51 }
0x158c   :  { %v13448_v59 = vpop.eup %13447 }
0x158d   :  { %v8879_v38 = vmul.f32 %v13448_v59, %v8855_v36  ;;  %v8887_v15 = vmul.f32 %v11356_v22, %v8878_v43  ;;  %v16440_v17 = vadd.f32 %v11357_v48, %v8886_v25 }
0x158f   :  { %v8888_v41 = vmul.f32 %v11356_v22, %v8879_v38  ;;  %v16442_v23 = vadd.f32 %v11357_v48, %v8887_v15 }
0x1591   :  { %v16444_v53 = vadd.f32 %v11357_v48, %v8888_v41  ;;  %v8902_v46 = vpack.c.bf16 %v16442_v23, %v16440_v17 }
0x1593   :  { %v8903_v49 = vpack.c.bf16 %v16444_v53, %v16444_v53  ;;  %12664 = vmatprep.mubr.msk.bf16.mxu1 %vm2190_vm0, %v8902_v46 }
0x1595   :  { %12665 = vmatmul.mubr.msk.bf16.vlgmr.msra.gmra.mrb[8].mxu1 %vm2190_vm0, %v8903_v49 }
0x1596   :  { %12674 = vmatprep.mubr.msk.f32.mxu1 %vm13524_vm9, %v13525_v31 }
0x1668   :  { %v12666_v35 = vpop.f32.mrb[8].mxu1 }
0x1669   :  { %v16457_v3 = vadd.f32 %v12666_v35, %v11358_v6  ;;  %v8963_v60 = vpop.f32.mrb[9].mxu1 }
0x166a   :  { %v12667_v16 = vpop.f32.mrb[10].mxu1  ;;  %v8964_v13 = vadd.f32 %v11358_v6, %v8963_v60 }
0x166b   :  { %8987 = vrot.lane.b32.xlu1 %v16457_v3, %s13523_s4  ;;  %v8966_v5 = vpop.f32.mrb[11].mxu1  ;;  %v16483_v1 = vmul.f32 0.35355338, %v16457_v3 }
0x166c   :  { %v8967_v52 = vadd.f32 %v11358_v6, %v8966_v5  ;;  %v16469_v19 = vmul.f32 0.35355338, %v8964_v13 }
0x166e   :  { %v16461_v24 = vpack.i.bf16 %v8967_v52, %v8964_v13  ;;  %v16476_v0 = vmul.f32 0.35355338, %v8967_v52 }
0x1670   :  { %12994 = vrot.lane.b32.xlu0 %v16461_v24, %s13523_s4  ;;  %s13560_s4 = smov 32  }
0x16dd   :  { %v8988_v45 = vpop.permute.xlu1 %8987 }
0x16e2   :  { %v12995_v10 = vpop.permute.xlu0 %12994 }
0x16e3   :  { %v12997_v40 = vunpack.i.h.bf16 %v12995_v10  ;;  %v12996_v30 = vunpack.i.l.bf16 %v12995_v10 }
0x16e5   :  { %v12853_v34 = vpack.c.bf16 %v12997_v40, %v12996_v30 }
0x16e7   :  { %12855 = vmatpush3.bf16.xpose.msk.msra.mxu1 %vm16134_vm11, %v12853_v34 }
0x16e8   :  { %12672 = vmatprep.subr.mxu1 %v13525_v31 }
0x16ef   :  { %12673 = vmatpush3.xpose.msk.msra.mxu1 %vm7505_vm10, %v8988_v45 }
0x16f0   :  { %12856 = vmatprep.subr.bf16.mxu1 %v13522_v54 }
0x16f2   :  { %12675 = vmatmul.mubr.msk.f32.vlgmr.msra.gmra.mrb[12].mxu1 %vm7505_vm10, %v16469_v19 }
0x16f3   :  { %12677 = vmatprep.mubr.msk.f32.mxu1 %vm13524_vm9, %v13525_v31 }
0x16f6   :  { %12678 = vmatmul.mubr.msk.f32.gmra.mrb[14].mxu1 %vm7505_vm10, %v16476_v0 }
0x16f7   :  { %12680 = vmatprep.mubr.msk.f32.mxu1 %vm13524_vm9, %v13525_v31 }
0x16fa   :  { %12681 = vmatmul.mubr.msk.f32.gmra.mrb[16].mxu1 %vm7505_vm10, %v16483_v1 }
0x16fb   :  { %12689 = vmatprep.mubr.msk.f32.mxu1 %vm13524_vm9, %v13525_v31 }
0x17c5   :  { %v9070_v50 = vpop.f32.mrb[12].mxu1 }
0x17c6   :  { %v9071_v12 = vadd.f32 %v9070_v50, %v16165_v57  ;;  %v12676_v7 = vpop.f32.mrb[13].mxu1 }
0x17c8   :  { %v9084_v9 = vsel %vm7601_vm13, %v9071_v12, -inf }
0x17c9   :  { %9085 = vmax.xlane.f32.xlu1 %v9084_v9  ;;  %v9075_v21 = vpop.f32.mrb[14].mxu1 }
0x17ca   :  { %v9076_v62 = vadd.f32 %v9075_v21, %v16169_v42  ;;  %v12679_v27 = vpop.f32.mrb[15].mxu1 }
0x17cc   :  { %v9087_v36 = vsel %vm7601_vm13, %v9076_v62, -inf }
0x17cd   :  { %9088 = vmax.xlane.f32.xlu0 %v9087_v36  ;;  %v9080_v56 = vpop.f32.mrb[16].mxu1 }
0x17ce   :  { %v9081_v55 = vadd.f32 %v9080_v56, %v16172_v18  ;;  %v12682_v33 = vpop.f32.mrb[17].mxu1 }
0x17d0   :  { %v9090_v26 = vsel %vm7608_vm2, %v9081_v55, -inf }
0x17d1   :  { %9091 = vmax.xlane.f32.xlu0 %v9090_v26 }
0x1856   :  { %v9086_v39 = vpop.xlane.xlu1 %9085 }
0x1857   :  { %v9093_v2 = vsub.f32 %v9071_v12, %v9086_v39 }
0x1859   :  { %v9096_v11 = vmul.f32 1.442695, %v9093_v2 }
0x185a   :  { %v9089_v32 = vpop.xlane.xlu0 %9088 }
0x185b   :  { %13449 = vpow2.f32 %v9096_v11  ;;  %v9094_v61 = vsub.f32 %v9076_v62, %v9089_v32 }
0x185d   :  { %v9098_v44 = vmul.f32 1.442695, %v9094_v61 }
0x185e   :  { %v9092_v29 = vpop.xlane.xlu0 %9091 }
0x185f   :  { %13451 = vpow2.f32 %v9098_v44  ;;  %v9095_v37 = vsub.f32 %v9081_v55, %v9092_v29 }
0x1861   :  { %v9100_v20 = vmul.f32 1.442695, %v9095_v37 }
0x1863   :  { %13453 = vpow2.f32 %v9100_v20 }
0x1865   :  { %v13450_v4 = vpop.eup %13449 }
0x1866   :  { %v9102_v28 = vsel %vm7601_vm13, %v13450_v4, 0.0 }
0x1867   :  { %9103 = vadd.xlane.f32.xlu1 %v9102_v28 }
0x1869   :  { %v13452_v14 = vpop.eup %13451 }
0x186a   :  { %v9105_v8 = vsel %vm7601_vm13, %v13452_v14, 0.0 }
0x186b   :  { %9106 = vadd.xlane.f32.xlu0 %v9105_v8 }
0x186d   :  { %v13454_v22 = vpop.eup %13453 }
0x186e   :  { %v9108_v51 = vsel %vm7608_vm2, %v13454_v22, 0.0 }
0x1878   :  { %9121 = vrot.lane.b32.xlu1 %v16457_v3, %s13530_s13 }
0x187c   :  { %13004 = vrot.lane.b32.xlu1 %v16461_v24, %s13531_s14 }
0x1881   :  { %12999 = vrot.lane.b32.xlu0 %v16461_v24, %s13530_s13 }
0x1885   :  { %9226 = vrot.lane.b32.xlu0 %v16457_v3, %s13531_s14 }
0x1889   :  { %9218 = vrot.lane.b32.xlu0 %v16476_v0, %s13532_s15 }
0x18a0   :  { %9109 = vadd.xlane.f32.xlu1 %v9108_v51 }
0x18b1   :  { %9216 = vrot.lane.b32.xlu1 %v16469_v19, %s13532_s15 }
0x18b5   :  { %9220 = vrot.lane.b32.xlu1 %v16483_v1, %s13532_s15  ;;  %s13554_s15 = smov 23  }
0x18f4   :  { %v9104_v63 = vpop.xlane.xlu1 %9103 }
0x18f5   :  { %13455 = vrcp.f32 %v9104_v63 }
0x18f8   :  { %v9107_v43 = vpop.xlane.xlu0 %9106  ;;  %v9122_v59 = vpop.permute.xlu1 %9121 }
0x18f9   :  { %13457 = vrcp.f32 %v9107_v43 }
0x18fc   :  { %v13000_v25 = vpop.permute.xlu0 %12999  ;;  %v13005_v46 = vpop.permute.xlu1 %13004 }
0x18fd   :  { %v13002_v48 = vunpack.i.h.bf16 %v13000_v25  ;;  %v13001_v38 = vunpack.i.l.bf16 %v13000_v25  ;;  %v13007_v35 = vunpack.i.h.bf16 %v13005_v46  ;;  %v13006_v60 = vunpack.i.l.bf16 %v13005_v46 }
0x18ff   :  { %v12857_v15 = vpack.c.bf16 %v13002_v48, %v13001_v38  ;;  %v13456_v41 = vpop.eup %13455  ;;  %v12860_v5 = vpack.c.bf16 %v13007_v35, %v13006_v60 }
0x1900   :  { %v9114_v49 = vmul.f32 %v13456_v41, %v13450_v4  ;;  %v9227_v13 = vpop.permute.xlu0 %9226 }
0x1901   :  { %12858 = vmatpush3.bf16.msra.mxu1 %v12857_v15 }
0x1902   :  { %12687 = vmatprep.subr.mxu1 %v13525_v31 }
0x1903   :  { %v13458_v6 = vpop.eup %13457 }
0x1904   :  { %v9115_v16 = vmul.f32 %v13458_v6, %v13452_v14  ;;  %v9219_v34 = vpop.permute.xlu0 %9218 }
0x1905   :  { %12688 = vmatpush3.msk.msra.mxu1 %vm7653_vm3, %v9122_v59 }
0x1906   :  { %12690 = vmatmul.mubr.msk.f32.vlgmr.msra.gmra.mrb[18].mxu1 %vm7601_vm13, %v9114_v49  ;;  %12859 = vmatprep.subr.bf16.mxu1 %v13522_v54 }
0x1907   :  { %12692 = vmatprep.mubr.msk.f32.mxu1 %vm13524_vm9, %v13525_v31 }
0x190a   :  { %12693 = vmatmul.mubr.msk.f32.gmra.mrb[20].mxu1 %vm7601_vm13, %v9115_v16 }
0x190b   :  { %12695 = vmatprep.mubr.msk.f32.mxu1 %vm13524_vm9, %v13525_v31 }
0x190c   :  { %12862 = vmatpush3.bf16.xpose.msk.msra.mxu1 %vm16134_vm11, %v12860_v5 }
0x190d   :  { %12702 = vmatprep.subr.mxu1 %v13525_v31 }
0x1914   :  { %12703 = vmatpush3.xpose.msk.msra.mxu1 %vm7505_vm10, %v9227_v13 }
0x1915   :  { %12863 = vmatprep.subr.bf16.mxu1 %v13522_v54 }
0x192d   :  { %v9110_v52 = vpop.xlane.xlu1 %9109 }
0x192e   :  { %13459 = vrcp.f32 %v9110_v52 }
0x1931   :  { %v9217_v30 = vpop.permute.xlu1 %9216 }
0x1935   :  { %v9221_v45 = vpop.permute.xlu1 %9220 }
0x1938   :  { %v13460_v10 = vpop.eup %13459 }
0x1939   :  { %v9116_v40 = vmul.f32 %v13460_v10, %v13454_v22 }
0x193b   :  { %12696 = vmatmul.mubr.msk.f32.gmra.mrb[22].mxu1 %vm7601_vm13, %v9116_v40 }
0x193c   :  { %12704 = vmatprep.mubr.msk.f32.mxu1 %vm13524_vm9, %v13525_v31 }
0x193f   :  { %12705 = vmatmul.mubr.msk.f32.vlgmr.msra.gmra.mrb[24].mxu1 %vm7505_vm10, %v9217_v30 }
0x1940   :  { %12707 = vmatprep.mubr.msk.f32.mxu1 %vm13524_vm9, %v13525_v31 }
0x1943   :  { %12708 = vmatmul.mubr.msk.f32.gmra.mrb[26].mxu1 %vm7505_vm10, %v9219_v34 }
0x1944   :  { %12710 = vmatprep.mubr.msk.f32.mxu1 %vm13524_vm9, %v13525_v31 }
0x1947   :  { %12711 = vmatmul.mubr.msk.f32.gmra.mrb[28].mxu1 %vm7505_vm10, %v9221_v45 }
0x1948   :  { %12719 = vmatprep.mubr.msk.f32.mxu1 %vm13524_vm9, %v13525_v31 }
0x19d9   :  { %v16538_v50 = vpop.f32.mrb[18].mxu1 }
0x19da   :  { %v12691_v12 = vpop.f32.mrb[19].mxu1 }
0x19dd   :  { %v16540_v7 = vpop.f32.mrb[20].mxu1 }
0x19de   :  { %v12694_v9 = vpop.f32.mrb[21].mxu1 }
0x1a0e   :  { %v16542_v21 = vpop.f32.mrb[22].mxu1 }
0x1a0f   :  { %v12697_v62 = vpop.f32.mrb[23].mxu1 }
0x1a12   :  { %v9306_v27 = vpop.f32.mrb[24].mxu1 }
0x1a13   :  { %v9307_v36 = vadd.f32 %v9306_v27, %v16165_v57  ;;  %v12706_v56 = vpop.f32.mrb[25].mxu1 }
0x1a15   :  { %v9320_v55 = vsel %vm7601_vm13, %v9307_v36, -inf }
0x1a16   :  { %9321 = vmax.xlane.f32.xlu0 %v9320_v55  ;;  %v9311_v33 = vpop.f32.mrb[26].mxu1 }
0x1a17   :  { %v9312_v26 = vadd.f32 %v9311_v33, %v16169_v42  ;;  %v12709_v39 = vpop.f32.mrb[27].mxu1 }
0x1a19   :  { %v9323_v2 = vsel %vm7601_vm13, %v9312_v26, -inf }
0x1a1a   :  { %9324 = vmax.xlane.f32.xlu1 %v9323_v2  ;;  %v9316_v11 = vpop.f32.mrb[28].mxu1 }
0x1a1b   :  { %v9317_v32 = vadd.f32 %v9316_v11, %v16172_v18  ;;  %v12712_v61 = vpop.f32.mrb[29].mxu1 }
0x1a1d   :  { %v9326_v44 = vsel %vm7608_vm2, %v9317_v32, -inf }
0x1a1e   :  { %9327 = vmax.xlane.f32.xlu0 %v9326_v44 }
0x1a2b   :  { %13009 = vrot.lane.b32.xlu1 %v16461_v24, %s13533_s16 }
0x1a2f   :  { %13014 = vrot.lane.b32.xlu1 %v16461_v24, %s13534_s17 }
0x1aa3   :  { %v9322_v4 = vpop.xlane.xlu0 %9321 }
0x1aa4   :  { %v9329_v28 = vsub.f32 %v9307_v36, %v9322_v4 }
0x1aa6   :  { %v9332_v14 = vmul.f32 1.442695, %v9329_v28 }
0x1aa7   :  { %v9325_v8 = vpop.xlane.xlu1 %9324 }
0x1aa8   :  { %13461 = vpow2.f32 %v9332_v14  ;;  %v9330_v29 = vsub.f32 %v9312_v26, %v9325_v8 }
0x1aaa   :  { %v9334_v37 = vmul.f32 1.442695, %v9330_v29 }
0x1aab   :  { %v13010_v20 = vpop.permute.xlu1 %13009  ;;  %v9328_v38 = vpop.xlane.xlu0 %9327 }
0x1aac   :  { %13463 = vpow2.f32 %v9334_v37  ;;  %v13012_v22 = vunpack.i.h.bf16 %v13010_v20  ;;  %v13011_v51 = vunpack.i.l.bf16 %v13010_v20  ;;  %v9331_v15 = vsub.f32 %v9317_v32, %v9328_v38 }
0x1aae   :  { %v12864_v63 = vpack.c.bf16 %v13012_v22, %v13011_v51  ;;  %v9336_v41 = vmul.f32 1.442695, %v9331_v15 }
0x1aaf   :  { %v13015_v6 = vpop.permute.xlu1 %13014 }
0x1ab0   :  { %12865 = vmatpush3.bf16.msra.mxu1 %v12864_v63  ;;  %13465 = vpow2.f32 %v9336_v41  ;;  %v13017_v5 = vunpack.i.h.bf16 %v13015_v6  ;;  %v13016_v13 = vunpack.i.l.bf16 %v13015_v6 }
0x1ab1   :  { %12717 = vmatprep.subr.mxu1 %v13525_v31 }
0x1ab2   :  { %v13462_v43 = vpop.eup %13461  ;;  %v12867_v40 = vpack.c.bf16 %v13017_v5, %v13016_v13 }
0x1ab3   :  { %v9338_v25 = vsel %vm7601_vm13, %v13462_v43, 0.0 }
0x1ab4   :  { %9339 = vadd.xlane.f32.xlu0 %v9338_v25 }
0x1ab6   :  { %v13464_v59 = vpop.eup %13463 }
0x1ab7   :  { %v9341_v48 = vsel %vm7601_vm13, %v13464_v59, 0.0 }
0x1ab8   :  { %9342 = vadd.xlane.f32.xlu1 %v9341_v48 }
0x1aba   :  { %v13466_v46 = vpop.eup %13465 }
0x1abb   :  { %v9344_v49 = vsel %vm7608_vm2, %v13466_v46, 0.0 }
0x1ac9   :  { %9462 = vrot.lane.b32.xlu1 %v16457_v3, %s13534_s17 }
0x1aca   :  { %9357 = vrot.lane.b32.xlu0 %v16457_v3, %s13533_s16  ;;  %s13561_s16 = smov 34  }
0x1acd   :  { %9454 = vrot.lane.b32.xlu1 %v16476_v0, %s13535_s19 }
0x1ae9   :  { %9345 = vadd.xlane.f32.xlu0 %v9344_v49 }
0x1aff   :  { %9452 = vrot.lane.b32.xlu0 %v16469_v19, %s13535_s19 }
0x1b03   :  { %9456 = vrot.lane.b32.xlu0 %v16483_v1, %s13535_s19  ;;  %s10692_s19 = sld [smem:[%s16791_s0 + %s13554_s15]]  }
0x1b04   :  { %s10701_s15 = sld [smem:[%s16791_s0 + %s13560_s4]]  }
0x1b41   :  { %v9340_v35 = vpop.xlane.xlu0 %9339 }
0x1b42   :  { %13467 = vrcp.f32 %v9340_v35 }
0x1b45   :  { %v9343_v60 = vpop.xlane.xlu1 %9342  ;;  %v9358_v16 = vpop.permute.xlu0 %9357 }
0x1b46   :  { %13469 = vrcp.f32 %v9343_v60  ;;  %12718 = vmatpush3.msk.msra.mxu1 %vm7653_vm3, %v9358_v16 }
0x1b47   :  { %12866 = vmatprep.subr.bf16.mxu1 %v13522_v54 }
0x1b49   :  { %v9463_v45 = vpop.permute.xlu1 %9462 }
0x1b4c   :  { %v13468_v52 = vpop.eup %13467 }
0x1b4d   :  { %v9350_v10 = vmul.f32 %v13468_v52, %v13462_v43  ;;  %v9455_v36 = vpop.permute.xlu1 %9454 }
0x1b4f   :  { %12720 = vmatmul.mubr.msk.f32.vlgmr.msra.gmra.mrb[30].mxu1 %vm7601_vm13, %v9350_v10 }
0x1b50   :  { %v13470_v30 = vpop.eup %13469  ;;  %12869 = vmatpush3.bf16.xpose.msk.msra.mxu1 %vm16134_vm11, %v12867_v40  ;;  %12722 = vmatprep.mubr.msk.f32.mxu1 %vm13524_vm9, %v13525_v31 }
0x1b51   :  { %v9351_v34 = vmul.f32 %v13470_v30, %v13464_v59  ;;  %12732 = vmatprep.subr.mxu1 %v13525_v31 }
0x1b53   :  { %12723 = vmatmul.mubr.msk.f32.gmra.mrb[32].mxu1 %vm7601_vm13, %v9351_v34 }
0x1b54   :  { %12725 = vmatprep.mubr.msk.f32.mxu1 %vm13524_vm9, %v13525_v31 }
0x1b58   :  { %12733 = vmatpush3.xpose.msk.msra.mxu1 %vm7505_vm10, %v9463_v45 }
0x1b59   :  { %12870 = vmatprep.subr.bf16.mxu1 %v13522_v54 }
0x1b76   :  { %v9346_v12 = vpop.xlane.xlu0 %9345 }
0x1b77   :  { %13471 = vrcp.f32 %v9346_v12 }
0x1b7a   :  { %v9453_v27 = vpop.permute.xlu0 %9452 }
0x1b7e   :  { %v9457_v56 = vpop.permute.xlu0 %9456 }
0x1b81   :  { %v13472_v9 = vpop.eup %13471 }
0x1b82   :  { %v9352_v62 = vmul.f32 %v13472_v9, %v13466_v46 }
0x1b84   :  { %12726 = vmatmul.mubr.msk.f32.gmra.mrb[34].mxu1 %vm7601_vm13, %v9352_v62 }
0x1b85   :  { %12734 = vmatprep.mubr.msk.f32.mxu1 %vm13524_vm9, %v13525_v31 }
0x1b88   :  { %12735 = vmatmul.mubr.msk.f32.vlgmr.msra.gmra.mrb[36].mxu1 %vm7505_vm10, %v9453_v27 }
0x1b89   :  { %12737 = vmatprep.mubr.msk.f32.mxu1 %vm13524_vm9, %v13525_v31 }
0x1b8c   :  { %12738 = vmatmul.mubr.msk.f32.gmra.mrb[38].mxu1 %vm7505_vm10, %v9455_v36 }
0x1b8d   :  { %12740 = vmatprep.mubr.msk.f32.mxu1 %vm13524_vm9, %v13525_v31 }
0x1b90   :  { %12741 = vmatmul.mubr.msk.f32.gmra.mrb[40].mxu1 %vm7505_vm10, %v9457_v56 }
0x1b91   :  { %12749 = vmatprep.mubr.msk.f32.mxu1 %vm13524_vm9, %v13525_v31 }
0x1c22   :  { %v16593_v55 = vpop.f32.mrb[30].mxu1 }
0x1c23   :  { %v12721_v33 = vpop.f32.mrb[31].mxu1 }
0x1c26   :  { %v16595_v26 = vpop.f32.mrb[32].mxu1 }
0x1c27   :  { %v13033_v39 = vpack.i.bf16 %v16595_v26, %v16593_v55  ;;  %v12724_v2 = vpop.f32.mrb[33].mxu1 }
0x1c57   :  { %v16599_v11 = vpop.f32.mrb[34].mxu1 }
0x1c58   :  { %v12727_v32 = vpop.f32.mrb[35].mxu1 }
0x1c5b   :  { %v9542_v61 = vpop.f32.mrb[36].mxu1 }
0x1c5c   :  { %v9543_v44 = vadd.f32 %v9542_v61, %v16165_v57  ;;  %v12736_v4 = vpop.f32.mrb[37].mxu1 }
0x1c5e   :  { %v9556_v28 = vsel %vm7601_vm13, %v9543_v44, -inf }
0x1c5f   :  { %9557 = vmax.xlane.f32.xlu1 %v9556_v28  ;;  %v9547_v14 = vpop.f32.mrb[38].mxu1 }
0x1c60   :  { %v9548_v8 = vadd.f32 %v9547_v14, %v16169_v42  ;;  %v12739_v29 = vpop.f32.mrb[39].mxu1 }
0x1c62   :  { %v9559_v37 = vsel %vm7601_vm13, %v9548_v8, -inf }
0x1c63   :  { %9560 = vmax.xlane.f32.xlu0 %v9559_v37  ;;  %v9552_v20 = vpop.f32.mrb[40].mxu1 }
0x1c64   :  { %v9553_v22 = vadd.f32 %v9552_v20, %v16172_v18  ;;  %v12742_v51 = vpop.f32.mrb[41].mxu1 }
0x1c66   :  { %v9562_v63 = vsel %vm7608_vm2, %v9553_v22, -inf }
0x1c67   :  { %9563 = vmax.xlane.f32.xlu0 %v9562_v63 }
0x1cec   :  { %v9558_v43 = vpop.xlane.xlu1 %9557 }
0x1ced   :  { %v9565_v25 = vsub.f32 %v9543_v44, %v9558_v43 }
0x1cef   :  { %v9568_v59 = vmul.f32 1.442695, %v9565_v25 }
0x1cf0   :  { %v9561_v48 = vpop.xlane.xlu0 %9560 }
0x1cf1   :  { %13473 = vpow2.f32 %v9568_v59  ;;  %v9566_v38 = vsub.f32 %v9548_v8, %v9561_v48 }
0x1cf3   :  { %v9570_v15 = vmul.f32 1.442695, %v9566_v38 }
0x1cf4   :  { %v9564_v35 = vpop.xlane.xlu0 %9563 }
0x1cf5   :  { %13475 = vpow2.f32 %v9570_v15  ;;  %v9567_v60 = vsub.f32 %v9553_v22, %v9564_v35 }
0x1cf7   :  { %v9572_v16 = vmul.f32 1.442695, %v9567_v60 }
0x1cf9   :  { %13477 = vpow2.f32 %v9572_v16 }
0x1cfb   :  { %v13474_v41 = vpop.eup %13473 }
0x1cfc   :  { %v9574_v46 = vsel %vm7601_vm13, %v13474_v41, 0.0 }
0x1cfd   :  { %9575 = vadd.xlane.f32.xlu1 %v9574_v46 }
0x1cff   :  { %v13476_v49 = vpop.eup %13475 }
0x1d00   :  { %v9577_v6 = vsel %vm7601_vm13, %v13476_v49, 0.0 }
0x1d01   :  { %9578 = vadd.xlane.f32.xlu0 %v9577_v6 }
0x1d03   :  { %v13478_v5 = vpop.eup %13477 }
0x1d04   :  { %v9580_v13 = vsel %vm7608_vm2, %v13478_v5, 0.0 }
0x1d0e   :  { %9593 = vrot.lane.b32.xlu1 %v16457_v3, %s13536_s20 }
0x1d12   :  { %13024 = vrot.lane.b32.xlu1 %v16461_v24, %s13537_s21 }
0x1d17   :  { %13019 = vrot.lane.b32.xlu0 %v16461_v24, %s13536_s20  ;;  %s13555_s20 = smov 26  }
0x1d1b   :  { %9698 = vrot.lane.b32.xlu0 %v16457_v3, %s13537_s21  ;;  %s13562_s21 = smov 30  }
0x1d1f   :  { %9690 = vrot.lane.b32.xlu0 %v16476_v0, %s13538_s22 }
0x1d36   :  { %9581 = vadd.xlane.f32.xlu1 %v9580_v13 }
0x1d47   :  { %9688 = vrot.lane.b32.xlu1 %v16469_v19, %s13538_s22 }
0x1d4b   :  { %9692 = vrot.lane.b32.xlu1 %v16483_v1, %s13538_s22 }
0x1d8a   :  { %v9576_v52 = vpop.xlane.xlu1 %9575 }
0x1d8b   :  { %13479 = vrcp.f32 %v9576_v52 }
0x1d8e   :  { %v9579_v10 = vpop.xlane.xlu0 %9578  ;;  %v9594_v30 = vpop.permute.xlu1 %9593 }
0x1d8f   :  { %13481 = vrcp.f32 %v9579_v10 }
0x1d92   :  { %v13020_v40 = vpop.permute.xlu0 %13019  ;;  %v13025_v9 = vpop.permute.xlu1 %13024 }
0x1d93   :  { %v13022_v0 = vunpack.i.h.bf16 %v13020_v40  ;;  %v13021_v34 = vunpack.i.l.bf16 %v13020_v40  ;;  %v13027_v19 = vunpack.i.h.bf16 %v13025_v9  ;;  %v13026_v1 = vunpack.i.l.bf16 %v13025_v9 }
0x1d95   :  { %v12871_v45 = vpack.c.bf16 %v13022_v0, %v13021_v34  ;;  %v13480_v12 = vpop.eup %13479  ;;  %v12874_v56 = vpack.c.bf16 %v13027_v19, %v13026_v1 }
0x1d96   :  { %v9586_v62 = vmul.f32 %v13480_v12, %v13474_v41  ;;  %v9699_v33 = vpop.permute.xlu0 %9698 }
0x1d97   :  { %12872 = vmatpush3.bf16.msra.mxu1 %v12871_v45 }
0x1d98   :  { %12747 = vmatprep.subr.mxu1 %v13525_v31 }
0x1d99   :  { %v13482_v27 = vpop.eup %13481 }
0x1d9a   :  { %v9587_v36 = vmul.f32 %v13482_v27, %v13476_v49  ;;  %v9691_v47 = vpop.permute.xlu0 %9690 }
0x1d9b   :  { %12748 = vmatpush3.msk.msra.mxu1 %vm7653_vm3, %v9594_v30 }
0x1d9c   :  { %12750 = vmatmul.mubr.msk.f32.vlgmr.msra.gmra.mrb[42].mxu1 %vm7601_vm13, %v9586_v62  ;;  %12873 = vmatprep.subr.bf16.mxu1 %v13522_v54 }
0x1d9d   :  { %12752 = vmatprep.mubr.msk.f32.mxu1 %vm13524_vm9, %v13525_v31 }
0x1da0   :  { %12753 = vmatmul.mubr.msk.f32.gmra.mrb[44].mxu1 %vm7601_vm13, %v9587_v36 }
0x1da1   :  { %12755 = vmatprep.mubr.msk.f32.mxu1 %vm13524_vm9, %v13525_v31 }
0x1da2   :  { %12876 = vmatpush3.bf16.xpose.msk.msra.mxu1 %vm16134_vm11, %v12874_v56 }
0x1da3   :  { %12762 = vmatprep.subr.mxu1 %v13525_v31 }
0x1daa   :  { %12763 = vmatpush3.xpose.msk.msra.mxu1 %vm7505_vm10, %v9699_v33 }
0x1dab   :  { %12877 = vmatprep.subr.bf16.mxu1 %v13522_v54 }
0x1dc3   :  { %v9582_v2 = vpop.xlane.xlu1 %9581 }
0x1dc4   :  { %13483 = vrcp.f32 %v9582_v2 }
0x1dc7   :  { %v9689_v44 = vpop.permute.xlu1 %9688 }
0x1dcb   :  { %v9693_v54 = vpop.permute.xlu1 %9692 }
0x1dce   :  { %v13484_v32 = vpop.eup %13483 }
0x1dcf   :  { %v9588_v61 = vmul.f32 %v13484_v32, %v13478_v5 }
0x1dd1   :  { %12756 = vmatmul.mubr.msk.f32.gmra.mrb[46].mxu1 %vm7601_vm13, %v9588_v61 }
0x1dd2   :  { %12764 = vmatprep.mubr.msk.f32.mxu1 %vm13524_vm9, %v13525_v31 }
0x1dd5   :  { %12765 = vmatmul.mubr.msk.f32.vlgmr.msra.gmra.mrb[48].mxu1 %vm7505_vm10, %v9689_v44 }
0x1dd6   :  { %12767 = vmatprep.mubr.msk.f32.mxu1 %vm13524_vm9, %v13525_v31 }
0x1dd9   :  { %12768 = vmatmul.mubr.msk.f32.gmra.mrb[50].mxu1 %vm7505_vm10, %v9691_v47 }
0x1dda   :  { %12770 = vmatprep.mubr.msk.f32.mxu1 %vm13524_vm9, %v13525_v31 }
0x1ddd   :  { %12771 = vmatmul.mubr.msk.f32.gmra.mrb[52].mxu1 %vm7505_vm10, %v9693_v54 }
0x1dde   :  { %12779 = vmatprep.mubr.msk.f32.mxu1 %vm13524_vm9, %v13525_v31 }
0x1e6f   :  { %v9674_v4 = vpop.f32.mrb[42].mxu1 }
0x1e70   :  { %v12751_v28 = vpop.f32.mrb[43].mxu1 }
0x1e73   :  { %v9679_v14 = vpop.f32.mrb[44].mxu1 }
0x1e74   :  { %v13038_v8 = vpack.i.bf16 %v9679_v14, %v9674_v4  ;;  %v12754_v29 = vpop.f32.mrb[45].mxu1 }
0x1ea4   :  { %v9684_v37 = vpop.f32.mrb[46].mxu1 }
0x1ea5   :  { %v12757_v20 = vpop.f32.mrb[47].mxu1 }
0x1ea8   :  { %v9778_v22 = vpop.f32.mrb[48].mxu1 }
0x1ea9   :  { %v9779_v51 = vadd.f32 %v9778_v22, %v16165_v57  ;;  %v12766_v63 = vpop.f32.mrb[49].mxu1 }
0x1eab   :  { %v9792_v43 = vsel %vm7601_vm13, %v9779_v51, -inf }
0x1eac   :  { %9793 = vmax.xlane.f32.xlu0 %v9792_v43  ;;  %v9783_v25 = vpop.f32.mrb[50].mxu1 }
0x1ead   :  { %v9784_v59 = vadd.f32 %v9783_v25, %v16169_v42  ;;  %v12769_v48 = vpop.f32.mrb[51].mxu1 }
0x1eaf   :  { %v9795_v38 = vsel %vm7601_vm13, %v9784_v59, -inf }
0x1eb0   :  { %9796 = vmax.xlane.f32.xlu1 %v9795_v38  ;;  %v9788_v15 = vpop.f32.mrb[52].mxu1 }
0x1eb1   :  { %v9789_v41 = vadd.f32 %v9788_v15, %v16172_v18  ;;  %v12772_v46 = vpop.f32.mrb[53].mxu1 }
0x1eb3   :  { %v9798_v49 = vsel %vm7608_vm2, %v9789_v41, -inf }
0x1eb4   :  { %9799 = vmax.xlane.f32.xlu0 %v9798_v49 }
0x1f39   :  { %v9794_v6 = vpop.xlane.xlu0 %9793 }
0x1f3a   :  { %v9801_v57 = vsub.f32 %v9779_v51, %v9794_v6 }
0x1f3c   :  { %v9804_v35 = vmul.f32 1.442695, %v9801_v57 }
0x1f3d   :  { %v9797_v60 = vpop.xlane.xlu1 %9796 }
0x1f3e   :  { %13485 = vpow2.f32 %v9804_v35  ;;  %v9802_v16 = vsub.f32 %v9784_v59, %v9797_v60 }
0x1f40   :  { %v9806_v5 = vmul.f32 1.442695, %v9802_v16 }
0x1f41   :  { %v9800_v13 = vpop.xlane.xlu0 %9799 }
0x1f42   :  { %13487 = vpow2.f32 %v9806_v5  ;;  %v9803_v42 = vsub.f32 %v9789_v41, %v9800_v13 }
0x1f44   :  { %v9808_v52 = vmul.f32 1.442695, %v9803_v42 }
0x1f46   :  { %13489 = vpow2.f32 %v9808_v52 }
0x1f48   :  { %v13486_v10 = vpop.eup %13485 }
0x1f49   :  { %v9810_v40 = vsel %vm7601_vm13, %v13486_v10, 0.0 }
0x1f4a   :  { %9811 = vadd.xlane.f32.xlu0 %v9810_v40 }
0x1f4c   :  { %v13488_v18 = vpop.eup %13487 }
0x1f4d   :  { %v9813_v30 = vsel %vm7601_vm13, %v13488_v18, 0.0 }
0x1f4e   :  { %9814 = vadd.xlane.f32.xlu1 %v9813_v30 }
0x1f50   :  { %v13490_v0 = vpop.eup %13489 }
0x1f51   :  { %v9816_v34 = vsel %vm7608_vm2, %v13490_v0, 0.0 }
0x1f52   :  { %9817 = vadd.xlane.f32.xlu0 %v9816_v34 }
0x1f5f   :  { %13029 = vrot.lane.b32.xlu1 %v16461_v24, %s13540_s27 }
0x1f63   :  { %13034 = vrot.lane.b32.xlu1 %v13033_v39, %s13518_s18 }
0x1f67   :  { %9931 = vrot.lane.b32.xlu1 %v16599_v11, %s13518_s18  ;;  %s13553_s18 = smov 22  }
0x1f68   :  { %9829 = vrot.lane.b32.xlu0 %v16457_v3, %s13540_s27  ;;  %s10691_s14 = sld [smem:[%s16791_s0 + %s13553_s18]]   ;;  %s13556_s27 = smov 28  }
0x1f69   :  { %s16717_s25 = sld [smem:[%s16791_s0 + %s13556_s27]]  }
0x1f6a   :  { %s10698_s18 = sld [smem:[%s16791_s0 + %s13559_s9]]  }
0x1f6b   :  { %9943 = vrot.lane.b32.xlu1 %v9684_v37, %s13539_s23  ;;  %s10699_s27 = sld [smem:[%s16791_s0 + %s13562_s21]]  }
0x1f6c   :  { %13039 = vrot.lane.b32.xlu0 %v13038_v8, %s13539_s23  ;;  %s10695_s23 = sld [smem:[%s16791_s0 + %s13555_s20]]  }
0x1f6d   :  { %s16755_s20 = sld [smem:[%s16791_s0 + %s13561_s16]]  }
0x1f6e   :  { %v13355_v56 = vld [vmem:[%s10691_s14] sm:$0xff]   ;;  %v13356_v33 = vld [vmem:[%s10691_s14 + $0x8] sm:$0xff]  }
0x1fd7   :  { %v9812_v45 = vpop.xlane.xlu0 %9811 }
0x1fd8   :  { %13491 = vrcp.f32 %v9812_v45 }
0x1fdb   :  { %v9815_v12 = vpop.xlane.xlu1 %9814 }
0x1fdc   :  { %13493 = vrcp.f32 %v9815_v12 }
0x1fdf   :  { %v13030_v24 = vpop.permute.xlu1 %13029  ;;  %v9818_v9 = vpop.xlane.xlu0 %9817 }
0x1fe0   :  { %v13032_v62 = vunpack.i.h.bf16 %v13030_v24  ;;  %v13031_v27 = vunpack.i.l.bf16 %v13030_v24  ;;  %13495 = vrcp.f32 %v9818_v9 }
0x1fe2   :  { %v12878_v55 = vpack.c.bf16 %v13032_v62, %v13031_v27  ;;  %v13492_v26 = vpop.eup %13491 }
0x1fe3   :  { %v9822_v39 = vmul.f32 %v13492_v26, %v13486_v10  ;;  %v9830_v3 = vpop.permute.xlu0 %9829  ;;  %v13035_v4 = vpop.permute.xlu1 %13034 }
0x1fe4   :  { %12879 = vmatpush3.bf16.msra.mxu1 %v12878_v55  ;;  %v13037_v8 = vunpack.i.h.bf16 %v13035_v4  ;;  %v13036_v29 = vunpack.i.l.bf16 %v13035_v4 }
0x1fe5   :  { %12777 = vmatprep.subr.mxu1 %v13525_v31 }
0x1fe6   :  { %v13494_v11 = vpop.eup %13493  ;;  %v9961_v51 = vsel %vm7505_vm10, %v16540_v7, %v13037_v8  ;;  %v9960_v43 = vsel %vm7505_vm10, %v16538_v50, %v13036_v29 }
0x1fe7   :  { %v9823_v19 = vmul.f32 %v13494_v11, %v13488_v18  ;;  %v9932_v28 = vpop.permute.xlu1 %9931  ;;  %v13040_v14 = vpop.permute.xlu0 %13039 }
0x1fe8   :  { %12778 = vmatpush3.msk.msra.mxu1 %vm7653_vm3, %v9830_v3  ;;  %v13042_v37 = vunpack.i.h.bf16 %v13040_v14  ;;  %v13041_v20 = vunpack.i.l.bf16 %v13040_v14  ;;  %v9962_v25 = vsel %vm7505_vm10, %v16542_v21, %v9932_v28  ;;  %v11403_v21 = vld [vmem:[%s10692_s19] ss:$0 sm:$0xff] }
0x1fe9   :  { %12780 = vmatmul.mubr.msk.f32.vlgmr.msra.gmra.mrb[54].mxu1 %vm7601_vm13, %v9822_v39  ;;  %12788 = vmatprep.subr.bf16.mxu1 %v13355_v56  ;;  %v11408_v14 = vld [vmem:[%s10693_s30] ss:$0 sm:$0xff] }
0x1fea   :  { %12782 = vmatprep.mubr.msk.f32.mxu1 %vm13524_vm9, %v13525_v31  ;;  %v13496_v1 = vpop.eup %13495  ;;  %12789 = vmatpush3.bf16.msra.mxu1 %v13355_v56  ;;  %v9964_v38 = vsel %vm5968_vm1, %v9961_v51, %v13042_v37  ;;  %v9963_v15 = vsel %vm5968_vm1, %v9960_v43, %v13041_v20  ;;  %v13359_v56 = vld [vmem:[%s16717_s25] sm:$0xff]  }
0x1feb   :  { %v9824_v36 = vmul.f32 %v13496_v1, %v13490_v0  ;;  %12790 = vmatprep.subr.bf16.mxu1 %v13356_v33  ;;  %v9944_v22 = vpop.permute.xlu1 %9943  ;;  %v13357_v1 = vld [vmem:[%s10695_s23] sm:$0xff]  }
0x1fec   :  { %v9965_v41 = vsel %vm5968_vm1, %v9962_v25, %v9944_v22  ;;  %v11409_v51 = vld [vmem:[%s10694_s6] ss:$0 sm:$0xff] }
0x1fed   :  { %12783 = vmatmul.mubr.msk.f32.gmra.mrb[56].mxu1 %vm7601_vm13, %v9823_v19 }
0x1fee   :  { %12785 = vmatprep.mubr.msk.f32.mxu1 %vm13524_vm9, %v13525_v31  ;;  %12791 = vmatpush3.bf16.msra.mxu1 %v13356_v33 }
0x1fef   :  { %12796 = vmatprep.subr.bf16.mxu1 %v13357_v1 }
0x1ff1   :  { %12786 = vmatmul.mubr.msk.f32.gmra.mrb[58].mxu1 %vm7601_vm13, %v9824_v36  ;;  %v13358_v36 = vld [vmem:[%s10695_s23 + $0x8] sm:$0xff]  }
0x20bc   :  { %v9910_v2 = vpop.f32.mrb[54].mxu1 }
0x20bd   :  { %v12781_v32 = vpop.f32.mrb[55].mxu1 }
0x20c0   :  { %v9915_v61 = vpop.f32.mrb[56].mxu1 }
0x20c1   :  { %v13043_v44 = vpack.i.bf16 %v9915_v61, %v9910_v2  ;;  %v12784_v47 = vpop.f32.mrb[57].mxu1 }
0x20c3   :  { %13044 = vrot.lane.b32.xlu0 %v13043_v44, %s13542_s2 }
0x20c4   :  { %v9920_v31 = vpop.f32.mrb[58].mxu1 }
0x20c5   :  { %9955 = vrot.lane.b32.xlu1 %v9920_v31, %s13542_s2  ;;  %v12787_v54 = vpop.f32.mrb[59].mxu1  ;;  %s13558_s2 = smov 27  }
0x20c6   :  { %s10696_s26 = sld [smem:[%s16791_s0 + %s13558_s2]]  }
0x2135   :  { %v13045_v63 = vpop.permute.xlu0 %13044 }
0x2136   :  { %v13047_v59 = vunpack.i.h.bf16 %v13045_v63  ;;  %v13046_v48 = vunpack.i.l.bf16 %v13045_v63 }
0x2137   :  { %v9956_v46 = vpop.permute.xlu1 %9955 }
0x2138   :  { %v9967_v49 = vsel %vm8486_vm4, %v9964_v38, %v13047_v59  ;;  %v9966_v7 = vsel %vm8486_vm4, %v9963_v15, %v13046_v48  ;;  %v9968_v6 = vsel %vm8486_vm4, %v9965_v41, %v9956_v46  ;;  %v13360_v46 = vld [vmem:[%s16717_s25 + $0x8] sm:$0xff]  }
0x2139   :  { %v9973_v57 = vpack.c.bf16 %v9967_v49, %v9966_v7  ;;  %v9974_v50 = vpack.c.bf16 %v9968_v6, %v9968_v6  ;;  %v13361_v49 = vld [vmem:[%s16717_s25 + $0x10] sm:$0xff]   ;;  %v13362_v7 = vld [vmem:[%s16717_s25 + $0x18] sm:$0xff]   ;;  %v13363_v6 = vld [vmem:[%s16717_s25 + $0x20] sm:$0xff]  }
0x213b   :  { %12792 = vmatprep.mubr.msk.bf16.mxu1 %vm2190_vm0, %v9973_v57  ;;  %v13364_v57 = vld [vmem:[%s16717_s25 + $0x28] sm:$0xff]  }
0x213c   :  { %12793 = vmatmul.mubr.msk.bf16.vlgmr.msra.gmra.mrb[60].mxu1 %vm2190_vm0, %v9974_v50  ;;  %v13365_v50 = vld [vmem:[%s16717_s25 + $0x30] sm:$0xff]  }
0x213d   :  { %12797 = vmatpush3.bf16.msra.mxu1 %v13357_v1 }
0x213e   :  { %12798 = vmatprep.subr.bf16.mxu1 %v13358_v36 }
0x2141   :  { %12799 = vmatpush3.bf16.msra.mxu1 %v13358_v36 }
0x2142   :  { %12804 = vmatprep.subr.bf16.mxu1 %v13359_v56 }
0x220f   :  { %v12794_v35 = vpop.f32.mrb[60].mxu1 }
0x2210   :  { %v10034_v60 = vpop.f32.mrb[61].mxu1  ;;  %v10043_v16 = vadd.f32 %v12794_v35, %v11403_v21  ;;  %v11410_v35 = vld [vmem:[%s10696_s26] ss:$0 sm:$0xff] }
0x2211   :  { %v10035_v5 = vadd.f32 %v11403_v21, %v10034_v60  ;;  %v12795_v13 = vpop.f32.mrb[62].mxu1 }
0x2212   :  { %v10037_v42 = vpop.f32.mrb[63].mxu1  ;;  %v10050_v40 = vadd.f32 %v10043_v16, %v16444_v53 }
0x2213   :  { %v10048_v52 = vadd.f32 %v10035_v5, %v16440_v17  ;;  %v10038_v10 = vadd.f32 %v11403_v21, %v10037_v42  ;;  %v13366_v21 = vld [vmem:[%s16717_s25 + $0x38] sm:$0xff]  }
0x2214   :  { %v10059_v34 = vsel %vm8580_vm5, %v10050_v40, 0.0 }
0x2215   :  { %v10049_v18 = vadd.f32 %v10038_v10, %v16442_v23  ;;  %v10053_v30 = vsel %vm2190_vm0, %v10048_v52, 0.0 }
0x2216   :  { %10054 = vadd.xlane.f32.xlu0 %v10053_v30 }
0x2217   :  { %v10056_v0 = vsel %vm2190_vm0, %v10049_v18, 0.0 }
0x2218   :  { %10057 = vadd.xlane.f32.xlu1 %v10056_v0 }
0x221a   :  { %10060 = vadd.xlane.f32.xlu0 %v10059_v34 }
0x22a3   :  { %v10055_v45 = vpop.xlane.xlu0 %10054 }
0x22a4   :  { %v10062_v12 = vmul.f32 0.03125, %v10055_v45  ;;  %v11415_v45 = vld [vmem:[%s10698_s18] ss:$0 sm:$0xff] }
0x22a5   :  { %v10058_v24 = vpop.xlane.xlu1 %10057 }
0x22a6   :  { %v10065_v9 = vsub.f32 %v10048_v52, %v10062_v12  ;;  %v10063_v62 = vmul.f32 0.03125, %v10058_v24 }
0x22a7   :  { %v10061_v17 = vpop.xlane.xlu0 %10060 }
0x22a8   :  { %v10066_v27 = vsub.f32 %v10049_v18, %v10063_v62  ;;  %v10064_v55 = vmul.f32 0.03125, %v10061_v17  ;;  %v10068_v53 = vmul.f32 %v10065_v9, %v10065_v9 }
0x22aa   :  { %v10067_v26 = vsub.f32 %v10050_v40, %v10064_v55  ;;  %v10071_v23 = vsel %vm2190_vm0, %v10068_v53, 0.0  ;;  %v10069_v39 = vmul.f32 %v10066_v27, %v10066_v27 }
0x22ab   :  { %10072 = vadd.xlane.f32.xlu0 %v10071_v23 }
0x22ac   :  { %v10074_v3 = vsel %vm2190_vm0, %v10069_v39, 0.0  ;;  %v10070_v11 = vmul.f32 %v10067_v26, %v10067_v26 }
0x22ad   :  { %10075 = vadd.xlane.f32.xlu1 %v10074_v3 }
0x22ae   :  { %v10077_v19 = vsel %vm8580_vm5, %v10070_v11, 0.0 }
0x22af   :  { %10078 = vadd.xlane.f32.xlu0 %v10077_v19 }
0x2338   :  { %v10073_v33 = vpop.xlane.xlu0 %10072 }
0x2339   :  { %v10080_v2 = vmul.f32 0.03125, %v10073_v33 }
0x233a   :  { %v10076_v32 = vpop.xlane.xlu1 %10075 }
0x233b   :  { %v10083_v61 = vadd.f32 1e-05, %v10080_v2  ;;  %v10081_v44 = vmul.f32 0.03125, %v10076_v32 }
0x233c   :  { %v10079_v47 = vpop.xlane.xlu0 %10078 }
0x233d   :  { %13497 = vrsqrt.f32 %v10083_v61  ;;  %v10084_v31 = vadd.f32 1e-05, %v10081_v44  ;;  %v10082_v54 = vmul.f32 0.03125, %v10079_v47 }
0x233f   :  { %13499 = vrsqrt.f32 %v10084_v31  ;;  %v10085_v4 = vadd.f32 1e-05, %v10082_v54 }
0x2341   :  { %13501 = vrsqrt.f32 %v10085_v4 }
0x2347   :  { %v13498_v28 = vpop.eup %13497 }
0x2348   :  { %v10089_v8 = vmul.f32 %v13498_v28, %v10065_v9 }
0x2349   :  { %v13500_v29 = vpop.eup %13499 }
0x234a   :  { %v10090_v37 = vmul.f32 %v13500_v29, %v10066_v27  ;;  %v10098_v20 = vmul.f32 %v11408_v14, %v10089_v8  ;;  %v13367_v8 = vld [vmem:[%s10701_s15] ss:$8 sps:$4 sm:$0xff]   ;;  %v13369_v29 = vld [vmem:[%s10701_s15 + $0x4] ss:$8 sps:$4 sm:$0xff]  }
0x234b   :  { %v13502_v22 = vpop.eup %13501 }
0x234c   :  { %v10091_v63 = vmul.f32 %v13502_v22, %v10067_v26  ;;  %v10099_v43 = vmul.f32 %v11408_v14, %v10090_v37  ;;  %v10107_v59 = vadd.f32 %v11409_v51, %v10098_v20  ;;  %v13372_v37 = vld [vmem:[%s10701_s15 + $0x14] ss:$8 sps:$4 sm:$0xff]   ;;  %v13370_v20 = vld [vmem:[%s10701_s15 + $0x10] ss:$8 sps:$4 sm:$0xff]   ;;  %v13373_v22 = vld [vmem:[%s16755_s20 + $0x40] sm:$0xff]  }
0x234e   :  { %v10100_v25 = vmul.f32 %v11408_v14, %v10091_v63  ;;  %v10108_v48 = vadd.f32 %v11409_v51, %v10099_v43 }
0x2350   :  { %v10109_v38 = vadd.f32 %v11409_v51, %v10100_v25  ;;  %v10114_v15 = vpack.c.bf16 %v10108_v48, %v10107_v59 }
0x2352   :  { %v10115_v41 = vpack.c.bf16 %v10109_v38, %v10109_v38  ;;  %12800 = vmatprep.mubr.msk.bf16.mxu1 %vm2190_vm0, %v10114_v15 }
0x2354   :  { %12801 = vmatmul.mubr.msk.bf16.vlgmr.msra.gmra.mrb[64].mxu1 %vm2190_vm0, %v10115_v41 }
0x2355   :  { %12805 = vmatpush3.bf16.msra.mxu1 %v13359_v56 }
0x2356   :  { %12806 = vmatprep.subr.bf16.mxu1 %v13360_v46 }
0x2359   :  { %12807 = vmatpush3.bf16.msra.mxu1 %v13360_v46 }
0x235a   :  { %12808 = vmatprep.subr.bf16.mxu1 %v13361_v49 }
0x235d   :  { %12809 = vmatpush3.bf16.msra.mxu1 %v13361_v49  ;;  %v11424_v49 = vld [vmem:[%s10699_s27] ss:$0 sm:$0xff] }
0x235e   :  { %12810 = vmatprep.subr.bf16.mxu1 %v13362_v7 }
0x2361   :  { %12811 = vmatpush3.bf16.msra.mxu1 %v13362_v7 }
0x2362   :  { %12812 = vmatprep.subr.bf16.mxu1 %v13363_v6 }
0x2365   :  { %12813 = vmatpush3.bf16.msra.mxu1 %v13363_v6 }
0x2366   :  { %12814 = vmatprep.subr.bf16.mxu1 %v13364_v57 }
0x2369   :  { %12815 = vmatpush3.bf16.msra.mxu1 %v13364_v57 }
0x236a   :  { %12816 = vmatprep.subr.bf16.mxu1 %v13365_v50 }
0x236d   :  { %12817 = vmatpush3.bf16.msra.mxu1 %v13365_v50 }
0x236e   :  { %12818 = vmatprep.subr.bf16.mxu1 %v13366_v21 }
0x2371   :  { %12819 = vmatpush3.bf16.msra.mxu1 %v13366_v21 }
0x2372   :  { %10419 = vmatprep.subr.bf16.mxu1 %v13369_v29 }
0x2427   :  { %v12802_v60 = vpop.f32.mrb[64].mxu1 }
0x2428   :  { %v10184_v16 = vadd.f32 %v12802_v60, %v11410_v35  ;;  %v10175_v5 = vpop.f32.mrb[65].mxu1 }
0x2429   :  { %v10176_v13 = vadd.f32 %v11410_v35, %v10175_v5  ;;  %v12803_v42 = vpop.f32.mrb[66].mxu1 }
0x242a   :  { %v10178_v52 = vpop.f32.mrb[67].mxu1  ;;  %v10191_v40 = vmax.f32 %v10184_v16, 0.0  ;;  %v13374_v42 = vld [vmem:[%s16755_s20] sm:$0xff]  }
0x242b   :  { %v10179_v10 = vadd.f32 %v11410_v35, %v10178_v52  ;;  %v10189_v18 = vmax.f32 %v10176_v13, 0.0  ;;  %v11425_v35 = vld [vmem:[%s10700_s28] ss:$0 sm:$0xff] }
0x242c   :  { %v10209_v34 = vpack.c.bf16 %v10191_v40, %v10191_v40  ;;  %v13375_v40 = vld [vmem:[%s16755_s20 + $0x48] sm:$0xff]  }
0x242d   :  { %v10190_v30 = vmax.f32 %v10179_v10, 0.0 }
0x242f   :  { %v10208_v0 = vpack.c.bf16 %v10190_v30, %v10189_v18  ;;  %v13376_v18 = vld [vmem:[%s16755_s20 + $0x8] sm:$0xff]  }
0x2431   :  { %12820 = vmatprep.mubr.bf16.mxu1 %v10208_v0  ;;  %v13377_v0 = vld [vmem:[%s16755_s20 + $0x50] sm:$0xff]  }
0x2432   :  { %12821 = vmatmul.mubr.bf16.vlgmr.msra.gmra.mrb[68].mxu1 %v10209_v34  ;;  %v13378_v34 = vld [vmem:[%s16755_s20 + $0x10] sm:$0xff]  }
0x2433   :  { %10451 = vmatprep.mubr.bf16.mxu1 %v13526_v58  ;;  %10420 = vmatpush1.bf16.msra.mxu1 %v13367_v8 }
0x2434   :  { %10421 = vmatprep.subr.bf16.mxu1 %v13372_v37 }
0x2437   :  { %10422 = vmatpush1.bf16.msra.mxu1 %v13370_v20 }
0x2438   :  { %11882 = vmatprep.subr.bf16.mxu1 %v13373_v22 }
0x2505   :  { %v12822_v12 = vpop.f32.mrb[68].mxu1 }
0x2506   :  { %v10299_v24 = vpop.f32.mrb[69].mxu1  ;;  %v10308_v9 = vadd.f32 %v12822_v12, %v11415_v45  ;;  %v13379_v12 = vld [vmem:[%s16755_s20 + $0x58] sm:$0xff]  }
0x2507   :  { %v10300_v62 = vadd.f32 %v11415_v45, %v10299_v24  ;;  %v12823_v17 = vpop.f32.mrb[70].mxu1  ;;  %v13381_v24 = vld [vmem:[%s16755_s20 + $0x60] sm:$0xff]  }
0x2508   :  { %v10302_v27 = vpop.f32.mrb[71].mxu1  ;;  %v10315_v26 = vadd.f32 %v10308_v9, %v10109_v38  ;;  %v13382_v9 = vld [vmem:[%s16755_s20 + $0x20] sm:$0xff]   ;;  %v13384_v17 = vld [vmem:[%s16755_s20 + $0x28] sm:$0xff]  }
0x2509   :  { %v10313_v55 = vadd.f32 %v10300_v62, %v10107_v59  ;;  %v10303_v53 = vadd.f32 %v11415_v45, %v10302_v27  ;;  %v13383_v62 = vld [vmem:[%s16755_s20 + $0x68] sm:$0xff]   ;;  %v13385_v27 = vld [vmem:[%s16755_s20 + $0x70] sm:$0xff]  }
0x250a   :  { %v10324_v11 = vsel %vm8580_vm5, %v10315_v26, 0.0 }
0x250b   :  { %v10314_v23 = vadd.f32 %v10303_v53, %v10108_v48  ;;  %v10318_v39 = vsel %vm2190_vm0, %v10313_v55, 0.0  ;;  %v13387_v53 = vld [vmem:[%s16755_s20 + $0x78] sm:$0xff]  }
0x250c   :  { %10319 = vadd.xlane.f32.xlu1 %v10318_v39 }
0x250d   :  { %v10321_v3 = vsel %vm2190_vm0, %v10314_v23, 0.0 }
0x250e   :  { %10322 = vadd.xlane.f32.xlu0 %v10321_v3 }
0x2510   :  { %10325 = vadd.xlane.f32.xlu1 %v10324_v11  ;;  %v10381_v11 = vld [vmem:[%s10702_s3] sm:$0x3] }
0x2599   :  { %v10320_v19 = vpop.xlane.xlu1 %10319 }
0x259a   :  { %v10327_v1 = vmul.f32 0.03125, %v10320_v19 }
0x259b   :  { %v10323_v36 = vpop.xlane.xlu0 %10322 }
0x259c   :  { %v10330_v56 = vsub.f32 %v10313_v55, %v10327_v1  ;;  %v10328_v33 = vmul.f32 0.03125, %v10323_v36  ;;  %v13386_v55 = vld [vmem:[%s16755_s20 + $0x30] sm:$0xff]  }
0x259d   :  { %v10326_v2 = vpop.xlane.xlu1 %10325 }
0x259e   :  { %v10331_v32 = vsub.f32 %v10314_v23, %v10328_v33  ;;  %v10329_v61 = vmul.f32 0.03125, %v10326_v2  ;;  %v10333_v44 = vmul.f32 %v10330_v56, %v10330_v56  ;;  %v10383_v23 = vlaneseq }
0x25a0   :  { %v10332_v47 = vsub.f32 %v10315_v26, %v10329_v61  ;;  %v10336_v31 = vsel %vm2190_vm0, %v10333_v44, 0.0  ;;  %v10334_v54 = vmul.f32 %v10331_v32, %v10331_v32  ;;  %v13388_v26 = vld [vmem:[%s16755_s20 + $0x38] sm:$0xff]   ;;  %v10384_v39 = vshrl.u32 %v10383_v23, 7 }
0x25a1   :  { %10337 = vadd.xlane.f32.xlu0 %v10336_v31 }
0x25a2   :  { %v10339_v4 = vsel %vm2190_vm0, %v10334_v54, 0.0  ;;  %v10335_v28 = vmul.f32 %v10332_v47, %v10332_v47  ;;  %v10385_v3 = vsub.s32 0, %v10384_v39  ;;  %v10389_v19 = vsub.s32 1, %v10384_v39 }
0x25a3   :  { %10340 = vadd.xlane.f32.xlu1 %v10339_v4 }
0x25a4   :  { %v10342_v14 = vsel %vm8580_vm5, %v10335_v28, 0.0  ;;  %v10386_v1 = vrot.slane %v10381_v11, %v10385_v3  ;;  %v10390_v36 = vrot.slane %v10381_v11, %v10389_v19 }
0x25a5   :  { %10343 = vadd.xlane.f32.xlu0 %v10342_v14 }
0x262e   :  { %v10338_v51 = vpop.xlane.xlu0 %10337 }
0x262f   :  { %v10345_v63 = vmul.f32 0.03125, %v10338_v51 }
0x2630   :  { %v10341_v43 = vpop.xlane.xlu1 %10340 }
0x2631   :  { %v10348_v25 = vadd.f32 1e-05, %v10345_v63  ;;  %v10346_v59 = vmul.f32 0.03125, %v10341_v43 }
0x2632   :  { %v10344_v48 = vpop.xlane.xlu0 %10343 }
0x2633   :  { %13503 = vrsqrt.f32 %v10348_v25  ;;  %v10349_v38 = vadd.f32 1e-05, %v10346_v59  ;;  %v10347_v15 = vmul.f32 0.03125, %v10344_v48 }
0x2635   :  { %13505 = vrsqrt.f32 %v10349_v38  ;;  %v10350_v41 = vadd.f32 1e-05, %v10347_v15 }
0x2637   :  { %13507 = vrsqrt.f32 %v10350_v41  ;;  %v11432_v41 = vld [vmem:[%s10704_s7] ss:$0 sm:$0xff] }
0x263d   :  { %v13504_v46 = vpop.eup %13503 }
0x263e   :  { %v10354_v7 = vmul.f32 %v13504_v46, %v10330_v56 }
0x263f   :  { %v13506_v6 = vpop.eup %13505 }
0x2640   :  { %v10363_v57 = vmul.f32 %v11424_v49, %v10354_v7  ;;  %v10355_v50 = vmul.f32 %v13506_v6, %v10331_v32 }
0x2641   :  { %v13508_v21 = vpop.eup %13507 }
0x2642   :  { %v10364_v60 = vmul.f32 %v11424_v49, %v10355_v50  ;;  %v10356_v16 = vmul.f32 %v13508_v21, %v10332_v47  ;;  %v10372_v5 = vadd.f32 %v11425_v35, %v10363_v57 }
0x2644   :  { %v10373_v13 = vadd.f32 %v11425_v35, %v10364_v60  ;;  %v10365_v10 = vmul.f32 %v11424_v49, %v10356_v16 }
0x2646   :  { %v10379_v52 = vpack.c.bf16 %v10373_v13, %v10372_v5  ;;  %v10374_v30 = vadd.f32 %v11425_v35, %v10365_v10 }
0x2648   :  { %11430 = vmatmul.mubr.msk.bf16.vlgmr.msra.gmra.mrb[72].mxu1 %vm2190_vm0, %v10379_v52  ;;  %v10380_v45 = vpack.c.bf16 %v10374_v30, %v10374_v30 }
0x2649   :  { %10461 = vmatprep.mubr.bf16.mxu1 %v13526_v58  ;;  %11883 = vmatpush3.bf16.msra.mxu1 %v13374_v42  ;;  %v13380_v58 = vld [vmem:[%s16755_s20 + $0x18] sm:$0xff]  }
0x264a   :  { %11884 = vmatprep.subr.bf16.mxu1 %v13375_v40 }
0x264d   :  { %11885 = vmatpush3.bf16.msra.mxu1 %v13376_v18 }
0x264e   :  { %11886 = vmatprep.subr.bf16.mxu1 %v13377_v0 }
0x2650   :  { %11431 = vmatmul.mubr.msk.bf16.gmra.mrb[76].mxu1 %vm2190_vm0, %v10380_v45 }
0x2651   :  { %11887 = vmatpush3.bf16.msra.mxu1 %v13378_v34 }
0x2652   :  { %11888 = vmatprep.subr.bf16.mxu1 %v13379_v12 }
0x2655   :  { %11889 = vmatpush3.bf16.msra.mxu1 %v13380_v58 }
0x2656   :  { %11890 = vmatprep.subr.bf16.mxu1 %v13381_v24 }
0x2659   :  { %11891 = vmatpush3.bf16.msra.mxu1 %v13382_v9 }
0x265a   :  { %11892 = vmatprep.subr.bf16.mxu1 %v13383_v62 }
0x265d   :  { %11893 = vmatpush3.bf16.msra.mxu1 %v13384_v17 }
0x265e   :  { %11894 = vmatprep.subr.bf16.mxu1 %v13385_v27 }
0x2661   :  { %11895 = vmatpush3.bf16.msra.mxu1 %v13386_v55 }
0x2662   :  { %11896 = vmatprep.subr.bf16.mxu1 %v13387_v53 }
0x2665   :  { %11897 = vmatpush3.bf16.msra.mxu1 %v13388_v26 }
0x271b   :  { %v10453_v56 = vpop.f32.mrb[72].mxu1 }
0x271c   :  { %v10454_v33 = vadd.f32 %v10453_v56, %v10386_v1  ;;  %v10455_v2 = vpop.f32.mrb[73].mxu1 }
0x271d   :  { %v10456_v32 = vadd.f32 %v10455_v2, %v10390_v36  ;;  %v10457_v61 = vpop.f32.mrb[74].mxu1 }
0x271e   :  { %v10458_v44 = vadd.f32 %v10457_v61, %v10386_v1  ;;  %v10459_v47 = vpop.f32.mrb[75].mxu1  ;;  %v10470_v54 = vmax.f32 %v10454_v33, 0.0 }
0x271f   :  { %v10460_v31 = vadd.f32 %v10459_v47, %v10390_v36  ;;  %v10471_v28 = vmax.f32 %v10456_v32, 0.0 }
0x2720   :  { %v10472_v4 = vmax.f32 %v10458_v44, 0.0 }
0x2721   :  { %v10473_v14 = vmax.f32 %v10460_v31, 0.0 }
0x2722   :  { %v10508_v8 = vpack.c.bf16 %v10472_v4, %v10470_v54 }
0x2723   :  { %v10509_v29 = vpack.c.bf16 %v10473_v14, %v10471_v28  ;;  %v10463_v37 = vpop.f32.mrb[76].mxu1 }
0x2724   :  { %v10464_v20 = vadd.f32 %v10463_v37, %v10386_v1  ;;  %v10465_v22 = vpop.f32.mrb[77].mxu1 }
0x2725   :  { %v10466_v51 = vadd.f32 %v10465_v22, %v10390_v36  ;;  %v10467_v63 = vpop.f32.mrb[78].mxu1  ;;  %10647 = vmatprep.mubr.bf16.mxu1 %v10509_v29 }
0x2726   :  { %v10468_v43 = vpop.f32.mrb[79].mxu1  ;;  %10648 = vmatmul.mubr.bf16.vlgmr.msra.gmra.mrb[80].mxu1 %v10508_v8  ;;  %v10474_v59 = vmax.f32 %v10464_v20, 0.0 }
0x2727   :  { %v10475_v25 = vmax.f32 %v10466_v51, 0.0 }
0x2728   :  { %v10510_v38 = vpack.c.bf16 %v10474_v59, %v10474_v59 }
0x2729   :  { %v10511_v48 = vpack.c.bf16 %v10475_v25, %v10475_v25 }
0x272b   :  { %10655 = vmatprep.mubr.bf16.mxu1 %v10511_v48 }
0x272e   :  { %10656 = vmatmul.mubr.bf16.gmra.mrb[84].mxu1 %v10510_v38 }
0x27f9   :  { %v11898_v15 = vpop.f32.mrb[80].mxu1 }
0x27fa   :  { %v11899_v46 = vpop.f32.mrb[81].mxu1 }
0x27fb   :  { %v11900_v49 = vadd.f32 %v11899_v46, %v11898_v15  ;;  %v11901_v7 = vpop.f32.mrb[82].mxu1 }
0x27fc   :  { %v11902_v6 = vpop.f32.mrb[83].mxu1 }
0x27fd   :  { %v10650_v57 = vadd.f32 %v11900_v49, %v11432_v41  ;;  %v11903_v50 = vadd.f32 %v11902_v6, %v11901_v7 }
0x27ff   :  { %10663 = vst [vmem:[%s10705_s10] sm:$0xff] %v10650_v57  ;;  %v10653_v21 = vadd.f32 %v11903_v50, %v11432_v41 }
0x2801   :  { %10664 = vst [vmem:[%s10705_s10 + $0x8] sm:$0xff] %v10653_v21  ;;  %v11904_v35 = vpop.f32.mrb[84].mxu1 }
0x2802   :  { %v11905_v60 = vpop.f32.mrb[85].mxu1 }
0x2803   :  { %v11906_v16 = vadd.f32 %v11905_v60, %v11904_v35  ;;  %v11907_v5 = vpop.f32.mrb[86].mxu1 }
0x2804   :  { %v11908_v13 = vpop.f32.mrb[87].mxu1 }
0x2805   :  { %v10658_v42 = vadd.f32 %v11906_v16, %v11432_v41 }
0x2807   :  { %10665 = vst [vmem:[%s10705_s10 + $0x10] sm:$0x3] %v10658_v42 }

</bundles_post_ra>
